<compile_context>
chip_gen: v6e
topology: v6e:2x2x1
jax: 0.10.0
libtpu: 0.0.40
codegen_flags: <defaults>
</compile_context>

<pallas_src>
import jax
import jax.numpy as jnp
import numpy as np
from jax.experimental import pallas as pl
from jax.experimental.pallas import tpu as pltpu

_GT = 128      # lanes per gate tile (fwd gate at [0:H], bwd gate at [H:2H])
_HP = 128      # padded hidden-state width ([h_f | h_b | 0])
_NEG = -1e30   # logit padding so softmax over padded lanes contributes 0


# ----------------------------------------------------------------------------
# Fused Pallas kernel
# ----------------------------------------------------------------------------
def make_fused_rnn_kernel(T, num_layers, GT):
    """Fused bidirectional multi-layer GRU + FC + softmax.

    VMEM operands:
      ids_ref  : (T*8, 1)  int32, row (t*8+b) = token id at time t, batch b
      emb_ref  : (Vp, 128) f32, embedding table (rows/lanes zero padded)
      wmat_ref : (NW, 128, 384) f32 weight slabs, in order:
                   [W_inF_0, W_inB_0, W_hh_0,
                    (PF1, PF2, PB1, PB2, W_hh_l) for l = 1..L-1,
                    FC_f, FC_b]
      bmat_ref : (NB, 8, 384) f32 bias slabs (rows pre-broadcast to 8):
                   [b_in_l, b_hh_l for each layer] + [fc_bias (padded -1e30)]
      out_ref  : (8, 128) f32, softmax probs in [:B, :O]
    """

    def kernel(ids_ref, emb_ref, wmat_ref, bmat_ref, out_ref):
        T8 = T * 8
        Vp = emb_ref.shape[0]

        # ---- Embedding gather folded in: one-hot (T8,Vp) @ table (Vp,128) ----
        ids = ids_ref[...]                                          # (T8, 1)
        iota = jax.lax.broadcasted_iota(jnp.int32, (T8, Vp), 1)
        onehot = (iota == ids).astype(jnp.float32)                  # (T8, Vp)
        x0 = jnp.dot(onehot, emb_ref[...],
                     preferred_element_type=jnp.float32)            # (T8, 128)

        # ---- Layer-0 hoisted input projections (off the serial chain) ----
        # GF[t]: forward-gate pre-activations for time t (fwd lanes of each
        #        gate tile); GB[t]: backward-gate pre-activations for time t.
        GF = jnp.dot(x0, wmat_ref[0], preferred_element_type=jnp.float32)
        GB = jnp.dot(x0, wmat_ref[1], preferred_element_type=jnp.float32)
        w_idx, b_idx = 2, 0

        h_first = h_last = None
        for l in range(num_layers):
            b_in = bmat_ref[b_idx]                                  # (8, 384)
            b_hh = bmat_ref[b_idx + 1]
            b_idx += 2
            whh = wmat_ref[w_idx]                                   # (128, 384)
            w_idx += 1

            # Merged fwd+bwd recurrence: one chain, one matmul per step.
            # At step s the fwd half processes time s, the bwd half time T-1-s.
            h = jnp.zeros((8, GT), jnp.float32)                     # [h_f|h_b|0]
            outs = []
            for s in range(T):                                      # unrolled
                gi = (GF[s * 8:(s + 1) * 8]
                      + GB[(T - 1 - s) * 8:(T - s) * 8] + b_in)     # (8, 384)
                gh = jnp.dot(h, whh,
                             preferred_element_type=jnp.float32) + b_hh
                r = jax.nn.sigmoid(gi[:, 0:GT] + gh[:, 0:GT])
                z = jax.nn.sigmoid(gi[:, GT:2 * GT] + gh[:, GT:2 * GT])
                n = jnp.tanh(gi[:, 2 * GT:3 * GT] + r * gh[:, 2 * GT:3 * GT])
                h = (1.0 - z) * n + z * h
                outs.append(h)

            if l == num_layers - 1:
                # torch output[:, -1, :] = [h_f(T-1) || h_b(T-1)].
                # h_b(T-1) is produced at step 0 of the merged chain.
                h_first, h_last = outs[0], outs[T - 1]
            else:
                # Next layer's hoisted projections WITHOUT lane concatenation:
                # row-block t of M  = [h_f(t)     | h_b(T-1-t)]
                # row-block t of Mr = [h_f(T-1-t) | h_b(t)    ]
                # zero-padded split weights pick the correct halves.
                M = jnp.concatenate(outs, axis=0)                   # (T8, 128)
                Mr = jnp.concatenate(outs[::-1], axis=0)            # (T8, 128)
                PF1, PF2 = wmat_ref[w_idx], wmat_ref[w_idx + 1]
                PB1, PB2 = wmat_ref[w_idx + 2], wmat_ref[w_idx + 3]
                w_idx += 4
                GF = (jnp.dot(M, PF1, preferred_element_type=jnp.float32) +
                      jnp.dot(Mr, PF2, preferred_element_type=jnp.float32))
                GB = (jnp.dot(M, PB1, preferred_element_type=jnp.float32) +
                      jnp.dot(Mr, PB2, preferred_element_type=jnp.float32))

        # ---- FC + softmax head (split weights, no concat) ----
        # TODO(synk): nn.Dropout(p=0.7) reproduced as inference-mode identity
        # (stochastic training-time dropout not emulated).
        FCF, FCB = wmat_ref[w_idx], wmat_ref[w_idx + 1]
        fc_b = bmat_ref[b_idx]                       # padded lanes hold -1e30
        logits = (jnp.dot(h_last, FCF, preferred_element_type=jnp.float32) +
                  jnp.dot(h_first, FCB, preferred_element_type=jnp.float32) +
                  fc_b)                                              # (8, 384)
        m = jnp.max(logits, axis=1, keepdims=True)
        e = jnp.exp(logits - m)                      # padded lanes -> exactly 0
        probs = e / jnp.sum(e, axis=1, keepdims=True)
        out_ref[...] = probs[:, 0:GT]                # lane-dense (8,128) store

    return kernel


# ----------------------------------------------------------------------------
# Host-side operand packing
# ----------------------------------------------------------------------------
def _place_gates(w, H, GT, off):
    """(I, 3H) gate-major (r,z,n) -> (I, 3*GT); gate g at [g*GT+off, +H)."""
    I = w.shape[0]
    out = jnp.zeros((I, 3 * GT), jnp.float32)
    for g in range(3):
        out = out.at[:, g * GT + off:g * GT + off + H].set(
            w[:, g * H:(g + 1) * H])
    return out


def _pad_rows(w, rows):
    return jnp.zeros((rows, w.shape[1]), w.dtype).at[:w.shape[0]].set(w)


def pack_operands(params, input_sequence):
    B, T = input_sequence.shape
    H = params["hidden"]
    layers = params["gru_layers"]
    L = len(layers)
    V, E = params["embedding"].shape
    O = params["fc_w_t"].shape[1]
    GT, HP = _GT, _HP
    assert 2 * H <= GT and 2 * H <= HP and E <= HP and O <= GT

    # Token ids, time-major, batch padded to 8 sublanes (pad token = 0).
    ids = jnp.zeros((T, 8), jnp.int32).at[:, :B].set(
        input_sequence.T.astype(jnp.int32)).reshape(T * 8, 1)

    # Embedding table: rows padded to multiple of 8, lanes to HP.
    Vp = int(np.ceil(V / 8) * 8)
    emb = jnp.zeros((Vp, HP), jnp.float32).at[:V, :E].set(params["embedding"])

    wslabs, bslabs = [], []
    for l, layer in enumerate(layers):
        wf, wb = layer["w_ih_f"], layer["w_ih_b"]
        if l == 0:
            # Input projections from the (lane-padded) embedding.
            wslabs.append(_pad_rows(_place_gates(wf, H, GT, 0), HP))
            wslabs.append(_pad_rows(_place_gates(wb, H, GT, H), HP))
        else:
            # Split input-projection weights: rows 0:H multiply h_f, rows
            # H:2H multiply h_b; zero padding does the "concat" implicitly.
            wslabs.append(_pad_rows(_place_gates(wf[:H], H, GT, 0), HP))      # PF1
            wslabs.append(jnp.zeros((HP, 3 * GT), jnp.float32)
                          .at[H:2 * H].set(_place_gates(wf[H:2 * H], H, GT, 0)))  # PF2
            wslabs.append(_pad_rows(_place_gates(wb[:H], H, GT, H), HP))      # PB1
            wslabs.append(jnp.zeros((HP, 3 * GT), jnp.float32)
                          .at[H:2 * H].set(_place_gates(wb[H:2 * H], H, GT, H)))  # PB2
        # Block-diagonal recurrent weight: rows 0:H drive fwd gates, H:2H bwd.
        whh = jnp.zeros((HP, 3 * GT), jnp.float32)
        whh = whh.at[:H].set(_place_gates(layer["w_hh_f"], H, GT, 0))
        whh = whh.at[H:2 * H].set(_place_gates(layer["w_hh_b"], H, GT, H))
        wslabs.append(whh)
        # Biases (fwd + bwd occupy disjoint lanes), broadcast to 8 rows.
        b_in = (_place_gates(layer["b_ih_f"].reshape(1, -1), H, GT, 0) +
                _place_gates(layer["b_ih_b"].reshape(1, -1), H, GT, H))
        b_hh = (_place_gates(layer["b_hh_f"].reshape(1, -1), H, GT, 0) +
                _place_gates(layer["b_hh_b"].reshape(1, -1), H, GT, H))
        bslabs.append(jnp.tile(b_in, (8, 1)))
        bslabs.append(jnp.tile(b_hh, (8, 1)))

    # FC head, split along its input dim (h_f part / h_b part).
    fcw = params["fc_w_t"]                                        # (2H, O)
    FCF = jnp.zeros((HP, 3 * GT), jnp.float32).at[:H, :O].set(fcw[:H])
    FCB = jnp.zeros((HP, 3 * GT), jnp.float32).at[H:2 * H, :O].set(fcw[H:2 * H])
    wslabs += [FCF, FCB]
    fcb = jnp.full((1, 3 * GT), _NEG, jnp.float32).at[0, :O].set(params["fc_b"])
    bslabs.append(jnp.tile(fcb, (8, 1)))

    wmat = jnp.stack(wslabs)                                      # (NW,128,384)
    bmat = jnp.stack(bslabs)                                      # (NB,  8,384)
    return ids, emb, wmat, bmat


# ----------------------------------------------------------------------------
# Wrapper
# ----------------------------------------------------------------------------
_VMEM = pl.BlockSpec(memory_space=pltpu.MemorySpace.VMEM)


def rnn_classifier_forward(params, input_sequence):
    """Pallas forward pass. input_sequence: (B, T) int32 -> (B, O) probs."""
    B, T = input_sequence.shape
    O = params["fc_w_t"].shape[1]
    num_layers = len(params["gru_layers"])

    ids, emb, wmat, bmat = pack_operands(params, input_sequence)
    kernel = make_fused_rnn_kernel(T, num_layers, _GT)
    out = pl.pallas_call(
        kernel,
        out_shape=jax.ShapeDtypeStruct((8, _GT), jnp.float32),
        in_specs=[_VMEM, _VMEM, _VMEM, _VMEM],
        out_specs=_VMEM,
    )(ids, emb, wmat, bmat)
    return out[:B, :O]


# ----------------------------------------------------------------------------
# Pure-JAX reference (for correctness check)
# ----------------------------------------------------------------------------
def _ref_gru_dir(x_tbi, w_ih_t, w_hh_t, b_ih, b_hh, H, reverse):
    T, B, _ = x_tbi.shape
    h = jnp.zeros((B, H), jnp.float32)
    outs = [None] * T
    order = range(T - 1, -1, -1) if reverse else range(T)
    for t in order:
        gi = x_tbi[t] @ w_ih_t + b_ih
        gh = h @ w_hh_t + b_hh
        r = jax.nn.sigmoid(gi[:, :H] + gh[:, :H])
        z = jax.nn.sigmoid(gi[:, H:2 * H] + gh[:, H:2 * H])
        n = jnp.tanh(gi[:, 2 * H:] + r * gh[:, 2 * H:])
        h = (1.0 - z) * n + z * h
        outs[t] = h
    return jnp.stack(outs, axis=0)


def rnn_classifier_reference(params, input_sequence):
    seq_emb = jnp.take(params["embedding"], input_sequence, axis=0)
    x = jnp.transpose(seq_emb, (1, 0, 2)).astype(jnp.float32)
    H = params["hidden"]
    for layer in params["gru_layers"]:
        of = _ref_gru_dir(x, layer["w_ih_f"], layer["w_hh_f"],
                          layer["b_ih_f"], layer["b_hh_f"], H, False)
        ob = _ref_gru_dir(x, layer["w_ih_b"], layer["w_hh_b"],
                          layer["b_ih_b"], layer["b_hh_b"], H, True)
        x = jnp.concatenate([of, ob], axis=-1)
    last = x[-1]
    logits = last @ params["fc_w_t"] + params["fc_b"]
    return jax.nn.softmax(logits, axis=1)


# ----------------------------------------------------------------------------
# Deterministic parameter init (shapes mirror nn.Embedding / nn.GRU / nn.Linear)
# ----------------------------------------------------------------------------
def init_params(key, vocab, emb, hidden, num_layers, out_dim):
    keys = jax.random.split(key, 3 + num_layers)
    params = {"hidden": hidden}
    params["embedding"] = jax.random.normal(keys[0], (vocab, emb), jnp.float32)

    k = 1.0 / np.sqrt(hidden)
    layers = []
    for l in range(num_layers):
        in_size = emb if l == 0 else 2 * hidden
        lk = jax.random.split(keys[1 + l], 8)
        u = lambda kk, shape: jax.random.uniform(kk, shape, jnp.float32, -k, k)
        layers.append({
            # stored transposed: (in, 3H) / (H, 3H); gate order (r, z, n)
            "w_ih_f": u(lk[0], (in_size, 3 * hidden)),
            "w_hh_f": u(lk[1], (hidden, 3 * hidden)),
            "b_ih_f": u(lk[2], (3 * hidden,)),
            "b_hh_f": u(lk[3], (3 * hidden,)),
            "w_ih_b": u(lk[4], (in_size, 3 * hidden)),
            "w_hh_b": u(lk[5], (hidden, 3 * hidden)),
            "b_ih_b": u(lk[6], (3 * hidden,)),
            "b_hh_b": u(lk[7], (3 * hidden,)),
        })
    params["gru_layers"] = layers

    kf = 1.0 / np.sqrt(2 * hidden)
    fk = jax.random.split(keys[1 + num_layers], 2)
    params["fc_w_t"] = jax.random.uniform(fk[0], (2 * hidden, out_dim),
                                          jnp.float32, -kf, kf)
    params["fc_b"] = jax.random.uniform(fk[1], (out_dim,), jnp.float32, -kf, kf)
    return params


# ----------------------------------------------------------------------------
if __name__ == "__main__":
    VOCAB, EMB, HIDDEN, LAYERS, OUT = 27, 16, 32, 2, 2
    B, T = 2, 8

    key = jax.random.PRNGKey(0)
    pkey, xkey = jax.random.split(key)
    params = init_params(pkey, VOCAB, EMB, HIDDEN, LAYERS, OUT)
    input_sequence = jax.random.randint(xkey, (B, T), 0, VOCAB, jnp.int32)

    probs = rnn_classifier_forward(params, input_sequence)
    probs = jax.block_until_ready(probs)

    ref = jax.block_until_ready(rnn_classifier_reference(params, input_sequence))

    assert probs.shape == (B, OUT), probs.shape
    np.testing.assert_allclose(np.asarray(probs), np.asarray(ref),
                               rtol=1e-5, atol=1e-5)
    np.testing.assert_allclose(np.asarray(probs).sum(axis=1),
                               np.ones(B), rtol=1e-5, atol=1e-5)
    print("KERNEL_OK")
</pallas_src>

<mosaic_0001>
module attributes {stable_mosaic.version = 11 : i64} {
  func.func @kernel(%arg0: memref<64x1xi32, #tpu.memory_space<vmem>>, %arg1: memref<32x128xf32, #tpu.memory_space<vmem>>, %arg2: memref<10x128x384xf32, #tpu.memory_space<vmem>>, %arg3: memref<5x8x384xf32, #tpu.memory_space<vmem>>, %arg4: memref<8x128xf32, #tpu.memory_space<vmem>>) attributes {dimension_semantics = [], scalar_prefetch = 0 : i64, scratch_operands = 0 : i64, tpu.core_type = #tpu.core_type<tc>} {
    %c0 = arith.constant 0 : index
    %c0_0 = arith.constant 0 : index
    %0 = vector.load %arg0[%c0, %c0_0] : memref<64x1xi32, #tpu.memory_space<vmem>>, vector<64x1xi32>
    %1 = tpu.iota {dimensions = array<i32: 1>} : vector<64x32xi32>
    %2 = vector.broadcast %0 : vector<64x1xi32> to vector<64x32xi32>
    %3 = arith.cmpi eq, %1, %2 : vector<64x32xi32>
    %4 = arith.extui %3 : vector<64x32xi1> to vector<64x32xi32>
    %5 = arith.sitofp %4 : vector<64x32xi32> to vector<64x32xf32>
    %c0_1 = arith.constant 0 : index
    %c0_2 = arith.constant 0 : index
    %6 = vector.load %arg1[%c0_1, %c0_2] : memref<32x128xf32, #tpu.memory_space<vmem>>, vector<32x128xf32>
    %cst = arith.constant dense<0.000000e+00> : vector<64x128xf32>
    %7 = tpu.matmul %5, %6, %cst {dimension_numbers = #tpu.dot_dimension_numbers<[1], [0], [0], [1], [0, 0, 1, 1], [], []>} : vector<64x32xf32>, vector<32x128xf32>, vector<64x128xf32> -> vector<64x128xf32>
    %c0_3 = arith.constant 0 : index
    %c0_4 = arith.constant 0 : index
    %c0_5 = arith.constant 0 : index
    %8 = vector.load %arg2[%c0_3, %c0_4, %c0_5] : memref<10x128x384xf32, #tpu.memory_space<vmem>>, vector<1x128x384xf32>
    %9 = vector.shape_cast %8 : vector<1x128x384xf32> to vector<128x384xf32>
    %cst_6 = arith.constant dense<0.000000e+00> : vector<64x384xf32>
    %10 = tpu.matmul %7, %9, %cst_6 {dimension_numbers = #tpu.dot_dimension_numbers<[1], [0], [0], [1], [0, 0, 1, 1], [], []>} : vector<64x128xf32>, vector<128x384xf32>, vector<64x384xf32> -> vector<64x384xf32>
    %c1 = arith.constant 1 : index
    %c0_7 = arith.constant 0 : index
    %c0_8 = arith.constant 0 : index
    %11 = vector.load %arg2[%c1, %c0_7, %c0_8] : memref<10x128x384xf32, #tpu.memory_space<vmem>>, vector<1x128x384xf32>
    %12 = vector.shape_cast %11 : vector<1x128x384xf32> to vector<128x384xf32>
    %cst_9 = arith.constant dense<0.000000e+00> : vector<64x384xf32>
    %13 = tpu.matmul %7, %12, %cst_9 {dimension_numbers = #tpu.dot_dimension_numbers<[1], [0], [0], [1], [0, 0, 1, 1], [], []>} : vector<64x128xf32>, vector<128x384xf32>, vector<64x384xf32> -> vector<64x384xf32>
    %c0_10 = arith.constant 0 : index
    %c0_11 = arith.constant 0 : index
    %c0_12 = arith.constant 0 : index
    %14 = vector.load %arg3[%c0_10, %c0_11, %c0_12] : memref<5x8x384xf32, #tpu.memory_space<vmem>>, vector<1x8x384xf32>
    %15 = vector.shape_cast %14 : vector<1x8x384xf32> to vector<8x384xf32>
    %c1_13 = arith.constant 1 : index
    %c0_14 = arith.constant 0 : index
    %c0_15 = arith.constant 0 : index
    %16 = vector.load %arg3[%c1_13, %c0_14, %c0_15] : memref<5x8x384xf32, #tpu.memory_space<vmem>>, vector<1x8x384xf32>
    %17 = vector.shape_cast %16 : vector<1x8x384xf32> to vector<8x384xf32>
    %c2 = arith.constant 2 : index
    %c0_16 = arith.constant 0 : index
    %c0_17 = arith.constant 0 : index
    %18 = vector.load %arg2[%c2, %c0_16, %c0_17] : memref<10x128x384xf32, #tpu.memory_space<vmem>>, vector<1x128x384xf32>
    %19 = vector.shape_cast %18 : vector<1x128x384xf32> to vector<128x384xf32>
    %cst_18 = arith.constant 0.000000e+00 : f32
    %20 = vector.broadcast %cst_18 : f32 to vector<8x128xf32>
    %21 = vector.extract_strided_slice %10 {offsets = [0, 0], sizes = [8, 384], strides = [1, 1]} : vector<64x384xf32> to vector<8x384xf32>
    %22 = vector.extract_strided_slice %13 {offsets = [56, 0], sizes = [8, 384], strides = [1, 1]} : vector<64x384xf32> to vector<8x384xf32>
    %23 = arith.addf %21, %22 : vector<8x384xf32>
    %24 = arith.addf %23, %15 : vector<8x384xf32>
    %cst_19 = arith.constant dense<0.000000e+00> : vector<8x384xf32>
    %25 = tpu.matmul %20, %19, %cst_19 {dimension_numbers = #tpu.dot_dimension_numbers<[1], [0], [0], [1], [0, 0, 1, 1], [], []>} : vector<8x128xf32>, vector<128x384xf32>, vector<8x384xf32> -> vector<8x384xf32>
    %26 = arith.addf %25, %17 : vector<8x384xf32>
    %27 = vector.extract_strided_slice %24 {offsets = [0, 0], sizes = [8, 128], strides = [1, 1]} : vector<8x384xf32> to vector<8x128xf32>
    %28 = vector.extract_strided_slice %26 {offsets = [0, 0], sizes = [8, 128], strides = [1, 1]} : vector<8x384xf32> to vector<8x128xf32>
    %29 = arith.addf %27, %28 : vector<8x128xf32>
    %30 = arith.negf %29 : vector<8x128xf32>
    %31 = math.exp %30 : vector<8x128xf32>
    %cst_20 = arith.constant 1.000000e+00 : f32
    %32 = vector.broadcast %cst_20 : f32 to vector<8x128xf32>
    %33 = arith.addf %32, %31 : vector<8x128xf32>
    %34 = arith.divf %32, %33 : vector<8x128xf32>
    %35 = vector.extract_strided_slice %24 {offsets = [0, 128], sizes = [8, 128], strides = [1, 1]} : vector<8x384xf32> to vector<8x128xf32>
    %36 = vector.extract_strided_slice %26 {offsets = [0, 128], sizes = [8, 128], strides = [1, 1]} : vector<8x384xf32> to vector<8x128xf32>
    %37 = arith.addf %35, %36 : vector<8x128xf32>
    %38 = arith.negf %37 : vector<8x128xf32>
    %39 = math.exp %38 : vector<8x128xf32>
    %cst_21 = arith.constant 1.000000e+00 : f32
    %40 = vector.broadcast %cst_21 : f32 to vector<8x128xf32>
    %41 = arith.addf %40, %39 : vector<8x128xf32>
    %42 = arith.divf %40, %41 : vector<8x128xf32>
    %43 = vector.extract_strided_slice %24 {offsets = [0, 256], sizes = [8, 128], strides = [1, 1]} : vector<8x384xf32> to vector<8x128xf32>
    %44 = vector.extract_strided_slice %26 {offsets = [0, 256], sizes = [8, 128], strides = [1, 1]} : vector<8x384xf32> to vector<8x128xf32>
    %45 = arith.mulf %34, %44 : vector<8x128xf32>
    %46 = arith.addf %43, %45 : vector<8x128xf32>
    %47 = math.tanh %46 : vector<8x128xf32>
    %cst_22 = arith.constant 1.000000e+00 : f32
    %48 = vector.broadcast %cst_22 : f32 to vector<8x128xf32>
    %49 = arith.subf %48, %42 : vector<8x128xf32>
    %50 = arith.mulf %49, %47 : vector<8x128xf32>
    %51 = arith.mulf %42, %20 : vector<8x128xf32>
    %52 = arith.addf %50, %51 : vector<8x128xf32>
    %53 = vector.extract_strided_slice %10 {offsets = [8, 0], sizes = [8, 384], strides = [1, 1]} : vector<64x384xf32> to vector<8x384xf32>
    %54 = vector.extract_strided_slice %13 {offsets = [48, 0], sizes = [8, 384], strides = [1, 1]} : vector<64x384xf32> to vector<8x384xf32>
    %55 = arith.addf %53, %54 : vector<8x384xf32>
    %56 = arith.addf %55, %15 : vector<8x384xf32>
    %cst_23 = arith.constant dense<0.000000e+00> : vector<8x384xf32>
    %57 = tpu.matmul %52, %19, %cst_23 {dimension_numbers = #tpu.dot_dimension_numbers<[1], [0], [0], [1], [0, 0, 1, 1], [], []>} : vector<8x128xf32>, vector<128x384xf32>, vector<8x384xf32> -> vector<8x384xf32>
    %58 = arith.addf %57, %17 : vector<8x384xf32>
    %59 = vector.extract_strided_slice %56 {offsets = [0, 0], sizes = [8, 128], strides = [1, 1]} : vector<8x384xf32> to vector<8x128xf32>
    %60 = vector.extract_strided_slice %58 {offsets = [0, 0], sizes = [8, 128], strides = [1, 1]} : vector<8x384xf32> to vector<8x128xf32>
    %61 = arith.addf %59, %60 : vector<8x128xf32>
    %62 = arith.negf %61 : vector<8x128xf32>
    %63 = math.exp %62 : vector<8x128xf32>
    %cst_24 = arith.constant 1.000000e+00 : f32
    %64 = vector.broadcast %cst_24 : f32 to vector<8x128xf32>
    %65 = arith.addf %64, %63 : vector<8x128xf32>
    %66 = arith.divf %64, %65 : vector<8x128xf32>
    %67 = vector.extract_strided_slice %56 {offsets = [0, 128], sizes = [8, 128], strides = [1, 1]} : vector<8x384xf32> to vector<8x128xf32>
    %68 = vector.extract_strided_slice %58 {offsets = [0, 128], sizes = [8, 128], strides = [1, 1]} : vector<8x384xf32> to vector<8x128xf32>
    %69 = arith.addf %67, %68 : vector<8x128xf32>
    %70 = arith.negf %69 : vector<8x128xf32>
    %71 = math.exp %70 : vector<8x128xf32>
    %cst_25 = arith.constant 1.000000e+00 : f32
    %72 = vector.broadcast %cst_25 : f32 to vector<8x128xf32>
    %73 = arith.addf %72, %71 : vector<8x128xf32>
    %74 = arith.divf %72, %73 : vector<8x128xf32>
    %75 = vector.extract_strided_slice %56 {offsets = [0, 256], sizes = [8, 128], strides = [1, 1]} : vector<8x384xf32> to vector<8x128xf32>
    %76 = vector.extract_strided_slice %58 {offsets = [0, 256], sizes = [8, 128], strides = [1, 1]} : vector<8x384xf32> to vector<8x128xf32>
    %77 = arith.mulf %66, %76 : vector<8x128xf32>
    %78 = arith.addf %75, %77 : vector<8x128xf32>
    %79 = math.tanh %78 : vector<8x128xf32>
    %cst_26 = arith.constant 1.000000e+00 : f32
    %80 = vector.broadcast %cst_26 : f32 to vector<8x128xf32>
    %81 = arith.subf %80, %74 : vector<8x128xf32>
    %82 = arith.mulf %81, %79 : vector<8x128xf32>
    %83 = arith.mulf %74, %52 : vector<8x128xf32>
    %84 = arith.addf %82, %83 : vector<8x128xf32>
    %85 = vector.extract_strided_slice %10 {offsets = [16, 0], sizes = [8, 384], strides = [1, 1]} : vector<64x384xf32> to vector<8x384xf32>
    %86 = vector.extract_strided_slice %13 {offsets = [40, 0], sizes = [8, 384], strides = [1, 1]} : vector<64x384xf32> to vector<8x384xf32>
    %87 = arith.addf %85, %86 : vector<8x384xf32>
    %88 = arith.addf %87, %15 : vector<8x384xf32>
    %cst_27 = arith.constant dense<0.000000e+00> : vector<8x384xf32>
    %89 = tpu.matmul %84, %19, %cst_27 {dimension_numbers = #tpu.dot_dimension_numbers<[1], [0], [0], [1], [0, 0, 1, 1], [], []>} : vector<8x128xf32>, vector<128x384xf32>, vector<8x384xf32> -> vector<8x384xf32>
    %90 = arith.addf %89, %17 : vector<8x384xf32>
    %91 = vector.extract_strided_slice %88 {offsets = [0, 0], sizes = [8, 128], strides = [1, 1]} : vector<8x384xf32> to vector<8x128xf32>
    %92 = vector.extract_strided_slice %90 {offsets = [0, 0], sizes = [8, 128], strides = [1, 1]} : vector<8x384xf32> to vector<8x128xf32>
    %93 = arith.addf %91, %92 : vector<8x128xf32>
    %94 = arith.negf %93 : vector<8x128xf32>
    %95 = math.exp %94 : vector<8x128xf32>
    %cst_28 = arith.constant 1.000000e+00 : f32
    %96 = vector.broadcast %cst_28 : f32 to vector<8x128xf32>
    %97 = arith.addf %96, %95 : vector<8x128xf32>
    %98 = arith.divf %96, %97 : vector<8x128xf32>
    %99 = vector.extract_strided_slice %88 {offsets = [0, 128], sizes = [8, 128], strides = [1, 1]} : vector<8x384xf32> to vector<8x128xf32>
    %100 = vector.extract_strided_slice %90 {offsets = [0, 128], sizes = [8, 128], strides = [1, 1]} : vector<8x384xf32> to vector<8x128xf32>
    %101 = arith.addf %99, %100 : vector<8x128xf32>
    %102 = arith.negf %101 : vector<8x128xf32>
    %103 = math.exp %102 : vector<8x128xf32>
    %cst_29 = arith.constant 1.000000e+00 : f32
    %104 = vector.broadcast %cst_29 : f32 to vector<8x128xf32>
    %105 = arith.addf %104, %103 : vector<8x128xf32>
    %106 = arith.divf %104, %105 : vector<8x128xf32>
    %107 = vector.extract_strided_slice %88 {offsets = [0, 256], sizes = [8, 128], strides = [1, 1]} : vector<8x384xf32> to vector<8x128xf32>
    %108 = vector.extract_strided_slice %90 {offsets = [0, 256], sizes = [8, 128], strides = [1, 1]} : vector<8x384xf32> to vector<8x128xf32>
    %109 = arith.mulf %98, %108 : vector<8x128xf32>
    %110 = arith.addf %107, %109 : vector<8x128xf32>
    %111 = math.tanh %110 : vector<8x128xf32>
    %cst_30 = arith.constant 1.000000e+00 : f32
    %112 = vector.broadcast %cst_30 : f32 to vector<8x128xf32>
    %113 = arith.subf %112, %106 : vector<8x128xf32>
    %114 = arith.mulf %113, %111 : vector<8x128xf32>
    %115 = arith.mulf %106, %84 : vector<8x128xf32>
    %116 = arith.addf %114, %115 : vector<8x128xf32>
    %117 = vector.extract_strided_slice %10 {offsets = [24, 0], sizes = [8, 384], strides = [1, 1]} : vector<64x384xf32> to vector<8x384xf32>
    %118 = vector.extract_strided_slice %13 {offsets = [32, 0], sizes = [8, 384], strides = [1, 1]} : vector<64x384xf32> to vector<8x384xf32>
    %119 = arith.addf %117, %118 : vector<8x384xf32>
    %120 = arith.addf %119, %15 : vector<8x384xf32>
    %cst_31 = arith.constant dense<0.000000e+00> : vector<8x384xf32>
    %121 = tpu.matmul %116, %19, %cst_31 {dimension_numbers = #tpu.dot_dimension_numbers<[1], [0], [0], [1], [0, 0, 1, 1], [], []>} : vector<8x128xf32>, vector<128x384xf32>, vector<8x384xf32> -> vector<8x384xf32>
    %122 = arith.addf %121, %17 : vector<8x384xf32>
    %123 = vector.extract_strided_slice %120 {offsets = [0, 0], sizes = [8, 128], strides = [1, 1]} : vector<8x384xf32> to vector<8x128xf32>
    %124 = vector.extract_strided_slice %122 {offsets = [0, 0], sizes = [8, 128], strides = [1, 1]} : vector<8x384xf32> to vector<8x128xf32>
    %125 = arith.addf %123, %124 : vector<8x128xf32>
    %126 = arith.negf %125 : vector<8x128xf32>
    %127 = math.exp %126 : vector<8x128xf32>
    %cst_32 = arith.constant 1.000000e+00 : f32
    %128 = vector.broadcast %cst_32 : f32 to vector<8x128xf32>
    %129 = arith.addf %128, %127 : vector<8x128xf32>
    %130 = arith.divf %128, %129 : vector<8x128xf32>
    %131 = vector.extract_strided_slice %120 {offsets = [0, 128], sizes = [8, 128], strides = [1, 1]} : vector<8x384xf32> to vector<8x128xf32>
    %132 = vector.extract_strided_slice %122 {offsets = [0, 128], sizes = [8, 128], strides = [1, 1]} : vector<8x384xf32> to vector<8x128xf32>
    %133 = arith.addf %131, %132 : vector<8x128xf32>
    %134 = arith.negf %133 : vector<8x128xf32>
    %135 = math.exp %134 : vector<8x128xf32>
    %cst_33 = arith.constant 1.000000e+00 : f32
    %136 = vector.broadcast %cst_33 : f32 to vector<8x128xf32>
    %137 = arith.addf %136, %135 : vector<8x128xf32>
    %138 = arith.divf %136, %137 : vector<8x128xf32>
    %139 = vector.extract_strided_slice %120 {offsets = [0, 256], sizes = [8, 128], strides = [1, 1]} : vector<8x384xf32> to vector<8x128xf32>
    %140 = vector.extract_strided_slice %122 {offsets = [0, 256], sizes = [8, 128], strides = [1, 1]} : vector<8x384xf32> to vector<8x128xf32>
    %141 = arith.mulf %130, %140 : vector<8x128xf32>
    %142 = arith.addf %139, %141 : vector<8x128xf32>
    %143 = math.tanh %142 : vector<8x128xf32>
    %cst_34 = arith.constant 1.000000e+00 : f32
    %144 = vector.broadcast %cst_34 : f32 to vector<8x128xf32>
    %145 = arith.subf %144, %138 : vector<8x128xf32>
    %146 = arith.mulf %145, %143 : vector<8x128xf32>
    %147 = arith.mulf %138, %116 : vector<8x128xf32>
    %148 = arith.addf %146, %147 : vector<8x128xf32>
    %149 = vector.extract_strided_slice %10 {offsets = [32, 0], sizes = [8, 384], strides = [1, 1]} : vector<64x384xf32> to vector<8x384xf32>
    %150 = vector.extract_strided_slice %13 {offsets = [24, 0], sizes = [8, 384], strides = [1, 1]} : vector<64x384xf32> to vector<8x384xf32>
    %151 = arith.addf %149, %150 : vector<8x384xf32>
    %152 = arith.addf %151, %15 : vector<8x384xf32>
    %cst_35 = arith.constant dense<0.000000e+00> : vector<8x384xf32>
    %153 = tpu.matmul %148, %19, %cst_35 {dimension_numbers = #tpu.dot_dimension_numbers<[1], [0], [0], [1], [0, 0, 1, 1], [], []>} : vector<8x128xf32>, vector<128x384xf32>, vector<8x384xf32> -> vector<8x384xf32>
    %154 = arith.addf %153, %17 : vector<8x384xf32>
    %155 = vector.extract_strided_slice %152 {offsets = [0, 0], sizes = [8, 128], strides = [1, 1]} : vector<8x384xf32> to vector<8x128xf32>
    %156 = vector.extract_strided_slice %154 {offsets = [0, 0], sizes = [8, 128], strides = [1, 1]} : vector<8x384xf32> to vector<8x128xf32>
    %157 = arith.addf %155, %156 : vector<8x128xf32>
    %158 = arith.negf %157 : vector<8x128xf32>
    %159 = math.exp %158 : vector<8x128xf32>
    %cst_36 = arith.constant 1.000000e+00 : f32
    %160 = vector.broadcast %cst_36 : f32 to vector<8x128xf32>
    %161 = arith.addf %160, %159 : vector<8x128xf32>
    %162 = arith.divf %160, %161 : vector<8x128xf32>
    %163 = vector.extract_strided_slice %152 {offsets = [0, 128], sizes = [8, 128], strides = [1, 1]} : vector<8x384xf32> to vector<8x128xf32>
    %164 = vector.extract_strided_slice %154 {offsets = [0, 128], sizes = [8, 128], strides = [1, 1]} : vector<8x384xf32> to vector<8x128xf32>
    %165 = arith.addf %163, %164 : vector<8x128xf32>
    %166 = arith.negf %165 : vector<8x128xf32>
    %167 = math.exp %166 : vector<8x128xf32>
    %cst_37 = arith.constant 1.000000e+00 : f32
    %168 = vector.broadcast %cst_37 : f32 to vector<8x128xf32>
    %169 = arith.addf %168, %167 : vector<8x128xf32>
    %170 = arith.divf %168, %169 : vector<8x128xf32>
    %171 = vector.extract_strided_slice %152 {offsets = [0, 256], sizes = [8, 128], strides = [1, 1]} : vector<8x384xf32> to vector<8x128xf32>
    %172 = vector.extract_strided_slice %154 {offsets = [0, 256], sizes = [8, 128], strides = [1, 1]} : vector<8x384xf32> to vector<8x128xf32>
    %173 = arith.mulf %162, %172 : vector<8x128xf32>
    %174 = arith.addf %171, %173 : vector<8x128xf32>
    %175 = math.tanh %174 : vector<8x128xf32>
    %cst_38 = arith.constant 1.000000e+00 : f32
    %176 = vector.broadcast %cst_38 : f32 to vector<8x128xf32>
    %177 = arith.subf %176, %170 : vector<8x128xf32>
    %178 = arith.mulf %177, %175 : vector<8x128xf32>
    %179 = arith.mulf %170, %148 : vector<8x128xf32>
    %180 = arith.addf %178, %179 : vector<8x128xf32>
    %181 = vector.extract_strided_slice %10 {offsets = [40, 0], sizes = [8, 384], strides = [1, 1]} : vector<64x384xf32> to vector<8x384xf32>
    %182 = vector.extract_strided_slice %13 {offsets = [16, 0], sizes = [8, 384], strides = [1, 1]} : vector<64x384xf32> to vector<8x384xf32>
    %183 = arith.addf %181, %182 : vector<8x384xf32>
    %184 = arith.addf %183, %15 : vector<8x384xf32>
    %cst_39 = arith.constant dense<0.000000e+00> : vector<8x384xf32>
    %185 = tpu.matmul %180, %19, %cst_39 {dimension_numbers = #tpu.dot_dimension_numbers<[1], [0], [0], [1], [0, 0, 1, 1], [], []>} : vector<8x128xf32>, vector<128x384xf32>, vector<8x384xf32> -> vector<8x384xf32>
    %186 = arith.addf %185, %17 : vector<8x384xf32>
    %187 = vector.extract_strided_slice %184 {offsets = [0, 0], sizes = [8, 128], strides = [1, 1]} : vector<8x384xf32> to vector<8x128xf32>
    %188 = vector.extract_strided_slice %186 {offsets = [0, 0], sizes = [8, 128], strides = [1, 1]} : vector<8x384xf32> to vector<8x128xf32>
    %189 = arith.addf %187, %188 : vector<8x128xf32>
    %190 = arith.negf %189 : vector<8x128xf32>
    %191 = math.exp %190 : vector<8x128xf32>
    %cst_40 = arith.constant 1.000000e+00 : f32
    %192 = vector.broadcast %cst_40 : f32 to vector<8x128xf32>
    %193 = arith.addf %192, %191 : vector<8x128xf32>
    %194 = arith.divf %192, %193 : vector<8x128xf32>
    %195 = vector.extract_strided_slice %184 {offsets = [0, 128], sizes = [8, 128], strides = [1, 1]} : vector<8x384xf32> to vector<8x128xf32>
    %196 = vector.extract_strided_slice %186 {offsets = [0, 128], sizes = [8, 128], strides = [1, 1]} : vector<8x384xf32> to vector<8x128xf32>
    %197 = arith.addf %195, %196 : vector<8x128xf32>
    %198 = arith.negf %197 : vector<8x128xf32>
    %199 = math.exp %198 : vector<8x128xf32>
    %cst_41 = arith.constant 1.000000e+00 : f32
    %200 = vector.broadcast %cst_41 : f32 to vector<8x128xf32>
    %201 = arith.addf %200, %199 : vector<8x128xf32>
    %202 = arith.divf %200, %201 : vector<8x128xf32>
    %203 = vector.extract_strided_slice %184 {offsets = [0, 256], sizes = [8, 128], strides = [1, 1]} : vector<8x384xf32> to vector<8x128xf32>
    %204 = vector.extract_strided_slice %186 {offsets = [0, 256], sizes = [8, 128], strides = [1, 1]} : vector<8x384xf32> to vector<8x128xf32>
    %205 = arith.mulf %194, %204 : vector<8x128xf32>
    %206 = arith.addf %203, %205 : vector<8x128xf32>
    %207 = math.tanh %206 : vector<8x128xf32>
    %cst_42 = arith.constant 1.000000e+00 : f32
    %208 = vector.broadcast %cst_42 : f32 to vector<8x128xf32>
    %209 = arith.subf %208, %202 : vector<8x128xf32>
    %210 = arith.mulf %209, %207 : vector<8x128xf32>
    %211 = arith.mulf %202, %180 : vector<8x128xf32>
    %212 = arith.addf %210, %211 : vector<8x128xf32>
    %213 = vector.extract_strided_slice %10 {offsets = [48, 0], sizes = [8, 384], strides = [1, 1]} : vector<64x384xf32> to vector<8x384xf32>
    %214 = vector.extract_strided_slice %13 {offsets = [8, 0], sizes = [8, 384], strides = [1, 1]} : vector<64x384xf32> to vector<8x384xf32>
    %215 = arith.addf %213, %214 : vector<8x384xf32>
    %216 = arith.addf %215, %15 : vector<8x384xf32>
    %cst_43 = arith.constant dense<0.000000e+00> : vector<8x384xf32>
    %217 = tpu.matmul %212, %19, %cst_43 {dimension_numbers = #tpu.dot_dimension_numbers<[1], [0], [0], [1], [0, 0, 1, 1], [], []>} : vector<8x128xf32>, vector<128x384xf32>, vector<8x384xf32> -> vector<8x384xf32>
    %218 = arith.addf %217, %17 : vector<8x384xf32>
    %219 = vector.extract_strided_slice %216 {offsets = [0, 0], sizes = [8, 128], strides = [1, 1]} : vector<8x384xf32> to vector<8x128xf32>
    %220 = vector.extract_strided_slice %218 {offsets = [0, 0], sizes = [8, 128], strides = [1, 1]} : vector<8x384xf32> to vector<8x128xf32>
    %221 = arith.addf %219, %220 : vector<8x128xf32>
    %222 = arith.negf %221 : vector<8x128xf32>
    %223 = math.exp %222 : vector<8x128xf32>
    %cst_44 = arith.constant 1.000000e+00 : f32
    %224 = vector.broadcast %cst_44 : f32 to vector<8x128xf32>
    %225 = arith.addf %224, %223 : vector<8x128xf32>
    %226 = arith.divf %224, %225 : vector<8x128xf32>
    %227 = vector.extract_strided_slice %216 {offsets = [0, 128], sizes = [8, 128], strides = [1, 1]} : vector<8x384xf32> to vector<8x128xf32>
    %228 = vector.extract_strided_slice %218 {offsets = [0, 128], sizes = [8, 128], strides = [1, 1]} : vector<8x384xf32> to vector<8x128xf32>
    %229 = arith.addf %227, %228 : vector<8x128xf32>
    %230 = arith.negf %229 : vector<8x128xf32>
    %231 = math.exp %230 : vector<8x128xf32>
    %cst_45 = arith.constant 1.000000e+00 : f32
    %232 = vector.broadcast %cst_45 : f32 to vector<8x128xf32>
    %233 = arith.addf %232, %231 : vector<8x128xf32>
    %234 = arith.divf %232, %233 : vector<8x128xf32>
    %235 = vector.extract_strided_slice %216 {offsets = [0, 256], sizes = [8, 128], strides = [1, 1]} : vector<8x384xf32> to vector<8x128xf32>
    %236 = vector.extract_strided_slice %218 {offsets = [0, 256], sizes = [8, 128], strides = [1, 1]} : vector<8x384xf32> to vector<8x128xf32>
    %237 = arith.mulf %226, %236 : vector<8x128xf32>
    %238 = arith.addf %235, %237 : vector<8x128xf32>
    %239 = math.tanh %238 : vector<8x128xf32>
    %cst_46 = arith.constant 1.000000e+00 : f32
    %240 = vector.broadcast %cst_46 : f32 to vector<8x128xf32>
    %241 = arith.subf %240, %234 : vector<8x128xf32>
    %242 = arith.mulf %241, %239 : vector<8x128xf32>
    %243 = arith.mulf %234, %212 : vector<8x128xf32>
    %244 = arith.addf %242, %243 : vector<8x128xf32>
    %245 = vector.extract_strided_slice %10 {offsets = [56, 0], sizes = [8, 384], strides = [1, 1]} : vector<64x384xf32> to vector<8x384xf32>
    %246 = vector.extract_strided_slice %13 {offsets = [0, 0], sizes = [8, 384], strides = [1, 1]} : vector<64x384xf32> to vector<8x384xf32>
    %247 = arith.addf %245, %246 : vector<8x384xf32>
    %248 = arith.addf %247, %15 : vector<8x384xf32>
    %cst_47 = arith.constant dense<0.000000e+00> : vector<8x384xf32>
    %249 = tpu.matmul %244, %19, %cst_47 {dimension_numbers = #tpu.dot_dimension_numbers<[1], [0], [0], [1], [0, 0, 1, 1], [], []>} : vector<8x128xf32>, vector<128x384xf32>, vector<8x384xf32> -> vector<8x384xf32>
    %250 = arith.addf %249, %17 : vector<8x384xf32>
    %251 = vector.extract_strided_slice %248 {offsets = [0, 0], sizes = [8, 128], strides = [1, 1]} : vector<8x384xf32> to vector<8x128xf32>
    %252 = vector.extract_strided_slice %250 {offsets = [0, 0], sizes = [8, 128], strides = [1, 1]} : vector<8x384xf32> to vector<8x128xf32>
    %253 = arith.addf %251, %252 : vector<8x128xf32>
    %254 = arith.negf %253 : vector<8x128xf32>
    %255 = math.exp %254 : vector<8x128xf32>
    %cst_48 = arith.constant 1.000000e+00 : f32
    %256 = vector.broadcast %cst_48 : f32 to vector<8x128xf32>
    %257 = arith.addf %256, %255 : vector<8x128xf32>
    %258 = arith.divf %256, %257 : vector<8x128xf32>
    %259 = vector.extract_strided_slice %248 {offsets = [0, 128], sizes = [8, 128], strides = [1, 1]} : vector<8x384xf32> to vector<8x128xf32>
    %260 = vector.extract_strided_slice %250 {offsets = [0, 128], sizes = [8, 128], strides = [1, 1]} : vector<8x384xf32> to vector<8x128xf32>
    %261 = arith.addf %259, %260 : vector<8x128xf32>
    %262 = arith.negf %261 : vector<8x128xf32>
    %263 = math.exp %262 : vector<8x128xf32>
    %cst_49 = arith.constant 1.000000e+00 : f32
    %264 = vector.broadcast %cst_49 : f32 to vector<8x128xf32>
    %265 = arith.addf %264, %263 : vector<8x128xf32>
    %266 = arith.divf %264, %265 : vector<8x128xf32>
    %267 = vector.extract_strided_slice %248 {offsets = [0, 256], sizes = [8, 128], strides = [1, 1]} : vector<8x384xf32> to vector<8x128xf32>
    %268 = vector.extract_strided_slice %250 {offsets = [0, 256], sizes = [8, 128], strides = [1, 1]} : vector<8x384xf32> to vector<8x128xf32>
    %269 = arith.mulf %258, %268 : vector<8x128xf32>
    %270 = arith.addf %267, %269 : vector<8x128xf32>
    %271 = math.tanh %270 : vector<8x128xf32>
    %cst_50 = arith.constant 1.000000e+00 : f32
    %272 = vector.broadcast %cst_50 : f32 to vector<8x128xf32>
    %273 = arith.subf %272, %266 : vector<8x128xf32>
    %274 = arith.mulf %273, %271 : vector<8x128xf32>
    %275 = arith.mulf %266, %244 : vector<8x128xf32>
    %276 = arith.addf %274, %275 : vector<8x128xf32>
    %277 = tpu.concatenate %52, %84, %116, %148, %180, %212, %244, %276 in 0 : vector<8x128xf32>, vector<8x128xf32>, vector<8x128xf32>, vector<8x128xf32>, vector<8x128xf32>, vector<8x128xf32>, vector<8x128xf32>, vector<8x128xf32> -> vector<64x128xf32>
    %278 = tpu.concatenate %276, %244, %212, %180, %148, %116, %84, %52 in 0 : vector<8x128xf32>, vector<8x128xf32>, vector<8x128xf32>, vector<8x128xf32>, vector<8x128xf32>, vector<8x128xf32>, vector<8x128xf32>, vector<8x128xf32> -> vector<64x128xf32>
    %c3 = arith.constant 3 : index
    %c0_51 = arith.constant 0 : index
    %c0_52 = arith.constant 0 : index
    %279 = vector.load %arg2[%c3, %c0_51, %c0_52] : memref<10x128x384xf32, #tpu.memory_space<vmem>>, vector<1x128x384xf32>
    %280 = vector.shape_cast %279 : vector<1x128x384xf32> to vector<128x384xf32>
    %c4 = arith.constant 4 : index
    %c0_53 = arith.constant 0 : index
    %c0_54 = arith.constant 0 : index
    %281 = vector.load %arg2[%c4, %c0_53, %c0_54] : memref<10x128x384xf32, #tpu.memory_space<vmem>>, vector<1x128x384xf32>
    %282 = vector.shape_cast %281 : vector<1x128x384xf32> to vector<128x384xf32>
    %c5 = arith.constant 5 : index
    %c0_55 = arith.constant 0 : index
    %c0_56 = arith.constant 0 : index
    %283 = vector.load %arg2[%c5, %c0_55, %c0_56] : memref<10x128x384xf32, #tpu.memory_space<vmem>>, vector<1x128x384xf32>
    %284 = vector.shape_cast %283 : vector<1x128x384xf32> to vector<128x384xf32>
    %c6 = arith.constant 6 : index
    %c0_57 = arith.constant 0 : index
    %c0_58 = arith.constant 0 : index
    %285 = vector.load %arg2[%c6, %c0_57, %c0_58] : memref<10x128x384xf32, #tpu.memory_space<vmem>>, vector<1x128x384xf32>
    %286 = vector.shape_cast %285 : vector<1x128x384xf32> to vector<128x384xf32>
    %cst_59 = arith.constant dense<0.000000e+00> : vector<64x384xf32>
    %287 = tpu.matmul %277, %280, %cst_59 {dimension_numbers = #tpu.dot_dimension_numbers<[1], [0], [0], [1], [0, 0, 1, 1], [], []>} : vector<64x128xf32>, vector<128x384xf32>, vector<64x384xf32> -> vector<64x384xf32>
    %cst_60 = arith.constant dense<0.000000e+00> : vector<64x384xf32>
    %288 = tpu.matmul %278, %282, %cst_60 {dimension_numbers = #tpu.dot_dimension_numbers<[1], [0], [0], [1], [0, 0, 1, 1], [], []>} : vector<64x128xf32>, vector<128x384xf32>, vector<64x384xf32> -> vector<64x384xf32>
    %289 = arith.addf %287, %288 : vector<64x384xf32>
    %cst_61 = arith.constant dense<0.000000e+00> : vector<64x384xf32>
    %290 = tpu.matmul %277, %284, %cst_61 {dimension_numbers = #tpu.dot_dimension_numbers<[1], [0], [0], [1], [0, 0, 1, 1], [], []>} : vector<64x128xf32>, vector<128x384xf32>, vector<64x384xf32> -> vector<64x384xf32>
    %cst_62 = arith.constant dense<0.000000e+00> : vector<64x384xf32>
    %291 = tpu.matmul %278, %286, %cst_62 {dimension_numbers = #tpu.dot_dimension_numbers<[1], [0], [0], [1], [0, 0, 1, 1], [], []>} : vector<64x128xf32>, vector<128x384xf32>, vector<64x384xf32> -> vector<64x384xf32>
    %292 = arith.addf %290, %291 : vector<64x384xf32>
    %c2_63 = arith.constant 2 : index
    %c0_64 = arith.constant 0 : index
    %c0_65 = arith.constant 0 : index
    %293 = vector.load %arg3[%c2_63, %c0_64, %c0_65] : memref<5x8x384xf32, #tpu.memory_space<vmem>>, vector<1x8x384xf32>
    %294 = vector.shape_cast %293 : vector<1x8x384xf32> to vector<8x384xf32>
    %c3_66 = arith.constant 3 : index
    %c0_67 = arith.constant 0 : index
    %c0_68 = arith.constant 0 : index
    %295 = vector.load %arg3[%c3_66, %c0_67, %c0_68] : memref<5x8x384xf32, #tpu.memory_space<vmem>>, vector<1x8x384xf32>
    %296 = vector.shape_cast %295 : vector<1x8x384xf32> to vector<8x384xf32>
    %c7 = arith.constant 7 : index
    %c0_69 = arith.constant 0 : index
    %c0_70 = arith.constant 0 : index
    %297 = vector.load %arg2[%c7, %c0_69, %c0_70] : memref<10x128x384xf32, #tpu.memory_space<vmem>>, vector<1x128x384xf32>
    %298 = vector.shape_cast %297 : vector<1x128x384xf32> to vector<128x384xf32>
    %cst_71 = arith.constant 0.000000e+00 : f32
    %299 = vector.broadcast %cst_71 : f32 to vector<8x128xf32>
    %300 = vector.extract_strided_slice %289 {offsets = [0, 0], sizes = [8, 384], strides = [1, 1]} : vector<64x384xf32> to vector<8x384xf32>
    %301 = vector.extract_strided_slice %292 {offsets = [56, 0], sizes = [8, 384], strides = [1, 1]} : vector<64x384xf32> to vector<8x384xf32>
    %302 = arith.addf %300, %301 : vector<8x384xf32>
    %303 = arith.addf %302, %294 : vector<8x384xf32>
    %cst_72 = arith.constant dense<0.000000e+00> : vector<8x384xf32>
    %304 = tpu.matmul %299, %298, %cst_72 {dimension_numbers = #tpu.dot_dimension_numbers<[1], [0], [0], [1], [0, 0, 1, 1], [], []>} : vector<8x128xf32>, vector<128x384xf32>, vector<8x384xf32> -> vector<8x384xf32>
    %305 = arith.addf %304, %296 : vector<8x384xf32>
    %306 = vector.extract_strided_slice %303 {offsets = [0, 0], sizes = [8, 128], strides = [1, 1]} : vector<8x384xf32> to vector<8x128xf32>
    %307 = vector.extract_strided_slice %305 {offsets = [0, 0], sizes = [8, 128], strides = [1, 1]} : vector<8x384xf32> to vector<8x128xf32>
    %308 = arith.addf %306, %307 : vector<8x128xf32>
    %309 = arith.negf %308 : vector<8x128xf32>
    %310 = math.exp %309 : vector<8x128xf32>
    %cst_73 = arith.constant 1.000000e+00 : f32
    %311 = vector.broadcast %cst_73 : f32 to vector<8x128xf32>
    %312 = arith.addf %311, %310 : vector<8x128xf32>
    %313 = arith.divf %311, %312 : vector<8x128xf32>
    %314 = vector.extract_strided_slice %303 {offsets = [0, 128], sizes = [8, 128], strides = [1, 1]} : vector<8x384xf32> to vector<8x128xf32>
    %315 = vector.extract_strided_slice %305 {offsets = [0, 128], sizes = [8, 128], strides = [1, 1]} : vector<8x384xf32> to vector<8x128xf32>
    %316 = arith.addf %314, %315 : vector<8x128xf32>
    %317 = arith.negf %316 : vector<8x128xf32>
    %318 = math.exp %317 : vector<8x128xf32>
    %cst_74 = arith.constant 1.000000e+00 : f32
    %319 = vector.broadcast %cst_74 : f32 to vector<8x128xf32>
    %320 = arith.addf %319, %318 : vector<8x128xf32>
    %321 = arith.divf %319, %320 : vector<8x128xf32>
    %322 = vector.extract_strided_slice %303 {offsets = [0, 256], sizes = [8, 128], strides = [1, 1]} : vector<8x384xf32> to vector<8x128xf32>
    %323 = vector.extract_strided_slice %305 {offsets = [0, 256], sizes = [8, 128], strides = [1, 1]} : vector<8x384xf32> to vector<8x128xf32>
    %324 = arith.mulf %313, %323 : vector<8x128xf32>
    %325 = arith.addf %322, %324 : vector<8x128xf32>
    %326 = math.tanh %325 : vector<8x128xf32>
    %cst_75 = arith.constant 1.000000e+00 : f32
    %327 = vector.broadcast %cst_75 : f32 to vector<8x128xf32>
    %328 = arith.subf %327, %321 : vector<8x128xf32>
    %329 = arith.mulf %328, %326 : vector<8x128xf32>
    %330 = arith.mulf %321, %299 : vector<8x128xf32>
    %331 = arith.addf %329, %330 : vector<8x128xf32>
    %332 = vector.extract_strided_slice %289 {offsets = [8, 0], sizes = [8, 384], strides = [1, 1]} : vector<64x384xf32> to vector<8x384xf32>
    %333 = vector.extract_strided_slice %292 {offsets = [48, 0], sizes = [8, 384], strides = [1, 1]} : vector<64x384xf32> to vector<8x384xf32>
    %334 = arith.addf %332, %333 : vector<8x384xf32>
    %335 = arith.addf %334, %294 : vector<8x384xf32>
    %cst_76 = arith.constant dense<0.000000e+00> : vector<8x384xf32>
    %336 = tpu.matmul %331, %298, %cst_76 {dimension_numbers = #tpu.dot_dimension_numbers<[1], [0], [0], [1], [0, 0, 1, 1], [], []>} : vector<8x128xf32>, vector<128x384xf32>, vector<8x384xf32> -> vector<8x384xf32>
    %337 = arith.addf %336, %296 : vector<8x384xf32>
    %338 = vector.extract_strided_slice %335 {offsets = [0, 0], sizes = [8, 128], strides = [1, 1]} : vector<8x384xf32> to vector<8x128xf32>
    %339 = vector.extract_strided_slice %337 {offsets = [0, 0], sizes = [8, 128], strides = [1, 1]} : vector<8x384xf32> to vector<8x128xf32>
    %340 = arith.addf %338, %339 : vector<8x128xf32>
    %341 = arith.negf %340 : vector<8x128xf32>
    %342 = math.exp %341 : vector<8x128xf32>
    %cst_77 = arith.constant 1.000000e+00 : f32
    %343 = vector.broadcast %cst_77 : f32 to vector<8x128xf32>
    %344 = arith.addf %343, %342 : vector<8x128xf32>
    %345 = arith.divf %343, %344 : vector<8x128xf32>
    %346 = vector.extract_strided_slice %335 {offsets = [0, 128], sizes = [8, 128], strides = [1, 1]} : vector<8x384xf32> to vector<8x128xf32>
    %347 = vector.extract_strided_slice %337 {offsets = [0, 128], sizes = [8, 128], strides = [1, 1]} : vector<8x384xf32> to vector<8x128xf32>
    %348 = arith.addf %346, %347 : vector<8x128xf32>
    %349 = arith.negf %348 : vector<8x128xf32>
    %350 = math.exp %349 : vector<8x128xf32>
    %cst_78 = arith.constant 1.000000e+00 : f32
    %351 = vector.broadcast %cst_78 : f32 to vector<8x128xf32>
    %352 = arith.addf %351, %350 : vector<8x128xf32>
    %353 = arith.divf %351, %352 : vector<8x128xf32>
    %354 = vector.extract_strided_slice %335 {offsets = [0, 256], sizes = [8, 128], strides = [1, 1]} : vector<8x384xf32> to vector<8x128xf32>
    %355 = vector.extract_strided_slice %337 {offsets = [0, 256], sizes = [8, 128], strides = [1, 1]} : vector<8x384xf32> to vector<8x128xf32>
    %356 = arith.mulf %345, %355 : vector<8x128xf32>
    %357 = arith.addf %354, %356 : vector<8x128xf32>
    %358 = math.tanh %357 : vector<8x128xf32>
    %cst_79 = arith.constant 1.000000e+00 : f32
    %359 = vector.broadcast %cst_79 : f32 to vector<8x128xf32>
    %360 = arith.subf %359, %353 : vector<8x128xf32>
    %361 = arith.mulf %360, %358 : vector<8x128xf32>
    %362 = arith.mulf %353, %331 : vector<8x128xf32>
    %363 = arith.addf %361, %362 : vector<8x128xf32>
    %364 = vector.extract_strided_slice %289 {offsets = [16, 0], sizes = [8, 384], strides = [1, 1]} : vector<64x384xf32> to vector<8x384xf32>
    %365 = vector.extract_strided_slice %292 {offsets = [40, 0], sizes = [8, 384], strides = [1, 1]} : vector<64x384xf32> to vector<8x384xf32>
    %366 = arith.addf %364, %365 : vector<8x384xf32>
    %367 = arith.addf %366, %294 : vector<8x384xf32>
    %cst_80 = arith.constant dense<0.000000e+00> : vector<8x384xf32>
    %368 = tpu.matmul %363, %298, %cst_80 {dimension_numbers = #tpu.dot_dimension_numbers<[1], [0], [0], [1], [0, 0, 1, 1], [], []>} : vector<8x128xf32>, vector<128x384xf32>, vector<8x384xf32> -> vector<8x384xf32>
    %369 = arith.addf %368, %296 : vector<8x384xf32>
    %370 = vector.extract_strided_slice %367 {offsets = [0, 0], sizes = [8, 128], strides = [1, 1]} : vector<8x384xf32> to vector<8x128xf32>
    %371 = vector.extract_strided_slice %369 {offsets = [0, 0], sizes = [8, 128], strides = [1, 1]} : vector<8x384xf32> to vector<8x128xf32>
    %372 = arith.addf %370, %371 : vector<8x128xf32>
    %373 = arith.negf %372 : vector<8x128xf32>
    %374 = math.exp %373 : vector<8x128xf32>
    %cst_81 = arith.constant 1.000000e+00 : f32
    %375 = vector.broadcast %cst_81 : f32 to vector<8x128xf32>
    %376 = arith.addf %375, %374 : vector<8x128xf32>
    %377 = arith.divf %375, %376 : vector<8x128xf32>
    %378 = vector.extract_strided_slice %367 {offsets = [0, 128], sizes = [8, 128], strides = [1, 1]} : vector<8x384xf32> to vector<8x128xf32>
    %379 = vector.extract_strided_slice %369 {offsets = [0, 128], sizes = [8, 128], strides = [1, 1]} : vector<8x384xf32> to vector<8x128xf32>
    %380 = arith.addf %378, %379 : vector<8x128xf32>
    %381 = arith.negf %380 : vector<8x128xf32>
    %382 = math.exp %381 : vector<8x128xf32>
    %cst_82 = arith.constant 1.000000e+00 : f32
    %383 = vector.broadcast %cst_82 : f32 to vector<8x128xf32>
    %384 = arith.addf %383, %382 : vector<8x128xf32>
    %385 = arith.divf %383, %384 : vector<8x128xf32>
    %386 = vector.extract_strided_slice %367 {offsets = [0, 256], sizes = [8, 128], strides = [1, 1]} : vector<8x384xf32> to vector<8x128xf32>
    %387 = vector.extract_strided_slice %369 {offsets = [0, 256], sizes = [8, 128], strides = [1, 1]} : vector<8x384xf32> to vector<8x128xf32>
    %388 = arith.mulf %377, %387 : vector<8x128xf32>
    %389 = arith.addf %386, %388 : vector<8x128xf32>
    %390 = math.tanh %389 : vector<8x128xf32>
    %cst_83 = arith.constant 1.000000e+00 : f32
    %391 = vector.broadcast %cst_83 : f32 to vector<8x128xf32>
    %392 = arith.subf %391, %385 : vector<8x128xf32>
    %393 = arith.mulf %392, %390 : vector<8x128xf32>
    %394 = arith.mulf %385, %363 : vector<8x128xf32>
    %395 = arith.addf %393, %394 : vector<8x128xf32>
    %396 = vector.extract_strided_slice %289 {offsets = [24, 0], sizes = [8, 384], strides = [1, 1]} : vector<64x384xf32> to vector<8x384xf32>
    %397 = vector.extract_strided_slice %292 {offsets = [32, 0], sizes = [8, 384], strides = [1, 1]} : vector<64x384xf32> to vector<8x384xf32>
    %398 = arith.addf %396, %397 : vector<8x384xf32>
    %399 = arith.addf %398, %294 : vector<8x384xf32>
    %cst_84 = arith.constant dense<0.000000e+00> : vector<8x384xf32>
    %400 = tpu.matmul %395, %298, %cst_84 {dimension_numbers = #tpu.dot_dimension_numbers<[1], [0], [0], [1], [0, 0, 1, 1], [], []>} : vector<8x128xf32>, vector<128x384xf32>, vector<8x384xf32> -> vector<8x384xf32>
    %401 = arith.addf %400, %296 : vector<8x384xf32>
    %402 = vector.extract_strided_slice %399 {offsets = [0, 0], sizes = [8, 128], strides = [1, 1]} : vector<8x384xf32> to vector<8x128xf32>
    %403 = vector.extract_strided_slice %401 {offsets = [0, 0], sizes = [8, 128], strides = [1, 1]} : vector<8x384xf32> to vector<8x128xf32>
    %404 = arith.addf %402, %403 : vector<8x128xf32>
    %405 = arith.negf %404 : vector<8x128xf32>
    %406 = math.exp %405 : vector<8x128xf32>
    %cst_85 = arith.constant 1.000000e+00 : f32
    %407 = vector.broadcast %cst_85 : f32 to vector<8x128xf32>
    %408 = arith.addf %407, %406 : vector<8x128xf32>
    %409 = arith.divf %407, %408 : vector<8x128xf32>
    %410 = vector.extract_strided_slice %399 {offsets = [0, 128], sizes = [8, 128], strides = [1, 1]} : vector<8x384xf32> to vector<8x128xf32>
    %411 = vector.extract_strided_slice %401 {offsets = [0, 128], sizes = [8, 128], strides = [1, 1]} : vector<8x384xf32> to vector<8x128xf32>
    %412 = arith.addf %410, %411 : vector<8x128xf32>
    %413 = arith.negf %412 : vector<8x128xf32>
    %414 = math.exp %413 : vector<8x128xf32>
    %cst_86 = arith.constant 1.000000e+00 : f32
    %415 = vector.broadcast %cst_86 : f32 to vector<8x128xf32>
    %416 = arith.addf %415, %414 : vector<8x128xf32>
    %417 = arith.divf %415, %416 : vector<8x128xf32>
    %418 = vector.extract_strided_slice %399 {offsets = [0, 256], sizes = [8, 128], strides = [1, 1]} : vector<8x384xf32> to vector<8x128xf32>
    %419 = vector.extract_strided_slice %401 {offsets = [0, 256], sizes = [8, 128], strides = [1, 1]} : vector<8x384xf32> to vector<8x128xf32>
    %420 = arith.mulf %409, %419 : vector<8x128xf32>
    %421 = arith.addf %418, %420 : vector<8x128xf32>
    %422 = math.tanh %421 : vector<8x128xf32>
    %cst_87 = arith.constant 1.000000e+00 : f32
    %423 = vector.broadcast %cst_87 : f32 to vector<8x128xf32>
    %424 = arith.subf %423, %417 : vector<8x128xf32>
    %425 = arith.mulf %424, %422 : vector<8x128xf32>
    %426 = arith.mulf %417, %395 : vector<8x128xf32>
    %427 = arith.addf %425, %426 : vector<8x128xf32>
    %428 = vector.extract_strided_slice %289 {offsets = [32, 0], sizes = [8, 384], strides = [1, 1]} : vector<64x384xf32> to vector<8x384xf32>
    %429 = vector.extract_strided_slice %292 {offsets = [24, 0], sizes = [8, 384], strides = [1, 1]} : vector<64x384xf32> to vector<8x384xf32>
    %430 = arith.addf %428, %429 : vector<8x384xf32>
    %431 = arith.addf %430, %294 : vector<8x384xf32>
    %cst_88 = arith.constant dense<0.000000e+00> : vector<8x384xf32>
    %432 = tpu.matmul %427, %298, %cst_88 {dimension_numbers = #tpu.dot_dimension_numbers<[1], [0], [0], [1], [0, 0, 1, 1], [], []>} : vector<8x128xf32>, vector<128x384xf32>, vector<8x384xf32> -> vector<8x384xf32>
    %433 = arith.addf %432, %296 : vector<8x384xf32>
    %434 = vector.extract_strided_slice %431 {offsets = [0, 0], sizes = [8, 128], strides = [1, 1]} : vector<8x384xf32> to vector<8x128xf32>
    %435 = vector.extract_strided_slice %433 {offsets = [0, 0], sizes = [8, 128], strides = [1, 1]} : vector<8x384xf32> to vector<8x128xf32>
    %436 = arith.addf %434, %435 : vector<8x128xf32>
    %437 = arith.negf %436 : vector<8x128xf32>
    %438 = math.exp %437 : vector<8x128xf32>
    %cst_89 = arith.constant 1.000000e+00 : f32
    %439 = vector.broadcast %cst_89 : f32 to vector<8x128xf32>
    %440 = arith.addf %439, %438 : vector<8x128xf32>
    %441 = arith.divf %439, %440 : vector<8x128xf32>
    %442 = vector.extract_strided_slice %431 {offsets = [0, 128], sizes = [8, 128], strides = [1, 1]} : vector<8x384xf32> to vector<8x128xf32>
    %443 = vector.extract_strided_slice %433 {offsets = [0, 128], sizes = [8, 128], strides = [1, 1]} : vector<8x384xf32> to vector<8x128xf32>
    %444 = arith.addf %442, %443 : vector<8x128xf32>
    %445 = arith.negf %444 : vector<8x128xf32>
    %446 = math.exp %445 : vector<8x128xf32>
    %cst_90 = arith.constant 1.000000e+00 : f32
    %447 = vector.broadcast %cst_90 : f32 to vector<8x128xf32>
    %448 = arith.addf %447, %446 : vector<8x128xf32>
    %449 = arith.divf %447, %448 : vector<8x128xf32>
    %450 = vector.extract_strided_slice %431 {offsets = [0, 256], sizes = [8, 128], strides = [1, 1]} : vector<8x384xf32> to vector<8x128xf32>
    %451 = vector.extract_strided_slice %433 {offsets = [0, 256], sizes = [8, 128], strides = [1, 1]} : vector<8x384xf32> to vector<8x128xf32>
    %452 = arith.mulf %441, %451 : vector<8x128xf32>
    %453 = arith.addf %450, %452 : vector<8x128xf32>
    %454 = math.tanh %453 : vector<8x128xf32>
    %cst_91 = arith.constant 1.000000e+00 : f32
    %455 = vector.broadcast %cst_91 : f32 to vector<8x128xf32>
    %456 = arith.subf %455, %449 : vector<8x128xf32>
    %457 = arith.mulf %456, %454 : vector<8x128xf32>
    %458 = arith.mulf %449, %427 : vector<8x128xf32>
    %459 = arith.addf %457, %458 : vector<8x128xf32>
    %460 = vector.extract_strided_slice %289 {offsets = [40, 0], sizes = [8, 384], strides = [1, 1]} : vector<64x384xf32> to vector<8x384xf32>
    %461 = vector.extract_strided_slice %292 {offsets = [16, 0], sizes = [8, 384], strides = [1, 1]} : vector<64x384xf32> to vector<8x384xf32>
    %462 = arith.addf %460, %461 : vector<8x384xf32>
    %463 = arith.addf %462, %294 : vector<8x384xf32>
    %cst_92 = arith.constant dense<0.000000e+00> : vector<8x384xf32>
    %464 = tpu.matmul %459, %298, %cst_92 {dimension_numbers = #tpu.dot_dimension_numbers<[1], [0], [0], [1], [0, 0, 1, 1], [], []>} : vector<8x128xf32>, vector<128x384xf32>, vector<8x384xf32> -> vector<8x384xf32>
    %465 = arith.addf %464, %296 : vector<8x384xf32>
    %466 = vector.extract_strided_slice %463 {offsets = [0, 0], sizes = [8, 128], strides = [1, 1]} : vector<8x384xf32> to vector<8x128xf32>
    %467 = vector.extract_strided_slice %465 {offsets = [0, 0], sizes = [8, 128], strides = [1, 1]} : vector<8x384xf32> to vector<8x128xf32>
    %468 = arith.addf %466, %467 : vector<8x128xf32>
    %469 = arith.negf %468 : vector<8x128xf32>
    %470 = math.exp %469 : vector<8x128xf32>
    %cst_93 = arith.constant 1.000000e+00 : f32
    %471 = vector.broadcast %cst_93 : f32 to vector<8x128xf32>
    %472 = arith.addf %471, %470 : vector<8x128xf32>
    %473 = arith.divf %471, %472 : vector<8x128xf32>
    %474 = vector.extract_strided_slice %463 {offsets = [0, 128], sizes = [8, 128], strides = [1, 1]} : vector<8x384xf32> to vector<8x128xf32>
    %475 = vector.extract_strided_slice %465 {offsets = [0, 128], sizes = [8, 128], strides = [1, 1]} : vector<8x384xf32> to vector<8x128xf32>
    %476 = arith.addf %474, %475 : vector<8x128xf32>
    %477 = arith.negf %476 : vector<8x128xf32>
    %478 = math.exp %477 : vector<8x128xf32>
    %cst_94 = arith.constant 1.000000e+00 : f32
    %479 = vector.broadcast %cst_94 : f32 to vector<8x128xf32>
    %480 = arith.addf %479, %478 : vector<8x128xf32>
    %481 = arith.divf %479, %480 : vector<8x128xf32>
    %482 = vector.extract_strided_slice %463 {offsets = [0, 256], sizes = [8, 128], strides = [1, 1]} : vector<8x384xf32> to vector<8x128xf32>
    %483 = vector.extract_strided_slice %465 {offsets = [0, 256], sizes = [8, 128], strides = [1, 1]} : vector<8x384xf32> to vector<8x128xf32>
    %484 = arith.mulf %473, %483 : vector<8x128xf32>
    %485 = arith.addf %482, %484 : vector<8x128xf32>
    %486 = math.tanh %485 : vector<8x128xf32>
    %cst_95 = arith.constant 1.000000e+00 : f32
    %487 = vector.broadcast %cst_95 : f32 to vector<8x128xf32>
    %488 = arith.subf %487, %481 : vector<8x128xf32>
    %489 = arith.mulf %488, %486 : vector<8x128xf32>
    %490 = arith.mulf %481, %459 : vector<8x128xf32>
    %491 = arith.addf %489, %490 : vector<8x128xf32>
    %492 = vector.extract_strided_slice %289 {offsets = [48, 0], sizes = [8, 384], strides = [1, 1]} : vector<64x384xf32> to vector<8x384xf32>
    %493 = vector.extract_strided_slice %292 {offsets = [8, 0], sizes = [8, 384], strides = [1, 1]} : vector<64x384xf32> to vector<8x384xf32>
    %494 = arith.addf %492, %493 : vector<8x384xf32>
    %495 = arith.addf %494, %294 : vector<8x384xf32>
    %cst_96 = arith.constant dense<0.000000e+00> : vector<8x384xf32>
    %496 = tpu.matmul %491, %298, %cst_96 {dimension_numbers = #tpu.dot_dimension_numbers<[1], [0], [0], [1], [0, 0, 1, 1], [], []>} : vector<8x128xf32>, vector<128x384xf32>, vector<8x384xf32> -> vector<8x384xf32>
    %497 = arith.addf %496, %296 : vector<8x384xf32>
    %498 = vector.extract_strided_slice %495 {offsets = [0, 0], sizes = [8, 128], strides = [1, 1]} : vector<8x384xf32> to vector<8x128xf32>
    %499 = vector.extract_strided_slice %497 {offsets = [0, 0], sizes = [8, 128], strides = [1, 1]} : vector<8x384xf32> to vector<8x128xf32>
    %500 = arith.addf %498, %499 : vector<8x128xf32>
    %501 = arith.negf %500 : vector<8x128xf32>
    %502 = math.exp %501 : vector<8x128xf32>
    %cst_97 = arith.constant 1.000000e+00 : f32
    %503 = vector.broadcast %cst_97 : f32 to vector<8x128xf32>
    %504 = arith.addf %503, %502 : vector<8x128xf32>
    %505 = arith.divf %503, %504 : vector<8x128xf32>
    %506 = vector.extract_strided_slice %495 {offsets = [0, 128], sizes = [8, 128], strides = [1, 1]} : vector<8x384xf32> to vector<8x128xf32>
    %507 = vector.extract_strided_slice %497 {offsets = [0, 128], sizes = [8, 128], strides = [1, 1]} : vector<8x384xf32> to vector<8x128xf32>
    %508 = arith.addf %506, %507 : vector<8x128xf32>
    %509 = arith.negf %508 : vector<8x128xf32>
    %510 = math.exp %509 : vector<8x128xf32>
    %cst_98 = arith.constant 1.000000e+00 : f32
    %511 = vector.broadcast %cst_98 : f32 to vector<8x128xf32>
    %512 = arith.addf %511, %510 : vector<8x128xf32>
    %513 = arith.divf %511, %512 : vector<8x128xf32>
    %514 = vector.extract_strided_slice %495 {offsets = [0, 256], sizes = [8, 128], strides = [1, 1]} : vector<8x384xf32> to vector<8x128xf32>
    %515 = vector.extract_strided_slice %497 {offsets = [0, 256], sizes = [8, 128], strides = [1, 1]} : vector<8x384xf32> to vector<8x128xf32>
    %516 = arith.mulf %505, %515 : vector<8x128xf32>
    %517 = arith.addf %514, %516 : vector<8x128xf32>
    %518 = math.tanh %517 : vector<8x128xf32>
    %cst_99 = arith.constant 1.000000e+00 : f32
    %519 = vector.broadcast %cst_99 : f32 to vector<8x128xf32>
    %520 = arith.subf %519, %513 : vector<8x128xf32>
    %521 = arith.mulf %520, %518 : vector<8x128xf32>
    %522 = arith.mulf %513, %491 : vector<8x128xf32>
    %523 = arith.addf %521, %522 : vector<8x128xf32>
    %524 = vector.extract_strided_slice %289 {offsets = [56, 0], sizes = [8, 384], strides = [1, 1]} : vector<64x384xf32> to vector<8x384xf32>
    %525 = vector.extract_strided_slice %292 {offsets = [0, 0], sizes = [8, 384], strides = [1, 1]} : vector<64x384xf32> to vector<8x384xf32>
    %526 = arith.addf %524, %525 : vector<8x384xf32>
    %527 = arith.addf %526, %294 : vector<8x384xf32>
    %cst_100 = arith.constant dense<0.000000e+00> : vector<8x384xf32>
    %528 = tpu.matmul %523, %298, %cst_100 {dimension_numbers = #tpu.dot_dimension_numbers<[1], [0], [0], [1], [0, 0, 1, 1], [], []>} : vector<8x128xf32>, vector<128x384xf32>, vector<8x384xf32> -> vector<8x384xf32>
    %529 = arith.addf %528, %296 : vector<8x384xf32>
    %530 = vector.extract_strided_slice %527 {offsets = [0, 0], sizes = [8, 128], strides = [1, 1]} : vector<8x384xf32> to vector<8x128xf32>
    %531 = vector.extract_strided_slice %529 {offsets = [0, 0], sizes = [8, 128], strides = [1, 1]} : vector<8x384xf32> to vector<8x128xf32>
    %532 = arith.addf %530, %531 : vector<8x128xf32>
    %533 = arith.negf %532 : vector<8x128xf32>
    %534 = math.exp %533 : vector<8x128xf32>
    %cst_101 = arith.constant 1.000000e+00 : f32
    %535 = vector.broadcast %cst_101 : f32 to vector<8x128xf32>
    %536 = arith.addf %535, %534 : vector<8x128xf32>
    %537 = arith.divf %535, %536 : vector<8x128xf32>
    %538 = vector.extract_strided_slice %527 {offsets = [0, 128], sizes = [8, 128], strides = [1, 1]} : vector<8x384xf32> to vector<8x128xf32>
    %539 = vector.extract_strided_slice %529 {offsets = [0, 128], sizes = [8, 128], strides = [1, 1]} : vector<8x384xf32> to vector<8x128xf32>
    %540 = arith.addf %538, %539 : vector<8x128xf32>
    %541 = arith.negf %540 : vector<8x128xf32>
    %542 = math.exp %541 : vector<8x128xf32>
    %cst_102 = arith.constant 1.000000e+00 : f32
    %543 = vector.broadcast %cst_102 : f32 to vector<8x128xf32>
    %544 = arith.addf %543, %542 : vector<8x128xf32>
    %545 = arith.divf %543, %544 : vector<8x128xf32>
    %546 = vector.extract_strided_slice %527 {offsets = [0, 256], sizes = [8, 128], strides = [1, 1]} : vector<8x384xf32> to vector<8x128xf32>
    %547 = vector.extract_strided_slice %529 {offsets = [0, 256], sizes = [8, 128], strides = [1, 1]} : vector<8x384xf32> to vector<8x128xf32>
    %548 = arith.mulf %537, %547 : vector<8x128xf32>
    %549 = arith.addf %546, %548 : vector<8x128xf32>
    %550 = math.tanh %549 : vector<8x128xf32>
    %cst_103 = arith.constant 1.000000e+00 : f32
    %551 = vector.broadcast %cst_103 : f32 to vector<8x128xf32>
    %552 = arith.subf %551, %545 : vector<8x128xf32>
    %553 = arith.mulf %552, %550 : vector<8x128xf32>
    %554 = arith.mulf %545, %523 : vector<8x128xf32>
    %555 = arith.addf %553, %554 : vector<8x128xf32>
    %c8 = arith.constant 8 : index
    %c0_104 = arith.constant 0 : index
    %c0_105 = arith.constant 0 : index
    %556 = vector.load %arg2[%c8, %c0_104, %c0_105] : memref<10x128x384xf32, #tpu.memory_space<vmem>>, vector<1x128x384xf32>
    %557 = vector.shape_cast %556 : vector<1x128x384xf32> to vector<128x384xf32>
    %c9 = arith.constant 9 : index
    %c0_106 = arith.constant 0 : index
    %c0_107 = arith.constant 0 : index
    %558 = vector.load %arg2[%c9, %c0_106, %c0_107] : memref<10x128x384xf32, #tpu.memory_space<vmem>>, vector<1x128x384xf32>
    %559 = vector.shape_cast %558 : vector<1x128x384xf32> to vector<128x384xf32>
    %c4_108 = arith.constant 4 : index
    %c0_109 = arith.constant 0 : index
    %c0_110 = arith.constant 0 : index
    %560 = vector.load %arg3[%c4_108, %c0_109, %c0_110] : memref<5x8x384xf32, #tpu.memory_space<vmem>>, vector<1x8x384xf32>
    %561 = vector.shape_cast %560 : vector<1x8x384xf32> to vector<8x384xf32>
    %cst_111 = arith.constant dense<0.000000e+00> : vector<8x384xf32>
    %562 = tpu.matmul %555, %557, %cst_111 {dimension_numbers = #tpu.dot_dimension_numbers<[1], [0], [0], [1], [0, 0, 1, 1], [], []>} : vector<8x128xf32>, vector<128x384xf32>, vector<8x384xf32> -> vector<8x384xf32>
    %cst_112 = arith.constant dense<0.000000e+00> : vector<8x384xf32>
    %563 = tpu.matmul %331, %559, %cst_112 {dimension_numbers = #tpu.dot_dimension_numbers<[1], [0], [0], [1], [0, 0, 1, 1], [], []>} : vector<8x128xf32>, vector<128x384xf32>, vector<8x384xf32> -> vector<8x384xf32>
    %564 = arith.addf %562, %563 : vector<8x384xf32>
    %565 = arith.addf %564, %561 : vector<8x384xf32>
    %cst_113 = arith.constant dense<0xFF800000> : vector<8xf32>
    %566 = vector.multi_reduction <maximumf>, %565, %cst_113 [1] : vector<8x384xf32> to vector<8xf32>
    %567 = vector.shape_cast %566 : vector<8xf32> to vector<8x1xf32>
    %568 = vector.broadcast %567 : vector<8x1xf32> to vector<8x384xf32>
    %569 = arith.subf %565, %568 : vector<8x384xf32>
    %570 = math.exp %569 : vector<8x384xf32>
    %cst_114 = arith.constant dense<0.000000e+00> : vector<8xf32>
    %571 = vector.multi_reduction <add>, %570, %cst_114 [1] : vector<8x384xf32> to vector<8xf32>
    %572 = vector.shape_cast %571 : vector<8xf32> to vector<8x1xf32>
    %573 = vector.broadcast %572 : vector<8x1xf32> to vector<8x384xf32>
    %574 = arith.divf %570, %573 : vector<8x384xf32>
    %575 = vector.extract_strided_slice %574 {offsets = [0, 0], sizes = [8, 128], strides = [1, 1]} : vector<8x384xf32> to vector<8x128xf32>
    %c0_115 = arith.constant 0 : index
    %c0_116 = arith.constant 0 : index
    %576 = vector.load %arg4[%c0_115, %c0_116] : memref<8x128xf32, #tpu.memory_space<vmem>>, vector<8x128xf32>
    tpu.vector_store %arg4[%c0_115, %c0_116], %575 {strides = array<i32>} : memref<8x128xf32, #tpu.memory_space<vmem>>, vector<8x128xf32>,
    return
  }
}

</mosaic_0001>

<bundles_post_ra>
// kernel: tpu_custom_call.1
= control target key start
LH: loop header
LB: loop body
LE: loop exit
PB: predicated region body
PF: predicated region fallthrough
CT: control target
= control target key end

     0   :  { %9 = vsyncpa [#allocation3], 0  ;;  %s9072_s0 = inlined_call_operand.vmem [shape: s32[64,1], index: 0, kind: input, shape index: {}]   ;;  %s9073_s1 = inlined_call_operand.hbm [shape: f32[32,128], index: 1, kind: input, shape index: {}]   ;;  %s9074_s2 = inlined_call_operand.hbm [shape: f32[10,128,384], index: 2, kind: input, shape index: {}]   ;;  %s9075_s3 = inlined_call_operand.hbm [shape: f32[5,8,384], index: 3, kind: input, shape index: {}]   ;;  %s9076_s4 = inlined_call_operand.hbm [shape: f32[8,128], index: 4, kind: output, shape index: {}]  }
   0x1   :  { %10 = vsyncpa [#allocation6], 0 }
   0x2   :  { %11 = vsyncpa [#allocation4], 0  ;;  %s6870_s15 = smov [#allocation5]  }
   0x3   :  { %s31_s16 = sshll.u32 %s6870_s15, 4  ;;  %s32_s16 = int_to_ptr.vmem [resolvable:$true] %s31_s16 }
   0x4   :  { %s6792_s17 = scalar_lea.vmem %s32_s16, 61440  ;;  %p6797_p1 = scmp.lt.s32.totalorder %s32_s16, %s32_s16 }
   0x5   :  { %p6793_p0 = scmp.ne.s32.totalorder %s32_s16, %s6792_s17  ;;  %p6798_p2 = scmp.lt.s32.totalorder %s6792_s17, %s6792_s17 }
   0x7   :  { %p6799_p3 = por %p6798_p2, %p6797_p1 }
   0x9   :  { %p6800_p4 = pnand %p6799_p3, %p6793_p0 }
   0xb   :  { %6803 = shalt.err (!%p6800_p4)
}
   0xc   :  { %s6871_s18 = smov 384   ;;  %s6872_s19 = smov 24  }
   0xd   :  { %37 = dma.hbm_to_vmem [thread:$0]  %s9074_s2, 61440, %s32_s16, [#allocation6], %s6871_s18, %s6871_s18, %s6872_s19  }
   0xe   :  { %s6873_s22 = smov [#allocation2]  }
   0xf   :  { %s19_s23 = sshll.u32 %s6873_s22, 4  ;;  %s20_s23 = int_to_ptr.vmem [resolvable:$true] %s19_s23 }
  0x10   :  { %s6812_s24 = scalar_lea.vmem %s20_s23, 512  ;;  %p6817_p6 = scmp.lt.s32.totalorder %s20_s23, %s20_s23 }
  0x11   :  { %p6813_p5 = scmp.ne.s32.totalorder %s20_s23, %s6812_s24  ;;  %p6818_p7 = scmp.lt.s32.totalorder %s6812_s24, %s6812_s24 }
  0x13   :  { %p6819_p8 = por %p6818_p7, %p6817_p6 }
  0x15   :  { %p6820_p9 = pnand %p6819_p8, %p6813_p5 }
  0x17   :  { %6823 = shalt.err (!%p6820_p9)
}
  0x18   :  { %s6874_s25 = smov 128   ;;  %s6875_s26 = smov 8  }
  0x19   :  { %25 = dma.hbm_to_vmem [thread:$0]  %s9073_s1, 512, %s20_s23, [#allocation3], %s6874_s25, %s6874_s25, %s6875_s26  }
  0x1a   :  { %s6876_s29 = smov [#allocation7]  }
  0x1b   :  { %s43_s30 = sshll.u32 %s6876_s29, 4  ;;  %s44_s30 = int_to_ptr.vmem [resolvable:$true] %s43_s30 }
  0x1c   :  { %s6832_s2 = scalar_lea.vmem %s44_s30, 1920  ;;  %p6837_p11 = scmp.lt.s32.totalorder %s44_s30, %s44_s30 }
  0x1d   :  { %p6833_p10 = scmp.ne.s32.totalorder %s44_s30, %s6832_s2  ;;  %p6838_p12 = scmp.lt.s32.totalorder %s6832_s2, %s6832_s2 }
  0x1f   :  { %p6839_p13 = por %p6838_p12, %p6837_p11 }
  0x21   :  { %p6840_p0 = pnand %p6839_p13, %p6833_p10 }
  0x23   :  { %6843 = shalt.err (!%p6840_p0)
}
  0x24   :  { %49 = dma.hbm_to_vmem [thread:$0]  %s9075_s3, 1920, %s44_s30, [#allocation6], %s6871_s18, %s6871_s18, %s6872_s19  }
  0x25   :  { %6864 = dma.done.wait [#allocation3], 512  }
  0x26   :  { %6865 = vsyncadd [#allocation3], 4294966784 }
  0x27   :  { %6866 = dma.done.wait [#allocation6], 63360  }
  0x28   :  { %6867 = vsyncadd [#allocation6], 4294903936  ;;  %v6877_v0 = vmov 0   ;;  %v9077_v1 = vmov 0.0   ;;  %v61_v2 = vld [vmem:[%s9072_s0 + $0x10] sm:$0xff]  ;;  %v59_v3 = vld [vmem:[%s9072_s0] sm:$0xff]  ;;  %v67_v45 = vlaneseq }
  0x29   :  { %6512 = vset.pattern.permute.xlu1 %v6877_v0  ;;  %6511 = vset.pattern.permute.xlu0 %v6877_v0  ;;  %v62_v4 = vld [vmem:[%s9072_s0 + $0x18] sm:$0xff]  ;;  %v60_v5 = vld [vmem:[%s9072_s0 + $0x8] sm:$0xff]  ;;  %v119_v7 = vld [vmem:[#allocation2 + $0x10] sm:$0xff]  ;;  %vm121_vm0 = vcmask 261120   ;;  %vm6879_vm9 = vmmov 0  }
  0x2a   :  { %363 = vmatprep.mubr.f32.mxu1 %v9077_v1  ;;  %76 = vperm.xlu1 %6512, %v61_v2   ;;  %v120_v6 = vld [vmem:[#allocation2 + $0x18] sm:$0xff]  ;;  %v118_v8 = vld [vmem:[#allocation2 + $0x8] sm:$0xff]  ;;  %v63_v10 = vld [vmem:[%s9072_s0 + $0x20] sm:$0xff]  ;;  %v68_v46 = vand.u32 127, %v67_v45 }
  0x2b   :  { %70 = vperm.xlu0 %6511, %v59_v3   ;;  %5586 = vmatprep.subr.mxu0 %v120_v6  ;;  %v64_v9 = vld [vmem:[%s9072_s0 + $0x28] sm:$0xff]  ;;  %v117_v11 = vld [vmem:[#allocation2] sm:$0xff]  ;;  %v66_v12 = vld [vmem:[%s9072_s0 + $0x38] sm:$0xff] }
  0x2c   :  { %5587 = vmatpush3.msra.mxu0 %v120_v6  ;;  %v65_v13 = vld [vmem:[%s9072_s0 + $0x30] sm:$0xff]  ;;  %v296_v15 = vld [vmem:[#allocation5 + $0x168] sm:$0xff]  ;;  %v6940_v16 = vld [vmem:[#allocation5 + $0x178] sm:$0xff]  ;;  %s6880_s0 = smov [#allocation8]  }
  0x2d   :  { %5588 = vmatprep.subr.mxu0 %v119_v7  ;;  %v297_v14 = vld [vmem:[#allocation5 + $0x170] sm:$0xff]  ;;  %v294_v17 = vld [vmem:[#allocation5 + $0x158] sm:$0xff]  ;;  %v291_v19 = vld [vmem:[#allocation5 + $0x140] sm:$0xff]  ;;  %s5066_s21 = sshll.u32 %s6880_s0, 4  ;;  %s5067_s21 = int_to_ptr.vmem [resolvable:$true] %s5066_s21 }
  0x2e   :  { %79 = vperm.xlu1 %6512, %v62_v4   ;;  %5589 = vmatpush3.msra.mxu0 %v119_v7  ;;  %v293_v18 = vld [vmem:[#allocation5 + $0x150] sm:$0xff]  ;;  %v290_v20 = vld [vmem:[#allocation5 + $0x138] sm:$0xff]  ;;  %v288_v21 = vld [vmem:[#allocation5 + $0x128] sm:$0xff]  ;;  %s6844_s22 = scalar_lea.vmem %s5067_s21, 128  ;;  %p6849_p2 = scmp.lt.s32.totalorder %s5067_s21, %s5067_s21 }
  0x2f   :  { %73 = vperm.xlu0 %6511, %v60_v5   ;;  %5590 = vmatprep.subr.mxu0 %v118_v8  ;;  %v287_v22 = vld [vmem:[#allocation5 + $0x120] sm:$0xff]  ;;  %v285_v23 = vld [vmem:[#allocation5 + $0x110] sm:$0xff]  ;;  %v284_v24 = vld [vmem:[#allocation5 + $0x108] sm:$0xff]  ;;  %p6845_p1 = scmp.ne.s32.totalorder %s5067_s21, %s6844_s22  ;;  %p6850_p3 = scmp.lt.s32.totalorder %s6844_s22, %s6844_s22 }
  0x30   :  { %5591 = vmatpush3.msra.mxu0 %v118_v8  ;;  %299 = vmatprep.subr.mxu1 %v297_v14  ;;  %v282_v25 = vld [vmem:[#allocation5 + $0xf8] sm:$0xff]  ;;  %v281_v26 = vld [vmem:[#allocation5 + $0xf0] sm:$0xff]  ;;  %v279_v27 = vld [vmem:[#allocation5 + $0xe0] sm:$0xff] }
  0x31   :  { %5592 = vmatprep.subr.mxu0 %v117_v11  ;;  %300 = vmatpush1.msra.mxu1 %v296_v15  ;;  %v278_v28 = vld [vmem:[#allocation5 + $0xd8] sm:$0xff]  ;;  %v276_v29 = vld [vmem:[#allocation5 + $0xc8] sm:$0xff]  ;;  %v275_v30 = vld [vmem:[#allocation5 + $0xc0] sm:$0xff]  ;;  %p6851_p4 = por %p6850_p3, %p6849_p2 }
  0x32   :  { %85 = vperm.xlu1 %6512, %v64_v9   ;;  %5593 = vmatpush3.msra.mxu0 %v117_v11  ;;  %v273_v31 = vld [vmem:[#allocation5 + $0xb0] sm:$0xff]  ;;  %v272_v32 = vld [vmem:[#allocation5 + $0xa8] sm:$0xff]  ;;  %v270_v33 = vld [vmem:[#allocation5 + $0x98] sm:$0xff] }
  0x33   :  { %82 = vperm.xlu0 %6511, %v63_v10   ;;  %5606 = vmatprep.subr.mxu0 %v6940_v16  ;;  %v269_v34 = vld [vmem:[#allocation5 + $0x90] sm:$0xff]  ;;  %v267_v35 = vld [vmem:[#allocation5 + $0x80] sm:$0xff]  ;;  %v266_v36 = vld [vmem:[#allocation5 + $0x78] sm:$0xff]  ;;  %p6852_p5 = pnand %p6851_p4, %p6845_p1 }
  0x34   :  { %301 = vmatprep.subr.mxu1 %v294_v17  ;;  %v264_v37 = vld [vmem:[#allocation5 + $0x68] sm:$0xff]  ;;  %v263_v38 = vld [vmem:[#allocation5 + $0x60] sm:$0xff]  ;;  %v261_v39 = vld [vmem:[#allocation5 + $0x50] sm:$0xff] }
  0x35   :  { %302 = vmatpush1.msra.mxu1 %v293_v18  ;;  %v260_v40 = vld [vmem:[#allocation5 + $0x48] sm:$0xff]  ;;  %v258_v41 = vld [vmem:[#allocation5 + $0x38] sm:$0xff]  ;;  %v257_v42 = vld [vmem:[#allocation5 + $0x30] sm:$0xff] }
  0x36   :  { %91 = vperm.xlu1 %6512, %v66_v12   ;;  %303 = vmatprep.subr.mxu1 %v291_v19  ;;  %v255_v43 = vld [vmem:[#allocation5 + $0x20] sm:$0xff]  ;;  %v254_v44 = vld [vmem:[#allocation5 + $0x18] sm:$0xff]  ;;  %v292_v58 = vld [vmem:[#allocation5 + $0x148] sm:$0xff] }
  0x37   :  { %88 = vperm.xlu0 %6511, %v65_v13   ;;  %304 = vmatpush1.msra.mxu1 %v290_v20  ;;  %v295_v54 = vld [vmem:[#allocation5 + $0x160] sm:$0xff]  ;;  %v289_v60 = vld [vmem:[#allocation5 + $0x130] sm:$0xff]  ;;  %v286_v63 = vld [vmem:[#allocation5 + $0x118] sm:$0xff] }
  0x38   :  { %305 = vmatprep.subr.mxu1 %v288_v21  ;;  %v283_v3 = vld [vmem:[#allocation5 + $0x100] sm:$0xff]  ;;  %v280_v4 = vld [vmem:[#allocation5 + $0xe8] sm:$0xff]  ;;  %v277_v6 = vld [vmem:[#allocation5 + $0xd0] sm:$0xff] }
  0x39   :  { %306 = vmatpush1.msra.mxu1 %v287_v22  ;;  %v274_v7 = vld [vmem:[#allocation5 + $0xb8] sm:$0xff]  ;;  %v271_v8 = vld [vmem:[#allocation5 + $0xa0] sm:$0xff]  ;;  %v268_v9 = vld [vmem:[#allocation5 + $0x88] sm:$0xff] }
  0x3a   :  { %307 = vmatprep.subr.mxu1 %v285_v23  ;;  %v265_v10 = vld [vmem:[#allocation5 + $0x70] sm:$0xff]  ;;  %v262_v11 = vld [vmem:[#allocation5 + $0x58] sm:$0xff]  ;;  %v259_v12 = vld [vmem:[#allocation5 + $0x40] sm:$0xff] }
  0x3b   :  { %308 = vmatpush1.msra.mxu1 %v284_v24  ;;  %v256_v13 = vld [vmem:[#allocation5 + $0x28] sm:$0xff]  ;;  %v251_v15 = vld [vmem:[#allocation5] sm:$0xff]  ;;  %v564_v17 = vld [vmem:[#allocation5 + $0x2f0] sm:$0xff] }
  0x3c   :  { %309 = vmatprep.subr.mxu1 %v282_v25  ;;  %v252_v14 = vld [vmem:[#allocation5 + $0x8] sm:$0xff]  ;;  %v565_v18 = vld [vmem:[#allocation5 + $0x2f8] sm:$0xff]  ;;  %v560_v23 = vld [vmem:[#allocation5 + $0x2d0] sm:$0xff] }
  0x3d   :  { %310 = vmatpush1.msra.mxu1 %v281_v26  ;;  %v563_v20 = vld [vmem:[#allocation5 + $0x2e8] sm:$0xff]  ;;  %v561_v22 = vld [vmem:[#allocation5 + $0x2d8] sm:$0xff]  ;;  %v562_v24 = vld [vmem:[#allocation5 + $0x2e0] sm:$0xff] }
  0x3e   :  { %311 = vmatprep.subr.mxu1 %v279_v27  ;;  %v558_v26 = vld [vmem:[#allocation5 + $0x2c0] sm:$0xff]  ;;  %v547_v45 = vld [vmem:[#allocation5 + $0x268] sm:$0xff] }
  0x3f   :  { %312 = vmatpush1.msra.mxu1 %v278_v28  ;;  %v557_v28 = vld [vmem:[#allocation5 + $0x2b8] sm:$0xff] }
  0x40   :  { %313 = vmatprep.subr.mxu1 %v276_v29  ;;  %v559_v29 = vld [vmem:[#allocation5 + $0x2c8] sm:$0xff] }
  0x41   :  { %314 = vmatpush1.msra.mxu1 %v275_v30 }
  0x42   :  { %315 = vmatprep.subr.mxu1 %v273_v31  ;;  %v555_v31 = vld [vmem:[#allocation5 + $0x2a8] sm:$0xff] }
  0x43   :  { %316 = vmatpush1.msra.mxu1 %v272_v32  ;;  %v554_v32 = vld [vmem:[#allocation5 + $0x2a0] sm:$0xff] }
  0x44   :  { %317 = vmatprep.subr.mxu1 %v270_v33  ;;  %v556_v33 = vld [vmem:[#allocation5 + $0x2b0] sm:$0xff] }
  0x45   :  { %318 = vmatpush1.msra.mxu1 %v269_v34 }
  0x46   :  { %319 = vmatprep.subr.mxu1 %v267_v35  ;;  %v552_v35 = vld [vmem:[#allocation5 + $0x290] sm:$0xff] }
  0x47   :  { %320 = vmatpush1.msra.mxu1 %v266_v36  ;;  %v551_v36 = vld [vmem:[#allocation5 + $0x288] sm:$0xff] }
  0x48   :  { %321 = vmatprep.subr.mxu1 %v264_v37  ;;  %v553_v37 = vld [vmem:[#allocation5 + $0x298] sm:$0xff] }
  0x49   :  { %322 = vmatpush1.msra.mxu1 %v263_v38 }
  0x4a   :  { %323 = vmatprep.subr.mxu1 %v261_v39  ;;  %v549_v39 = vld [vmem:[#allocation5 + $0x278] sm:$0xff] }
  0x4b   :  { %324 = vmatpush1.msra.mxu1 %v260_v40  ;;  %v548_v40 = vld [vmem:[#allocation5 + $0x270] sm:$0xff] }
  0x4c   :  { %325 = vmatprep.subr.mxu1 %v258_v41  ;;  %v550_v41 = vld [vmem:[#allocation5 + $0x280] sm:$0xff] }
  0x4d   :  { %326 = vmatpush1.msra.mxu1 %v257_v42  ;;  %v546_v42 = vld [vmem:[#allocation5 + $0x260] sm:$0xff] }
  0x4e   :  { %327 = vmatprep.subr.mxu1 %v255_v43 }
  0x4f   :  { %328 = vmatpush1.msra.mxu1 %v254_v44  ;;  %v545_v44 = vld [vmem:[#allocation5 + $0x258] sm:$0xff] }
  0x50   :  { %329 = vmatprep.subr.mxu1 %v252_v14  ;;  %v7014_v14 = vld [vmem:[#allocation5 + $0x440] sm:$0xff] }
  0x51   :  { %330 = vmatpush1.msra.mxu1 %v251_v15  ;;  %v7018_v15 = vld [vmem:[#allocation5 + $0x438] sm:$0xff] }
  0x52   :  { %566 = vmatprep.subr.mxu1 %v564_v17  ;;  %v7026_v17 = vld [vmem:[#allocation5 + $0x420] sm:$0xff] }
  0xa5   :  { %v77_v47 = vpop.permute.xlu1 %76 }
  0xa6   :  { %v71_v48 = vpop.permute.xlu0 %70  ;;  %vm95_vm2 = vcmp.eq.s32.totalorder %v68_v46, %v77_v47  ;;  %v542_v47 = vld [vmem:[#allocation5 + $0x240] sm:$0xff] }
  0xa7   :  { %vm93_vm1 = vcmp.eq.s32.totalorder %v68_v46, %v71_v48  ;;  %v5078_v52 = vsel %vm95_vm2, 1.0, %v9077_v1  ;;  %v544_v48 = vld [vmem:[#allocation5 + $0x250] sm:$0xff] }
  0xa8   :  { %v5076_v49 = vsel %vm93_vm1, 1.0, %v9077_v1 }
  0xa9   :  { %5594 = vmatprep.mubr.msk.f32.mxu0 %vm121_vm0, %v5076_v49  ;;  %v80_v50 = vpop.permute.xlu1 %79  ;;  %v540_v49 = vld [vmem:[#allocation5 + $0x230] sm:$0xff] }
  0xaa   :  { %v74_v51 = vpop.permute.xlu0 %73  ;;  %vm96_vm3 = vcmp.eq.s32.totalorder %v68_v46, %v80_v50  ;;  %v541_v50 = vld [vmem:[#allocation5 + $0x238] sm:$0xff] }
  0xab   :  { %vm94_vm4 = vcmp.eq.s32.totalorder %v68_v46, %v74_v51  ;;  %v5079_v55 = vsel %vm96_vm3, 1.0, %v9077_v1  ;;  %v539_v51 = vld [vmem:[#allocation5 + $0x228] sm:$0xff] }
  0xac   :  { %v5077_v53 = vsel %vm94_vm4, 1.0, %v9077_v1 }
  0xad   :  { %5595 = vmatmul.mubr.msk.f32.vlgmr.msra.gmra.mxu0 %vm121_vm0, %v5077_v53  ;;  %v86_v56 = vpop.permute.xlu1 %85  ;;  %v538_v53 = vld [vmem:[#allocation5 + $0x220] sm:$0xff] }
  0xae   :  { %v83_v57 = vpop.permute.xlu0 %82  ;;  %5597 = vmatprep.mubr.msk.f32.mxu0 %vm121_vm0, %v5078_v52  ;;  %5607 = vmatpush3.msra.mxu0 %v6940_v16  ;;  %vm98_vm6 = vcmp.eq.s32.totalorder %v68_v46, %v86_v56  ;;  %v253_v16 = vld [vmem:[#allocation5 + $0x10] sm:$0xff]  ;;  %v537_v52 = vld [vmem:[#allocation5 + $0x218] sm:$0xff]  ;;  %v535_v56 = vld [vmem:[#allocation5 + $0x208] sm:$0xff] }
  0xaf   :  { %vm97_vm5 = vcmp.eq.s32.totalorder %v68_v46, %v83_v57  ;;  %5608 = vmatprep.subr.mxu0 %v295_v54  ;;  %v5081_v0 = vsel %vm98_vm6, 1.0, %v9077_v1  ;;  %v533_v57 = vld [vmem:[#allocation5 + $0x1f8] sm:$0xff] }
  0xb0   :  { %v5080_v59 = vsel %vm97_vm5, 1.0, %v9077_v1  ;;  %5609 = vmatpush3.msra.mxu0 %v295_v54  ;;  %v536_v54 = vld [vmem:[#allocation5 + $0x210] sm:$0xff] }
  0xb1   :  { %5598 = vmatmul.mubr.msk.f32.gmra.mxu0 %vm121_vm0, %v5079_v55  ;;  %5610 = vmatprep.subr.mxu0 %v292_v58  ;;  %v92_v61 = vpop.permute.xlu1 %91  ;;  %v534_v55 = vld [vmem:[#allocation5 + $0x200] sm:$0xff] }
  0xb2   :  { %5600 = vmatprep.mubr.msk.f32.mxu0 %vm121_vm0, %v5080_v59  ;;  %v89_v62 = vpop.permute.xlu0 %88  ;;  %5611 = vmatpush3.msra.mxu0 %v292_v58  ;;  %vm100_vm8 = vcmp.eq.s32.totalorder %v68_v46, %v92_v61  ;;  %v531_v58 = vld [vmem:[#allocation5 + $0x1e8] sm:$0xff]  ;;  %v532_v59 = vld [vmem:[#allocation5 + $0x1f0] sm:$0xff] }
  0xb3   :  { %vm99_vm7 = vcmp.eq.s32.totalorder %v68_v46, %v89_v62  ;;  %5612 = vmatprep.subr.mxu0 %v289_v60  ;;  %v5083_v5 = vsel %vm100_vm8, 1.0, %v9077_v1  ;;  %v543_v46 = vld [vmem:[#allocation5 + $0x248] sm:$0xff]  ;;  %v528_v61 = vld [vmem:[#allocation5 + $0x1d0] sm:$0xff]  ;;  %v529_v62 = vld [vmem:[#allocation5 + $0x1d8] sm:$0xff] }
  0xb4   :  { %v5082_v2 = vsel %vm99_vm7, 1.0, %v9077_v1  ;;  %5613 = vmatpush3.msra.mxu0 %v289_v60  ;;  %v530_v60 = vld [vmem:[#allocation5 + $0x1e0] sm:$0xff] }
  0xb5   :  { %5601 = vmatmul.mubr.msk.f32.gmra.mxu0 %vm121_vm0, %v5081_v0  ;;  %5614 = vmatprep.subr.mxu0 %v286_v63  ;;  %v525_v0 = vld [vmem:[#allocation5 + $0x1b8] sm:$0xff] }
  0xb6   :  { %5603 = vmatprep.mubr.msk.f32.mxu0 %vm121_vm0, %v5082_v2  ;;  %5615 = vmatpush3.msra.mxu0 %v286_v63  ;;  %v527_v63 = vld [vmem:[#allocation5 + $0x1c8] sm:$0xff]  ;;  %v526_v2 = vld [vmem:[#allocation5 + $0x1c0] sm:$0xff] }
  0xb7   :  { %5616 = vmatprep.subr.mxu0 %v283_v3 }
  0xb8   :  { %5617 = vmatpush3.msra.mxu0 %v283_v3  ;;  %v524_v3 = vld [vmem:[#allocation5 + $0x1b0] sm:$0xff] }
  0xb9   :  { %5604 = vmatmul.mubr.msk.f32.gmra.mxu0 %vm121_vm0, %v5083_v5  ;;  %5618 = vmatprep.subr.mxu0 %v280_v4  ;;  %v523_v5 = vld [vmem:[#allocation5 + $0x1a8] sm:$0xff] }
  0xba   :  { %5619 = vmatpush3.msra.mxu0 %v280_v4  ;;  %v522_v4 = vld [vmem:[#allocation5 + $0x1a0] sm:$0xff] }
  0xbb   :  { %5620 = vmatprep.subr.mxu0 %v277_v6 }
  0xbc   :  { %5621 = vmatpush3.msra.mxu0 %v277_v6  ;;  %v521_v6 = vld [vmem:[#allocation5 + $0x198] sm:$0xff] }
  0xbd   :  { %5622 = vmatprep.subr.mxu0 %v274_v7 }
  0xbe   :  { %5623 = vmatpush3.msra.mxu0 %v274_v7  ;;  %v519_v7 = vld [vmem:[#allocation5 + $0x188] sm:$0xff] }
  0xbf   :  { %5624 = vmatprep.subr.mxu0 %v271_v8 }
  0xc0   :  { %5625 = vmatpush3.msra.mxu0 %v271_v8  ;;  %v520_v8 = vld [vmem:[#allocation5 + $0x190] sm:$0xff] }
  0xc1   :  { %5626 = vmatprep.subr.mxu0 %v268_v9 }
  0xc2   :  { %5627 = vmatpush3.msra.mxu0 %v268_v9  ;;  %v518_v9 = vld [vmem:[#allocation5 + $0x180] sm:$0xff] }
  0xc3   :  { %5628 = vmatprep.subr.mxu0 %v265_v10 }
  0xc4   :  { %5629 = vmatpush3.msra.mxu0 %v265_v10  ;;  %v7000_v10 = vld [vmem:[#allocation5 + $0x470] sm:$0xff] }
  0xc5   :  { %5630 = vmatprep.subr.mxu0 %v262_v11  ;;  %9242 = vst [vmem:[#allocation12_spill] sm:$0xff] %v7000_v10 }
  0xc6   :  { %5631 = vmatpush3.msra.mxu0 %v262_v11  ;;  %v7003_v11 = vld [vmem:[#allocation5 + $0x468] sm:$0xff] }
  0xc7   :  { %5632 = vmatprep.subr.mxu0 %v259_v12 }
  0xc8   :  { %5633 = vmatpush3.msra.mxu0 %v259_v12  ;;  %v7006_v12 = vld [vmem:[#allocation5 + $0x458] sm:$0xff] }
  0xc9   :  { %5634 = vmatprep.subr.mxu0 %v256_v13 }
  0xca   :  { %5635 = vmatpush3.msra.mxu0 %v256_v13  ;;  %v7010_v13 = vld [vmem:[#allocation5 + $0x450] sm:$0xff] }
  0xcb   :  { %5636 = vmatprep.subr.mxu0 %v253_v16 }
  0xcc   :  { %5637 = vmatpush3.msra.mxu0 %v253_v16  ;;  %v7021_v16 = vld [vmem:[#allocation5 + $0x428] sm:$0xff] }
  0xcd   :  { %5650 = vmatprep.subr.mxu0 %v565_v18 }
 0x16d   :  { %v6960_v19 = vpop.f32.mrf.mxu0 }
 0x16f   :  { %v6962_v21 = vpop.f32.mrf.mxu0 }
 0x170   :  { %364 = vmatmul.mubr.f32.vlgmr.msra.gmra.mxu1 %v6962_v21  ;;  %5638 = vmatprep.mubr.f32.mxu0 %v6962_v21 }
 0x171   :  { %567 = vmatpush1.msra.mxu1 %v563_v20  ;;  %v6966_v25 = vpop.f32.mrf.mxu0  ;;  %5639 = vmatmul.mubr.f32.vlgmr.msra.gmra.mxu0 %v6960_v19  ;;  %v7034_v20 = vld [vmem:[#allocation5 + $0x408] sm:$0xff] }
 0x172   :  { %568 = vmatprep.subr.mxu1 %v561_v22  ;;  %5651 = vmatpush3.msra.mxu0 %v565_v18  ;;  %v7030_v18 = vld [vmem:[#allocation5 + $0x410] sm:$0xff]  ;;  %v7046_v22 = vld [vmem:[#allocation5 + $0x3e0] sm:$0xff] }
 0x173   :  { %569 = vmatpush1.msra.mxu1 %v560_v23  ;;  %5652 = vmatprep.subr.mxu0 %v562_v24  ;;  %v6969_v27 = vpop.f32.mrf.mxu0  ;;  %v7050_v23 = vld [vmem:[#allocation5 + $0x3d8] sm:$0xff] }
 0x174   :  { %369 = vmatprep.mubr.f32.mxu1 %v9077_v1  ;;  %570 = vmatprep.subr.mxu1 %v558_v26  ;;  %v7058_v26 = vld [vmem:[#allocation5 + $0x3c0] sm:$0xff] }
 0x175   :  { %5653 = vmatpush3.msra.mxu0 %v562_v24  ;;  %370 = vmatmul.mubr.f32.gmra.mxu1 %v6960_v19  ;;  %v6973_v30 = vpop.f32.mrf.mxu0  ;;  %v7054_v24 = vld [vmem:[#allocation5 + $0x3c8] sm:$0xff] }
 0x176   :  { %5641 = vmatprep.mubr.f32.mxu0 %v6969_v27  ;;  %571 = vmatpush1.msra.mxu1 %v557_v28  ;;  %v7064_v28 = vld [vmem:[#allocation5 + $0x3b0] sm:$0xff] }
 0x177   :  { %5654 = vmatprep.subr.mxu0 %v559_v29  ;;  %5642 = vmatmul.mubr.f32.gmra.mxu0 %v6966_v25  ;;  %v6977_v34 = vpop.f32.mrf.mxu0 }
 0x178   :  { %572 = vmatprep.subr.mxu1 %v555_v31  ;;  %5655 = vmatpush3.msra.mxu0 %v559_v29  ;;  %v7068_v29 = vld [vmem:[#allocation5 + $0x3a8] sm:$0xff]  ;;  %v7071_v31 = vld [vmem:[#allocation5 + $0x398] sm:$0xff] }
 0x179   :  { %573 = vmatpush1.msra.mxu1 %v554_v32  ;;  %5656 = vmatprep.subr.mxu0 %v556_v33  ;;  %v6981_v38 = vpop.f32.mrf.mxu0  ;;  %9243 = vst [vmem:[#allocation13_spill] sm:$0xff] %v7071_v31  ;;  %v7078_v32 = vld [vmem:[#allocation5 + $0x460] sm:$0xff] }
 0x17a   :  { %375 = vmatprep.mubr.f32.mxu1 %v9077_v1  ;;  %574 = vmatprep.subr.mxu1 %v552_v35  ;;  %v7085_v35 = vld [vmem:[#allocation5 + $0x378] sm:$0xff] }
 0x17b   :  { %5657 = vmatpush3.msra.mxu0 %v556_v33  ;;  %376 = vmatmul.mubr.f32.gmra.mxu1 %v6969_v27  ;;  %v6985_v43 = vpop.f32.mrf.mxu0  ;;  %v7082_v33 = vld [vmem:[#allocation5 + $0x380] sm:$0xff]  ;;  %9246 = vst [vmem:[#allocation16_spill] sm:$0xff] %v7085_v35 }
 0x17c   :  { %5644 = vmatprep.mubr.f32.mxu0 %v6977_v34  ;;  %575 = vmatpush1.msra.mxu1 %v551_v36  ;;  %9245 = vst [vmem:[#allocation15_spill] sm:$0xff] %v7082_v33  ;;  %v7089_v36 = vld [vmem:[#allocation5 + $0x368] sm:$0xff] }
 0x17d   :  { %5658 = vmatprep.subr.mxu0 %v553_v37  ;;  %5645 = vmatmul.mubr.f32.gmra.mxu0 %v6973_v30  ;;  %9247 = vst [vmem:[#allocation17_spill] sm:$0xff] %v7089_v36 }
 0x17e   :  { %576 = vmatprep.subr.mxu1 %v549_v39  ;;  %5659 = vmatpush3.msra.mxu0 %v553_v37  ;;  %v7096_v37 = vld [vmem:[#allocation5 + $0x448] sm:$0xff]  ;;  %v7100_v39 = vld [vmem:[#allocation5 + $0x350] sm:$0xff] }
 0x17f   :  { %577 = vmatpush1.msra.mxu1 %v548_v40  ;;  %5660 = vmatprep.subr.mxu0 %v550_v41  ;;  %9249 = vst [vmem:[#allocation19_spill] sm:$0xff] %v7100_v39  ;;  %v7103_v40 = vld [vmem:[#allocation5 + $0x348] sm:$0xff] }
 0x180   :  { %381 = vmatprep.mubr.f32.mxu1 %v9077_v1  ;;  %578 = vmatprep.subr.mxu1 %v546_v42  ;;  %9250 = vst [vmem:[#allocation20_spill] sm:$0xff] %v7103_v40  ;;  %v7114_v42 = vld [vmem:[#allocation5 + $0x430] sm:$0xff] }
 0x181   :  { %5661 = vmatpush3.msra.mxu0 %v550_v41  ;;  %382 = vmatmul.mubr.f32.gmra.mxu1 %v6966_v25  ;;  %v7107_v41 = vld [vmem:[#allocation5 + $0x338] sm:$0xff] }
 0x182   :  { %5647 = vmatprep.mubr.f32.mxu0 %v6985_v43  ;;  %579 = vmatpush1.msra.mxu1 %v545_v44  ;;  %9251 = vst [vmem:[#allocation21_spill] sm:$0xff] %v7107_v41  ;;  %v7118_v44 = vld [vmem:[#allocation5 + $0x320] sm:$0xff] }
 0x183   :  { %5662 = vmatprep.subr.mxu0 %v547_v45  ;;  %5648 = vmatmul.mubr.f32.gmra.mxu0 %v6981_v38  ;;  %9253 = vst [vmem:[#allocation23_spill] sm:$0xff] %v7118_v44 }
 0x184   :  { %580 = vmatprep.subr.mxu1 %v543_v46  ;;  %5663 = vmatpush3.msra.mxu0 %v547_v45  ;;  %v7121_v45 = vld [vmem:[#allocation5 + $0x318] sm:$0xff]  ;;  %v7125_v46 = vld [vmem:[#allocation5 + $0x308] sm:$0xff] }
 0x185   :  { %581 = vmatpush1.msra.mxu1 %v542_v47  ;;  %5664 = vmatprep.subr.mxu0 %v544_v48  ;;  %9254 = vst [vmem:[#allocation24_spill] sm:$0xff] %v7121_v45  ;;  %9255 = vst [vmem:[#allocation25_spill] sm:$0xff] %v7125_v46  ;;  %v7132_v47 = vld [vmem:[#allocation5 + $0x418] sm:$0xff] }
 0x186   :  { %5682 = vmatprep.mubr.f32.mxu0 %v6962_v21  ;;  %387 = vmatprep.mubr.f32.mxu1 %v9077_v1 }
 0x187   :  { %582 = vmatprep.subr.mxu1 %v540_v49  ;;  %5665 = vmatpush3.msra.mxu0 %v544_v48  ;;  %v7138_v48 = vld [vmem:[#allocation5 + $0x400] sm:$0xff]  ;;  %v7150_v49 = vld [vmem:[#allocation5 + $0x3d0] sm:$0xff] }
 0x188   :  { %388 = vmatmul.mubr.f32.gmra.mxu1 %v6977_v34  ;;  %5666 = vmatprep.subr.mxu0 %v541_v50 }
 0x189   :  { %583 = vmatpush1.msra.mxu1 %v539_v51  ;;  %5667 = vmatpush3.msra.mxu0 %v541_v50  ;;  %v7156_v50 = vld [vmem:[#allocation5 + $0x3b8] sm:$0xff]  ;;  %v7162_v51 = vld [vmem:[#allocation5 + $0x3a0] sm:$0xff] }
 0x18a   :  { %584 = vmatprep.subr.mxu1 %v537_v52  ;;  %5668 = vmatprep.subr.mxu0 %v538_v53  ;;  %9257 = vst [vmem:[#allocation27_spill] sm:$0xff] %v7156_v50  ;;  %9258 = vst [vmem:[#allocation28_spill] sm:$0xff] %v7162_v51  ;;  %v7168_v52 = vld [vmem:[#allocation5 + $0x388] sm:$0xff] }
 0x18b   :  { %585 = vmatpush1.msra.mxu1 %v536_v54  ;;  %393 = vmatprep.mubr.f32.mxu1 %v9077_v1  ;;  %9259 = vst [vmem:[#allocation29_spill] sm:$0xff] %v7168_v52  ;;  %v7180_v54 = vld [vmem:[#allocation5 + $0x358] sm:$0xff] }
 0x18c   :  { %586 = vmatprep.subr.mxu1 %v534_v55  ;;  %5669 = vmatpush3.msra.mxu0 %v538_v53  ;;  %v7174_v53 = vld [vmem:[#allocation5 + $0x370] sm:$0xff]  ;;  %9261 = vst [vmem:[#allocation31_spill] sm:$0xff] %v7180_v54  ;;  %v7186_v55 = vld [vmem:[#allocation5 + $0x340] sm:$0xff] }
 0x18d   :  { %394 = vmatmul.mubr.f32.gmra.mxu1 %v6973_v30  ;;  %5670 = vmatprep.subr.mxu0 %v535_v56  ;;  %9260 = vst [vmem:[#allocation30_spill] sm:$0xff] %v7174_v53  ;;  %9262 = vst [vmem:[#allocation32_spill] sm:$0xff] %v7186_v55 }
 0x18e   :  { %587 = vmatpush1.msra.mxu1 %v533_v57  ;;  %5671 = vmatpush3.msra.mxu0 %v535_v56  ;;  %v7192_v56 = vld [vmem:[#allocation5 + $0x328] sm:$0xff]  ;;  %v7198_v57 = vld [vmem:[#allocation5 + $0x310] sm:$0xff] }
 0x18f   :  { %588 = vmatprep.subr.mxu1 %v531_v58  ;;  %5672 = vmatprep.subr.mxu0 %v532_v59  ;;  %9263 = vst [vmem:[#allocation33_spill] sm:$0xff] %v7192_v56  ;;  %9264 = vst [vmem:[#allocation34_spill] sm:$0xff] %v7198_v57 }
 0x190   :  { %589 = vmatpush1.msra.mxu1 %v530_v60  ;;  %399 = vmatprep.mubr.f32.mxu1 %v9077_v1 }
 0x191   :  { %590 = vmatprep.subr.mxu1 %v528_v61  ;;  %5673 = vmatpush3.msra.mxu0 %v532_v59 }
 0x192   :  { %400 = vmatmul.mubr.f32.gmra.mxu1 %v6985_v43  ;;  %5674 = vmatprep.subr.mxu0 %v529_v62 }
 0x193   :  { %591 = vmatpush1.msra.mxu1 %v527_v63  ;;  %5675 = vmatpush3.msra.mxu0 %v529_v62 }
 0x194   :  { %592 = vmatprep.subr.mxu1 %v525_v0  ;;  %5676 = vmatprep.subr.mxu0 %v526_v2 }
 0x195   :  { %593 = vmatpush1.msra.mxu1 %v524_v3  ;;  %405 = vmatprep.mubr.f32.mxu1 %v9077_v1 }
 0x196   :  { %594 = vmatprep.subr.mxu1 %v522_v4  ;;  %5677 = vmatpush3.msra.mxu0 %v526_v2 }
 0x197   :  { %406 = vmatmul.mubr.f32.gmra.mxu1 %v6981_v38  ;;  %5678 = vmatprep.subr.mxu0 %v523_v5 }
 0x198   :  { %595 = vmatpush1.msra.mxu1 %v521_v6  ;;  %5679 = vmatpush3.msra.mxu0 %v523_v5 }
 0x199   :  { %596 = vmatprep.subr.mxu1 %v519_v7  ;;  %5680 = vmatprep.subr.mxu0 %v520_v8 }
 0x19a   :  { %597 = vmatpush1.msra.mxu1 %v518_v9  ;;  %630 = vmatprep.mubr.f32.mxu1 %v9077_v1 }
 0x19b   :  { %5681 = vmatpush3.msra.mxu0 %v520_v8  ;;  %846 = vmatprep.subr.mxu1 %v7000_v10 }
 0x19c   :  { %631 = vmatmul.mubr.f32.vlgmr.msra.gmra.mxu1 %v6962_v21  ;;  %5683 = vmatmul.mubr.f32.vlgmr.msra.gmra.mxu0 %v6960_v19  ;;  %v7038_v21 = vld [vmem:[#allocation5 + $0x3f8] sm:$0xff] }
 0x19d   :  { %847 = vmatpush1.msra.mxu1 %v7003_v11  ;;  %5685 = vmatprep.mubr.f32.mxu0 %v6969_v27 }
 0x19e   :  { %848 = vmatprep.subr.mxu1 %v7006_v12  ;;  %636 = vmatprep.mubr.f32.mxu1 %v9077_v1 }
 0x19f   :  { %849 = vmatpush1.msra.mxu1 %v7010_v13  ;;  %5694 = vmatprep.subr.mxu0 %v9077_v1 }
 0x1a0   :  { %850 = vmatprep.subr.mxu1 %v7014_v14  ;;  %637 = vmatmul.mubr.f32.gmra.mxu1 %v6960_v19  ;;  %v7042_v19 = vld [vmem:[#allocation5 + $0x3f0] sm:$0xff] }
 0x1a1   :  { %5686 = vmatmul.mubr.f32.gmra.mxu0 %v6966_v25  ;;  %851 = vmatpush1.msra.mxu1 %v7018_v15 }
 0x1a2   :  { %5688 = vmatprep.mubr.f32.mxu0 %v6977_v34  ;;  %852 = vmatprep.subr.mxu1 %v7021_v16 }
 0x1a3   :  { %853 = vmatpush1.msra.mxu1 %v7026_v17  ;;  %642 = vmatprep.mubr.f32.mxu1 %v9077_v1 }
 0x1a4   :  { %854 = vmatprep.subr.mxu1 %v7030_v18  ;;  %643 = vmatmul.mubr.f32.gmra.mxu1 %v6969_v27  ;;  %v7060_v27 = vld [vmem:[#allocation5 + $0x478] sm:$0xff] }
 0x1a5   :  { %5689 = vmatmul.mubr.f32.gmra.mxu0 %v6973_v30  ;;  %855 = vmatpush1.msra.mxu1 %v7034_v20 }
 0x1a6   :  { %5691 = vmatprep.mubr.f32.mxu0 %v6985_v43  ;;  %856 = vmatprep.subr.mxu1 %v7038_v21 }
 0x1a7   :  { %857 = vmatpush1.msra.mxu1 %v7042_v19  ;;  %648 = vmatprep.mubr.f32.mxu1 %v9077_v1 }
 0x1a8   :  { %858 = vmatprep.subr.mxu1 %v7046_v22  ;;  %649 = vmatmul.mubr.f32.gmra.mxu1 %v6966_v25  ;;  %v7076_v25 = vld [vmem:[#allocation5 + $0x390] sm:$0xff] }
 0x1a9   :  { %5692 = vmatmul.mubr.f32.gmra.mxu0 %v6981_v38  ;;  %859 = vmatpush1.msra.mxu1 %v7050_v23  ;;  %9244 = vst [vmem:[#allocation14_spill] sm:$0xff] %v7076_v25 }
 0x1aa   :  { %860 = vmatprep.subr.mxu1 %v7054_v24  ;;  %654 = vmatprep.mubr.f32.mxu1 %v9077_v1 }
 0x1ab   :  { %861 = vmatpush1.msra.mxu1 %v7058_v26  ;;  %5695 = vmatpush3.msra.mxu0 %v7060_v27 }
 0x1ac   :  { %862 = vmatprep.subr.mxu1 %v7064_v28  ;;  %655 = vmatmul.mubr.f32.gmra.mxu1 %v6977_v34  ;;  %v7094_v34 = vld [vmem:[#allocation5 + $0x360] sm:$0xff] }
 0x1ad   :  { %863 = vmatpush1.msra.mxu1 %v7068_v29  ;;  %660 = vmatprep.mubr.f32.mxu1 %v9077_v1  ;;  %9248 = vst [vmem:[#allocation18_spill] sm:$0xff] %v7094_v34 }
 0x1ae   :  { %864 = vmatprep.subr.mxu1 %v7071_v31  ;;  %5696 = vmatprep.subr.mxu0 %v9077_v1 }
 0x1af   :  { %865 = vmatpush1.msra.mxu1 %v7076_v25  ;;  %5697 = vmatpush3.msra.mxu0 %v7078_v32 }
 0x1b0   :  { %866 = vmatprep.subr.mxu1 %v7082_v33  ;;  %661 = vmatmul.mubr.f32.gmra.mxu1 %v6973_v30  ;;  %v7112_v30 = vld [vmem:[#allocation5 + $0x330] sm:$0xff] }
 0x1b1   :  { %867 = vmatpush1.msra.mxu1 %v7085_v35  ;;  %666 = vmatprep.mubr.f32.mxu1 %v9077_v1  ;;  %9252 = vst [vmem:[#allocation22_spill] sm:$0xff] %v7112_v30 }
 0x1b2   :  { %868 = vmatprep.subr.mxu1 %v7089_v36  ;;  %5698 = vmatprep.subr.mxu0 %v9077_v1 }
 0x1b3   :  { %869 = vmatpush1.msra.mxu1 %v7094_v34  ;;  %5699 = vmatpush3.msra.mxu0 %v7096_v37 }
 0x1b4   :  { %870 = vmatprep.subr.mxu1 %v7100_v39  ;;  %667 = vmatmul.mubr.f32.gmra.mxu1 %v6985_v43  ;;  %v7130_v43 = vld [vmem:[#allocation5 + $0x300] sm:$0xff] }
 0x1b5   :  { %871 = vmatpush1.msra.mxu1 %v7103_v40  ;;  %672 = vmatprep.mubr.f32.mxu1 %v9077_v1  ;;  %9256 = vst [vmem:[#allocation26_spill] sm:$0xff] %v7130_v43 }
 0x1b6   :  { %872 = vmatprep.subr.mxu1 %v7107_v41  ;;  %5700 = vmatprep.subr.mxu0 %v9077_v1 }
 0x1b7   :  { %873 = vmatpush1.msra.mxu1 %v7112_v30  ;;  %5701 = vmatpush3.msra.mxu0 %v7114_v42 }
 0x1b8   :  { %874 = vmatprep.subr.mxu1 %v7118_v44  ;;  %673 = vmatmul.mubr.f32.gmra.mxu1 %v6981_v38  ;;  %v7144_v38 = vld [vmem:[#allocation5 + $0x3e8] sm:$0xff] }
 0x1b9   :  { %875 = vmatpush1.msra.mxu1 %v7121_v45  ;;  %910 = vmatprep.mubr.f32.mxu1 %v9077_v1 }
 0x1ba   :  { %876 = vmatprep.subr.mxu1 %v7125_v46  ;;  %5702 = vmatprep.subr.mxu0 %v9077_v1 }
 0x1bb   :  { %877 = vmatpush1.msra.mxu1 %v7130_v43  ;;  %5703 = vmatpush3.msra.mxu0 %v7132_v47 }
 0x1bc   :  { %911 = vmatmul.mubr.f32.vlgmr.msra.gmra.mxu1 %v9077_v1  ;;  %5704 = vmatprep.subr.mxu0 %v9077_v1 }
 0x1bd   :  { %5705 = vmatpush3.msra.mxu0 %v7138_v48  ;;  %5726 = vmatprep.mubr.msk.f32.mxu0 %vm6879_vm9, %v9077_v1 }
 0x1be   :  { %5706 = vmatprep.subr.mxu0 %v9077_v1  ;;  %1014 = vmatprep.subr.mxu1 %v7000_v10 }
 0x1bf   :  { %5707 = vmatpush3.msra.mxu0 %v7144_v38  ;;  %1015 = vmatpush1.msra.mxu1 %v7003_v11 }
 0x1c0   :  { %5708 = vmatprep.subr.mxu0 %v9077_v1  ;;  %1016 = vmatprep.subr.mxu1 %v7006_v12 }
 0x1c1   :  { %5709 = vmatpush3.msra.mxu0 %v7150_v49  ;;  %1017 = vmatpush1.msra.mxu1 %v7010_v13 }
 0x1c2   :  { %5710 = vmatprep.subr.mxu0 %v9077_v1  ;;  %1018 = vmatprep.subr.mxu1 %v7014_v14 }
 0x1c3   :  { %5711 = vmatpush3.msra.mxu0 %v7156_v50  ;;  %1019 = vmatpush1.msra.mxu1 %v7018_v15 }
 0x1c4   :  { %5712 = vmatprep.subr.mxu0 %v9077_v1  ;;  %1020 = vmatprep.subr.mxu1 %v7021_v16 }
 0x1c5   :  { %5713 = vmatpush3.msra.mxu0 %v7162_v51  ;;  %1021 = vmatpush1.msra.mxu1 %v7026_v17 }
 0x1c6   :  { %5714 = vmatprep.subr.mxu0 %v9077_v1  ;;  %1022 = vmatprep.subr.mxu1 %v7030_v18 }
 0x1c7   :  { %5715 = vmatpush3.msra.mxu0 %v7168_v52  ;;  %1023 = vmatpush1.msra.mxu1 %v7034_v20 }
 0x1c8   :  { %5716 = vmatprep.subr.mxu0 %v9077_v1  ;;  %1024 = vmatprep.subr.mxu1 %v7038_v21 }
 0x1c9   :  { %5717 = vmatpush3.msra.mxu0 %v7174_v53  ;;  %1025 = vmatpush1.msra.mxu1 %v7042_v19 }
 0x1ca   :  { %5718 = vmatprep.subr.mxu0 %v9077_v1  ;;  %1026 = vmatprep.subr.mxu1 %v7046_v22 }
 0x1cb   :  { %5719 = vmatpush3.msra.mxu0 %v7180_v54  ;;  %1027 = vmatpush1.msra.mxu1 %v7050_v23 }
 0x1cc   :  { %5720 = vmatprep.subr.mxu0 %v9077_v1  ;;  %1028 = vmatprep.subr.mxu1 %v7054_v24 }
 0x1cd   :  { %5721 = vmatpush3.msra.mxu0 %v7186_v55  ;;  %1029 = vmatpush1.msra.mxu1 %v7058_v26 }
 0x1ce   :  { %5722 = vmatprep.subr.mxu0 %v9077_v1  ;;  %1030 = vmatprep.subr.mxu1 %v7064_v28 }
 0x1cf   :  { %5723 = vmatpush3.msra.mxu0 %v7192_v56  ;;  %1031 = vmatpush1.msra.mxu1 %v7068_v29 }
 0x1d0   :  { %5724 = vmatprep.subr.mxu0 %v9077_v1  ;;  %1032 = vmatprep.subr.mxu1 %v7071_v31 }
 0x1d1   :  { %5725 = vmatpush3.msra.mxu0 %v7198_v57  ;;  %1033 = vmatpush1.msra.mxu1 %v7076_v25 }
 0x1d2   :  { %5727 = vmatmul.mubr.f32.vlgmr.msra.gmra.mxu0 %v9077_v1  ;;  %5729 = vmatprep.subr.mxu0 %v9077_v1 }
 0x1d3   :  { %5730 = vmatpush3.msra.mxu0 %v7060_v27  ;;  %1034 = vmatprep.subr.mxu1 %v7082_v33 }
 0x1d4   :  { %5731 = vmatprep.subr.mxu0 %v9077_v1  ;;  %1035 = vmatpush1.msra.mxu1 %v7085_v35 }
 0x1d5   :  { %5732 = vmatpush3.msra.mxu0 %v7078_v32  ;;  %1036 = vmatprep.subr.mxu1 %v7089_v36 }
 0x1d6   :  { %5733 = vmatprep.subr.mxu0 %v9077_v1  ;;  %1037 = vmatpush1.msra.mxu1 %v7094_v34 }
 0x1d7   :  { %5734 = vmatpush3.msra.mxu0 %v7096_v37  ;;  %1038 = vmatprep.subr.mxu1 %v7100_v39 }
 0x1d8   :  { %5735 = vmatprep.subr.mxu0 %v9077_v1  ;;  %1039 = vmatpush1.msra.mxu1 %v7103_v40  ;;  %v7279_v40 = vld [vmem:[#allocation7 + $0x10] sm:$0xff] }
 0x1d9   :  { %5736 = vmatpush3.msra.mxu0 %v7114_v42  ;;  %1040 = vmatprep.subr.mxu1 %v7107_v41  ;;  %v7277_v41 = vld [vmem:[#allocation7] sm:$0xff] }
 0x1da   :  { %5737 = vmatprep.subr.mxu0 %v9077_v1  ;;  %1041 = vmatpush1.msra.mxu1 %v7112_v30 }
 0x1db   :  { %5738 = vmatpush3.msra.mxu0 %v7132_v47  ;;  %1042 = vmatprep.subr.mxu1 %v7118_v44 }
 0x1dc   :  { %5739 = vmatprep.subr.mxu0 %v9077_v1  ;;  %1043 = vmatpush1.msra.mxu1 %v7121_v45 }
 0x1dd   :  { %5740 = vmatpush3.msra.mxu0 %v7138_v48  ;;  %1044 = vmatprep.subr.mxu1 %v7125_v46 }
 0x1de   :  { %5741 = vmatprep.subr.mxu0 %v9077_v1  ;;  %1045 = vmatpush1.msra.mxu1 %v7130_v43 }
 0x1df   :  { %5742 = vmatpush3.msra.mxu0 %v7144_v38  ;;  %1078 = vmatprep.mubr.f32.mxu1 %v9077_v1 }
 0x1e0   :  { %5743 = vmatprep.subr.mxu0 %v9077_v1  ;;  %5761 = vmatprep.mubr.msk.f32.mxu0 %vm6879_vm9, %v9077_v1 }
 0x1e1   :  { %5744 = vmatpush3.msra.mxu0 %v7150_v49  ;;  %1182 = vmatprep.subr.mxu1 %v7000_v10 }
 0x1e2   :  { %5745 = vmatprep.subr.mxu0 %v9077_v1 }
 0x1e3   :  { %5746 = vmatpush3.msra.mxu0 %v7156_v50 }
 0x1e4   :  { %5747 = vmatprep.subr.mxu0 %v9077_v1 }
 0x1e5   :  { %5748 = vmatpush3.msra.mxu0 %v7162_v51 }
 0x1e6   :  { %5749 = vmatprep.subr.mxu0 %v9077_v1 }
 0x1e7   :  { %5750 = vmatpush3.msra.mxu0 %v7168_v52 }
 0x1e8   :  { %5751 = vmatprep.subr.mxu0 %v9077_v1 }
 0x1e9   :  { %5752 = vmatpush3.msra.mxu0 %v7174_v53 }
 0x1ea   :  { %5753 = vmatprep.subr.mxu0 %v9077_v1 }
 0x1eb   :  { %5754 = vmatpush3.msra.mxu0 %v7180_v54 }
 0x1ec   :  { %5755 = vmatprep.subr.mxu0 %v9077_v1 }
 0x1ed   :  { %5756 = vmatpush3.msra.mxu0 %v7186_v55 }
 0x1ee   :  { %5757 = vmatprep.subr.mxu0 %v9077_v1 }
 0x1ef   :  { %5758 = vmatpush3.msra.mxu0 %v7192_v56 }
 0x1f0   :  { %5759 = vmatprep.subr.mxu0 %v9077_v1 }
 0x1f1   :  { %5760 = vmatpush3.msra.mxu0 %v7198_v57 }
 0x1f2   :  { %5764 = vmatprep.subr.mxu0 %v9077_v1 }
 0x230   :  { %v7257_v58 = vpop.f32.mrf.mxu1 }
 0x231   :  { %v5640_v0 = vpop.f32.mrf.mxu0 }
 0x232   :  { %v7259_v59 = vpop.f32.mrf.mxu1 }
 0x233   :  { %v7269_v3 = vpop.f32.mrf.mxu0 }
 0x235   :  { %v7261_v60 = vpop.f32.mrf.mxu1 }
 0x237   :  { %v7263_v61 = vpop.f32.mrf.mxu1  ;;  %v5643_v5 = vpop.f32.mrf.mxu0 }
 0x239   :  { %v488_v7 = vpop.f32.mrf.mxu0 }
 0x23b   :  { %v7265_v62 = vpop.f32.mrf.mxu1 }
 0x23d   :  { %v7267_v63 = vpop.f32.mrf.mxu1  ;;  %v5646_v1 = vpop.f32.mrf.mxu0 }
 0x23f   :  { %v498_v57 = vpop.f32.mrf.mxu0 }
 0x241   :  { %v383_v2 = vpop.f32.mrf.mxu1 }
 0x243   :  { %v7271_v4 = vpop.f32.mrf.mxu1  ;;  %v5649_v56 = vpop.f32.mrf.mxu0 }
 0x245   :  { %v508_v55 = vpop.f32.mrf.mxu0 }
 0x248   :  { %v389_v6 = vpop.f32.mrf.mxu1 }
 0x24a   :  { %v391_v8 = vpop.f32.mrf.mxu1 }
 0x24d   :  { %v395_v9 = vpop.f32.mrf.mxu1 }
 0x24f   :  { %v397_v10 = vpop.f32.mrf.mxu1 }
 0x252   :  { %v401_v43 = vpop.f32.mrf.mxu1 }
 0x254   :  { %v7273_v46 = vpop.f32.mrf.mxu1 }
 0x255   :  { %9265 = vst [vmem:[#allocation35_spill] sm:$0xff] %v7273_v46 }
 0x257   :  { %v407_v45 = vpop.f32.mrf.mxu1 }
 0x259   :  { %v7275_v44 = vpop.f32.mrf.mxu1 }
 0x25a   :  { %9266 = vst [vmem:[#allocation36_spill] sm:$0xff] %v7275_v44 }
 0x25c   :  { %v632_v30 = vpop.f32.mrf.mxu1  ;;  %v5684_v54 = vpop.f32.mrf.mxu0 }
 0x25d   :  { %v2016_v39 = vadd.f32 %v632_v30, %v407_v45  ;;  %v1850_v53 = vadd.f32 %v5684_v54, %v508_v55 }
 0x25e   :  { %v7281_v34 = vpop.f32.mrf.mxu1  ;;  %v745_v36 = vpop.f32.mrf.mxu0 }
 0x25f   :  { %9267 = vst [vmem:[#allocation37_spill] sm:$0xff] %v7281_v34  ;;  %v7284_v52 = vadd.f32 %v2016_v39, %v7277_v41  ;;  %v7287_v46 = vadd.f32 %v1850_v53, %v7279_v40  ;;  %v2018_v35 = vadd.f32 %v5649_v56, %v745_v36 }
 0x260   :  { %v638_v44 = vpop.f32.mrf.mxu1 }
 0x261   :  { %9268 = vst [vmem:[#allocation38_spill] sm:$0xff] %v7284_v52  ;;  %9269 = vst [vmem:[#allocation39_spill] sm:$0xff] %v7287_v46  ;;  %v7290_v33 = vadd.f32 %v2018_v35, %v7279_v40  ;;  %v1848_v51 = vadd.f32 %v638_v44, %v401_v43  ;;  %v5687_v25 = vpop.f32.mrf.mxu0 }
 0x262   :  { %v1514_v31 = vadd.f32 %v5687_v25, %v498_v57  ;;  %v7292_v50 = vpop.f32.mrf.mxu1 }
 0x263   :  { %9270 = vst [vmem:[#allocation40_spill] sm:$0xff] %v7290_v33  ;;  %9271 = vst [vmem:[#allocation41_spill] sm:$0xff] %v7292_v50  ;;  %v7295_v30 = vadd.f32 %v1848_v51, %v7277_v41  ;;  %v755_v45 = vpop.f32.mrf.mxu0  ;;  %v785_v51 = vld [vmem:[#allocation7 + $0x8] sm:$0xff] }
 0x264   :  { %v7298_v39 = vadd.f32 %v1514_v31, %v7279_v40  ;;  %v1682_v54 = vadd.f32 %v5646_v1, %v755_v45  ;;  %v644_v53 = vpop.f32.mrf.mxu1 }
 0x265   :  { %9272 = vst [vmem:[#allocation42_spill] sm:$0xff] %v7295_v30  ;;  %v1680_v55 = vadd.f32 %v644_v53, %v395_v9  ;;  %v5690_v36 = vpop.f32.mrf.mxu0 }
 0x266   :  { %9273 = vst [vmem:[#allocation43_spill] sm:$0xff] %v7298_v39  ;;  %v7301_v56 = vadd.f32 %v1682_v54, %v7279_v40  ;;  %v1178_v35 = vadd.f32 %v5690_v36, %v488_v7  ;;  %v646_v44 = vpop.f32.mrf.mxu1  ;;  %v9310_v39 = vld [vmem:[#allocation12_spill] sm:$0xff] }
 0x267   :  { %v7304_v25 = vadd.f32 %v1680_v55, %v7277_v41  ;;  %v1681_v43 = vadd.f32 %v646_v44, %v397_v10  ;;  %v765_v57 = vpop.f32.mrf.mxu0 }
 0x268   :  { %9274 = vst [vmem:[#allocation44_spill] sm:$0xff] %v7301_v56  ;;  %v7307_v33 = vadd.f32 %v1178_v35, %v7279_v40  ;;  %v1346_v31 = vadd.f32 %v5643_v5, %v765_v57  ;;  %v650_v52 = vpop.f32.mrf.mxu1 }
 0x269   :  { %9275 = vst [vmem:[#allocation45_spill] sm:$0xff] %v7304_v25  ;;  %v7309_v1 = vadd.f32 %v1681_v43, %v785_v51  ;;  %v1512_v9 = vadd.f32 %v650_v52, %v389_v6  ;;  %v5693_v45 = vpop.f32.mrf.mxu0  ;;  %v9309_v25 = vld [vmem:[#allocation34_spill] sm:$0xff] }
 0x26a   :  { %9276 = vst [vmem:[#allocation46_spill] sm:$0xff] %v7307_v33  ;;  %v7312_v54 = vadd.f32 %v1346_v31, %v7279_v40  ;;  %v652_v7 = vpop.f32.mrf.mxu1  ;;  %v842_v56 = vadd.f32 %v5693_v45, %v7269_v3  ;;  %v9289_v3 = vld [vmem:[#allocation13_spill] sm:$0xff]  ;;  %v9291_v45 = vld [vmem:[#allocation28_spill] sm:$0xff] }
 0x26b   :  { %9277 = vst [vmem:[#allocation47_spill] sm:$0xff] %v7309_v1  ;;  %v7315_v53 = vadd.f32 %v1512_v9, %v7277_v41  ;;  %v1513_v55 = vadd.f32 %v652_v7, %v391_v8  ;;  %v775_v10 = vpop.f32.mrf.mxu0  ;;  %v9308_v1 = vld [vmem:[#allocation26_spill] sm:$0xff] }
 0x26c   :  { %9278 = vst [vmem:[#allocation48_spill] sm:$0xff] %v7312_v54  ;;  %v1010_v36 = vadd.f32 %v5640_v0, %v775_v10  ;;  %v656_v44 = vpop.f32.mrf.mxu1 }
 0x26d   :  { %9279 = vst [vmem:[#allocation49_spill] sm:$0xff] %v7315_v53  ;;  %v7317_v34 = vadd.f32 %v1513_v55, %v785_v51  ;;  %v1344_v35 = vadd.f32 %v656_v44, %v383_v2 }
 0x26e   :  { %v7320_v5 = vadd.f32 %v1010_v36, %v7279_v40  ;;  %v658_v43 = vpop.f32.mrf.mxu1 }
 0x26f   :  { %9280 = vst [vmem:[#allocation50_spill] sm:$0xff] %v7317_v34  ;;  %v7323_v52 = vadd.f32 %v1344_v35, %v7277_v41  ;;  %v1345_v6 = vadd.f32 %v658_v43, %v7271_v4 }
 0x270   :  { %v662_v57 = vpop.f32.mrf.mxu1 }
 0x271   :  { %9281 = vst [vmem:[#allocation51_spill] sm:$0xff] %v7323_v52  ;;  %v7326_v31 = vadd.f32 %v1345_v6, %v785_v51  ;;  %v1176_v8 = vadd.f32 %v662_v57, %v7265_v62  ;;  %v7343_v57 = vld [vmem:[#allocation7 + $0x18] sm:$0xff] }
 0x272   :  { %v664_v9 = vpop.f32.mrf.mxu1  ;;  %9285 = vst [vmem:[#allocation55_spill] sm:$0xff] %v7343_v57 }
 0x273   :  { %9282 = vst [vmem:[#allocation52_spill] sm:$0xff] %v7326_v31  ;;  %v7330_v0 = vadd.f32 %v1176_v8, %v7277_v41  ;;  %v1177_v2 = vadd.f32 %v664_v9, %v7267_v63 }
 0x274   :  { %v668_v7 = vpop.f32.mrf.mxu1 }
 0x275   :  { %9283 = vst [vmem:[#allocation53_spill] sm:$0xff] %v7330_v0  ;;  %v7333_v55 = vadd.f32 %v1177_v2, %v785_v51  ;;  %v1008_v10 = vadd.f32 %v668_v7, %v7261_v60  ;;  %v7347_v60 = vld [vmem:[#allocation7 + $0x20] sm:$0xff] }
 0x276   :  { %v670_v36 = vpop.f32.mrf.mxu1 }
 0x277   :  { %9284 = vst [vmem:[#allocation54_spill] sm:$0xff] %v7333_v55  ;;  %v7337_v44 = vadd.f32 %v1008_v10, %v7277_v41  ;;  %v1009_v4 = vadd.f32 %v670_v36, %v7263_v61 }
 0x278   :  { %v674_v35 = vpop.f32.mrf.mxu1 }
 0x279   :  { %v7340_v43 = vadd.f32 %v1009_v4, %v785_v51  ;;  %v840_v62 = vadd.f32 %v674_v35, %v7257_v58 }
 0x27a   :  { %v676_v6 = vpop.f32.mrf.mxu1 }
 0x27b   :  { %v843_v8 = vadd.f32 %v840_v62, %v7277_v41  ;;  %v841_v7 = vadd.f32 %v676_v6, %v7259_v59 }
 0x27c   :  { %v912_v63 = vpop.f32.mrf.mxu1 }
 0x27d   :  { %v913_v9 = vadd.f32 %v912_v63, %v7343_v57  ;;  %v844_v4 = vadd.f32 %v841_v7, %v785_v51  ;;  %v7351_v63 = vld [vmem:[#allocation7 + $0x28] sm:$0xff]  ;;  %v845_v51 = vadd.f32 %v842_v56, %v7279_v40  ;;  %v9287_v40 = vmov 0.0   ;;  %v9290_v56 = vld [vmem:[#allocation14_spill] sm:$0xff] }
 0x27e   :  { %v914_v2 = vpop.f32.mrf.mxu1 }
 0x27f   :  { %v987_v10 = vadd.f32 %v913_v9, %v843_v8  ;;  %v915_v36 = vadd.f32 %v914_v2, %v7347_v60 }
 0x281   :  { %v5092_v61 = vmul.f32 -1.442695, %v987_v10  ;;  %v994_v58 = vadd.f32 %v915_v36, %v844_v4  ;;  %v9292_v4 = vld [vmem:[#allocation15_spill] sm:$0xff] }
 0x283   :  { %6513 = vpow2.f32 %v5092_v61  ;;  %v5093_v35 = vmul.f32 -1.442695, %v994_v58  ;;  %v9293_v58 = vld [vmem:[#allocation16_spill] sm:$0xff] }
 0x285   :  { %6515 = vpow2.f32 %v5093_v35  ;;  %v9294_v35 = vld [vmem:[#allocation29_spill] sm:$0xff] }
 0x290   :  { %v6514_v46 = vpop.eup %6513 }
 0x291   :  { %v991_v30 = vadd.f32 1.0, %v6514_v46 }
 0x292   :  { %v983_v50 = vpop.f32.mrf.mxu0  ;;  %v6516_v62 = vpop.eup %6515 }
 0x293   :  { %6517 = vrcp.f32 %v991_v30  ;;  %v998_v59 = vadd.f32 1.0, %v6516_v62  ;;  %v984_v6 = vadd.f32 %v983_v50, %v7351_v63  ;;  %v9288_v50 = vld [vmem:[#allocation27_spill] sm:$0xff]  ;;  %v9296_v62 = vld [vmem:[#allocation18_spill] sm:$0xff] }
 0x294   :  { %v5728_v41 = vpop.f32.mrf.mxu0 }
 0x295   :  { %6519 = vrcp.f32 %v998_v59  ;;  %v9295_v41 = vld [vmem:[#allocation17_spill] sm:$0xff]  ;;  %v9297_v59 = vld [vmem:[#allocation30_spill] sm:$0xff] }
 0x2a0   :  { %v6518_v8 = vpop.eup %6517 }
 0x2a1   :  { %v1001_v9 = vmul.f32 %v6518_v8, %v984_v6  ;;  %v9298_v6 = vld [vmem:[#allocation19_spill] sm:$0xff]  ;;  %v9299_v8 = vld [vmem:[#allocation20_spill] sm:$0xff] }
 0x2a2   :  { %v6520_v7 = vpop.eup %6519 }
 0x2a3   :  { %v1002_v2 = vadd.f32 %v1001_v9, %v845_v51  ;;  %v1004_v46 = vsub.f32 1.0, %v6520_v7  ;;  %v1006_v30 = vmul.f32 0.0, %v6520_v7  ;;  %v9300_v51 = vld [vmem:[#allocation31_spill] sm:$0xff]  ;;  %v9301_v9 = vld [vmem:[#allocation21_spill] sm:$0xff]  ;;  %v9303_v7 = vld [vmem:[#allocation32_spill] sm:$0xff] }
 0x2a5   :  { %6521 = vtanh.f32 %v1002_v2  ;;  %v9302_v2 = vld [vmem:[#allocation22_spill] sm:$0xff] }
 0x2b2   :  { %v6522_v10 = vpop.eup %6521 }
 0x2b3   :  { %v1005_v61 = vmul.f32 %v6522_v10, %v1004_v46  ;;  %v9304_v46 = vld [vmem:[#allocation23_spill] sm:$0xff]  ;;  %v9305_v10 = vld [vmem:[#allocation24_spill] sm:$0xff] }
 0x2b5   :  { %v7356_v36 = vadd.f32 %v1006_v30, %v1005_v61  ;;  %v9306_v30 = vld [vmem:[#allocation33_spill] sm:$0xff] }
 0x2b6   :  { %v9307_v61 = vld [vmem:[#allocation25_spill] sm:$0xff] }
 0x2b7   :  { %9286 = vst [vmem:[#allocation56_spill] sm:$0xff] %v7356_v36  ;;  %1079 = vmatmul.mubr.f32.vlgmr.msra.gmra.mxu1 %v7356_v36  ;;  %5762 = vmatmul.mubr.f32.vlgmr.msra.gmra.mxu0 %v7356_v36 }
 0x2b8   :  { %1183 = vmatpush1.msra.mxu1 %v7003_v11  ;;  %5765 = vmatpush3.msra.mxu0 %v7060_v27 }
 0x2b9   :  { %1184 = vmatprep.subr.mxu1 %v7006_v12  ;;  %5766 = vmatprep.subr.mxu0 %v9287_v40 }
 0x2ba   :  { %1185 = vmatpush1.msra.mxu1 %v7010_v13  ;;  %5767 = vmatpush3.msra.mxu0 %v7078_v32 }
 0x2bb   :  { %1186 = vmatprep.subr.mxu1 %v7014_v14  ;;  %5768 = vmatprep.subr.mxu0 %v9287_v40 }
 0x2bc   :  { %1187 = vmatpush1.msra.mxu1 %v7018_v15  ;;  %5769 = vmatpush3.msra.mxu0 %v7096_v37 }
 0x2bd   :  { %1188 = vmatprep.subr.mxu1 %v7021_v16  ;;  %5770 = vmatprep.subr.mxu0 %v9287_v40 }
 0x2be   :  { %1189 = vmatpush1.msra.mxu1 %v7026_v17  ;;  %5771 = vmatpush3.msra.mxu0 %v7114_v42 }
 0x2bf   :  { %1190 = vmatprep.subr.mxu1 %v7030_v18  ;;  %5772 = vmatprep.subr.mxu0 %v9287_v40 }
 0x2c0   :  { %1191 = vmatpush1.msra.mxu1 %v7034_v20  ;;  %5773 = vmatpush3.msra.mxu0 %v7132_v47 }
 0x2c1   :  { %1192 = vmatprep.subr.mxu1 %v7038_v21  ;;  %5774 = vmatprep.subr.mxu0 %v9287_v40 }
 0x2c2   :  { %1193 = vmatpush1.msra.mxu1 %v7042_v19  ;;  %5775 = vmatpush3.msra.mxu0 %v7138_v48 }
 0x2c3   :  { %1194 = vmatprep.subr.mxu1 %v7046_v22  ;;  %5776 = vmatprep.subr.mxu0 %v9287_v40 }
 0x2c4   :  { %1195 = vmatpush1.msra.mxu1 %v7050_v23  ;;  %5777 = vmatpush3.msra.mxu0 %v7144_v38 }
 0x2c5   :  { %1196 = vmatprep.subr.mxu1 %v7054_v24  ;;  %5778 = vmatprep.subr.mxu0 %v9287_v40 }
 0x2c6   :  { %1197 = vmatpush1.msra.mxu1 %v7058_v26  ;;  %5779 = vmatpush3.msra.mxu0 %v7150_v49 }
 0x2c7   :  { %1198 = vmatprep.subr.mxu1 %v7064_v28  ;;  %5780 = vmatprep.subr.mxu0 %v9287_v40 }
 0x2c8   :  { %1199 = vmatpush1.msra.mxu1 %v7068_v29  ;;  %5781 = vmatpush3.msra.mxu0 %v9288_v50 }
 0x2c9   :  { %1200 = vmatprep.subr.mxu1 %v9289_v3  ;;  %5782 = vmatprep.subr.mxu0 %v9287_v40 }
 0x2ca   :  { %1201 = vmatpush1.msra.mxu1 %v9290_v56  ;;  %5783 = vmatpush3.msra.mxu0 %v9291_v45 }
 0x2cb   :  { %1202 = vmatprep.subr.mxu1 %v9292_v4  ;;  %5784 = vmatprep.subr.mxu0 %v9287_v40 }
 0x2cc   :  { %1203 = vmatpush1.msra.mxu1 %v9293_v58  ;;  %5785 = vmatpush3.msra.mxu0 %v9294_v35 }
 0x2cd   :  { %1204 = vmatprep.subr.mxu1 %v9295_v41  ;;  %5786 = vmatprep.subr.mxu0 %v9287_v40 }
 0x2ce   :  { %1205 = vmatpush1.msra.mxu1 %v9296_v62  ;;  %5787 = vmatpush3.msra.mxu0 %v9297_v59 }
 0x2cf   :  { %1206 = vmatprep.subr.mxu1 %v9298_v6  ;;  %5788 = vmatprep.subr.mxu0 %v9287_v40 }
 0x2d0   :  { %1207 = vmatpush1.msra.mxu1 %v9299_v8  ;;  %5789 = vmatpush3.msra.mxu0 %v9300_v51 }
 0x2d1   :  { %1208 = vmatprep.subr.mxu1 %v9301_v9  ;;  %5790 = vmatprep.subr.mxu0 %v9287_v40 }
 0x2d2   :  { %1209 = vmatpush1.msra.mxu1 %v9302_v2  ;;  %5791 = vmatpush3.msra.mxu0 %v9303_v7 }
 0x2d3   :  { %1210 = vmatprep.subr.mxu1 %v9304_v46  ;;  %5792 = vmatprep.subr.mxu0 %v9287_v40 }
 0x2d4   :  { %1211 = vmatpush1.msra.mxu1 %v9305_v10  ;;  %5793 = vmatpush3.msra.mxu0 %v9306_v30 }
 0x2d5   :  { %1212 = vmatprep.subr.mxu1 %v9307_v61  ;;  %5794 = vmatprep.subr.mxu0 %v9287_v40 }
 0x2d6   :  { %1213 = vmatpush1.msra.mxu1 %v9308_v1  ;;  %1246 = vmatprep.mubr.f32.mxu1 %v9287_v40 }
 0x2d7   :  { %5795 = vmatpush3.msra.mxu0 %v9309_v25  ;;  %5796 = vmatprep.mubr.msk.f32.mxu0 %vm6879_vm9, %v9287_v40 }
 0x2d8   :  { %1350 = vmatprep.subr.mxu1 %v9310_v39  ;;  %5799 = vmatprep.subr.mxu0 %v9287_v40 }
 0x377   :  { %v1080_v34 = vpop.f32.mrf.mxu1  ;;  %v1151_v53 = vpop.f32.mrf.mxu0 }
 0x378   :  { %v1081_v54 = vadd.f32 %v1080_v34, %v7343_v57  ;;  %v1152_v46 = vadd.f32 %v1151_v53, %v7351_v63 }
 0x379   :  { %v1082_v31 = vpop.f32.mrf.mxu1  ;;  %v5763_v52 = vpop.f32.mrf.mxu0 }
 0x37a   :  { %v1155_v33 = vadd.f32 %v1081_v54, %v7337_v44  ;;  %v1083_v0 = vadd.f32 %v1082_v31, %v7347_v60 }
 0x37c   :  { %v5094_v55 = vmul.f32 -1.442695, %v1155_v33  ;;  %v1162_v25 = vadd.f32 %v1083_v0, %v7340_v43 }
 0x37e   :  { %6523 = vpow2.f32 %v5094_v55  ;;  %v5095_v1 = vmul.f32 -1.442695, %v1162_v25 }
 0x380   :  { %6525 = vpow2.f32 %v5095_v1 }
 0x38b   :  { %v6524_v61 = vpop.eup %6523 }
 0x38c   :  { %v1159_v39 = vadd.f32 1.0, %v6524_v61 }
 0x38d   :  { %v6526_v30 = vpop.eup %6525 }
 0x38e   :  { %6527 = vrcp.f32 %v1159_v39  ;;  %v1166_v10 = vadd.f32 1.0, %v6526_v30  ;;  %v9321_v39 = vld [vmem:[#allocation54_spill] sm:$0xff] }
 0x38f   :  { %v9322_v30 = vld [vmem:[#allocation46_spill] sm:$0xff] }
 0x390   :  { %6529 = vrcp.f32 %v1166_v10 }
 0x39b   :  { %v6528_v34 = vpop.eup %6527 }
 0x39c   :  { %v1169_v57 = vmul.f32 %v6528_v34, %v1152_v46 }
 0x39d   :  { %v6530_v33 = vpop.eup %6529 }
 0x39e   :  { %v1170_v54 = vadd.f32 %v1169_v57, %v7320_v5  ;;  %v1172_v52 = vsub.f32 1.0, %v6530_v33  ;;  %v1174_v25 = vmul.f32 %v6530_v33, %v7356_v36 }
 0x3a0   :  { %6531 = vtanh.f32 %v1170_v54 }
 0x3ad   :  { %v6532_v31 = vpop.eup %6531 }
 0x3ae   :  { %v1173_v55 = vmul.f32 %v6532_v31, %v1172_v52 }
 0x3b0   :  { %v7434_v1 = vadd.f32 %v1174_v25, %v1173_v55  ;;  %v7516_v25 = vld [vmem:[#allocation5 + $0x468] sm:$0xff] }
 0x3b2   :  { %9311 = vst [vmem:[#allocation27_spill] sm:$0xff] %v7434_v1  ;;  %1247 = vmatmul.mubr.f32.vlgmr.msra.gmra.mxu1 %v7434_v1  ;;  %5797 = vmatmul.mubr.f32.vlgmr.msra.gmra.mxu0 %v7434_v1 }
 0x3b3   :  { %1351 = vmatpush1.msra.mxu1 %v7003_v11  ;;  %5800 = vmatpush3.msra.mxu0 %v7060_v27  ;;  %v9312_v11 = vld [vmem:[#allocation23_spill] sm:$0xff] }
 0x3b4   :  { %1352 = vmatprep.subr.mxu1 %v7006_v12  ;;  %5801 = vmatprep.subr.mxu0 %v9287_v40  ;;  %v9313_v12 = vld [vmem:[#allocation24_spill] sm:$0xff] }
 0x3b5   :  { %1353 = vmatpush1.msra.mxu1 %v7010_v13  ;;  %5802 = vmatpush3.msra.mxu0 %v7078_v32  ;;  %v9314_v13 = vld [vmem:[#allocation33_spill] sm:$0xff] }
 0x3b6   :  { %1354 = vmatprep.subr.mxu1 %v7014_v14  ;;  %5803 = vmatprep.subr.mxu0 %v9287_v40  ;;  %v9315_v14 = vld [vmem:[#allocation25_spill] sm:$0xff] }
 0x3b7   :  { %1355 = vmatpush1.msra.mxu1 %v7018_v15  ;;  %5804 = vmatpush3.msra.mxu0 %v7096_v37  ;;  %v9316_v15 = vld [vmem:[#allocation26_spill] sm:$0xff] }
 0x3b8   :  { %1356 = vmatprep.subr.mxu1 %v7021_v16  ;;  %5805 = vmatprep.subr.mxu0 %v9287_v40  ;;  %v9317_v16 = vld [vmem:[#allocation34_spill] sm:$0xff] }
 0x3b9   :  { %1357 = vmatpush1.msra.mxu1 %v7026_v17  ;;  %5806 = vmatpush3.msra.mxu0 %v7114_v42  ;;  %v9318_v17 = vld [vmem:[#allocation12_spill] sm:$0xff] }
 0x3ba   :  { %1358 = vmatprep.subr.mxu1 %v7030_v18  ;;  %5807 = vmatprep.subr.mxu0 %v9287_v40 }
 0x3bb   :  { %1359 = vmatpush1.msra.mxu1 %v7034_v20  ;;  %5808 = vmatpush3.msra.mxu0 %v7132_v47 }
 0x3bc   :  { %1360 = vmatprep.subr.mxu1 %v7038_v21  ;;  %5809 = vmatprep.subr.mxu0 %v9287_v40  ;;  %v9319_v21 = vld [vmem:[#allocation55_spill] sm:$0xff] }
 0x3bd   :  { %1361 = vmatpush1.msra.mxu1 %v7042_v19  ;;  %5810 = vmatpush3.msra.mxu0 %v7138_v48 }
 0x3be   :  { %1362 = vmatprep.subr.mxu1 %v7046_v22  ;;  %5811 = vmatprep.subr.mxu0 %v9287_v40 }
 0x3bf   :  { %1363 = vmatpush1.msra.mxu1 %v7050_v23  ;;  %5812 = vmatpush3.msra.mxu0 %v7144_v38 }
 0x3c0   :  { %1364 = vmatprep.subr.mxu1 %v7054_v24  ;;  %5813 = vmatprep.subr.mxu0 %v9287_v40  ;;  %v9320_v24 = vld [vmem:[#allocation53_spill] sm:$0xff] }
 0x3c1   :  { %1365 = vmatpush1.msra.mxu1 %v7058_v26  ;;  %5814 = vmatpush3.msra.mxu0 %v7150_v49 }
 0x3c2   :  { %1366 = vmatprep.subr.mxu1 %v7064_v28  ;;  %5815 = vmatprep.subr.mxu0 %v9287_v40 }
 0x3c3   :  { %1367 = vmatpush1.msra.mxu1 %v7068_v29  ;;  %5816 = vmatpush3.msra.mxu0 %v9288_v50 }
 0x3c4   :  { %1368 = vmatprep.subr.mxu1 %v9289_v3  ;;  %5817 = vmatprep.subr.mxu0 %v9287_v40 }
 0x3c5   :  { %1369 = vmatpush1.msra.mxu1 %v9290_v56  ;;  %5818 = vmatpush3.msra.mxu0 %v9291_v45 }
 0x3c6   :  { %1370 = vmatprep.subr.mxu1 %v9292_v4  ;;  %5819 = vmatprep.subr.mxu0 %v9287_v40 }
 0x3c7   :  { %1371 = vmatpush1.msra.mxu1 %v9293_v58  ;;  %5820 = vmatpush3.msra.mxu0 %v9294_v35 }
 0x3c8   :  { %1372 = vmatprep.subr.mxu1 %v9295_v41  ;;  %5821 = vmatprep.subr.mxu0 %v9287_v40 }
 0x3c9   :  { %1373 = vmatpush1.msra.mxu1 %v9296_v62  ;;  %5822 = vmatpush3.msra.mxu0 %v9297_v59 }
 0x3ca   :  { %1374 = vmatprep.subr.mxu1 %v9298_v6  ;;  %5823 = vmatprep.subr.mxu0 %v9287_v40 }
 0x3cb   :  { %1375 = vmatpush1.msra.mxu1 %v9299_v8  ;;  %5824 = vmatpush3.msra.mxu0 %v9300_v51 }
 0x3cc   :  { %1376 = vmatprep.subr.mxu1 %v9301_v9  ;;  %5825 = vmatprep.subr.mxu0 %v9287_v40 }
 0x3cd   :  { %1377 = vmatpush1.msra.mxu1 %v9302_v2  ;;  %5826 = vmatpush3.msra.mxu0 %v9303_v7 }
 0x3ce   :  { %1378 = vmatprep.subr.mxu1 %v9312_v11  ;;  %5827 = vmatprep.subr.mxu0 %v9287_v40 }
 0x3cf   :  { %1379 = vmatpush1.msra.mxu1 %v9313_v12  ;;  %5828 = vmatpush3.msra.mxu0 %v9314_v13 }
 0x3d0   :  { %1380 = vmatprep.subr.mxu1 %v9315_v14  ;;  %5829 = vmatprep.subr.mxu0 %v9287_v40 }
 0x3d1   :  { %1381 = vmatpush1.msra.mxu1 %v9316_v15  ;;  %1414 = vmatprep.mubr.f32.mxu1 %v9287_v40 }
 0x3d2   :  { %5830 = vmatpush3.msra.mxu0 %v9317_v16  ;;  %5831 = vmatprep.mubr.msk.f32.mxu0 %vm6879_vm9, %v9287_v40 }
 0x3d3   :  { %1518 = vmatprep.subr.mxu1 %v9318_v17  ;;  %5834 = vmatprep.subr.mxu0 %v9287_v40  ;;  %v7520_v17 = vld [vmem:[#allocation5 + $0x458] sm:$0xff] }
 0x472   :  { %v1248_v18 = vpop.f32.mrf.mxu1  ;;  %v1319_v20 = vpop.f32.mrf.mxu0 }
 0x473   :  { %v1249_v19 = vadd.f32 %v1248_v18, %v9319_v21  ;;  %v1320_v3 = vadd.f32 %v1319_v20, %v7351_v63  ;;  %v7524_v18 = vld [vmem:[#allocation5 + $0x450] sm:$0xff]  ;;  %v7528_v20 = vld [vmem:[#allocation5 + $0x440] sm:$0xff] }
 0x474   :  { %v1250_v22 = vpop.f32.mrf.mxu1  ;;  %v5798_v23 = vpop.f32.mrf.mxu0 }
 0x475   :  { %v1323_v26 = vadd.f32 %v1249_v19, %v9320_v24  ;;  %v1251_v29 = vadd.f32 %v1250_v22, %v7347_v60  ;;  %v7532_v19 = vld [vmem:[#allocation5 + $0x438] sm:$0xff]  ;;  %v7540_v22 = vld [vmem:[#allocation5 + $0x420] sm:$0xff]  ;;  %v7548_v23 = vld [vmem:[#allocation5 + $0x408] sm:$0xff] }
 0x476   :  { %v7556_v24 = vld [vmem:[#allocation5 + $0x3f0] sm:$0xff] }
 0x477   :  { %v5096_v28 = vmul.f32 -1.442695, %v1323_v26  ;;  %v1330_v53 = vadd.f32 %v1251_v29, %v9321_v39  ;;  %v7564_v26 = vld [vmem:[#allocation5 + $0x3d8] sm:$0xff]  ;;  %v7580_v29 = vld [vmem:[#allocation5 + $0x3a8] sm:$0xff] }
 0x479   :  { %6533 = vpow2.f32 %v5096_v28  ;;  %v5097_v5 = vmul.f32 -1.442695, %v1330_v53  ;;  %v7572_v28 = vld [vmem:[#allocation5 + $0x3c0] sm:$0xff] }
 0x47b   :  { %6535 = vpow2.f32 %v5097_v5 }
 0x486   :  { %v6534_v0 = vpop.eup %6533 }
 0x487   :  { %v1327_v44 = vadd.f32 1.0, %v6534_v0 }
 0x488   :  { %v6536_v43 = vpop.eup %6535 }
 0x489   :  { %6537 = vrcp.f32 %v1327_v44  ;;  %v1334_v57 = vadd.f32 1.0, %v6536_v43 }
 0x48b   :  { %6539 = vrcp.f32 %v1334_v57  ;;  %v7633_v57 = vld [vmem:[#allocation5 + $0x478] sm:$0xff] }
 0x496   :  { %v6538_v46 = vpop.eup %6537 }
 0x497   :  { %v1337_v10 = vmul.f32 %v6538_v46, %v1320_v3  ;;  %v7639_v3 = vld [vmem:[#allocation5 + $0x460] sm:$0xff]  ;;  %v7645_v46 = vld [vmem:[#allocation5 + $0x448] sm:$0xff] }
 0x498   :  { %v6540_v34 = vpop.eup %6539 }
 0x499   :  { %v1338_v61 = vadd.f32 %v1337_v10, %v9322_v30  ;;  %v1340_v54 = vsub.f32 1.0, %v6540_v34  ;;  %v1342_v31 = vmul.f32 %v6540_v34, %v7434_v1  ;;  %v7651_v10 = vld [vmem:[#allocation5 + $0x430] sm:$0xff]  ;;  %v7657_v30 = vld [vmem:[#allocation5 + $0x418] sm:$0xff]  ;;  %v7669_v34 = vld [vmem:[#allocation5 + $0x3e8] sm:$0xff] }
 0x49a   :  { %v9335_v1 = vld [vmem:[#allocation50_spill] sm:$0xff] }
 0x49b   :  { %6541 = vtanh.f32 %v1338_v61  ;;  %v7663_v61 = vld [vmem:[#allocation5 + $0x400] sm:$0xff] }
 0x4a8   :  { %v6542_v33 = vpop.eup %6541 }
 0x4a9   :  { %v1341_v52 = vmul.f32 %v6542_v33, %v1340_v54  ;;  %v7675_v54 = vld [vmem:[#allocation5 + $0x3d0] sm:$0xff]  ;;  %v7681_v33 = vld [vmem:[#allocation5 + $0x3b8] sm:$0xff] }
 0x4ab   :  { %v7512_v55 = vadd.f32 %v1342_v31, %v1341_v52  ;;  %v7686_v52 = vld [vmem:[#allocation5 + $0x390] sm:$0xff]  ;;  %v7689_v31 = vld [vmem:[#allocation5 + $0x3a0] sm:$0xff] }
 0x4ad   :  { %9323 = vst [vmem:[#allocation13_spill] sm:$0xff] %v7512_v55  ;;  %1415 = vmatmul.mubr.f32.vlgmr.msra.gmra.mxu1 %v7512_v55  ;;  %5832 = vmatmul.mubr.f32.vlgmr.msra.gmra.mxu0 %v7512_v55 }
 0x4ae   :  { %1519 = vmatpush1.msra.mxu1 %v7516_v25  ;;  %5835 = vmatpush3.msra.mxu0 %v7060_v27  ;;  %v7536_v27 = vld [vmem:[#allocation5 + $0x428] sm:$0xff] }
 0x4af   :  { %1520 = vmatprep.subr.mxu1 %v7520_v17  ;;  %5836 = vmatprep.subr.mxu0 %v9287_v40 }
 0x4b0   :  { %1521 = vmatpush1.msra.mxu1 %v7524_v18  ;;  %5837 = vmatpush3.msra.mxu0 %v7078_v32  ;;  %v7544_v32 = vld [vmem:[#allocation5 + $0x410] sm:$0xff] }
 0x4b1   :  { %1522 = vmatprep.subr.mxu1 %v7528_v20  ;;  %5838 = vmatprep.subr.mxu0 %v9287_v40 }
 0x4b2   :  { %1523 = vmatpush1.msra.mxu1 %v7532_v19  ;;  %5839 = vmatpush3.msra.mxu0 %v7096_v37  ;;  %v7552_v37 = vld [vmem:[#allocation5 + $0x3f8] sm:$0xff] }
 0x4b3   :  { %1524 = vmatprep.subr.mxu1 %v7536_v27  ;;  %5840 = vmatprep.subr.mxu0 %v9287_v40 }
 0x4b4   :  { %1525 = vmatpush1.msra.mxu1 %v7540_v22  ;;  %5841 = vmatpush3.msra.mxu0 %v7114_v42  ;;  %v7560_v42 = vld [vmem:[#allocation5 + $0x3e0] sm:$0xff] }
 0x4b5   :  { %1526 = vmatprep.subr.mxu1 %v7544_v32  ;;  %5842 = vmatprep.subr.mxu0 %v9287_v40 }
 0x4b6   :  { %1527 = vmatpush1.msra.mxu1 %v7548_v23  ;;  %5843 = vmatpush3.msra.mxu0 %v7132_v47  ;;  %v7568_v47 = vld [vmem:[#allocation5 + $0x3c8] sm:$0xff] }
 0x4b7   :  { %1528 = vmatprep.subr.mxu1 %v7552_v37  ;;  %5844 = vmatprep.subr.mxu0 %v9287_v40 }
 0x4b8   :  { %1529 = vmatpush1.msra.mxu1 %v7556_v24  ;;  %5845 = vmatpush3.msra.mxu0 %v7138_v48  ;;  %v7576_v48 = vld [vmem:[#allocation5 + $0x3b0] sm:$0xff] }
 0x4b9   :  { %1530 = vmatprep.subr.mxu1 %v7560_v42  ;;  %5846 = vmatprep.subr.mxu0 %v9287_v40 }
 0x4ba   :  { %1531 = vmatpush1.msra.mxu1 %v7564_v26  ;;  %5847 = vmatpush3.msra.mxu0 %v7144_v38  ;;  %v7584_v38 = vld [vmem:[#allocation5 + $0x398] sm:$0xff] }
 0x4bb   :  { %1532 = vmatprep.subr.mxu1 %v7568_v47  ;;  %5848 = vmatprep.subr.mxu0 %v9287_v40 }
 0x4bc   :  { %1533 = vmatpush1.msra.mxu1 %v7572_v28  ;;  %5849 = vmatpush3.msra.mxu0 %v7150_v49  ;;  %v7617_v49 = vld [vmem:[#allocation5 + $0x470] sm:$0xff] }
 0x4bd   :  { %1534 = vmatprep.subr.mxu1 %v7576_v48  ;;  %5850 = vmatprep.subr.mxu0 %v9287_v40  ;;  %9324 = vst [vmem:[#allocation14_spill] sm:$0xff] %v7617_v49 }
 0x4be   :  { %1535 = vmatpush1.msra.mxu1 %v7580_v29  ;;  %5851 = vmatpush3.msra.mxu0 %v9288_v50 }
 0x4bf   :  { %1536 = vmatprep.subr.mxu1 %v7584_v38  ;;  %5852 = vmatprep.subr.mxu0 %v9287_v40 }
 0x4c0   :  { %1537 = vmatpush1.msra.mxu1 %v9290_v56  ;;  %5853 = vmatpush3.msra.mxu0 %v9291_v45 }
 0x4c1   :  { %1538 = vmatprep.subr.mxu1 %v9292_v4  ;;  %5854 = vmatprep.subr.mxu0 %v9287_v40 }
 0x4c2   :  { %1539 = vmatpush1.msra.mxu1 %v9293_v58  ;;  %5855 = vmatpush3.msra.mxu0 %v9294_v35  ;;  %v9325_v35 = vld [vmem:[#allocation51_spill] sm:$0xff] }
 0x4c3   :  { %1540 = vmatprep.subr.mxu1 %v9295_v41  ;;  %5856 = vmatprep.subr.mxu0 %v9287_v40 }
 0x4c4   :  { %1541 = vmatpush1.msra.mxu1 %v9296_v62  ;;  %5857 = vmatpush3.msra.mxu0 %v9297_v59 }
 0x4c5   :  { %1542 = vmatprep.subr.mxu1 %v9298_v6  ;;  %5858 = vmatprep.subr.mxu0 %v9287_v40  ;;  %v9326_v6 = vld [vmem:[#allocation52_spill] sm:$0xff] }
 0x4c6   :  { %1543 = vmatpush1.msra.mxu1 %v9299_v8  ;;  %5859 = vmatpush3.msra.mxu0 %v9300_v51 }
 0x4c7   :  { %1544 = vmatprep.subr.mxu1 %v9301_v9  ;;  %5860 = vmatprep.subr.mxu0 %v9287_v40 }
 0x4c8   :  { %1545 = vmatpush1.msra.mxu1 %v9302_v2  ;;  %5861 = vmatpush3.msra.mxu0 %v9303_v7 }
 0x4c9   :  { %1546 = vmatprep.subr.mxu1 %v9312_v11  ;;  %5862 = vmatprep.subr.mxu0 %v9287_v40 }
 0x4ca   :  { %1547 = vmatpush1.msra.mxu1 %v9313_v12  ;;  %5863 = vmatpush3.msra.mxu0 %v9314_v13 }
 0x4cb   :  { %1548 = vmatprep.subr.mxu1 %v9315_v14  ;;  %5864 = vmatprep.subr.mxu0 %v9287_v40 }
 0x4cc   :  { %1549 = vmatpush1.msra.mxu1 %v9316_v15  ;;  %1582 = vmatprep.mubr.f32.mxu1 %v9287_v40  ;;  %v9327_v15 = vld [vmem:[#allocation48_spill] sm:$0xff] }
 0x4cd   :  { %5865 = vmatpush3.msra.mxu0 %v9317_v16  ;;  %5866 = vmatprep.mubr.msk.f32.mxu0 %vm6879_vm9, %v9287_v40 }
 0x4ce   :  { %1686 = vmatprep.subr.mxu1 %v7617_v49  ;;  %5869 = vmatprep.subr.mxu0 %v9287_v40 }
 0x56d   :  { %v1416_v50 = vpop.f32.mrf.mxu1  ;;  %v1487_v56 = vpop.f32.mrf.mxu0 }
 0x56e   :  { %v1417_v45 = vadd.f32 %v1416_v50, %v9319_v21  ;;  %v1488_v12 = vadd.f32 %v1487_v56, %v7351_v63  ;;  %v7692_v50 = vld [vmem:[#allocation5 + $0x380] sm:$0xff]  ;;  %v7696_v56 = vld [vmem:[#allocation5 + $0x378] sm:$0xff] }
 0x56f   :  { %v1418_v4 = vpop.f32.mrf.mxu1  ;;  %v5833_v58 = vpop.f32.mrf.mxu0 }
 0x570   :  { %v1491_v41 = vadd.f32 %v1417_v45, %v9325_v35  ;;  %v1419_v59 = vadd.f32 %v1418_v4, %v7347_v60  ;;  %v7699_v45 = vld [vmem:[#allocation5 + $0x388] sm:$0xff]  ;;  %v7706_v58 = vld [vmem:[#allocation5 + $0x360] sm:$0xff]  ;;  %v7709_v35 = vld [vmem:[#allocation5 + $0x370] sm:$0xff] }
 0x571   :  { %v7702_v4 = vld [vmem:[#allocation5 + $0x368] sm:$0xff] }
 0x572   :  { %v5098_v62 = vmul.f32 -1.442695, %v1491_v41  ;;  %v1498_v8 = vadd.f32 %v1419_v59, %v9326_v6  ;;  %v7712_v41 = vld [vmem:[#allocation5 + $0x350] sm:$0xff]  ;;  %v7719_v59 = vld [vmem:[#allocation5 + $0x358] sm:$0xff] }
 0x573   :  { %v7722_v6 = vld [vmem:[#allocation5 + $0x338] sm:$0xff] }
 0x574   :  { %6543 = vpow2.f32 %v5098_v62  ;;  %v5099_v51 = vmul.f32 -1.442695, %v1498_v8  ;;  %v7716_v62 = vld [vmem:[#allocation5 + $0x348] sm:$0xff]  ;;  %v7726_v8 = vld [vmem:[#allocation5 + $0x330] sm:$0xff] }
 0x576   :  { %6545 = vpow2.f32 %v5099_v51  ;;  %v7729_v51 = vld [vmem:[#allocation5 + $0x340] sm:$0xff] }
 0x581   :  { %v6544_v9 = vpop.eup %6543 }
 0x582   :  { %v1495_v2 = vadd.f32 1.0, %v6544_v9  ;;  %v7732_v9 = vld [vmem:[#allocation5 + $0x320] sm:$0xff] }
 0x583   :  { %v6546_v7 = vpop.eup %6545 }
 0x584   :  { %6547 = vrcp.f32 %v1495_v2  ;;  %v1502_v11 = vadd.f32 1.0, %v6546_v7  ;;  %v7736_v2 = vld [vmem:[#allocation5 + $0x318] sm:$0xff]  ;;  %v7739_v7 = vld [vmem:[#allocation5 + $0x328] sm:$0xff] }
 0x585   :  { %9329 = vst [vmem:[#allocation15_spill] sm:$0xff] %v7736_v2  ;;  %9330 = vst [vmem:[#allocation16_spill] sm:$0xff] %v7739_v7 }
 0x586   :  { %6549 = vrcp.f32 %v1502_v11  ;;  %v7742_v11 = vld [vmem:[#allocation5 + $0x308] sm:$0xff] }
 0x587   :  { %9331 = vst [vmem:[#allocation29_spill] sm:$0xff] %v7742_v11 }
 0x591   :  { %v6548_v13 = vpop.eup %6547 }
 0x592   :  { %v1505_v14 = vmul.f32 %v6548_v13, %v1488_v12  ;;  %v7746_v12 = vld [vmem:[#allocation5 + $0x300] sm:$0xff]  ;;  %v7750_v13 = vld [vmem:[#allocation5 + $0x310] sm:$0xff] }
 0x593   :  { %v6550_v39 = vpop.eup %6549  ;;  %9332 = vst [vmem:[#allocation17_spill] sm:$0xff] %v7746_v12  ;;  %9333 = vst [vmem:[#allocation18_spill] sm:$0xff] %v7750_v13 }
 0x594   :  { %v1506_v16 = vadd.f32 %v1505_v14, %v9327_v15  ;;  %v1508_v53 = vsub.f32 1.0, %v6550_v39  ;;  %v1510_v44 = vmul.f32 %v6550_v39, %v7512_v55 }
 0x596   :  { %6551 = vtanh.f32 %v1506_v16 }
 0x5a3   :  { %v6552_v5 = vpop.eup %6551 }
 0x5a4   :  { %v1509_v0 = vmul.f32 %v6552_v5, %v1508_v53  ;;  %v9334_v5 = vld [vmem:[#allocation49_spill] sm:$0xff] }
 0x5a6   :  { %v7628_v43 = vadd.f32 %v1510_v44, %v1509_v0 }
 0x5a8   :  { %9328 = vst [vmem:[#allocation28_spill] sm:$0xff] %v7628_v43  ;;  %1583 = vmatmul.mubr.f32.vlgmr.msra.gmra.mxu1 %v7628_v43  ;;  %5867 = vmatmul.mubr.f32.vlgmr.msra.gmra.mxu0 %v7628_v43 }
 0x5a9   :  { %1687 = vmatpush1.msra.mxu1 %v7516_v25  ;;  %5870 = vmatpush3.msra.mxu0 %v7633_v57 }
 0x5aa   :  { %1688 = vmatprep.subr.mxu1 %v7520_v17  ;;  %5871 = vmatprep.subr.mxu0 %v9287_v40 }
 0x5ab   :  { %1689 = vmatpush1.msra.mxu1 %v7524_v18  ;;  %5872 = vmatpush3.msra.mxu0 %v7639_v3 }
 0x5ac   :  { %1690 = vmatprep.subr.mxu1 %v7528_v20  ;;  %5873 = vmatprep.subr.mxu0 %v9287_v40 }
 0x5ad   :  { %1691 = vmatpush1.msra.mxu1 %v7532_v19  ;;  %5874 = vmatpush3.msra.mxu0 %v7645_v46 }
 0x5ae   :  { %1692 = vmatprep.subr.mxu1 %v7536_v27  ;;  %5875 = vmatprep.subr.mxu0 %v9287_v40 }
 0x5af   :  { %1693 = vmatpush1.msra.mxu1 %v7540_v22  ;;  %5876 = vmatpush3.msra.mxu0 %v7651_v10 }
 0x5b0   :  { %1694 = vmatprep.subr.mxu1 %v7544_v32  ;;  %5877 = vmatprep.subr.mxu0 %v9287_v40 }
 0x5b1   :  { %1695 = vmatpush1.msra.mxu1 %v7548_v23  ;;  %5878 = vmatpush3.msra.mxu0 %v7657_v30 }
 0x5b2   :  { %1696 = vmatprep.subr.mxu1 %v7552_v37  ;;  %5879 = vmatprep.subr.mxu0 %v9287_v40 }
 0x5b3   :  { %1697 = vmatpush1.msra.mxu1 %v7556_v24  ;;  %5880 = vmatpush3.msra.mxu0 %v7663_v61 }
 0x5b4   :  { %1698 = vmatprep.subr.mxu1 %v7560_v42  ;;  %5881 = vmatprep.subr.mxu0 %v9287_v40 }
 0x5b5   :  { %1699 = vmatpush1.msra.mxu1 %v7564_v26  ;;  %5882 = vmatpush3.msra.mxu0 %v7669_v34 }
 0x5b6   :  { %1700 = vmatprep.subr.mxu1 %v7568_v47  ;;  %5883 = vmatprep.subr.mxu0 %v9287_v40 }
 0x5b7   :  { %1701 = vmatpush1.msra.mxu1 %v7572_v28  ;;  %5884 = vmatpush3.msra.mxu0 %v7675_v54 }
 0x5b8   :  { %1702 = vmatprep.subr.mxu1 %v7576_v48  ;;  %5885 = vmatprep.subr.mxu0 %v9287_v40 }
 0x5b9   :  { %1703 = vmatpush1.msra.mxu1 %v7580_v29  ;;  %5886 = vmatpush3.msra.mxu0 %v7681_v33 }
 0x5ba   :  { %1704 = vmatprep.subr.mxu1 %v7584_v38  ;;  %5887 = vmatprep.subr.mxu0 %v9287_v40 }
 0x5bb   :  { %1705 = vmatpush1.msra.mxu1 %v7686_v52  ;;  %5888 = vmatpush3.msra.mxu0 %v7689_v31 }
 0x5bc   :  { %1706 = vmatprep.subr.mxu1 %v7692_v50  ;;  %5889 = vmatprep.subr.mxu0 %v9287_v40 }
 0x5bd   :  { %1707 = vmatpush1.msra.mxu1 %v7696_v56  ;;  %5890 = vmatpush3.msra.mxu0 %v7699_v45 }
 0x5be   :  { %1708 = vmatprep.subr.mxu1 %v7702_v4  ;;  %5891 = vmatprep.subr.mxu0 %v9287_v40 }
 0x5bf   :  { %1709 = vmatpush1.msra.mxu1 %v7706_v58  ;;  %5892 = vmatpush3.msra.mxu0 %v7709_v35 }
 0x5c0   :  { %1710 = vmatprep.subr.mxu1 %v7712_v41  ;;  %5893 = vmatprep.subr.mxu0 %v9287_v40 }
 0x5c1   :  { %1711 = vmatpush1.msra.mxu1 %v7716_v62  ;;  %5894 = vmatpush3.msra.mxu0 %v7719_v59 }
 0x5c2   :  { %1712 = vmatprep.subr.mxu1 %v7722_v6  ;;  %5895 = vmatprep.subr.mxu0 %v9287_v40 }
 0x5c3   :  { %1713 = vmatpush1.msra.mxu1 %v7726_v8  ;;  %5896 = vmatpush3.msra.mxu0 %v7729_v51 }
 0x5c4   :  { %1714 = vmatprep.subr.mxu1 %v7732_v9  ;;  %5897 = vmatprep.subr.mxu0 %v9287_v40 }
 0x5c5   :  { %1715 = vmatpush1.msra.mxu1 %v7736_v2  ;;  %5898 = vmatpush3.msra.mxu0 %v7739_v7 }
 0x5c6   :  { %1716 = vmatprep.subr.mxu1 %v7742_v11  ;;  %5899 = vmatprep.subr.mxu0 %v9287_v40 }
 0x5c7   :  { %1717 = vmatpush1.msra.mxu1 %v7746_v12  ;;  %1750 = vmatprep.mubr.f32.mxu1 %v9287_v40 }
 0x5c8   :  { %5900 = vmatpush3.msra.mxu0 %v7750_v13  ;;  %5901 = vmatprep.mubr.msk.f32.mxu0 %vm6879_vm9, %v9287_v40 }
 0x5c9   :  { %1854 = vmatprep.subr.mxu1 %v7617_v49  ;;  %5904 = vmatprep.subr.mxu0 %v9287_v40 }
 0x668   :  { %v1584_v14 = vpop.f32.mrf.mxu1  ;;  %v1655_v15 = vpop.f32.mrf.mxu0 }
 0x669   :  { %v1585_v16 = vadd.f32 %v1584_v14, %v9319_v21  ;;  %v1656_v2 = vadd.f32 %v1655_v15, %v7351_v63  ;;  %v9343_v15 = vld [vmem:[#allocation55_spill] sm:$0xff] }
 0x66a   :  { %v1586_v39 = vpop.f32.mrf.mxu1  ;;  %v5868_v53 = vpop.f32.mrf.mxu0 }
 0x66b   :  { %v1659_v0 = vadd.f32 %v1585_v16, %v9334_v5  ;;  %v1587_v36 = vadd.f32 %v1586_v39, %v7347_v60  ;;  %v9336_v53 = vld [vmem:[#allocation43_spill] sm:$0xff] }
 0x66d   :  { %v5100_v44 = vmul.f32 -1.442695, %v1659_v0  ;;  %v1666_v55 = vadd.f32 %v1587_v36, %v9335_v1 }
 0x66f   :  { %6553 = vpow2.f32 %v5100_v44  ;;  %v5101_v13 = vmul.f32 -1.442695, %v1666_v55  ;;  %v9338_v55 = vld [vmem:[#allocation16_spill] sm:$0xff] }
 0x671   :  { %6555 = vpow2.f32 %v5101_v13 }
 0x67c   :  { %v6554_v12 = vpop.eup %6553 }
 0x67d   :  { %v1663_v49 = vadd.f32 1.0, %v6554_v12 }
 0x67e   :  { %v6556_v11 = vpop.eup %6555 }
 0x67f   :  { %6557 = vrcp.f32 %v1663_v49  ;;  %v1670_v7 = vadd.f32 1.0, %v6556_v11  ;;  %v9339_v49 = vld [vmem:[#allocation29_spill] sm:$0xff]  ;;  %v9342_v11 = vld [vmem:[#allocation14_spill] sm:$0xff] }
 0x681   :  { %6559 = vrcp.f32 %v1670_v7  ;;  %v9341_v7 = vld [vmem:[#allocation18_spill] sm:$0xff] }
 0x68c   :  { %v6558_v14 = vpop.eup %6557 }
 0x68d   :  { %v1673_v21 = vmul.f32 %v6558_v14, %v1656_v2  ;;  %v9340_v2 = vld [vmem:[#allocation17_spill] sm:$0xff] }
 0x68e   :  { %v6560_v5 = vpop.eup %6559 }
 0x68f   :  { %v1674_v16 = vadd.f32 %v1673_v21, %v9336_v53  ;;  %v1676_v39 = vsub.f32 1.0, %v6560_v5  ;;  %v1678_v36 = vmul.f32 %v6560_v5, %v7628_v43  ;;  %v9337_v21 = vld [vmem:[#allocation15_spill] sm:$0xff]  ;;  %v9344_v5 = vld [vmem:[#allocation45_spill] sm:$0xff] }
 0x691   :  { %6561 = vtanh.f32 %v1674_v16 }
 0x69e   :  { %v6562_v0 = vpop.eup %6561 }
 0x69f   :  { %v1677_v44 = vmul.f32 %v6562_v0, %v1676_v39 }
 0x6a1   :  { %v7764_v1 = vadd.f32 %v1678_v36, %v1677_v44  ;;  %v9345_v36 = vld [vmem:[#allocation47_spill] sm:$0xff] }
 0x6a3   :  { %1751 = vmatmul.mubr.f32.vlgmr.msra.gmra.mxu1 %v7764_v1  ;;  %5902 = vmatmul.mubr.f32.vlgmr.msra.gmra.mxu0 %v7764_v1 }
 0x6a4   :  { %1855 = vmatpush1.msra.mxu1 %v7516_v25  ;;  %5905 = vmatpush3.msra.mxu0 %v7633_v57 }
 0x6a5   :  { %1856 = vmatprep.subr.mxu1 %v7520_v17  ;;  %5906 = vmatprep.subr.mxu0 %v9287_v40 }
 0x6a6   :  { %1857 = vmatpush1.msra.mxu1 %v7524_v18  ;;  %5907 = vmatpush3.msra.mxu0 %v7639_v3 }
 0x6a7   :  { %1858 = vmatprep.subr.mxu1 %v7528_v20  ;;  %5908 = vmatprep.subr.mxu0 %v9287_v40 }
 0x6a8   :  { %1859 = vmatpush1.msra.mxu1 %v7532_v19  ;;  %5909 = vmatpush3.msra.mxu0 %v7645_v46 }
 0x6a9   :  { %1860 = vmatprep.subr.mxu1 %v7536_v27  ;;  %5910 = vmatprep.subr.mxu0 %v9287_v40 }
 0x6aa   :  { %1861 = vmatpush1.msra.mxu1 %v7540_v22  ;;  %5911 = vmatpush3.msra.mxu0 %v7651_v10 }
 0x6ab   :  { %1862 = vmatprep.subr.mxu1 %v7544_v32  ;;  %5912 = vmatprep.subr.mxu0 %v9287_v40 }
 0x6ac   :  { %1863 = vmatpush1.msra.mxu1 %v7548_v23  ;;  %5913 = vmatpush3.msra.mxu0 %v7657_v30 }
 0x6ad   :  { %1864 = vmatprep.subr.mxu1 %v7552_v37  ;;  %5914 = vmatprep.subr.mxu0 %v9287_v40 }
 0x6ae   :  { %1865 = vmatpush1.msra.mxu1 %v7556_v24  ;;  %5915 = vmatpush3.msra.mxu0 %v7663_v61 }
 0x6af   :  { %1866 = vmatprep.subr.mxu1 %v7560_v42  ;;  %5916 = vmatprep.subr.mxu0 %v9287_v40 }
 0x6b0   :  { %1867 = vmatpush1.msra.mxu1 %v7564_v26  ;;  %5917 = vmatpush3.msra.mxu0 %v7669_v34 }
 0x6b1   :  { %1868 = vmatprep.subr.mxu1 %v7568_v47  ;;  %5918 = vmatprep.subr.mxu0 %v9287_v40 }
 0x6b2   :  { %1869 = vmatpush1.msra.mxu1 %v7572_v28  ;;  %5919 = vmatpush3.msra.mxu0 %v7675_v54 }
 0x6b3   :  { %1870 = vmatprep.subr.mxu1 %v7576_v48  ;;  %5920 = vmatprep.subr.mxu0 %v9287_v40 }
 0x6b4   :  { %1871 = vmatpush1.msra.mxu1 %v7580_v29  ;;  %5921 = vmatpush3.msra.mxu0 %v7681_v33 }
 0x6b5   :  { %1872 = vmatprep.subr.mxu1 %v7584_v38  ;;  %5922 = vmatprep.subr.mxu0 %v9287_v40 }
 0x6b6   :  { %1873 = vmatpush1.msra.mxu1 %v7686_v52  ;;  %5923 = vmatpush3.msra.mxu0 %v7689_v31 }
 0x6b7   :  { %1874 = vmatprep.subr.mxu1 %v7692_v50  ;;  %5924 = vmatprep.subr.mxu0 %v9287_v40 }
 0x6b8   :  { %1875 = vmatpush1.msra.mxu1 %v7696_v56  ;;  %5925 = vmatpush3.msra.mxu0 %v7699_v45 }
 0x6b9   :  { %1876 = vmatprep.subr.mxu1 %v7702_v4  ;;  %5926 = vmatprep.subr.mxu0 %v9287_v40 }
 0x6ba   :  { %1877 = vmatpush1.msra.mxu1 %v7706_v58  ;;  %5927 = vmatpush3.msra.mxu0 %v7709_v35 }
 0x6bb   :  { %1878 = vmatprep.subr.mxu1 %v7712_v41  ;;  %5928 = vmatprep.subr.mxu0 %v9287_v40 }
 0x6bc   :  { %1879 = vmatpush1.msra.mxu1 %v7716_v62  ;;  %5929 = vmatpush3.msra.mxu0 %v7719_v59 }
 0x6bd   :  { %1880 = vmatprep.subr.mxu1 %v7722_v6  ;;  %5930 = vmatprep.subr.mxu0 %v9287_v40 }
 0x6be   :  { %1881 = vmatpush1.msra.mxu1 %v7726_v8  ;;  %5931 = vmatpush3.msra.mxu0 %v7729_v51 }
 0x6bf   :  { %1882 = vmatprep.subr.mxu1 %v7732_v9  ;;  %5932 = vmatprep.subr.mxu0 %v9287_v40 }
 0x6c0   :  { %1883 = vmatpush1.msra.mxu1 %v9337_v21  ;;  %5933 = vmatpush3.msra.mxu0 %v9338_v55 }
 0x6c1   :  { %1884 = vmatprep.subr.mxu1 %v9339_v49  ;;  %5934 = vmatprep.subr.mxu0 %v9287_v40 }
 0x6c2   :  { %1885 = vmatpush1.msra.mxu1 %v9340_v2  ;;  %1918 = vmatprep.mubr.f32.mxu1 %v9287_v40 }
 0x6c3   :  { %5935 = vmatpush3.msra.mxu0 %v9341_v7  ;;  %5936 = vmatprep.mubr.msk.f32.mxu0 %vm6879_vm9, %v9287_v40 }
 0x6c4   :  { %2022 = vmatprep.subr.mxu1 %v9342_v11  ;;  %5939 = vmatprep.subr.mxu0 %v9287_v40 }
 0x763   :  { %v1752_v12 = vpop.f32.mrf.mxu1  ;;  %v1823_v13 = vpop.f32.mrf.mxu0 }
 0x764   :  { %v1753_v14 = vadd.f32 %v1752_v12, %v9343_v15  ;;  %v1824_v21 = vadd.f32 %v1823_v13, %v7351_v63  ;;  %v9347_v63 = vld [vmem:[#allocation15_spill] sm:$0xff] }
 0x765   :  { %v1754_v53 = vpop.f32.mrf.mxu1  ;;  %v5903_v16 = vpop.f32.mrf.mxu0  ;;  %v2273_v13 = vld [vmem:[#allocation5 + $0x738] sm:$0xff] }
 0x766   :  { %v1827_v39 = vadd.f32 %v1753_v14, %v9344_v5  ;;  %v1755_v44 = vadd.f32 %v1754_v53, %v7347_v60  ;;  %v9346_v16 = vld [vmem:[#allocation44_spill] sm:$0xff] }
 0x768   :  { %v5102_v0 = vmul.f32 -1.442695, %v1827_v39  ;;  %v1834_v43 = vadd.f32 %v1755_v44, %v9345_v36  ;;  %v2272_v44 = vld [vmem:[#allocation5 + $0x730] sm:$0xff]  ;;  %v2270_v36 = vld [vmem:[#allocation5 + $0x720] sm:$0xff] }
 0x76a   :  { %6563 = vpow2.f32 %v5102_v0  ;;  %v5103_v7 = vmul.f32 -1.442695, %v1834_v43  ;;  %v2271_v0 = vld [vmem:[#allocation5 + $0x728] sm:$0xff] }
 0x76c   :  { %6565 = vpow2.f32 %v5103_v7 }
 0x777   :  { %v6564_v2 = vpop.eup %6563 }
 0x778   :  { %v1831_v11 = vadd.f32 1.0, %v6564_v2  ;;  %v2275_v2 = vld [vmem:[#allocation5 + $0x748] sm:$0xff] }
 0x779   :  { %v6566_v49 = vpop.eup %6565 }
 0x77a   :  { %6567 = vrcp.f32 %v1831_v11  ;;  %v1838_v55 = vadd.f32 1.0, %v6566_v49  ;;  %v2274_v49 = vld [vmem:[#allocation5 + $0x740] sm:$0xff]  ;;  %v2268_v11 = vld [vmem:[#allocation5 + $0x710] sm:$0xff] }
 0x77c   :  { %6569 = vrcp.f32 %v1838_v55  ;;  %v2276_v55 = vld [vmem:[#allocation5 + $0x750] sm:$0xff] }
 0x787   :  { %v6568_v12 = vpop.eup %6567 }
 0x788   :  { %v1841_v15 = vmul.f32 %v6568_v12, %v1824_v21  ;;  %v2278_v21 = vld [vmem:[#allocation5 + $0x760] sm:$0xff]  ;;  %v2269_v12 = vld [vmem:[#allocation5 + $0x718] sm:$0xff] }
 0x789   :  { %v6570_v5 = vpop.eup %6569 }
 0x78a   :  { %v1842_v14 = vadd.f32 %v1841_v15, %v9346_v16  ;;  %v1844_v60 = vsub.f32 1.0, %v6570_v5  ;;  %v1846_v43 = vmul.f32 %v6570_v5, %v7764_v1  ;;  %v2267_v15 = vld [vmem:[#allocation5 + $0x708] sm:$0xff]  ;;  %v2265_v16 = vld [vmem:[#allocation5 + $0x6f8] sm:$0xff]  ;;  %v2264_v5 = vld [vmem:[#allocation5 + $0x6f0] sm:$0xff] }
 0x78c   :  { %6571 = vtanh.f32 %v1842_v14  ;;  %v2266_v14 = vld [vmem:[#allocation5 + $0x700] sm:$0xff] }
 0x799   :  { %v6572_v53 = vpop.eup %6571 }
 0x79a   :  { %v1845_v39 = vmul.f32 %v6572_v53, %v1844_v60  ;;  %v2262_v60 = vld [vmem:[#allocation5 + $0x6e0] sm:$0xff]  ;;  %v2263_v53 = vld [vmem:[#allocation5 + $0x6e8] sm:$0xff] }
 0x79c   :  { %v7842_v7 = vadd.f32 %v1846_v43, %v1845_v39  ;;  %v2261_v39 = vld [vmem:[#allocation5 + $0x6d8] sm:$0xff]  ;;  %v2259_v43 = vld [vmem:[#allocation5 + $0x6c8] sm:$0xff] }
 0x79e   :  { %1919 = vmatmul.mubr.f32.vlgmr.msra.gmra.mxu1 %v7842_v7  ;;  %5937 = vmatmul.mubr.f32.vlgmr.msra.gmra.mxu0 %v7842_v7 }
 0x79f   :  { %2023 = vmatpush1.msra.mxu1 %v7516_v25  ;;  %5940 = vmatpush3.msra.mxu0 %v7633_v57  ;;  %v9348_v25 = vld [vmem:[#allocation16_spill] sm:$0xff]  ;;  %v7920_v57 = vld [vmem:[#allocation7 + $0x8] sm:$0xff] }
 0x7a0   :  { %2024 = vmatprep.subr.mxu1 %v7520_v17  ;;  %5941 = vmatprep.subr.mxu0 %v9287_v40  ;;  %v9349_v17 = vld [vmem:[#allocation29_spill] sm:$0xff] }
 0x7a1   :  { %2025 = vmatpush1.msra.mxu1 %v7524_v18  ;;  %5942 = vmatpush3.msra.mxu0 %v7639_v3  ;;  %v9350_v18 = vld [vmem:[#allocation17_spill] sm:$0xff] }
 0x7a2   :  { %2026 = vmatprep.subr.mxu1 %v7528_v20  ;;  %5943 = vmatprep.subr.mxu0 %v9287_v40  ;;  %v9351_v20 = vld [vmem:[#allocation18_spill] sm:$0xff] }
 0x7a3   :  { %2027 = vmatpush1.msra.mxu1 %v7532_v19  ;;  %5944 = vmatpush3.msra.mxu0 %v7645_v46 }
 0x7a4   :  { %2028 = vmatprep.subr.mxu1 %v7536_v27  ;;  %5945 = vmatprep.subr.mxu0 %v9287_v40 }
 0x7a5   :  { %2029 = vmatpush1.msra.mxu1 %v7540_v22  ;;  %5946 = vmatpush3.msra.mxu0 %v7651_v10  ;;  %v7911_v22 = vld [vmem:[#allocation7 + $0x18] sm:$0xff] }
 0x7a6   :  { %2030 = vmatprep.subr.mxu1 %v7544_v32  ;;  %5947 = vmatprep.subr.mxu0 %v9287_v40 }
 0x7a7   :  { %2031 = vmatpush1.msra.mxu1 %v7548_v23  ;;  %5948 = vmatpush3.msra.mxu0 %v7657_v30 }
 0x7a8   :  { %2032 = vmatprep.subr.mxu1 %v7552_v37  ;;  %5949 = vmatprep.subr.mxu0 %v9287_v40 }
 0x7a9   :  { %2033 = vmatpush1.msra.mxu1 %v7556_v24  ;;  %5950 = vmatpush3.msra.mxu0 %v7663_v61  ;;  %v9352_v24 = vld [vmem:[#allocation35_spill] sm:$0xff] }
 0x7aa   :  { %2034 = vmatprep.subr.mxu1 %v7560_v42  ;;  %5951 = vmatprep.subr.mxu0 %v9287_v40  ;;  %v9353_v42 = vld [vmem:[#allocation41_spill] sm:$0xff] }
 0x7ab   :  { %2035 = vmatpush1.msra.mxu1 %v7564_v26  ;;  %5952 = vmatpush3.msra.mxu0 %v7669_v34  ;;  %v1849_v26 = vadd.f32 %v9353_v42, %v9352_v24  ;;  %v2249_v24 = vld [vmem:[#allocation5 + $0x678] sm:$0xff]  ;;  %v2247_v42 = vld [vmem:[#allocation5 + $0x668] sm:$0xff] }
 0x7ac   :  { %2036 = vmatprep.subr.mxu1 %v7568_v47  ;;  %5953 = vmatprep.subr.mxu0 %v9287_v40  ;;  %v9354_v47 = vld [vmem:[#allocation42_spill] sm:$0xff] }
 0x7ad   :  { %2037 = vmatpush1.msra.mxu1 %v7572_v28  ;;  %5954 = vmatpush3.msra.mxu0 %v7675_v54  ;;  %v1852_v3 = vadd.f32 %v7920_v57, %v1849_v26  ;;  %v2248_v26 = vld [vmem:[#allocation5 + $0x670] sm:$0xff] }
 0x7ae   :  { %2038 = vmatprep.subr.mxu1 %v7576_v48  ;;  %5955 = vmatprep.subr.mxu0 %v9287_v40 }
 0x7af   :  { %2039 = vmatpush1.msra.mxu1 %v7580_v29  ;;  %5956 = vmatpush3.msra.mxu0 %v7681_v33  ;;  %v7917_v29 = vld [vmem:[#allocation7 + $0x20] sm:$0xff]  ;;  %v7923_v33 = vld [vmem:[#allocation7 + $0x28] sm:$0xff] }
 0x7b0   :  { %2040 = vmatprep.subr.mxu1 %v7584_v38  ;;  %5957 = vmatprep.subr.mxu0 %v9287_v40 }
 0x7b1   :  { %2041 = vmatpush1.msra.mxu1 %v7686_v52  ;;  %5958 = vmatpush3.msra.mxu0 %v7689_v31 }
 0x7b2   :  { %2042 = vmatprep.subr.mxu1 %v7692_v50  ;;  %5959 = vmatprep.subr.mxu0 %v9287_v40 }
 0x7b3   :  { %2043 = vmatpush1.msra.mxu1 %v7696_v56  ;;  %5960 = vmatpush3.msra.mxu0 %v7699_v45  ;;  %v9355_v56 = vld [vmem:[#allocation39_spill] sm:$0xff] }
 0x7b4   :  { %2044 = vmatprep.subr.mxu1 %v7702_v4  ;;  %5961 = vmatprep.subr.mxu0 %v9287_v40 }
 0x7b5   :  { %2045 = vmatpush1.msra.mxu1 %v7706_v58  ;;  %5962 = vmatpush3.msra.mxu0 %v7709_v35 }
 0x7b6   :  { %2046 = vmatprep.subr.mxu1 %v7712_v41  ;;  %5963 = vmatprep.subr.mxu0 %v9287_v40 }
 0x7b7   :  { %2047 = vmatpush1.msra.mxu1 %v7716_v62  ;;  %5964 = vmatpush3.msra.mxu0 %v7719_v59 }
 0x7b8   :  { %2048 = vmatprep.subr.mxu1 %v7722_v6  ;;  %5965 = vmatprep.subr.mxu0 %v9287_v40  ;;  %v2280_v6 = vld [vmem:[#allocation5 + $0x770] sm:$0xff] }
 0x7b9   :  { %2049 = vmatpush1.msra.mxu1 %v7726_v8  ;;  %5966 = vmatpush3.msra.mxu0 %v7729_v51  ;;  %v2281_v8 = vld [vmem:[#allocation5 + $0x778] sm:$0xff]  ;;  %v2279_v51 = vld [vmem:[#allocation5 + $0x768] sm:$0xff] }
 0x7ba   :  { %2050 = vmatprep.subr.mxu1 %v7732_v9  ;;  %5967 = vmatprep.subr.mxu0 %v9287_v40  ;;  %v2277_v9 = vld [vmem:[#allocation5 + $0x758] sm:$0xff] }
 0x7bb   :  { %2051 = vmatpush1.msra.mxu1 %v9347_v63  ;;  %5968 = vmatpush3.msra.mxu0 %v9348_v25  ;;  %v2260_v63 = vld [vmem:[#allocation5 + $0x6d0] sm:$0xff]  ;;  %v2258_v25 = vld [vmem:[#allocation5 + $0x6c0] sm:$0xff] }
 0x7bc   :  { %2052 = vmatprep.subr.mxu1 %v9349_v17  ;;  %5969 = vmatprep.subr.mxu0 %v9287_v40  ;;  %v2256_v17 = vld [vmem:[#allocation5 + $0x6b0] sm:$0xff] }
 0x7bd   :  { %2053 = vmatpush1.msra.mxu1 %v9350_v18  ;;  %2086 = vmatprep.mubr.f32.mxu1 %v9287_v40  ;;  %v2257_v18 = vld [vmem:[#allocation5 + $0x6b8] sm:$0xff] }
 0x7be   :  { %5970 = vmatpush3.msra.mxu0 %v9351_v20  ;;  %5971 = vmatprep.mubr.msk.f32.mxu0 %vm6879_vm9, %v9287_v40  ;;  %v2255_v20 = vld [vmem:[#allocation5 + $0x6a8] sm:$0xff] }
 0x7bf   :  { %2380 = vmatprep.subr.mxu1 %v2280_v6  ;;  %5974 = vmatprep.subr.mxu0 %v2281_v8  ;;  %v9357_v6 = vld [vmem:[#allocation37_spill] sm:$0xff] }
 0x85e   :  { %v1920_v19 = vpop.f32.mrf.mxu1  ;;  %v1991_v27 = vpop.f32.mrf.mxu0 }
 0x85f   :  { %v1921_v32 = vadd.f32 %v7911_v22, %v1920_v19  ;;  %v1992_v52 = vadd.f32 %v7923_v33, %v1991_v27  ;;  %v2253_v19 = vld [vmem:[#allocation5 + $0x698] sm:$0xff]  ;;  %v2254_v27 = vld [vmem:[#allocation5 + $0x6a0] sm:$0xff] }
 0x860   :  { %v1922_v23 = vpop.f32.mrf.mxu1  ;;  %v5938_v37 = vpop.f32.mrf.mxu0 }
 0x861   :  { %v1995_v28 = vadd.f32 %v1921_v32, %v9354_v47  ;;  %v1923_v38 = vadd.f32 %v7917_v29, %v1922_v23  ;;  %v2252_v32 = vld [vmem:[#allocation5 + $0x690] sm:$0xff]  ;;  %v2250_v23 = vld [vmem:[#allocation5 + $0x680] sm:$0xff]  ;;  %v2251_v37 = vld [vmem:[#allocation5 + $0x688] sm:$0xff] }
 0x862   :  { %v2246_v47 = vld [vmem:[#allocation5 + $0x660] sm:$0xff] }
 0x863   :  { %v5104_v48 = vmul.f32 -1.442695, %v1995_v28  ;;  %v2002_v46 = vadd.f32 %v1923_v38, %v1852_v3  ;;  %v2244_v28 = vld [vmem:[#allocation5 + $0x650] sm:$0xff]  ;;  %v2243_v38 = vld [vmem:[#allocation5 + $0x648] sm:$0xff]  ;;  %v2241_v3 = vld [vmem:[#allocation5 + $0x638] sm:$0xff] }
 0x865   :  { %6573 = vpow2.f32 %v5104_v48  ;;  %v5105_v10 = vmul.f32 -1.442695, %v2002_v46  ;;  %v2245_v48 = vld [vmem:[#allocation5 + $0x658] sm:$0xff]  ;;  %v2242_v46 = vld [vmem:[#allocation5 + $0x640] sm:$0xff] }
 0x867   :  { %6575 = vpow2.f32 %v5105_v10  ;;  %v2240_v10 = vld [vmem:[#allocation5 + $0x630] sm:$0xff] }
 0x872   :  { %v6574_v30 = vpop.eup %6573 }
 0x873   :  { %v1999_v61 = vadd.f32 1.0, %v6574_v30  ;;  %v2238_v30 = vld [vmem:[#allocation5 + $0x620] sm:$0xff] }
 0x874   :  { %v6576_v34 = vpop.eup %6575 }
 0x875   :  { %6577 = vrcp.f32 %v1999_v61  ;;  %v2006_v54 = vadd.f32 1.0, %v6576_v34  ;;  %v2239_v61 = vld [vmem:[#allocation5 + $0x628] sm:$0xff]  ;;  %v2237_v34 = vld [vmem:[#allocation5 + $0x618] sm:$0xff] }
 0x877   :  { %6579 = vrcp.f32 %v2006_v54  ;;  %v2235_v54 = vld [vmem:[#allocation5 + $0x608] sm:$0xff] }
 0x882   :  { %v6578_v31 = vpop.eup %6577 }
 0x883   :  { %v2009_v50 = vmul.f32 %v6578_v31, %v1992_v52  ;;  %v2234_v52 = vld [vmem:[#allocation5 + $0x600] sm:$0xff]  ;;  %v2236_v31 = vld [vmem:[#allocation5 + $0x610] sm:$0xff] }
 0x884   :  { %v6580_v4 = vpop.eup %6579 }
 0x885   :  { %v2010_v45 = vadd.f32 %v2009_v50, %v9355_v56  ;;  %v2012_v58 = vsub.f32 1.0, %v6580_v4  ;;  %v2014_v62 = vmul.f32 %v6580_v4, %v7842_v7  ;;  %v2231_v50 = vld [vmem:[#allocation5 + $0x5f0] sm:$0xff]  ;;  %v2232_v56 = vld [vmem:[#allocation5 + $0x5f8] sm:$0xff] }
 0x887   :  { %6581 = vtanh.f32 %v2010_v45 }
 0x894   :  { %v6582_v35 = vpop.eup %6581 }
 0x895   :  { %v2013_v41 = vmul.f32 %v6582_v35, %v2012_v58 }
 0x897   :  { %v7928_v59 = vadd.f32 %v2014_v62, %v2013_v41  ;;  %v9356_v62 = vld [vmem:[#allocation36_spill] sm:$0xff] }
 0x899   :  { %2087 = vmatmul.mubr.f32.vlgmr.msra.gmra.mxu1 %v7928_v59  ;;  %5972 = vmatmul.mubr.f32.vlgmr.msra.gmra.mxu0 %v7928_v59 }
 0x89a   :  { %2444 = vmatprep.mubr.f32.mxu1 %v9287_v40  ;;  %2381 = vmatpush1.msra.mxu1 %v2279_v51  ;;  %v9358_v51 = vld [vmem:[#allocation38_spill] sm:$0xff] }
 0x89b   :  { %5975 = vmatpush3.msra.mxu0 %v2281_v8  ;;  %2382 = vmatprep.subr.mxu1 %v2277_v9  ;;  %v2017_v8 = vadd.f32 %v9357_v6, %v9356_v62  ;;  %v2198_v62 = vld [vmem:[#allocation5 + $0x4e8] sm:$0xff]  ;;  %v2199_v6 = vld [vmem:[#allocation5 + $0x4f0] sm:$0xff] }
 0x89c   :  { %5976 = vmatprep.subr.mxu0 %v2278_v21  ;;  %2383 = vmatpush1.msra.mxu1 %v2276_v55 }
 0x89d   :  { %5977 = vmatpush3.msra.mxu0 %v2278_v21  ;;  %2384 = vmatprep.subr.mxu1 %v2274_v49  ;;  %v2020_v49 = vadd.f32 %v7920_v57, %v2017_v8  ;;  %v2197_v8 = vld [vmem:[#allocation5 + $0x4e0] sm:$0xff] }
 0x89e   :  { %5978 = vmatprep.subr.mxu0 %v2275_v2  ;;  %2385 = vmatpush1.msra.mxu1 %v2273_v13 }
 0x89f   :  { %5979 = vmatpush3.msra.mxu0 %v2275_v2  ;;  %2386 = vmatprep.subr.mxu1 %v2271_v0 }
 0x8a0   :  { %5980 = vmatprep.subr.mxu0 %v2272_v44  ;;  %2387 = vmatpush1.msra.mxu1 %v2270_v36 }
 0x8a1   :  { %5981 = vmatpush3.msra.mxu0 %v2272_v44  ;;  %2388 = vmatprep.subr.mxu1 %v2268_v11 }
 0x8a2   :  { %5982 = vmatprep.subr.mxu0 %v2269_v12  ;;  %2389 = vmatpush1.msra.mxu1 %v2267_v15 }
 0x8a3   :  { %5983 = vmatpush3.msra.mxu0 %v2269_v12  ;;  %2390 = vmatprep.subr.mxu1 %v2265_v16  ;;  %v9359_v16 = vld [vmem:[#allocation40_spill] sm:$0xff] }
 0x8a4   :  { %5984 = vmatprep.subr.mxu0 %v2266_v14  ;;  %2391 = vmatpush1.msra.mxu1 %v2264_v5 }
 0x8a5   :  { %5985 = vmatpush3.msra.mxu0 %v2266_v14  ;;  %2392 = vmatprep.subr.mxu1 %v2262_v60 }
 0x8a6   :  { %5986 = vmatprep.subr.mxu0 %v2263_v53  ;;  %2393 = vmatpush1.msra.mxu1 %v2261_v39 }
 0x8a7   :  { %5987 = vmatpush3.msra.mxu0 %v2263_v53  ;;  %2394 = vmatprep.subr.mxu1 %v2259_v43  ;;  %v2230_v43 = vld [vmem:[#allocation5 + $0x5e8] sm:$0xff] }
 0x8a8   :  { %5988 = vmatprep.subr.mxu0 %v2260_v63  ;;  %2395 = vmatpush1.msra.mxu1 %v2258_v25  ;;  %v2229_v25 = vld [vmem:[#allocation5 + $0x5e0] sm:$0xff] }
 0x8a9   :  { %5989 = vmatpush3.msra.mxu0 %v2260_v63  ;;  %2396 = vmatprep.subr.mxu1 %v2256_v17  ;;  %v2228_v63 = vld [vmem:[#allocation5 + $0x5d8] sm:$0xff]  ;;  %v2225_v17 = vld [vmem:[#allocation5 + $0x5c0] sm:$0xff] }
 0x8aa   :  { %5990 = vmatprep.subr.mxu0 %v2257_v18  ;;  %2397 = vmatpush1.msra.mxu1 %v2255_v20  ;;  %v2224_v20 = vld [vmem:[#allocation5 + $0x5b8] sm:$0xff] }
 0x8ab   :  { %5991 = vmatpush3.msra.mxu0 %v2257_v18  ;;  %2398 = vmatprep.subr.mxu1 %v2253_v19  ;;  %v2226_v18 = vld [vmem:[#allocation5 + $0x5c8] sm:$0xff] }
 0x8ac   :  { %5992 = vmatprep.subr.mxu0 %v2254_v27  ;;  %2399 = vmatpush1.msra.mxu1 %v2252_v32  ;;  %v2222_v19 = vld [vmem:[#allocation5 + $0x5a8] sm:$0xff]  ;;  %v2223_v32 = vld [vmem:[#allocation5 + $0x5b0] sm:$0xff] }
 0x8ad   :  { %5993 = vmatpush3.msra.mxu0 %v2254_v27  ;;  %2400 = vmatprep.subr.mxu1 %v2250_v23  ;;  %v2221_v27 = vld [vmem:[#allocation5 + $0x5a0] sm:$0xff]  ;;  %v2219_v23 = vld [vmem:[#allocation5 + $0x590] sm:$0xff] }
 0x8ae   :  { %5994 = vmatprep.subr.mxu0 %v2251_v37  ;;  %2401 = vmatpush1.msra.mxu1 %v2249_v24  ;;  %v2220_v24 = vld [vmem:[#allocation5 + $0x598] sm:$0xff] }
 0x8af   :  { %5995 = vmatpush3.msra.mxu0 %v2251_v37  ;;  %2402 = vmatprep.subr.mxu1 %v2247_v42  ;;  %v9360_v37 = vld [vmem:[#allocation28_spill] sm:$0xff]  ;;  %v2218_v42 = vld [vmem:[#allocation5 + $0x588] sm:$0xff] }
 0x8b0   :  { %5996 = vmatprep.subr.mxu0 %v2248_v26  ;;  %2403 = vmatpush1.msra.mxu1 %v2246_v47  ;;  %v2215_v47 = vld [vmem:[#allocation5 + $0x570] sm:$0xff] }
 0x8b1   :  { %5997 = vmatpush3.msra.mxu0 %v2248_v26  ;;  %2404 = vmatprep.subr.mxu1 %v2244_v28  ;;  %v2216_v26 = vld [vmem:[#allocation5 + $0x578] sm:$0xff]  ;;  %v9361_v28 = vld [vmem:[#allocation13_spill] sm:$0xff] }
 0x8b2   :  { %5998 = vmatprep.subr.mxu0 %v2245_v48  ;;  %2405 = vmatpush1.msra.mxu1 %v2243_v38  ;;  %v2213_v38 = vld [vmem:[#allocation5 + $0x560] sm:$0xff] }
 0x8b3   :  { %5999 = vmatpush3.msra.mxu0 %v2245_v48  ;;  %2406 = vmatprep.subr.mxu1 %v2241_v3  ;;  %v2217_v48 = vld [vmem:[#allocation5 + $0x580] sm:$0xff]  ;;  %v9362_v3 = vld [vmem:[#allocation27_spill] sm:$0xff] }
 0x8b4   :  { %6000 = vmatprep.subr.mxu0 %v2242_v46  ;;  %2407 = vmatpush1.msra.mxu1 %v2240_v10  ;;  %v2212_v10 = vld [vmem:[#allocation5 + $0x558] sm:$0xff] }
 0x8b5   :  { %6001 = vmatpush3.msra.mxu0 %v2242_v46  ;;  %2408 = vmatprep.subr.mxu1 %v2238_v30  ;;  %v2214_v46 = vld [vmem:[#allocation5 + $0x568] sm:$0xff] }
 0x8b6   :  { %6002 = vmatprep.subr.mxu0 %v2239_v61  ;;  %2409 = vmatpush1.msra.mxu1 %v2237_v34  ;;  %v2210_v30 = vld [vmem:[#allocation5 + $0x548] sm:$0xff]  ;;  %v2211_v34 = vld [vmem:[#allocation5 + $0x550] sm:$0xff] }
 0x8b7   :  { %6003 = vmatpush3.msra.mxu0 %v2239_v61  ;;  %2410 = vmatprep.subr.mxu1 %v2235_v54  ;;  %v2209_v61 = vld [vmem:[#allocation5 + $0x540] sm:$0xff] }
 0x8b8   :  { %6004 = vmatprep.subr.mxu0 %v2236_v31  ;;  %2411 = vmatpush1.msra.mxu1 %v2234_v52  ;;  %v9363_v54 = vld [vmem:[#allocation56_spill] sm:$0xff]  ;;  %v2207_v52 = vld [vmem:[#allocation5 + $0x530] sm:$0xff] }
 0x8b9   :  { %6005 = vmatpush3.msra.mxu0 %v2236_v31  ;;  %2598 = vmatprep.subr.mxu1 %v2231_v50  ;;  %v2208_v31 = vld [vmem:[#allocation5 + $0x538] sm:$0xff]  ;;  %v2206_v50 = vld [vmem:[#allocation5 + $0x528] sm:$0xff] }
 0x8ba   :  { %6018 = vmatprep.subr.mxu0 %v2232_v56 }
 0x959   :  { %v2088_v45 = vpop.f32.mrf.mxu1  ;;  %v2159_v4 = vpop.f32.mrf.mxu0 }
 0x95a   :  { %v2089_v58 = vadd.f32 %v7911_v22, %v2088_v45  ;;  %v2160_v11 = vadd.f32 %v7923_v33, %v2159_v4  ;;  %v2227_v33 = vld [vmem:[#allocation5 + $0x5d0] sm:$0xff]  ;;  %v2205_v45 = vld [vmem:[#allocation5 + $0x520] sm:$0xff] }
 0x95b   :  { %v2090_v35 = vpop.f32.mrf.mxu1  ;;  %v5973_v41 = vpop.f32.mrf.mxu0  ;;  %v2203_v4 = vld [vmem:[#allocation5 + $0x510] sm:$0xff] }
 0x95c   :  { %v2163_v9 = vadd.f32 %v2089_v58, %v9358_v51  ;;  %v2091_v55 = vadd.f32 %v7917_v29, %v2090_v35  ;;  %v2201_v58 = vld [vmem:[#allocation5 + $0x500] sm:$0xff]  ;;  %v2202_v35 = vld [vmem:[#allocation5 + $0x508] sm:$0xff]  ;;  %v2200_v41 = vld [vmem:[#allocation5 + $0x4f8] sm:$0xff] }
 0x95d   :  { %v2195_v51 = vld [vmem:[#allocation5 + $0x4d0] sm:$0xff] }
 0x95e   :  { %v5106_v21 = vmul.f32 -1.442695, %v2163_v9  ;;  %v2170_v2 = vadd.f32 %v2091_v55, %v2020_v49  ;;  %v2196_v9 = vld [vmem:[#allocation5 + $0x4d8] sm:$0xff]  ;;  %v2193_v49 = vld [vmem:[#allocation5 + $0x4c0] sm:$0xff] }
 0x95f   :  { %v2192_v55 = vld [vmem:[#allocation5 + $0x4b8] sm:$0xff] }
 0x960   :  { %6583 = vpow2.f32 %v5106_v21  ;;  %v5107_v13 = vmul.f32 -1.442695, %v2170_v2  ;;  %v2194_v21 = vld [vmem:[#allocation5 + $0x4c8] sm:$0xff]  ;;  %v2191_v2 = vld [vmem:[#allocation5 + $0x4b0] sm:$0xff] }
 0x962   :  { %6585 = vpow2.f32 %v5107_v13  ;;  %v2189_v13 = vld [vmem:[#allocation5 + $0x4a0] sm:$0xff] }
 0x96d   :  { %v6584_v0 = vpop.eup %6583 }
 0x96e   :  { %v2167_v44 = vadd.f32 1.0, %v6584_v0  ;;  %v2190_v0 = vld [vmem:[#allocation5 + $0x4a8] sm:$0xff] }
 0x96f   :  { %v6586_v22 = vpop.eup %6585 }
 0x970   :  { %6587 = vrcp.f32 %v2167_v44  ;;  %v2174_v36 = vadd.f32 1.0, %v6586_v22  ;;  %v2188_v44 = vld [vmem:[#allocation5 + $0x498] sm:$0xff]  ;;  %v2186_v22 = vld [vmem:[#allocation5 + $0x488] sm:$0xff] }
 0x972   :  { %6589 = vrcp.f32 %v2174_v36  ;;  %v2187_v36 = vld [vmem:[#allocation5 + $0x490] sm:$0xff] }
 0x97d   :  { %v6588_v12 = vpop.eup %6587 }
 0x97e   :  { %v2177_v15 = vmul.f32 %v6588_v12, %v2160_v11  ;;  %v2185_v11 = vld [vmem:[#allocation5 + $0x480] sm:$0xff]  ;;  %v2378_v12 = vld [vmem:[#allocation5 + $0xa70] sm:$0xff] }
 0x97f   :  { %v6590_v29 = vpop.eup %6589 }
 0x980   :  { %v2178_v14 = vadd.f32 %v2177_v15, %v9359_v16  ;;  %v2180_v5 = vsub.f32 1.0, %v6590_v29  ;;  %v2182_v53 = vmul.f32 %v6590_v29, %v7928_v59  ;;  %v2377_v15 = vld [vmem:[#allocation5 + $0xa68] sm:$0xff]  ;;  %v2379_v16 = vld [vmem:[#allocation5 + $0xa78] sm:$0xff]  ;;  %v2374_v29 = vld [vmem:[#allocation5 + $0xa50] sm:$0xff] }
 0x982   :  { %6591 = vtanh.f32 %v2178_v14  ;;  %v2375_v14 = vld [vmem:[#allocation5 + $0xa58] sm:$0xff] }
 0x98f   :  { %v6592_v57 = vpop.eup %6591 }
 0x990   :  { %v2181_v60 = vmul.f32 %v6592_v57, %v2180_v5  ;;  %v2376_v5 = vld [vmem:[#allocation5 + $0xa60] sm:$0xff] }
 0x991   :  { %v2372_v57 = vld [vmem:[#allocation5 + $0xa40] sm:$0xff] }
 0x992   :  { %v7942_v39 = vadd.f32 %v2182_v53, %v2181_v60  ;;  %v2371_v60 = vld [vmem:[#allocation5 + $0xa38] sm:$0xff]  ;;  %v2373_v53 = vld [vmem:[#allocation5 + $0xa48] sm:$0xff] }
 0x994   :  { %2445 = vmatmul.mubr.f32.vlgmr.msra.gmra.mxu1 %v7942_v39  ;;  %6006 = vmatprep.mubr.f32.mxu0 %v7942_v39 }
 0x995   :  { %2599 = vmatpush1.msra.mxu1 %v2230_v43  ;;  %6007 = vmatmul.mubr.f32.vlgmr.msra.gmra.mxu0 %v7928_v59  ;;  %v2369_v43 = vld [vmem:[#allocation5 + $0xa28] sm:$0xff] }
 0x996   :  { %2600 = vmatprep.subr.mxu1 %v2228_v63  ;;  %6019 = vmatpush3.msra.mxu0 %v2232_v56  ;;  %v2204_v56 = vld [vmem:[#allocation5 + $0x518] sm:$0xff]  ;;  %v2368_v63 = vld [vmem:[#allocation5 + $0xa20] sm:$0xff] }
 0x997   :  { %6009 = vmatprep.mubr.f32.mxu0 %v7842_v7  ;;  %2601 = vmatpush1.msra.mxu1 %v2227_v33  ;;  %v2370_v33 = vld [vmem:[#allocation5 + $0xa30] sm:$0xff] }
 0x998   :  { %6020 = vmatprep.subr.mxu0 %v2229_v25  ;;  %2450 = vmatprep.mubr.f32.mxu1 %v9287_v40 }
 0x999   :  { %2602 = vmatprep.subr.mxu1 %v2225_v17  ;;  %6021 = vmatpush3.msra.mxu0 %v2229_v25  ;;  %v2366_v25 = vld [vmem:[#allocation5 + $0xa10] sm:$0xff]  ;;  %v2365_v17 = vld [vmem:[#allocation5 + $0xa08] sm:$0xff] }
 0x99a   :  { %2451 = vmatmul.mubr.f32.gmra.mxu1 %v7928_v59  ;;  %6022 = vmatprep.subr.mxu0 %v2226_v18 }
 0x99b   :  { %2603 = vmatpush1.msra.mxu1 %v2224_v20  ;;  %6010 = vmatmul.mubr.f32.gmra.mxu0 %v7764_v1  ;;  %v2363_v20 = vld [vmem:[#allocation5 + $0x9f8] sm:$0xff] }
 0x99c   :  { %2604 = vmatprep.subr.mxu1 %v2222_v19  ;;  %6023 = vmatpush3.msra.mxu0 %v2226_v18  ;;  %v2367_v18 = vld [vmem:[#allocation5 + $0xa18] sm:$0xff]  ;;  %v2362_v19 = vld [vmem:[#allocation5 + $0x9f0] sm:$0xff] }
 0x99d   :  { %6012 = vmatprep.mubr.f32.mxu0 %v9360_v37  ;;  %2605 = vmatpush1.msra.mxu1 %v2221_v27  ;;  %v2364_v27 = vld [vmem:[#allocation5 + $0xa00] sm:$0xff] }
 0x99e   :  { %6024 = vmatprep.subr.mxu0 %v2223_v32  ;;  %2456 = vmatprep.mubr.f32.mxu1 %v9287_v40 }
 0x99f   :  { %2606 = vmatprep.subr.mxu1 %v2219_v23  ;;  %6025 = vmatpush3.msra.mxu0 %v2223_v32  ;;  %v2360_v32 = vld [vmem:[#allocation5 + $0x9e0] sm:$0xff]  ;;  %v2359_v23 = vld [vmem:[#allocation5 + $0x9d8] sm:$0xff] }
 0x9a0   :  { %2457 = vmatmul.mubr.f32.gmra.mxu1 %v7842_v7  ;;  %6026 = vmatprep.subr.mxu0 %v2220_v24 }
 0x9a1   :  { %2607 = vmatpush1.msra.mxu1 %v2218_v42  ;;  %6013 = vmatmul.mubr.f32.gmra.mxu0 %v9361_v28  ;;  %v2357_v42 = vld [vmem:[#allocation5 + $0x9c8] sm:$0xff] }
 0x9a2   :  { %2608 = vmatprep.subr.mxu1 %v2216_v26  ;;  %6027 = vmatpush3.msra.mxu0 %v2220_v24  ;;  %v2361_v24 = vld [vmem:[#allocation5 + $0x9e8] sm:$0xff]  ;;  %v2356_v26 = vld [vmem:[#allocation5 + $0x9c0] sm:$0xff] }
 0x9a3   :  { %6015 = vmatprep.mubr.f32.mxu0 %v9362_v3  ;;  %2609 = vmatpush1.msra.mxu1 %v2215_v47  ;;  %v2358_v47 = vld [vmem:[#allocation5 + $0x9d0] sm:$0xff] }
 0x9a4   :  { %6028 = vmatprep.subr.mxu0 %v2217_v48  ;;  %2462 = vmatprep.mubr.f32.mxu1 %v9287_v40 }
 0x9a5   :  { %2610 = vmatprep.subr.mxu1 %v2213_v38  ;;  %6029 = vmatpush3.msra.mxu0 %v2217_v48  ;;  %v2354_v48 = vld [vmem:[#allocation5 + $0x9b0] sm:$0xff]  ;;  %v2355_v38 = vld [vmem:[#allocation5 + $0x9b8] sm:$0xff] }
 0x9a6   :  { %2463 = vmatmul.mubr.f32.gmra.mxu1 %v7764_v1  ;;  %6030 = vmatprep.subr.mxu0 %v2214_v46 }
 0x9a7   :  { %2611 = vmatpush1.msra.mxu1 %v2212_v10  ;;  %6016 = vmatmul.mubr.f32.gmra.mxu0 %v9363_v54  ;;  %v2351_v10 = vld [vmem:[#allocation5 + $0x998] sm:$0xff] }
 0x9a8   :  { %2612 = vmatprep.subr.mxu1 %v2210_v30  ;;  %6031 = vmatpush3.msra.mxu0 %v2214_v46  ;;  %v2353_v46 = vld [vmem:[#allocation5 + $0x9a8] sm:$0xff]  ;;  %v2352_v30 = vld [vmem:[#allocation5 + $0x9a0] sm:$0xff] }
 0x9a9   :  { %2613 = vmatpush1.msra.mxu1 %v2209_v61  ;;  %6032 = vmatprep.subr.mxu0 %v2211_v34  ;;  %v2350_v61 = vld [vmem:[#allocation5 + $0x990] sm:$0xff] }
 0x9aa   :  { %6050 = vmatprep.mubr.f32.mxu0 %v9363_v54  ;;  %2468 = vmatprep.mubr.f32.mxu1 %v9287_v40 }
 0x9ab   :  { %2614 = vmatprep.subr.mxu1 %v2207_v52  ;;  %6033 = vmatpush3.msra.mxu0 %v2211_v34  ;;  %v2348_v34 = vld [vmem:[#allocation5 + $0x980] sm:$0xff]  ;;  %v2349_v52 = vld [vmem:[#allocation5 + $0x988] sm:$0xff] }
 0x9ac   :  { %2469 = vmatmul.mubr.f32.gmra.mxu1 %v9360_v37  ;;  %6034 = vmatprep.subr.mxu0 %v2208_v31 }
 0x9ad   :  { %2615 = vmatpush1.msra.mxu1 %v2206_v50  ;;  %6035 = vmatpush3.msra.mxu0 %v2208_v31  ;;  %v2347_v31 = vld [vmem:[#allocation5 + $0x978] sm:$0xff]  ;;  %v2345_v50 = vld [vmem:[#allocation5 + $0x968] sm:$0xff] }
 0x9ae   :  { %2616 = vmatprep.subr.mxu1 %v2204_v56  ;;  %6036 = vmatprep.subr.mxu0 %v2205_v45  ;;  %v2346_v56 = vld [vmem:[#allocation5 + $0x970] sm:$0xff] }
 0x9af   :  { %2617 = vmatpush1.msra.mxu1 %v2203_v4  ;;  %2474 = vmatprep.mubr.f32.mxu1 %v9287_v40  ;;  %v2342_v4 = vld [vmem:[#allocation5 + $0x950] sm:$0xff] }
 0x9b0   :  { %2618 = vmatprep.subr.mxu1 %v2201_v58  ;;  %6037 = vmatpush3.msra.mxu0 %v2205_v45  ;;  %v2344_v45 = vld [vmem:[#allocation5 + $0x960] sm:$0xff]  ;;  %v2343_v58 = vld [vmem:[#allocation5 + $0x958] sm:$0xff] }
 0x9b1   :  { %2475 = vmatmul.mubr.f32.gmra.mxu1 %v9361_v28  ;;  %6038 = vmatprep.subr.mxu0 %v2202_v35 }
 0x9b2   :  { %2619 = vmatpush1.msra.mxu1 %v2200_v41  ;;  %6039 = vmatpush3.msra.mxu0 %v2202_v35  ;;  %v2341_v35 = vld [vmem:[#allocation5 + $0x948] sm:$0xff]  ;;  %v2339_v41 = vld [vmem:[#allocation5 + $0x938] sm:$0xff] }
 0x9b3   :  { %2620 = vmatprep.subr.mxu1 %v2198_v62  ;;  %6040 = vmatprep.subr.mxu0 %v2199_v6  ;;  %v2340_v62 = vld [vmem:[#allocation5 + $0x940] sm:$0xff] }
 0x9b4   :  { %2621 = vmatpush1.msra.mxu1 %v2197_v8  ;;  %2480 = vmatprep.mubr.f32.mxu1 %v9287_v40  ;;  %v2336_v8 = vld [vmem:[#allocation5 + $0x920] sm:$0xff] }
 0x9b5   :  { %2622 = vmatprep.subr.mxu1 %v2195_v51  ;;  %6041 = vmatpush3.msra.mxu0 %v2199_v6  ;;  %v2338_v6 = vld [vmem:[#allocation5 + $0x930] sm:$0xff]  ;;  %v2337_v51 = vld [vmem:[#allocation5 + $0x928] sm:$0xff] }
 0x9b6   :  { %2481 = vmatmul.mubr.f32.gmra.mxu1 %v9362_v3  ;;  %6042 = vmatprep.subr.mxu0 %v2196_v9 }
 0x9b7   :  { %2623 = vmatpush1.msra.mxu1 %v2194_v21  ;;  %6043 = vmatpush3.msra.mxu0 %v2196_v9  ;;  %v2335_v9 = vld [vmem:[#allocation5 + $0x918] sm:$0xff]  ;;  %v2333_v21 = vld [vmem:[#allocation5 + $0x908] sm:$0xff] }
 0x9b8   :  { %2624 = vmatprep.subr.mxu1 %v2192_v55  ;;  %6044 = vmatprep.subr.mxu0 %v2193_v49  ;;  %v2334_v55 = vld [vmem:[#allocation5 + $0x910] sm:$0xff] }
 0x9b9   :  { %2625 = vmatpush1.msra.mxu1 %v2191_v2  ;;  %2486 = vmatprep.mubr.f32.mxu1 %v9287_v40  ;;  %v2329_v2 = vld [vmem:[#allocation5 + $0x8f0] sm:$0xff] }
 0x9ba   :  { %2626 = vmatprep.subr.mxu1 %v2189_v13  ;;  %6045 = vmatpush3.msra.mxu0 %v2193_v49  ;;  %v2332_v49 = vld [vmem:[#allocation5 + $0x900] sm:$0xff]  ;;  %v2328_v13 = vld [vmem:[#allocation5 + $0x8e8] sm:$0xff] }
 0x9bb   :  { %2487 = vmatmul.mubr.f32.gmra.mxu1 %v9363_v54  ;;  %6046 = vmatprep.subr.mxu0 %v2190_v0 }
 0x9bc   :  { %2627 = vmatpush1.msra.mxu1 %v2188_v44  ;;  %6047 = vmatpush3.msra.mxu0 %v2190_v0  ;;  %v2330_v0 = vld [vmem:[#allocation5 + $0x8f8] sm:$0xff] }
 0x9bd   :  { %2628 = vmatprep.subr.mxu1 %v2186_v22  ;;  %6048 = vmatprep.subr.mxu0 %v2187_v36  ;;  %v2326_v44 = vld [vmem:[#allocation5 + $0x8d8] sm:$0xff]  ;;  %v2325_v22 = vld [vmem:[#allocation5 + $0x8d0] sm:$0xff] }
 0x9be   :  { %2629 = vmatpush1.msra.mxu1 %v2185_v11  ;;  %2662 = vmatprep.mubr.f32.mxu1 %v9287_v40  ;;  %v2323_v11 = vld [vmem:[#allocation5 + $0x8c0] sm:$0xff] }
 0x9bf   :  { %6049 = vmatpush3.msra.mxu0 %v2187_v36  ;;  %2816 = vmatprep.subr.mxu1 %v2378_v12  ;;  %v2327_v36 = vld [vmem:[#allocation5 + $0x8e0] sm:$0xff]  ;;  %v2322_v12 = vld [vmem:[#allocation5 + $0x8b8] sm:$0xff] }
 0x9c0   :  { %2663 = vmatmul.mubr.f32.vlgmr.msra.gmra.mxu1 %v9363_v54  ;;  %6051 = vmatmul.mubr.f32.vlgmr.msra.gmra.mxu0 %v9362_v3 }
 0x9c1   :  { %2817 = vmatpush1.msra.mxu1 %v2377_v15  ;;  %6062 = vmatprep.subr.mxu0 %v2379_v16  ;;  %v2324_v15 = vld [vmem:[#allocation5 + $0x8c8] sm:$0xff] }
 0x9c2   :  { %6053 = vmatprep.mubr.f32.mxu0 %v9361_v28  ;;  %2818 = vmatprep.subr.mxu1 %v2375_v14  ;;  %v2319_v14 = vld [vmem:[#allocation5 + $0x8a0] sm:$0xff] }
 0x9c3   :  { %6063 = vmatpush3.msra.mxu0 %v2379_v16  ;;  %2819 = vmatpush1.msra.mxu1 %v2374_v29  ;;  %v2320_v16 = vld [vmem:[#allocation5 + $0x8a8] sm:$0xff]  ;;  %v2321_v29 = vld [vmem:[#allocation5 + $0x8b0] sm:$0xff] }
 0x9c4   :  { %6064 = vmatprep.subr.mxu0 %v2376_v5  ;;  %2668 = vmatprep.mubr.f32.mxu1 %v9287_v40 }
 0x9c5   :  { %2820 = vmatprep.subr.mxu1 %v2372_v57  ;;  %6065 = vmatpush3.msra.mxu0 %v2376_v5  ;;  %v2317_v5 = vld [vmem:[#allocation5 + $0x890] sm:$0xff]  ;;  %v2316_v57 = vld [vmem:[#allocation5 + $0x888] sm:$0xff] }
 0x9c6   :  { %2669 = vmatmul.mubr.f32.gmra.mxu1 %v9362_v3  ;;  %6054 = vmatmul.mubr.f32.gmra.mxu0 %v9360_v37 }
 0x9c7   :  { %2821 = vmatpush1.msra.mxu1 %v2371_v60  ;;  %6066 = vmatprep.subr.mxu0 %v2373_v53  ;;  %v2318_v60 = vld [vmem:[#allocation5 + $0x898] sm:$0xff] }
 0x9c8   :  { %6056 = vmatprep.mubr.f32.mxu0 %v7764_v1  ;;  %2822 = vmatprep.subr.mxu1 %v2369_v43  ;;  %v2313_v43 = vld [vmem:[#allocation5 + $0x870] sm:$0xff] }
 0x9c9   :  { %6067 = vmatpush3.msra.mxu0 %v2373_v53  ;;  %2823 = vmatpush1.msra.mxu1 %v2368_v63  ;;  %v2314_v53 = vld [vmem:[#allocation5 + $0x878] sm:$0xff]  ;;  %v2315_v63 = vld [vmem:[#allocation5 + $0x880] sm:$0xff] }
 0x9ca   :  { %6068 = vmatprep.subr.mxu0 %v2370_v33  ;;  %2674 = vmatprep.mubr.f32.mxu1 %v9287_v40 }
 0x9cb   :  { %2824 = vmatprep.subr.mxu1 %v2366_v25  ;;  %6069 = vmatpush3.msra.mxu0 %v2370_v33  ;;  %v2311_v33 = vld [vmem:[#allocation5 + $0x860] sm:$0xff]  ;;  %v2310_v25 = vld [vmem:[#allocation5 + $0x858] sm:$0xff] }
 0x9cc   :  { %2675 = vmatmul.mubr.f32.gmra.mxu1 %v9361_v28  ;;  %6057 = vmatmul.mubr.f32.gmra.mxu0 %v7842_v7 }
 0x9cd   :  { %2825 = vmatpush1.msra.mxu1 %v2365_v17  ;;  %6070 = vmatprep.subr.mxu0 %v2367_v18  ;;  %v2312_v17 = vld [vmem:[#allocation5 + $0x868] sm:$0xff] }
 0x9ce   :  { %6059 = vmatprep.mubr.f32.mxu0 %v7928_v59  ;;  %2826 = vmatprep.subr.mxu1 %v2363_v20  ;;  %v2307_v20 = vld [vmem:[#allocation5 + $0x840] sm:$0xff] }
 0x9cf   :  { %6071 = vmatpush3.msra.mxu0 %v2367_v18  ;;  %2827 = vmatpush1.msra.mxu1 %v2362_v19  ;;  %v2308_v18 = vld [vmem:[#allocation5 + $0x848] sm:$0xff]  ;;  %v2309_v19 = vld [vmem:[#allocation5 + $0x850] sm:$0xff] }
 0x9d0   :  { %6072 = vmatprep.subr.mxu0 %v2364_v27  ;;  %2680 = vmatprep.mubr.f32.mxu1 %v9287_v40 }
 0x9d1   :  { %2828 = vmatprep.subr.mxu1 %v2360_v32  ;;  %6073 = vmatpush3.msra.mxu0 %v2364_v27  ;;  %v2305_v27 = vld [vmem:[#allocation5 + $0x830] sm:$0xff]  ;;  %v2306_v32 = vld [vmem:[#allocation5 + $0x838] sm:$0xff] }
 0x9d2   :  { %2681 = vmatmul.mubr.f32.gmra.mxu1 %v9360_v37  ;;  %6060 = vmatmul.mubr.f32.gmra.mxu0 %v7942_v39 }
 0x9d3   :  { %2829 = vmatpush1.msra.mxu1 %v2359_v23  ;;  %6074 = vmatprep.subr.mxu0 %v2361_v24  ;;  %v2304_v23 = vld [vmem:[#allocation5 + $0x828] sm:$0xff] }
 0x9d4   :  { %2830 = vmatprep.subr.mxu1 %v2357_v42  ;;  %6075 = vmatpush3.msra.mxu0 %v2361_v24  ;;  %v2302_v24 = vld [vmem:[#allocation5 + $0x818] sm:$0xff]  ;;  %v2303_v42 = vld [vmem:[#allocation5 + $0x820] sm:$0xff] }
 0x9d5   :  { %6094 = vmatprep.mubr.f32.mxu0 %v7942_v39  ;;  %2831 = vmatpush1.msra.mxu1 %v2356_v26  ;;  %v2301_v26 = vld [vmem:[#allocation5 + $0x810] sm:$0xff] }
 0x9d6   :  { %6076 = vmatprep.subr.mxu0 %v2358_v47  ;;  %2686 = vmatprep.mubr.f32.mxu1 %v9287_v40 }
 0x9d7   :  { %2832 = vmatprep.subr.mxu1 %v2354_v48  ;;  %6077 = vmatpush3.msra.mxu0 %v2358_v47  ;;  %v2299_v47 = vld [vmem:[#allocation5 + $0x800] sm:$0xff]  ;;  %v2300_v48 = vld [vmem:[#allocation5 + $0x808] sm:$0xff] }
 0x9d8   :  { %2687 = vmatmul.mubr.f32.gmra.mxu1 %v7764_v1  ;;  %6078 = vmatprep.subr.mxu0 %v2355_v38 }
 0x9d9   :  { %2833 = vmatpush1.msra.mxu1 %v2353_v46  ;;  %6079 = vmatpush3.msra.mxu0 %v2355_v38  ;;  %v2298_v38 = vld [vmem:[#allocation5 + $0x7f8] sm:$0xff]  ;;  %v2296_v46 = vld [vmem:[#allocation5 + $0x7e8] sm:$0xff] }
 0x9da   :  { %2834 = vmatprep.subr.mxu1 %v2351_v10  ;;  %6080 = vmatprep.subr.mxu0 %v2352_v30  ;;  %v2297_v10 = vld [vmem:[#allocation5 + $0x7f0] sm:$0xff] }
 0x9db   :  { %2835 = vmatpush1.msra.mxu1 %v2350_v61  ;;  %2692 = vmatprep.mubr.f32.mxu1 %v9287_v40  ;;  %v2293_v61 = vld [vmem:[#allocation5 + $0x7d0] sm:$0xff] }
 0x9dc   :  { %2836 = vmatprep.subr.mxu1 %v2348_v34  ;;  %6081 = vmatpush3.msra.mxu0 %v2352_v30  ;;  %v2295_v30 = vld [vmem:[#allocation5 + $0x7e0] sm:$0xff]  ;;  %v2294_v34 = vld [vmem:[#allocation5 + $0x7d8] sm:$0xff] }
 0x9dd   :  { %2693 = vmatmul.mubr.f32.gmra.mxu1 %v7842_v7  ;;  %6082 = vmatprep.subr.mxu0 %v2349_v52 }
 0x9de   :  { %2837 = vmatpush1.msra.mxu1 %v2347_v31  ;;  %6083 = vmatpush3.msra.mxu0 %v2349_v52  ;;  %v2292_v52 = vld [vmem:[#allocation5 + $0x7c8] sm:$0xff]  ;;  %v2290_v31 = vld [vmem:[#allocation5 + $0x7b8] sm:$0xff] }
 0x9df   :  { %2838 = vmatprep.subr.mxu1 %v2345_v50  ;;  %6084 = vmatprep.subr.mxu0 %v2346_v56  ;;  %v2291_v50 = vld [vmem:[#allocation5 + $0x7c0] sm:$0xff] }
 0x9e0   :  { %2839 = vmatpush1.msra.mxu1 %v2344_v45  ;;  %2698 = vmatprep.mubr.f32.mxu1 %v9287_v40  ;;  %v2287_v45 = vld [vmem:[#allocation5 + $0x7a0] sm:$0xff] }
 0x9e1   :  { %2840 = vmatprep.subr.mxu1 %v2342_v4  ;;  %6085 = vmatpush3.msra.mxu0 %v2346_v56  ;;  %v2289_v56 = vld [vmem:[#allocation5 + $0x7b0] sm:$0xff]  ;;  %v2288_v4 = vld [vmem:[#allocation5 + $0x7a8] sm:$0xff] }
 0x9e2   :  { %2699 = vmatmul.mubr.f32.gmra.mxu1 %v7928_v59  ;;  %6086 = vmatprep.subr.mxu0 %v2343_v58 }
 0x9e3   :  { %2841 = vmatpush1.msra.mxu1 %v2341_v35  ;;  %6087 = vmatpush3.msra.mxu0 %v2343_v58  ;;  %v2286_v58 = vld [vmem:[#allocation5 + $0x798] sm:$0xff]  ;;  %v2284_v35 = vld [vmem:[#allocation5 + $0x788] sm:$0xff] }
 0x9e4   :  { %2842 = vmatprep.subr.mxu1 %v2339_v41  ;;  %6088 = vmatprep.subr.mxu0 %v2340_v62  ;;  %v2285_v41 = vld [vmem:[#allocation5 + $0x790] sm:$0xff] }
 0x9e5   :  { %2843 = vmatpush1.msra.mxu1 %v2338_v6  ;;  %2704 = vmatprep.mubr.f32.mxu1 %v9287_v40  ;;  %v8016_v6 = vld [vmem:[#allocation5 + $0xbf0] sm:$0xff] }
 0x9e6   :  { %2844 = vmatprep.subr.mxu1 %v2336_v8  ;;  %6089 = vmatpush3.msra.mxu0 %v2340_v62  ;;  %v2283_v62 = vld [vmem:[#allocation5 + $0x780] sm:$0xff]  ;;  %9364 = vst [vmem:[#allocation30_spill] sm:$0xff] %v8016_v6  ;;  %v8019_v8 = vld [vmem:[#allocation5 + $0xbe8] sm:$0xff] }
 0x9e7   :  { %2705 = vmatmul.mubr.f32.gmra.mxu1 %v7942_v39  ;;  %6090 = vmatprep.subr.mxu0 %v2337_v51  ;;  %9365 = vst [vmem:[#allocation19_spill] sm:$0xff] %v8019_v8 }
 0x9e8   :  { %2845 = vmatpush1.msra.mxu1 %v2335_v9  ;;  %6091 = vmatpush3.msra.mxu0 %v2337_v51  ;;  %v8022_v51 = vld [vmem:[#allocation5 + $0xbd8] sm:$0xff]  ;;  %v8026_v9 = vld [vmem:[#allocation5 + $0xbd0] sm:$0xff] }
 0x9e9   :  { %2846 = vmatprep.subr.mxu1 %v2333_v21  ;;  %6092 = vmatprep.subr.mxu0 %v2334_v55  ;;  %9366 = vst [vmem:[#allocation20_spill] sm:$0xff] %v8022_v51  ;;  %9367 = vst [vmem:[#allocation31_spill] sm:$0xff] %v8026_v9  ;;  %v8030_v21 = vld [vmem:[#allocation5 + $0xbc0] sm:$0xff] }
 0x9ea   :  { %2847 = vmatpush1.msra.mxu1 %v2332_v49  ;;  %2880 = vmatprep.mubr.f32.mxu1 %v9287_v40  ;;  %9368 = vst [vmem:[#allocation21_spill] sm:$0xff] %v8030_v21  ;;  %v8037_v49 = vld [vmem:[#allocation5 + $0xba8] sm:$0xff] }
 0x9eb   :  { %6093 = vmatpush3.msra.mxu0 %v2334_v55  ;;  %3034 = vmatprep.subr.mxu1 %v2329_v2  ;;  %v8034_v55 = vld [vmem:[#allocation5 + $0xbb8] sm:$0xff]  ;;  %9370 = vst [vmem:[#allocation32_spill] sm:$0xff] %v8037_v49  ;;  %v8046_v2 = vld [vmem:[#allocation5 + $0xb90] sm:$0xff] }
 0x9ec   :  { %2881 = vmatmul.mubr.f32.vlgmr.msra.gmra.mxu1 %v7942_v39  ;;  %6095 = vmatmul.mubr.f32.vlgmr.msra.gmra.mxu0 %v7928_v59  ;;  %9369 = vst [vmem:[#allocation22_spill] sm:$0xff] %v8034_v55  ;;  %9372 = vst [vmem:[#allocation24_spill] sm:$0xff] %v8046_v2 }
 0x9ed   :  { %3035 = vmatpush1.msra.mxu1 %v2328_v13  ;;  %6106 = vmatprep.subr.mxu0 %v2330_v0  ;;  %v8050_v13 = vld [vmem:[#allocation5 + $0xb88] sm:$0xff] }
 0x9ee   :  { %6097 = vmatprep.mubr.f32.mxu0 %v7842_v7  ;;  %3036 = vmatprep.subr.mxu1 %v2326_v44  ;;  %9373 = vst [vmem:[#allocation33_spill] sm:$0xff] %v8050_v13  ;;  %v8062_v44 = vld [vmem:[#allocation5 + $0xb60] sm:$0xff] }
 0x9ef   :  { %6107 = vmatpush3.msra.mxu0 %v2330_v0  ;;  %3037 = vmatpush1.msra.mxu1 %v2325_v22  ;;  %v8054_v0 = vld [vmem:[#allocation5 + $0xb78] sm:$0xff]  ;;  %9376 = vst [vmem:[#allocation34_spill] sm:$0xff] %v8062_v44 }
 0x9f0   :  { %6108 = vmatprep.subr.mxu0 %v2327_v36  ;;  %2886 = vmatprep.mubr.f32.mxu1 %v9287_v40  ;;  %9374 = vst [vmem:[#allocation25_spill] sm:$0xff] %v8054_v0  ;;  %v8066_v22 = vld [vmem:[#allocation5 + $0xb58] sm:$0xff] }
 0x9f1   :  { %3038 = vmatprep.subr.mxu1 %v2323_v11  ;;  %6109 = vmatpush3.msra.mxu0 %v2327_v36  ;;  %9377 = vst [vmem:[#allocation12_spill] sm:$0xff] %v8066_v22  ;;  %v8070_v36 = vld [vmem:[#allocation5 + $0xb48] sm:$0xff]  ;;  %v8076_v11 = vld [vmem:[#allocation5 + $0xbf8] sm:$0xff] }
 0x9f2   :  { %2887 = vmatmul.mubr.f32.gmra.mxu1 %v7928_v59  ;;  %6098 = vmatmul.mubr.f32.gmra.mxu0 %v7764_v1  ;;  %9378 = vst [vmem:[#allocation53_spill] sm:$0xff] %v8070_v36  ;;  %9380 = vst [vmem:[#allocation46_spill] sm:$0xff] %v8076_v11 }
 0x9f3   :  { %3039 = vmatpush1.msra.mxu1 %v2322_v12  ;;  %6110 = vmatprep.subr.mxu0 %v2324_v15  ;;  %v8080_v12 = vld [vmem:[#allocation5 + $0xb30] sm:$0xff] }
 0x9f4   :  { %6100 = vmatprep.mubr.f32.mxu0 %v9360_v37  ;;  %3040 = vmatprep.subr.mxu1 %v2320_v16  ;;  %9381 = vst [vmem:[#allocation51_spill] sm:$0xff] %v8080_v12  ;;  %v8087_v16 = vld [vmem:[#allocation5 + $0xb18] sm:$0xff] }
 0x9f5   :  { %6111 = vmatpush3.msra.mxu0 %v2324_v15  ;;  %3041 = vmatpush1.msra.mxu1 %v2319_v14  ;;  %v8084_v15 = vld [vmem:[#allocation5 + $0xb28] sm:$0xff]  ;;  %9383 = vst [vmem:[#allocation48_spill] sm:$0xff] %v8087_v16  ;;  %v8094_v14 = vld [vmem:[#allocation5 + $0xbe0] sm:$0xff] }
 0x9f6   :  { %6112 = vmatprep.subr.mxu0 %v2321_v29  ;;  %2892 = vmatprep.mubr.f32.mxu1 %v9287_v40  ;;  %9382 = vst [vmem:[#allocation52_spill] sm:$0xff] %v8084_v15  ;;  %9385 = vst [vmem:[#allocation50_spill] sm:$0xff] %v8094_v14 }
 0x9f7   :  { %3042 = vmatprep.subr.mxu1 %v2317_v5  ;;  %6113 = vmatpush3.msra.mxu0 %v2321_v29  ;;  %v8098_v29 = vld [vmem:[#allocation5 + $0xb00] sm:$0xff]  ;;  %v8101_v5 = vld [vmem:[#allocation5 + $0xaf8] sm:$0xff] }
 0x9f8   :  { %2893 = vmatmul.mubr.f32.gmra.mxu1 %v7842_v7  ;;  %6101 = vmatmul.mubr.f32.gmra.mxu0 %v9361_v28  ;;  %9386 = vst [vmem:[#allocation43_spill] sm:$0xff] %v8098_v29  ;;  %9387 = vst [vmem:[#allocation14_spill] sm:$0xff] %v8101_v5 }
 0x9f9   :  { %3043 = vmatpush1.msra.mxu1 %v2316_v57  ;;  %6114 = vmatprep.subr.mxu0 %v2318_v60  ;;  %v8105_v57 = vld [vmem:[#allocation5 + $0xae8] sm:$0xff] }
 0x9fa   :  { %6103 = vmatprep.mubr.f32.mxu0 %v9362_v3  ;;  %3044 = vmatprep.subr.mxu1 %v2314_v53  ;;  %9388 = vst [vmem:[#allocation55_spill] sm:$0xff] %v8105_v57  ;;  %v8116_v53 = vld [vmem:[#allocation5 + $0xad0] sm:$0xff] }
 0x9fb   :  { %6115 = vmatpush3.msra.mxu0 %v2318_v60  ;;  %3045 = vmatpush1.msra.mxu1 %v2313_v43  ;;  %v8112_v60 = vld [vmem:[#allocation5 + $0xbc8] sm:$0xff]  ;;  %9391 = vst [vmem:[#allocation44_spill] sm:$0xff] %v8116_v53 }
 0x9fc   :  { %6116 = vmatprep.subr.mxu0 %v2315_v63  ;;  %2898 = vmatprep.mubr.f32.mxu1 %v9287_v40  ;;  %9390 = vst [vmem:[#allocation47_spill] sm:$0xff] %v8112_v60  ;;  %v8119_v43 = vld [vmem:[#allocation5 + $0xac8] sm:$0xff] }
 0x9fd   :  { %3046 = vmatprep.subr.mxu1 %v2311_v33  ;;  %6117 = vmatpush3.msra.mxu0 %v2315_v63  ;;  %9392 = vst [vmem:[#allocation15_spill] sm:$0xff] %v8119_v43  ;;  %v8123_v63 = vld [vmem:[#allocation5 + $0xab8] sm:$0xff]  ;;  %v8130_v33 = vld [vmem:[#allocation5 + $0xbb0] sm:$0xff] }
 0x9fe   :  { %2899 = vmatmul.mubr.f32.gmra.mxu1 %v7764_v1  ;;  %6104 = vmatmul.mubr.f32.gmra.mxu0 %v9363_v54  ;;  %9393 = vst [vmem:[#allocation16_spill] sm:$0xff] %v8123_v63  ;;  %9395 = vst [vmem:[#allocation17_spill] sm:$0xff] %v8130_v33 }
 0x9ff   :  { %3047 = vmatpush1.msra.mxu1 %v2310_v25  ;;  %6118 = vmatprep.subr.mxu0 %v2312_v17  ;;  %v8134_v25 = vld [vmem:[#allocation5 + $0xaa0] sm:$0xff] }
 0xa00   :  { %3048 = vmatprep.subr.mxu1 %v2308_v18  ;;  %6119 = vmatpush3.msra.mxu0 %v2312_v17  ;;  %9396 = vst [vmem:[#allocation18_spill] sm:$0xff] %v8134_v25  ;;  %v8137_v17 = vld [vmem:[#allocation5 + $0xa98] sm:$0xff]  ;;  %v8141_v18 = vld [vmem:[#allocation5 + $0xa88] sm:$0xff] }
 0xa01   :  { %6138 = vmatprep.mubr.f32.mxu0 %v9363_v54  ;;  %3049 = vmatpush1.msra.mxu1 %v2307_v20  ;;  %9397 = vst [vmem:[#allocation35_spill] sm:$0xff] %v8137_v17  ;;  %9398 = vst [vmem:[#allocation41_spill] sm:$0xff] %v8141_v18  ;;  %v8148_v20 = vld [vmem:[#allocation5 + $0xb98] sm:$0xff] }
 0xa02   :  { %6120 = vmatprep.subr.mxu0 %v2309_v19  ;;  %2904 = vmatprep.mubr.f32.mxu1 %v9287_v40  ;;  %9400 = vst [vmem:[#allocation39_spill] sm:$0xff] %v8148_v20 }
 0xa03   :  { %3050 = vmatprep.subr.mxu1 %v2305_v27  ;;  %6121 = vmatpush3.msra.mxu0 %v2309_v19  ;;  %v8154_v19 = vld [vmem:[#allocation5 + $0xb80] sm:$0xff]  ;;  %v8166_v27 = vld [vmem:[#allocation5 + $0xb50] sm:$0xff] }
 0xa04   :  { %2905 = vmatmul.mubr.f32.gmra.mxu1 %v9360_v37  ;;  %6122 = vmatprep.subr.mxu0 %v2306_v32  ;;  %9401 = vst [vmem:[#allocation36_spill] sm:$0xff] %v8154_v19  ;;  %9403 = vst [vmem:[#allocation38_spill] sm:$0xff] %v8166_v27 }
 0xa05   :  { %3051 = vmatpush1.msra.mxu1 %v2304_v23  ;;  %6123 = vmatpush3.msra.mxu0 %v2306_v32  ;;  %v8172_v32 = vld [vmem:[#allocation5 + $0xb38] sm:$0xff]  ;;  %v8178_v23 = vld [vmem:[#allocation5 + $0xb20] sm:$0xff] }
 0xa06   :  { %3052 = vmatprep.subr.mxu1 %v2302_v24  ;;  %6124 = vmatprep.subr.mxu0 %v2303_v42  ;;  %9404 = vst [vmem:[#allocation40_spill] sm:$0xff] %v8172_v32  ;;  %9405 = vst [vmem:[#allocation28_spill] sm:$0xff] %v8178_v23  ;;  %v8184_v24 = vld [vmem:[#allocation5 + $0xb08] sm:$0xff] }
 0xa07   :  { %3053 = vmatpush1.msra.mxu1 %v2301_v26  ;;  %2910 = vmatprep.mubr.f32.mxu1 %v9287_v40  ;;  %9406 = vst [vmem:[#allocation13_spill] sm:$0xff] %v8184_v24  ;;  %v8196_v26 = vld [vmem:[#allocation5 + $0xad8] sm:$0xff] }
 0xa08   :  { %3054 = vmatprep.subr.mxu1 %v2299_v47  ;;  %6125 = vmatpush3.msra.mxu0 %v2303_v42  ;;  %v8190_v42 = vld [vmem:[#allocation5 + $0xaf0] sm:$0xff]  ;;  %9408 = vst [vmem:[#allocation56_spill] sm:$0xff] %v8196_v26  ;;  %v8202_v47 = vld [vmem:[#allocation5 + $0xac0] sm:$0xff] }
 0xa09   :  { %2911 = vmatmul.mubr.f32.gmra.mxu1 %v9361_v28  ;;  %6126 = vmatprep.subr.mxu0 %v2300_v48  ;;  %9407 = vst [vmem:[#allocation27_spill] sm:$0xff] %v8190_v42  ;;  %9409 = vst [vmem:[#allocation57_spill] sm:$0xff] %v8202_v47 }
 0xa0a   :  { %3055 = vmatpush1.msra.mxu1 %v2298_v38  ;;  %6127 = vmatpush3.msra.mxu0 %v2300_v48  ;;  %v8208_v48 = vld [vmem:[#allocation5 + $0xaa8] sm:$0xff]  ;;  %v8214_v38 = vld [vmem:[#allocation5 + $0xa90] sm:$0xff] }
 0xa0b   :  { %3056 = vmatprep.subr.mxu1 %v2296_v46  ;;  %6128 = vmatprep.subr.mxu0 %v2297_v10  ;;  %9410 = vst [vmem:[#allocation58_spill] sm:$0xff] %v8208_v48  ;;  %9411 = vst [vmem:[#allocation59_spill] sm:$0xff] %v8214_v38 }
 0xa0c   :  { %3057 = vmatpush1.msra.mxu1 %v2295_v30  ;;  %2916 = vmatprep.mubr.f32.mxu1 %v9287_v40 }
 0xa0d   :  { %3058 = vmatprep.subr.mxu1 %v2293_v61  ;;  %6129 = vmatpush3.msra.mxu0 %v2297_v10 }
 0xa0e   :  { %2917 = vmatmul.mubr.f32.gmra.mxu1 %v9362_v3  ;;  %6130 = vmatprep.subr.mxu0 %v2294_v34 }
 0xa0f   :  { %3059 = vmatpush1.msra.mxu1 %v2292_v52  ;;  %6131 = vmatpush3.msra.mxu0 %v2294_v34 }
 0xa10   :  { %3060 = vmatprep.subr.mxu1 %v2290_v31  ;;  %6132 = vmatprep.subr.mxu0 %v2291_v50 }
 0xa11   :  { %3061 = vmatpush1.msra.mxu1 %v2289_v56  ;;  %2922 = vmatprep.mubr.f32.mxu1 %v9287_v40 }
 0xa12   :  { %3062 = vmatprep.subr.mxu1 %v2287_v45  ;;  %6133 = vmatpush3.msra.mxu0 %v2291_v50 }
 0xa13   :  { %2923 = vmatmul.mubr.f32.gmra.mxu1 %v9363_v54  ;;  %6134 = vmatprep.subr.mxu0 %v2288_v4 }
 0xa14   :  { %3063 = vmatpush1.msra.mxu1 %v2286_v58  ;;  %6135 = vmatpush3.msra.mxu0 %v2288_v4 }
 0xa15   :  { %3064 = vmatprep.subr.mxu1 %v2284_v35  ;;  %6136 = vmatprep.subr.mxu0 %v2285_v41 }
 0xa16   :  { %3065 = vmatpush1.msra.mxu1 %v2283_v62  ;;  %3098 = vmatprep.mubr.f32.mxu1 %v9287_v40 }
 0xa17   :  { %6137 = vmatpush3.msra.mxu0 %v2285_v41  ;;  %3315 = vmatprep.subr.mxu1 %v8016_v6 }
 0xa18   :  { %3099 = vmatmul.mubr.f32.vlgmr.msra.gmra.mxu1 %v9363_v54  ;;  %6139 = vmatmul.mubr.f32.vlgmr.msra.gmra.mxu0 %v9362_v3  ;;  %v8042_v54 = vld [vmem:[#allocation5 + $0xba0] sm:$0xff] }
 0xa19   :  { %3316 = vmatpush1.msra.mxu1 %v8019_v8  ;;  %6141 = vmatprep.mubr.f32.mxu0 %v9361_v28  ;;  %9371 = vst [vmem:[#allocation23_spill] sm:$0xff] %v8042_v54 }
 0xa1a   :  { %3317 = vmatprep.subr.mxu1 %v8022_v51  ;;  %3104 = vmatprep.mubr.f32.mxu1 %v9287_v40 }
 0xa1b   :  { %3318 = vmatpush1.msra.mxu1 %v8026_v9  ;;  %6150 = vmatprep.subr.mxu0 %v9287_v40 }
 0xa1c   :  { %3319 = vmatprep.subr.mxu1 %v8030_v21  ;;  %3105 = vmatmul.mubr.f32.gmra.mxu1 %v9362_v3  ;;  %v8058_v3 = vld [vmem:[#allocation5 + $0xb70] sm:$0xff] }
 0xa1d   :  { %6142 = vmatmul.mubr.f32.gmra.mxu0 %v9360_v37  ;;  %3320 = vmatpush1.msra.mxu1 %v8034_v55  ;;  %9375 = vst [vmem:[#allocation26_spill] sm:$0xff] %v8058_v3 }
 0xa1e   :  { %6144 = vmatprep.mubr.f32.mxu0 %v7764_v1  ;;  %3321 = vmatprep.subr.mxu1 %v8037_v49 }
 0xa1f   :  { %3322 = vmatpush1.msra.mxu1 %v8042_v54  ;;  %3110 = vmatprep.mubr.f32.mxu1 %v9287_v40 }
 0xa20   :  { %3323 = vmatprep.subr.mxu1 %v8046_v2  ;;  %3111 = vmatmul.mubr.f32.gmra.mxu1 %v9361_v28  ;;  %v8074_v28 = vld [vmem:[#allocation5 + $0xb40] sm:$0xff] }
 0xa21   :  { %6145 = vmatmul.mubr.f32.gmra.mxu0 %v7842_v7  ;;  %3324 = vmatpush1.msra.mxu1 %v8050_v13  ;;  %9379 = vst [vmem:[#allocation54_spill] sm:$0xff] %v8074_v28 }
 0xa22   :  { %6147 = vmatprep.mubr.f32.mxu0 %v7928_v59  ;;  %3325 = vmatprep.subr.mxu1 %v8054_v0 }
 0xa23   :  { %3326 = vmatpush1.msra.mxu1 %v8058_v3  ;;  %3116 = vmatprep.mubr.f32.mxu1 %v9287_v40 }
 0xa24   :  { %3327 = vmatprep.subr.mxu1 %v8062_v44  ;;  %3117 = vmatmul.mubr.f32.gmra.mxu1 %v9360_v37  ;;  %v8092_v37 = vld [vmem:[#allocation5 + $0xb10] sm:$0xff] }
 0xa25   :  { %6148 = vmatmul.mubr.f32.gmra.mxu0 %v7942_v39  ;;  %3328 = vmatpush1.msra.mxu1 %v8066_v22  ;;  %9384 = vst [vmem:[#allocation49_spill] sm:$0xff] %v8092_v37 }
 0xa26   :  { %3329 = vmatprep.subr.mxu1 %v8070_v36  ;;  %3122 = vmatprep.mubr.f32.mxu1 %v9287_v40 }
 0xa27   :  { %3330 = vmatpush1.msra.mxu1 %v8074_v28  ;;  %6151 = vmatpush3.msra.mxu0 %v8076_v11 }
 0xa28   :  { %3331 = vmatprep.subr.mxu1 %v8080_v12  ;;  %3123 = vmatmul.mubr.f32.gmra.mxu1 %v7764_v1  ;;  %v8110_v1 = vld [vmem:[#allocation5 + $0xae0] sm:$0xff] }
 0xa29   :  { %3332 = vmatpush1.msra.mxu1 %v8084_v15  ;;  %3128 = vmatprep.mubr.f32.mxu1 %v9287_v40  ;;  %9389 = vst [vmem:[#allocation45_spill] sm:$0xff] %v8110_v1 }
 0xa2a   :  { %3333 = vmatprep.subr.mxu1 %v8087_v16  ;;  %6152 = vmatprep.subr.mxu0 %v9287_v40 }
 0xa2b   :  { %3334 = vmatpush1.msra.mxu1 %v8092_v37  ;;  %6153 = vmatpush3.msra.mxu0 %v8094_v14 }
 0xa2c   :  { %3335 = vmatprep.subr.mxu1 %v8098_v29  ;;  %3129 = vmatmul.mubr.f32.gmra.mxu1 %v7842_v7  ;;  %v8128_v7 = vld [vmem:[#allocation5 + $0xab0] sm:$0xff] }
 0xa2d   :  { %3336 = vmatpush1.msra.mxu1 %v8101_v5  ;;  %3134 = vmatprep.mubr.f32.mxu1 %v9287_v40  ;;  %9394 = vst [vmem:[#allocation29_spill] sm:$0xff] %v8128_v7 }
 0xa2e   :  { %3337 = vmatprep.subr.mxu1 %v8105_v57  ;;  %6154 = vmatprep.subr.mxu0 %v9287_v40 }
 0xa2f   :  { %3338 = vmatpush1.msra.mxu1 %v8110_v1  ;;  %6155 = vmatpush3.msra.mxu0 %v8112_v60 }
 0xa30   :  { %3339 = vmatprep.subr.mxu1 %v8116_v53  ;;  %3135 = vmatmul.mubr.f32.gmra.mxu1 %v7928_v59  ;;  %v8146_v59 = vld [vmem:[#allocation5 + $0xa80] sm:$0xff] }
 0xa31   :  { %3340 = vmatpush1.msra.mxu1 %v8119_v43  ;;  %3140 = vmatprep.mubr.f32.mxu1 %v9287_v40  ;;  %9399 = vst [vmem:[#allocation42_spill] sm:$0xff] %v8146_v59 }
 0xa32   :  { %3341 = vmatprep.subr.mxu1 %v8123_v63  ;;  %6156 = vmatprep.subr.mxu0 %v9287_v40 }
 0xa33   :  { %3342 = vmatpush1.msra.mxu1 %v8128_v7  ;;  %6157 = vmatpush3.msra.mxu0 %v8130_v33 }
 0xa34   :  { %3343 = vmatprep.subr.mxu1 %v8134_v25  ;;  %3141 = vmatmul.mubr.f32.gmra.mxu1 %v7942_v39  ;;  %v8160_v39 = vld [vmem:[#allocation5 + $0xb68] sm:$0xff] }
 0xa35   :  { %3344 = vmatpush1.msra.mxu1 %v8137_v17  ;;  %3379 = vmatprep.mubr.f32.mxu1 %v9287_v40  ;;  %9402 = vst [vmem:[#allocation37_spill] sm:$0xff] %v8160_v39 }
 0xa36   :  { %3345 = vmatprep.subr.mxu1 %v8141_v18  ;;  %6158 = vmatprep.subr.mxu0 %v9287_v40 }
 0xa37   :  { %3346 = vmatpush1.msra.mxu1 %v8146_v59  ;;  %6159 = vmatpush3.msra.mxu0 %v8148_v20 }
 0xa38   :  { %3380 = vmatmul.mubr.f32.vlgmr.msra.gmra.mxu1 %v9287_v40  ;;  %6160 = vmatprep.subr.mxu0 %v9287_v40 }
 0xa39   :  { %6161 = vmatpush3.msra.mxu0 %v8154_v19  ;;  %6182 = vmatprep.mubr.msk.f32.mxu0 %vm6879_vm9, %v9287_v40 }
 0xa3a   :  { %6162 = vmatprep.subr.mxu0 %v9287_v40  ;;  %3483 = vmatprep.subr.mxu1 %v8016_v6 }
 0xa3b   :  { %6163 = vmatpush3.msra.mxu0 %v8160_v39  ;;  %3484 = vmatpush1.msra.mxu1 %v8019_v8 }
 0xa3c   :  { %6164 = vmatprep.subr.mxu0 %v9287_v40  ;;  %3485 = vmatprep.subr.mxu1 %v8022_v51 }
 0xa3d   :  { %6165 = vmatpush3.msra.mxu0 %v8166_v27  ;;  %3486 = vmatpush1.msra.mxu1 %v8026_v9 }
 0xa3e   :  { %6166 = vmatprep.subr.mxu0 %v9287_v40  ;;  %3487 = vmatprep.subr.mxu1 %v8030_v21 }
 0xa3f   :  { %6167 = vmatpush3.msra.mxu0 %v8172_v32  ;;  %3488 = vmatpush1.msra.mxu1 %v8034_v55 }
 0xa40   :  { %6168 = vmatprep.subr.mxu0 %v9287_v40  ;;  %3489 = vmatprep.subr.mxu1 %v8037_v49 }
 0xa41   :  { %6169 = vmatpush3.msra.mxu0 %v8178_v23  ;;  %3490 = vmatpush1.msra.mxu1 %v8042_v54  ;;  %v8336_v54 = vld [vmem:[#allocation7 + $0x40] sm:$0xff] }
 0xa42   :  { %6170 = vmatprep.subr.mxu0 %v9287_v40  ;;  %3491 = vmatprep.subr.mxu1 %v8046_v2 }
 0xa43   :  { %6171 = vmatpush3.msra.mxu0 %v8184_v24  ;;  %3492 = vmatpush1.msra.mxu1 %v8050_v13 }
 0xa44   :  { %6172 = vmatprep.subr.mxu0 %v9287_v40  ;;  %3493 = vmatprep.subr.mxu1 %v8054_v0 }
 0xa45   :  { %6173 = vmatpush3.msra.mxu0 %v8190_v42  ;;  %3494 = vmatpush1.msra.mxu1 %v8058_v3 }
 0xa46   :  { %6174 = vmatprep.subr.mxu0 %v9287_v40  ;;  %3495 = vmatprep.subr.mxu1 %v8062_v44 }
 0xa47   :  { %6175 = vmatpush3.msra.mxu0 %v8196_v26  ;;  %3496 = vmatpush1.msra.mxu1 %v8066_v22 }
 0xa48   :  { %6176 = vmatprep.subr.mxu0 %v9287_v40  ;;  %3497 = vmatprep.subr.mxu1 %v8070_v36 }
 0xa49   :  { %6177 = vmatpush3.msra.mxu0 %v8202_v47  ;;  %3498 = vmatpush1.msra.mxu1 %v8074_v28 }
 0xa4a   :  { %6178 = vmatprep.subr.mxu0 %v9287_v40  ;;  %3499 = vmatprep.subr.mxu1 %v8080_v12 }
 0xa4b   :  { %6179 = vmatpush3.msra.mxu0 %v8208_v48  ;;  %3500 = vmatpush1.msra.mxu1 %v8084_v15 }
 0xa4c   :  { %6180 = vmatprep.subr.mxu0 %v9287_v40  ;;  %3501 = vmatprep.subr.mxu1 %v8087_v16 }
 0xa4d   :  { %6181 = vmatpush3.msra.mxu0 %v8214_v38  ;;  %3502 = vmatpush1.msra.mxu1 %v8092_v37 }
 0xa4e   :  { %6183 = vmatmul.mubr.f32.vlgmr.msra.gmra.mxu0 %v9287_v40  ;;  %6185 = vmatprep.subr.mxu0 %v9287_v40 }
 0xa4f   :  { %6186 = vmatpush3.msra.mxu0 %v8076_v11  ;;  %3503 = vmatprep.subr.mxu1 %v8098_v29  ;;  %v8340_v11 = vld [vmem:[#allocation7 + $0x38] sm:$0xff] }
 0xa50   :  { %6187 = vmatprep.subr.mxu0 %v9287_v40  ;;  %3504 = vmatpush1.msra.mxu1 %v8101_v5 }
 0xa51   :  { %6188 = vmatpush3.msra.mxu0 %v8094_v14  ;;  %3505 = vmatprep.subr.mxu1 %v8105_v57 }
 0xa52   :  { %6189 = vmatprep.subr.mxu0 %v9287_v40  ;;  %3506 = vmatpush1.msra.mxu1 %v8110_v1 }
 0xa53   :  { %6190 = vmatpush3.msra.mxu0 %v8112_v60  ;;  %3507 = vmatprep.subr.mxu1 %v8116_v53 }
 0xa54   :  { %v8235_v46 = vpop.f32.mrf.mxu1  ;;  %6191 = vmatprep.subr.mxu0 %v9287_v40  ;;  %3508 = vmatpush1.msra.mxu1 %v8119_v43 }
 0xa55   :  { %6192 = vmatpush3.msra.mxu0 %v8130_v33  ;;  %3509 = vmatprep.subr.mxu1 %v8123_v63  ;;  %v6008_v52 = vpop.f32.mrf.mxu0 }
 0xa56   :  { %v2448_v10 = vpop.f32.mrf.mxu1  ;;  %6193 = vmatprep.subr.mxu0 %v9287_v40  ;;  %3510 = vmatpush1.msra.mxu1 %v8128_v7 }
 0xa57   :  { %6194 = vmatpush3.msra.mxu0 %v8148_v20  ;;  %3511 = vmatprep.subr.mxu1 %v8134_v25  ;;  %v8266_v50 = vpop.f32.mrf.mxu0 }
 0xa58   :  { %6195 = vmatprep.subr.mxu0 %v9287_v40  ;;  %3512 = vmatpush1.msra.mxu1 %v8137_v17  ;;  %9412 = vst [vmem:[#allocation60_spill] sm:$0xff] %v8266_v50 }
 0xa59   :  { %6196 = vmatpush3.msra.mxu0 %v8154_v19  ;;  %3513 = vmatprep.subr.mxu1 %v8141_v18 }
 0xa5a   :  { %v2452_v30 = vpop.f32.mrf.mxu1  ;;  %6197 = vmatprep.subr.mxu0 %v9287_v40  ;;  %3514 = vmatpush1.msra.mxu1 %v8146_v59 }
 0xa5b   :  { %6198 = vmatpush3.msra.mxu0 %v8160_v39  ;;  %3547 = vmatprep.mubr.f32.mxu1 %v9287_v40  ;;  %v6011_v4 = vpop.f32.mrf.mxu0 }
 0xa5c   :  { %v2454_v61 = vpop.f32.mrf.mxu1  ;;  %6199 = vmatprep.subr.mxu0 %v9287_v40  ;;  %6217 = vmatprep.mubr.msk.f32.mxu0 %vm6879_vm9, %v9287_v40 }
 0xa5d   :  { %6200 = vmatpush3.msra.mxu0 %v8166_v27  ;;  %3651 = vmatprep.subr.mxu1 %v8016_v6  ;;  %v2569_v35 = vpop.f32.mrf.mxu0 }
 0xa5e   :  { %6201 = vmatprep.subr.mxu0 %v9287_v40 }
 0xa5f   :  { %6202 = vmatpush3.msra.mxu0 %v8172_v32 }
 0xa60   :  { %v2458_v34 = vpop.f32.mrf.mxu1  ;;  %6203 = vmatprep.subr.mxu0 %v9287_v40 }
 0xa61   :  { %6204 = vmatpush3.msra.mxu0 %v8178_v23  ;;  %v6014_v6 = vpop.f32.mrf.mxu0 }
 0xa62   :  { %v2460_v31 = vpop.f32.mrf.mxu1  ;;  %6205 = vmatprep.subr.mxu0 %v9287_v40 }
 0xa63   :  { %6206 = vmatpush3.msra.mxu0 %v8184_v24  ;;  %v2579_v18 = vpop.f32.mrf.mxu0 }
 0xa64   :  { %6207 = vmatprep.subr.mxu0 %v9287_v40 }
 0xa65   :  { %6208 = vmatpush3.msra.mxu0 %v8190_v42 }
 0xa66   :  { %v2464_v56 = vpop.f32.mrf.mxu1  ;;  %6209 = vmatprep.subr.mxu0 %v9287_v40 }
 0xa67   :  { %6210 = vmatpush3.msra.mxu0 %v8196_v26 }
 0xa68   :  { %v2466_v45 = vpop.f32.mrf.mxu1  ;;  %6211 = vmatprep.subr.mxu0 %v9287_v40 }
 0xa69   :  { %6212 = vmatpush3.msra.mxu0 %v8202_v47  ;;  %v6017_v47 = vpop.f32.mrf.mxu0 }
 0xa6a   :  { %6213 = vmatprep.subr.mxu0 %v9287_v40 }
 0xa6b   :  { %6214 = vmatpush3.msra.mxu0 %v8208_v48  ;;  %v2589_v26 = vpop.f32.mrf.mxu0 }
 0xa6c   :  { %v2470_v58 = vpop.f32.mrf.mxu1  ;;  %6215 = vmatprep.subr.mxu0 %v9287_v40 }
 0xa6d   :  { %6216 = vmatpush3.msra.mxu0 %v8214_v38 }
 0xa6e   :  { %v2472_v41 = vpop.f32.mrf.mxu1  ;;  %6220 = vmatprep.subr.mxu0 %v9287_v40  ;;  %v8338_v40 = vld [vmem:[#allocation7 + $0x30] sm:$0xff] }
 0xa71   :  { %v2476_v62 = vpop.f32.mrf.mxu1 }
 0xa73   :  { %v2478_v59 = vpop.f32.mrf.mxu1 }
 0xa76   :  { %v2482_v17 = vpop.f32.mrf.mxu1 }
 0xa78   :  { %v2484_v25 = vpop.f32.mrf.mxu1 }
 0xa7b   :  { %v2488_v7 = vpop.f32.mrf.mxu1 }
 0xa7d   :  { %v2490_v63 = vpop.f32.mrf.mxu1 }
 0xa80   :  { %v2664_v48 = vpop.f32.mrf.mxu1  ;;  %v6052_v43 = vpop.f32.mrf.mxu0 }
 0xa81   :  { %v8278_v53 = vadd.f32 %v2664_v48, %v8235_v46  ;;  %v8280_v38 = vadd.f32 %v6052_v43, %v6008_v52 }
 0xa82   :  { %v2666_v42 = vpop.f32.mrf.mxu1  ;;  %v8282_v1 = vpop.f32.mrf.mxu0 }
 0xa83   :  { %9413 = vst [vmem:[#allocation61_spill] sm:$0xff] %v8282_v1  ;;  %v8284_v57 = vadd.f32 %v2666_v42, %v2448_v10 }
 0xa86   :  { %v2670_v24 = vpop.f32.mrf.mxu1  ;;  %v6055_v5 = vpop.f32.mrf.mxu0 }
 0xa87   :  { %v8286_v29 = vadd.f32 %v2670_v24, %v2452_v30  ;;  %v8288_v23 = vadd.f32 %v6055_v5, %v6011_v4 }
 0xa88   :  { %v2672_v37 = vpop.f32.mrf.mxu1  ;;  %v2787_v16 = vpop.f32.mrf.mxu0 }
 0xa89   :  { %v8290_v32 = vadd.f32 %v2672_v37, %v2454_v61  ;;  %v8292_v15 = vadd.f32 %v2787_v16, %v2569_v35 }
 0xa8c   :  { %v2676_v48 = vpop.f32.mrf.mxu1  ;;  %v6058_v43 = vpop.f32.mrf.mxu0 }
 0xa8d   :  { %v8294_v46 = vadd.f32 %v2676_v48, %v2458_v34  ;;  %v8296_v52 = vadd.f32 %v6058_v43, %v6014_v6 }
 0xa8e   :  { %v2678_v42 = vpop.f32.mrf.mxu1  ;;  %v2797_v10 = vpop.f32.mrf.mxu0 }
 0xa8f   :  { %v8298_v12 = vadd.f32 %v2678_v42, %v2460_v31  ;;  %v8300_v24 = vadd.f32 %v2797_v10, %v2579_v18 }
 0xa92   :  { %v2682_v5 = vpop.f32.mrf.mxu1  ;;  %v6061_v30 = vpop.f32.mrf.mxu0 }
 0xa93   :  { %v8302_v4 = vadd.f32 %v2682_v5, %v2464_v56  ;;  %v2813_v37 = vadd.f32 %v6061_v30, %v6017_v47 }
 0xa94   :  { %v2684_v61 = vpop.f32.mrf.mxu1  ;;  %v2807_v16 = vpop.f32.mrf.mxu0 }
 0xa95   :  { %v8304_v35 = vadd.f32 %v2684_v61, %v2466_v45  ;;  %v2808_v27 = vadd.f32 %v2807_v16, %v2589_v26 }
 0xa98   :  { %v2688_v34 = vpop.f32.mrf.mxu1 }
 0xa99   :  { %v8306_v48 = vadd.f32 %v2688_v34, %v2470_v58 }
 0xa9a   :  { %v2690_v6 = vpop.f32.mrf.mxu1 }
 0xa9b   :  { %v8308_v43 = vadd.f32 %v2690_v6, %v2472_v41 }
 0xa9d   :  { %v2694_v31 = vpop.f32.mrf.mxu1 }
 0xa9e   :  { %v8310_v42 = vadd.f32 %v2694_v31, %v2476_v62 }
 0xa9f   :  { %v2696_v18 = vpop.f32.mrf.mxu1 }
 0xaa0   :  { %v8312_v10 = vadd.f32 %v2696_v18, %v2478_v59 }
 0xaa2   :  { %v2700_v56 = vpop.f32.mrf.mxu1 }
 0xaa3   :  { %v2701_v5 = vadd.f32 %v2700_v56, %v2482_v17 }
 0xaa4   :  { %v2702_v47 = vpop.f32.mrf.mxu1 }
 0xaa5   :  { %v2703_v30 = vadd.f32 %v2702_v47, %v2484_v25 }
 0xaa7   :  { %v2706_v28 = vpop.f32.mrf.mxu1 }
 0xaa8   :  { %v2707_v45 = vadd.f32 %v2706_v28, %v2488_v7 }
 0xaa9   :  { %v2708_v61 = vpop.f32.mrf.mxu1 }
 0xaaa   :  { %v2709_v26 = vadd.f32 %v2708_v61, %v2490_v63 }
 0xaac   :  { %v2882_v16 = vpop.f32.mrf.mxu1  ;;  %v6096_v6 = vpop.f32.mrf.mxu0 }
 0xaae   :  { %v2884_v58 = vpop.f32.mrf.mxu1  ;;  %v2995_v62 = vpop.f32.mrf.mxu0 }
 0xab2   :  { %v2888_v34 = vpop.f32.mrf.mxu1  ;;  %v6099_v18 = vpop.f32.mrf.mxu0 }
 0xab4   :  { %v2890_v36 = vpop.f32.mrf.mxu1  ;;  %v3005_v25 = vpop.f32.mrf.mxu0 }
 0xab8   :  { %v2894_v41 = vpop.f32.mrf.mxu1  ;;  %v6102_v63 = vpop.f32.mrf.mxu0 }
 0xaba   :  { %v2896_v39 = vpop.f32.mrf.mxu1  ;;  %v3015_v47 = vpop.f32.mrf.mxu0 }
 0xabe   :  { %v8314_v31 = vpop.f32.mrf.mxu1  ;;  %v8330_v44 = vpop.f32.mrf.mxu0 }
 0xabf   :  { %9414 = vst [vmem:[#allocation62_spill] sm:$0xff] %v8330_v44 }
 0xac0   :  { %v8316_v59 = vpop.f32.mrf.mxu1  ;;  %v3025_v0 = vpop.f32.mrf.mxu0 }
 0xac4   :  { %v8318_v17 = vpop.f32.mrf.mxu1 }
 0xac6   :  { %v8320_v56 = vpop.f32.mrf.mxu1 }
 0xac9   :  { %v8322_v28 = vpop.f32.mrf.mxu1 }
 0xacb   :  { %v8324_v7 = vpop.f32.mrf.mxu1 }
 0xace   :  { %v8326_v61 = vpop.f32.mrf.mxu1 }
 0xad0   :  { %v8328_v22 = vpop.f32.mrf.mxu1 }
 0xad3   :  { %v8332_v19 = vpop.f32.mrf.mxu1 }
 0xad5   :  { %v8334_v3 = vpop.f32.mrf.mxu1 }
 0xad8   :  { %v3100_v20 = vpop.f32.mrf.mxu1  ;;  %v6140_v13 = vpop.f32.mrf.mxu0 }
 0xad9   :  { %v3101_v2 = vadd.f32 %v3100_v20, %v2882_v16  ;;  %v3219_v33 = vadd.f32 %v6140_v13, %v6096_v6 }
 0xada   :  { %v3102_v49 = vpop.f32.mrf.mxu1  ;;  %v3213_v60 = vpop.f32.mrf.mxu0 }
 0xadb   :  { %v4485_v55 = vadd.f32 %v3101_v2, %v2707_v45  ;;  %v4319_v21 = vadd.f32 %v3219_v33, %v2808_v27  ;;  %v3103_v14 = vadd.f32 %v3102_v49, %v2884_v58  ;;  %v3214_v9 = vadd.f32 %v3213_v60, %v2995_v62 }
 0xadc   :  { %v3106_v51 = vpop.f32.mrf.mxu1 }
 0xadd   :  { %v8343_v8 = vadd.f32 %v4319_v21, %v8336_v54  ;;  %v4486_v1 = vadd.f32 %v3103_v14, %v2709_v26  ;;  %v4487_v50 = vadd.f32 %v3214_v9, %v2813_v37  ;;  %v3107_v20 = vadd.f32 %v3106_v51, %v2888_v34  ;;  %v6143_v13 = vpop.f32.mrf.mxu0 }
 0xade   :  { %v3229_v16 = vadd.f32 %v6143_v13, %v6099_v18  ;;  %v3108_v6 = vpop.f32.mrf.mxu1  ;;  %v8346_v44 = vadd.f32 %v4485_v55, %v8338_v40 }
 0xadf   :  { %9415 = vst [vmem:[#allocation63_spill] sm:$0xff] %v8343_v8  ;;  %v8349_v49 = vadd.f32 %v4487_v50, %v8336_v54  ;;  %v4317_v2 = vadd.f32 %v3107_v20, %v2701_v5  ;;  %v3109_v60 = vadd.f32 %v3108_v6, %v2890_v36  ;;  %v3223_v33 = vpop.f32.mrf.mxu0  ;;  %v8352_v27 = vadd.f32 %v4486_v1, %v8340_v11 }
 0xae0   :  { %9416 = vst [vmem:[#allocation64_spill] sm:$0xff] %v8346_v44  ;;  %v3983_v21 = vadd.f32 %v3229_v16, %v8300_v24  ;;  %v3224_v14 = vadd.f32 %v3223_v33, %v3005_v25  ;;  %v3112_v9 = vpop.f32.mrf.mxu1 }
 0xae1   :  { %9417 = vst [vmem:[#allocation65_spill] sm:$0xff] %v8349_v49  ;;  %9418 = vst [vmem:[#allocation66_spill] sm:$0xff] %v8352_v27  ;;  %v4318_v51 = vadd.f32 %v3109_v60, %v2703_v30  ;;  %v3113_v37 = vadd.f32 %v3112_v9, %v2894_v41  ;;  %v6146_v45 = vpop.f32.mrf.mxu0  ;;  %v8356_v26 = vadd.f32 %v4317_v2, %v8338_v40 }
 0xae2   :  { %v8359_v55 = vadd.f32 %v3983_v21, %v8336_v54  ;;  %v4151_v50 = vadd.f32 %v3224_v14, %v8296_v52  ;;  %v3239_v36 = vadd.f32 %v6146_v45, %v6102_v63  ;;  %v3114_v5 = vpop.f32.mrf.mxu1 }
 0xae3   :  { %9419 = vst [vmem:[#allocation67_spill] sm:$0xff] %v8356_v26  ;;  %v4149_v1 = vadd.f32 %v3113_v37, %v8310_v42  ;;  %v3115_v58 = vadd.f32 %v3114_v5, %v2896_v39  ;;  %v3233_v34 = vpop.f32.mrf.mxu0  ;;  %v8364_v24 = vadd.f32 %v4318_v51, %v8340_v11 }
 0xae4   :  { %9420 = vst [vmem:[#allocation68_spill] sm:$0xff] %v8359_v55  ;;  %v8367_v30 = vadd.f32 %v4151_v50, %v8336_v54  ;;  %v3647_v41 = vadd.f32 %v3239_v36, %v8292_v15  ;;  %v3234_v62 = vadd.f32 %v3233_v34, %v3015_v47  ;;  %v3118_v18 = vpop.f32.mrf.mxu1 }
 0xae5   :  { %9421 = vst [vmem:[#allocation69_spill] sm:$0xff] %v8364_v24  ;;  %v4150_v25 = vadd.f32 %v3115_v58, %v8312_v10  ;;  %v3119_v52 = vadd.f32 %v3118_v18, %v8314_v31  ;;  %v8372_v63 = vpop.f32.mrf.mxu0  ;;  %v8375_v42 = vadd.f32 %v4149_v1, %v8338_v40 }
 0xae6   :  { %9422 = vst [vmem:[#allocation70_spill] sm:$0xff] %v8367_v30  ;;  %v8378_v39 = vadd.f32 %v3647_v41, %v8336_v54  ;;  %v3815_v20 = vadd.f32 %v3234_v62, %v8288_v23  ;;  %v3120_v13 = vpop.f32.mrf.mxu1  ;;  %v8428_v62 = vld [vmem:[#allocation7 + $0x48] sm:$0xff] }
 0xae7   :  { %9423 = vst [vmem:[#allocation71_spill] sm:$0xff] %v8375_v42  ;;  %v3981_v16 = vadd.f32 %v3119_v52, %v8306_v48  ;;  %v3121_v15 = vadd.f32 %v3120_v13, %v8316_v59  ;;  %v3243_v47 = vpop.f32.mrf.mxu0  ;;  %v8384_v10 = vadd.f32 %v4150_v25, %v8340_v11  ;;  %9427 = vst [vmem:[#allocation75_spill] sm:$0xff] %v8428_v62 }
 0xae8   :  { %v8387_v31 = vadd.f32 %v3815_v20, %v8336_v54  ;;  %v3244_v6 = vadd.f32 %v3243_v47, %v3025_v0  ;;  %v3124_v2 = vpop.f32.mrf.mxu1  ;;  %v8438_v20 = vld [vmem:[#allocation7 + $0x50] sm:$0xff] }
 0xae9   :  { %9424 = vst [vmem:[#allocation72_spill] sm:$0xff] %v8384_v10  ;;  %v3982_v60 = vadd.f32 %v3121_v15, %v8308_v43  ;;  %v3125_v33 = vadd.f32 %v3124_v2, %v8318_v17  ;;  %v8392_v23 = vadd.f32 %v3981_v16, %v8338_v40 }
 0xaea   :  { %v3479_v48 = vadd.f32 %v3244_v6, %v8280_v38  ;;  %v3126_v21 = vpop.f32.mrf.mxu1 }
 0xaeb   :  { %9425 = vst [vmem:[#allocation73_spill] sm:$0xff] %v8392_v23  ;;  %v3813_v59 = vadd.f32 %v3125_v33, %v8302_v4  ;;  %v3127_v14 = vadd.f32 %v3126_v21, %v8320_v56  ;;  %v8398_v9 = vadd.f32 %v3982_v60, %v8340_v11  ;;  %v9428_v33 = vld [vmem:[#allocation62_spill] sm:$0xff] }
 0xaec   :  { %v8401_v0 = vadd.f32 %v3479_v48, %v8336_v54  ;;  %v3130_v51 = vpop.f32.mrf.mxu1  ;;  %v3249_v48 = vadd.f32 %v8372_v63, %v9428_v33  ;;  %v9453_v33 = vld [vmem:[#allocation53_spill] sm:$0xff] }
 0xaed   :  { %9426 = vst [vmem:[#allocation74_spill] sm:$0xff] %v8398_v9  ;;  %v3814_v43 = vadd.f32 %v3127_v14, %v8304_v35  ;;  %v3131_v17 = vadd.f32 %v3130_v51, %v8322_v28  ;;  %v8406_v37 = vadd.f32 %v3813_v59, %v8338_v40  ;;  %v8444_v59 = vld [vmem:[#allocation7 + $0x58] sm:$0xff]  ;;  %v9429_v14 = vld [vmem:[#allocation60_spill] sm:$0xff]  ;;  %v9430_v51 = vld [vmem:[#allocation61_spill] sm:$0xff] }
 0xaee   :  { %v3132_v38 = vpop.f32.mrf.mxu1 }
 0xaef   :  { %v3645_v45 = vadd.f32 %v3131_v17, %v8294_v46  ;;  %v3133_v4 = vadd.f32 %v3132_v38, %v8324_v7  ;;  %v8411_v56 = vadd.f32 %v3814_v43, %v8340_v11 }
 0xaf0   :  { %v3136_v50 = vpop.f32.mrf.mxu1 }
 0xaf1   :  { %v3646_v36 = vadd.f32 %v3133_v4, %v8298_v12  ;;  %v3137_v5 = vadd.f32 %v3136_v50, %v8326_v61  ;;  %v8416_v35 = vadd.f32 %v3645_v45, %v8338_v40 }
 0xaf2   :  { %v3138_v28 = vpop.f32.mrf.mxu1 }
 0xaf3   :  { %v3477_v1 = vadd.f32 %v3137_v5, %v8286_v29  ;;  %v3139_v58 = vadd.f32 %v3138_v28, %v8328_v22  ;;  %v8421_v46 = vadd.f32 %v3646_v36, %v8340_v11 }
 0xaf4   :  { %v3142_v7 = vpop.f32.mrf.mxu1 }
 0xaf5   :  { %v3478_v34 = vadd.f32 %v3139_v58, %v8290_v32  ;;  %v3143_v41 = vadd.f32 %v3142_v7, %v8332_v19  ;;  %v8426_v12 = vadd.f32 %v3477_v1, %v8338_v40 }
 0xaf6   :  { %v3144_v61 = vpop.f32.mrf.mxu1 }
 0xaf7   :  { %v3309_v18 = vadd.f32 %v3143_v41, %v8278_v53  ;;  %v3145_v29 = vadd.f32 %v3144_v61, %v8334_v3  ;;  %v8433_v22 = vadd.f32 %v3478_v34, %v8340_v11  ;;  %v9432_v34 = vld [vmem:[#allocation19_spill] sm:$0xff]  ;;  %v9433_v41 = vld [vmem:[#allocation46_spill] sm:$0xff]  ;;  %v9435_v61 = vmov 0.0  }
 0xaf8   :  { %v3381_v25 = vpop.f32.mrf.mxu1 }
 0xaf9   :  { %v3310_v52 = vadd.f32 %v3145_v29, %v8284_v57  ;;  %v3312_v32 = vadd.f32 %v3309_v18, %v8338_v40  ;;  %v3382_v19 = vadd.f32 %v3381_v25, %v8428_v62  ;;  %v9436_v18 = vld [vmem:[#allocation31_spill] sm:$0xff]  ;;  %v9437_v29 = vld [vmem:[#allocation50_spill] sm:$0xff]  ;;  %v9438_v25 = vld [vmem:[#allocation21_spill] sm:$0xff] }
 0xafa   :  { %v3383_v13 = vpop.f32.mrf.mxu1 }
 0xafb   :  { %v3456_v16 = vadd.f32 %v3382_v19, %v3312_v32  ;;  %v3313_v47 = vadd.f32 %v3310_v52, %v8340_v11  ;;  %v3384_v53 = vadd.f32 %v3383_v13, %v8438_v20  ;;  %v2778_v11 = vadd.f32 %v9430_v51, %v9429_v14  ;;  %v9439_v52 = vld [vmem:[#allocation22_spill] sm:$0xff]  ;;  %v9440_v32 = vld [vmem:[#allocation47_spill] sm:$0xff]  ;;  %v9441_v19 = vld [vmem:[#allocation32_spill] sm:$0xff] }
 0xafc   :  { %v9442_v13 = vld [vmem:[#allocation23_spill] sm:$0xff]  ;;  %v9457_v51 = vld [vmem:[#allocation52_spill] sm:$0xff] }
 0xafd   :  { %v5108_v15 = vmul.f32 -1.442695, %v3456_v16  ;;  %v3463_v3 = vadd.f32 %v3384_v53, %v3313_v47  ;;  %v3311_v43 = vadd.f32 %v3249_v48, %v2778_v11  ;;  %v9443_v16 = vld [vmem:[#allocation17_spill] sm:$0xff]  ;;  %v9446_v53 = vld [vmem:[#allocation39_spill] sm:$0xff]  ;;  %v9454_v48 = vld [vmem:[#allocation54_spill] sm:$0xff] }
 0xafe   :  { %v9445_v47 = vld [vmem:[#allocation33_spill] sm:$0xff]  ;;  %v9456_v14 = vld [vmem:[#allocation51_spill] sm:$0xff]  ;;  %v9458_v11 = vld [vmem:[#allocation40_spill] sm:$0xff] }
 0xaff   :  { %6593 = vpow2.f32 %v5108_v15  ;;  %v5109_v6 = vmul.f32 -1.442695, %v3463_v3  ;;  %v3314_v4 = vadd.f32 %v3311_v43, %v8336_v54  ;;  %v9434_v54 = vld [vmem:[#allocation20_spill] sm:$0xff]  ;;  %v9447_v3 = vld [vmem:[#allocation25_spill] sm:$0xff] }
 0xb00   :  { %v9444_v15 = vld [vmem:[#allocation24_spill] sm:$0xff] }
 0xb01   :  { %6595 = vpow2.f32 %v5109_v6  ;;  %v9448_v6 = vld [vmem:[#allocation26_spill] sm:$0xff]  ;;  %v9459_v43 = vld [vmem:[#allocation48_spill] sm:$0xff] }
 0xb0c   :  { %v6594_v2 = vpop.eup %6593 }
 0xb0d   :  { %v3460_v60 = vadd.f32 1.0, %v6594_v2  ;;  %v9449_v2 = vld [vmem:[#allocation36_spill] sm:$0xff] }
 0xb0e   :  { %v3452_v57 = vpop.f32.mrf.mxu0  ;;  %v6596_v21 = vpop.eup %6595 }
 0xb0f   :  { %6597 = vrcp.f32 %v3460_v60  ;;  %v3467_v17 = vadd.f32 1.0, %v6596_v21  ;;  %v3453_v38 = vadd.f32 %v3452_v57, %v8444_v59  ;;  %v9450_v60 = vld [vmem:[#allocation34_spill] sm:$0xff]  ;;  %v9451_v57 = vld [vmem:[#allocation12_spill] sm:$0xff] }
 0xb10   :  { %v6184_v40 = vpop.f32.mrf.mxu0  ;;  %v9455_v21 = vld [vmem:[#allocation38_spill] sm:$0xff] }
 0xb11   :  { %6599 = vrcp.f32 %v3467_v17  ;;  %v9452_v40 = vld [vmem:[#allocation37_spill] sm:$0xff] }
 0xb12   :  { %v9460_v17 = vld [vmem:[#allocation49_spill] sm:$0xff] }
 0xb1c   :  { %v6598_v45 = vpop.eup %6597 }
 0xb1d   :  { %v3470_v50 = vmul.f32 %v6598_v45, %v3453_v38  ;;  %v9461_v38 = vld [vmem:[#allocation28_spill] sm:$0xff]  ;;  %v9462_v45 = vld [vmem:[#allocation43_spill] sm:$0xff] }
 0xb1e   :  { %v6600_v5 = vpop.eup %6599 }
 0xb1f   :  { %v3471_v36 = vadd.f32 %v3470_v50, %v3314_v4  ;;  %v3473_v28 = vsub.f32 1.0, %v6600_v5  ;;  %v3475_v58 = vmul.f32 0.0, %v6600_v5  ;;  %v9463_v4 = vld [vmem:[#allocation14_spill] sm:$0xff]  ;;  %v9464_v50 = vld [vmem:[#allocation13_spill] sm:$0xff] }
 0xb20   :  { %v9466_v5 = vld [vmem:[#allocation45_spill] sm:$0xff] }
 0xb21   :  { %6601 = vtanh.f32 %v3471_v36  ;;  %v9465_v36 = vld [vmem:[#allocation55_spill] sm:$0xff] }
 0xb2e   :  { %v6602_v63 = vpop.eup %6601 }
 0xb2f   :  { %v3474_v1 = vmul.f32 %v6602_v63, %v3473_v28  ;;  %v9467_v28 = vld [vmem:[#allocation27_spill] sm:$0xff]  ;;  %v9468_v63 = vld [vmem:[#allocation44_spill] sm:$0xff] }
 0xb31   :  { %v8450_v7 = vadd.f32 %v3475_v58, %v3474_v1  ;;  %v9469_v1 = vld [vmem:[#allocation15_spill] sm:$0xff]  ;;  %v9470_v58 = vld [vmem:[#allocation56_spill] sm:$0xff] }
 0xb33   :  { %9431 = vst [vmem:[#allocation62_spill] sm:$0xff] %v8450_v7  ;;  %3548 = vmatmul.mubr.f32.vlgmr.msra.gmra.mxu1 %v8450_v7  ;;  %6218 = vmatmul.mubr.f32.vlgmr.msra.gmra.mxu0 %v8450_v7 }
 0xb34   :  { %3652 = vmatpush1.msra.mxu1 %v9432_v34  ;;  %6221 = vmatpush3.msra.mxu0 %v9433_v41  ;;  %v9471_v34 = vld [vmem:[#allocation16_spill] sm:$0xff] }
 0xb35   :  { %3653 = vmatprep.subr.mxu1 %v9434_v54  ;;  %6222 = vmatprep.subr.mxu0 %v9435_v61  ;;  %v9472_v54 = vld [vmem:[#allocation29_spill] sm:$0xff] }
 0xb36   :  { %3654 = vmatpush1.msra.mxu1 %v9436_v18  ;;  %6223 = vmatpush3.msra.mxu0 %v9437_v29  ;;  %v9473_v18 = vld [vmem:[#allocation57_spill] sm:$0xff] }
 0xb37   :  { %3655 = vmatprep.subr.mxu1 %v9438_v25  ;;  %6224 = vmatprep.subr.mxu0 %v9435_v61  ;;  %v9474_v25 = vld [vmem:[#allocation18_spill] sm:$0xff] }
 0xb38   :  { %3656 = vmatpush1.msra.mxu1 %v9439_v52  ;;  %6225 = vmatpush3.msra.mxu0 %v9440_v32  ;;  %v9475_v52 = vld [vmem:[#allocation35_spill] sm:$0xff] }
 0xb39   :  { %3657 = vmatprep.subr.mxu1 %v9441_v19  ;;  %6226 = vmatprep.subr.mxu0 %v9435_v61  ;;  %v9476_v19 = vld [vmem:[#allocation58_spill] sm:$0xff] }
 0xb3a   :  { %3658 = vmatpush1.msra.mxu1 %v9442_v13  ;;  %6227 = vmatpush3.msra.mxu0 %v9443_v16  ;;  %v9477_v13 = vld [vmem:[#allocation41_spill] sm:$0xff] }
 0xb3b   :  { %3659 = vmatprep.subr.mxu1 %v9444_v15  ;;  %6228 = vmatprep.subr.mxu0 %v9435_v61  ;;  %v9478_v15 = vld [vmem:[#allocation42_spill] sm:$0xff] }
 0xb3c   :  { %3660 = vmatpush1.msra.mxu1 %v9445_v47  ;;  %6229 = vmatpush3.msra.mxu0 %v9446_v53  ;;  %v9479_v47 = vld [vmem:[#allocation59_spill] sm:$0xff] }
 0xb3d   :  { %3661 = vmatprep.subr.mxu1 %v9447_v3  ;;  %6230 = vmatprep.subr.mxu0 %v9435_v61  ;;  %v9480_v3 = vld [vmem:[#allocation30_spill] sm:$0xff] }
 0xb3e   :  { %3662 = vmatpush1.msra.mxu1 %v9448_v6  ;;  %6231 = vmatpush3.msra.mxu0 %v9449_v2 }
 0xb3f   :  { %3663 = vmatprep.subr.mxu1 %v9450_v60  ;;  %6232 = vmatprep.subr.mxu0 %v9435_v61 }
 0xb40   :  { %3664 = vmatpush1.msra.mxu1 %v9451_v57  ;;  %6233 = vmatpush3.msra.mxu0 %v9452_v40 }
 0xb41   :  { %3665 = vmatprep.subr.mxu1 %v9453_v33  ;;  %6234 = vmatprep.subr.mxu0 %v9435_v61 }
 0xb42   :  { %3666 = vmatpush1.msra.mxu1 %v9454_v48  ;;  %6235 = vmatpush3.msra.mxu0 %v9455_v21 }
 0xb43   :  { %3667 = vmatprep.subr.mxu1 %v9456_v14  ;;  %6236 = vmatprep.subr.mxu0 %v9435_v61 }
 0xb44   :  { %3668 = vmatpush1.msra.mxu1 %v9457_v51  ;;  %6237 = vmatpush3.msra.mxu0 %v9458_v11 }
 0xb45   :  { %3669 = vmatprep.subr.mxu1 %v9459_v43  ;;  %6238 = vmatprep.subr.mxu0 %v9435_v61 }
 0xb46   :  { %3670 = vmatpush1.msra.mxu1 %v9460_v17  ;;  %6239 = vmatpush3.msra.mxu0 %v9461_v38 }
 0xb47   :  { %3671 = vmatprep.subr.mxu1 %v9462_v45  ;;  %6240 = vmatprep.subr.mxu0 %v9435_v61 }
 0xb48   :  { %3672 = vmatpush1.msra.mxu1 %v9463_v4  ;;  %6241 = vmatpush3.msra.mxu0 %v9464_v50 }
 0xb49   :  { %3673 = vmatprep.subr.mxu1 %v9465_v36  ;;  %6242 = vmatprep.subr.mxu0 %v9435_v61 }
 0xb4a   :  { %3674 = vmatpush1.msra.mxu1 %v9466_v5  ;;  %6243 = vmatpush3.msra.mxu0 %v9467_v28 }
 0xb4b   :  { %3675 = vmatprep.subr.mxu1 %v9468_v63  ;;  %6244 = vmatprep.subr.mxu0 %v9435_v61 }
 0xb4c   :  { %3676 = vmatpush1.msra.mxu1 %v9469_v1  ;;  %6245 = vmatpush3.msra.mxu0 %v9470_v58 }
 0xb4d   :  { %3677 = vmatprep.subr.mxu1 %v9471_v34  ;;  %6246 = vmatprep.subr.mxu0 %v9435_v61 }
 0xb4e   :  { %3678 = vmatpush1.msra.mxu1 %v9472_v54  ;;  %6247 = vmatpush3.msra.mxu0 %v9473_v18 }
 0xb4f   :  { %3679 = vmatprep.subr.mxu1 %v9474_v25  ;;  %6248 = vmatprep.subr.mxu0 %v9435_v61 }
 0xb50   :  { %3680 = vmatpush1.msra.mxu1 %v9475_v52  ;;  %6249 = vmatpush3.msra.mxu0 %v9476_v19 }
 0xb51   :  { %3681 = vmatprep.subr.mxu1 %v9477_v13  ;;  %6250 = vmatprep.subr.mxu0 %v9435_v61 }
 0xb52   :  { %3682 = vmatpush1.msra.mxu1 %v9478_v15  ;;  %3715 = vmatprep.mubr.f32.mxu1 %v9435_v61 }
 0xb53   :  { %6251 = vmatpush3.msra.mxu0 %v9479_v47  ;;  %6252 = vmatprep.mubr.msk.f32.mxu0 %vm6879_vm9, %v9435_v61 }
 0xb54   :  { %3819 = vmatprep.subr.mxu1 %v9480_v3  ;;  %6255 = vmatprep.subr.mxu0 %v9435_v61 }
 0xbf3   :  { %v3549_v6 = vpop.f32.mrf.mxu1  ;;  %v3620_v60 = vpop.f32.mrf.mxu0 }
 0xbf4   :  { %v3550_v57 = vadd.f32 %v3549_v6, %v8428_v62  ;;  %v3621_v24 = vadd.f32 %v3620_v60, %v8444_v59  ;;  %v8564_v60 = vld [vmem:[#allocation5 + $0xb88] sm:$0xff] }
 0xbf5   :  { %v3551_v33 = vpop.f32.mrf.mxu1  ;;  %v6219_v48 = vpop.f32.mrf.mxu0 }
 0xbf6   :  { %v3624_v14 = vadd.f32 %v3550_v57, %v8426_v12  ;;  %v3552_v43 = vadd.f32 %v3551_v33, %v8438_v20 }
 0xbf8   :  { %v5110_v51 = vmul.f32 -1.442695, %v3624_v14  ;;  %v3631_v17 = vadd.f32 %v3552_v43, %v8433_v22  ;;  %v8580_v43 = vld [vmem:[#allocation5 + $0xb58] sm:$0xff] }
 0xbfa   :  { %6603 = vpow2.f32 %v5110_v51  ;;  %v5111_v49 = vmul.f32 -1.442695, %v3631_v17  ;;  %v8572_v51 = vld [vmem:[#allocation5 + $0xb70] sm:$0xff]  ;;  %v8588_v17 = vld [vmem:[#allocation5 + $0xb40] sm:$0xff] }
 0xbfc   :  { %6605 = vpow2.f32 %v5111_v49 }
 0xc07   :  { %v6604_v27 = vpop.eup %6603 }
 0xc08   :  { %v3628_v3 = vadd.f32 1.0, %v6604_v27  ;;  %v8540_v27 = vld [vmem:[#allocation5 + $0xbd0] sm:$0xff] }
 0xc09   :  { %v6606_v44 = vpop.eup %6605 }
 0xc0a   :  { %6607 = vrcp.f32 %v3628_v3  ;;  %v3635_v8 = vadd.f32 1.0, %v6606_v44  ;;  %v8532_v44 = vld [vmem:[#allocation5 + $0xbe8] sm:$0xff] }
 0xc0b   :  { %v8596_v3 = vld [vmem:[#allocation5 + $0xb28] sm:$0xff] }
 0xc0c   :  { %6609 = vrcp.f32 %v3635_v8  ;;  %v8536_v8 = vld [vmem:[#allocation5 + $0xbd8] sm:$0xff] }
 0xc17   :  { %v6608_v6 = vpop.eup %6607 }
 0xc18   :  { %v3638_v26 = vmul.f32 %v6608_v6, %v3621_v24  ;;  %v8548_v24 = vld [vmem:[#allocation5 + $0xbb8] sm:$0xff]  ;;  %v8604_v6 = vld [vmem:[#allocation5 + $0xb10] sm:$0xff] }
 0xc19   :  { %v6610_v57 = vpop.eup %6609 }
 0xc1a   :  { %v3639_v12 = vadd.f32 %v3638_v26, %v8401_v0  ;;  %v3641_v33 = vsub.f32 1.0, %v6610_v57  ;;  %v3643_v22 = vmul.f32 %v6610_v57, %v8450_v7  ;;  %v8544_v26 = vld [vmem:[#allocation5 + $0xbc0] sm:$0xff]  ;;  %v8552_v0 = vld [vmem:[#allocation5 + $0xba8] sm:$0xff] }
 0xc1c   :  { %6611 = vtanh.f32 %v3639_v12 }
 0xc29   :  { %v6612_v48 = vpop.eup %6611 }
 0xc2a   :  { %v3642_v14 = vmul.f32 %v6612_v48, %v3641_v33  ;;  %v8651_v33 = vld [vmem:[#allocation5 + $0xbf8] sm:$0xff]  ;;  %v8663_v48 = vld [vmem:[#allocation5 + $0xbc8] sm:$0xff] }
 0xc2c   :  { %v8528_v49 = vadd.f32 %v3643_v22, %v3642_v14  ;;  %v8669_v14 = vld [vmem:[#allocation5 + $0xbb0] sm:$0xff]  ;;  %v8675_v22 = vld [vmem:[#allocation5 + $0xb98] sm:$0xff] }
 0xc2e   :  { %3716 = vmatmul.mubr.f32.vlgmr.msra.gmra.mxu1 %v8528_v49  ;;  %6253 = vmatmul.mubr.f32.vlgmr.msra.gmra.mxu0 %v8528_v49 }
 0xc2f   :  { %3820 = vmatpush1.msra.mxu1 %v8532_v44  ;;  %6256 = vmatpush3.msra.mxu0 %v9433_v41  ;;  %v8556_v41 = vld [vmem:[#allocation5 + $0xba0] sm:$0xff] }
 0xc30   :  { %3821 = vmatprep.subr.mxu1 %v8536_v8  ;;  %6257 = vmatprep.subr.mxu0 %v9435_v61 }
 0xc31   :  { %3822 = vmatpush1.msra.mxu1 %v8540_v27  ;;  %6258 = vmatpush3.msra.mxu0 %v9437_v29  ;;  %v8560_v29 = vld [vmem:[#allocation5 + $0xb90] sm:$0xff] }
 0xc32   :  { %3823 = vmatprep.subr.mxu1 %v8544_v26  ;;  %6259 = vmatprep.subr.mxu0 %v9435_v61 }
 0xc33   :  { %3824 = vmatpush1.msra.mxu1 %v8548_v24  ;;  %6260 = vmatpush3.msra.mxu0 %v9440_v32  ;;  %v8568_v32 = vld [vmem:[#allocation5 + $0xb78] sm:$0xff] }
 0xc34   :  { %3825 = vmatprep.subr.mxu1 %v8552_v0  ;;  %6261 = vmatprep.subr.mxu0 %v9435_v61 }
 0xc35   :  { %3826 = vmatpush1.msra.mxu1 %v8556_v41  ;;  %6262 = vmatpush3.msra.mxu0 %v9443_v16  ;;  %v8576_v16 = vld [vmem:[#allocation5 + $0xb60] sm:$0xff] }
 0xc36   :  { %3827 = vmatprep.subr.mxu1 %v8560_v29  ;;  %6263 = vmatprep.subr.mxu0 %v9435_v61 }
 0xc37   :  { %3828 = vmatpush1.msra.mxu1 %v8564_v60  ;;  %6264 = vmatpush3.msra.mxu0 %v9446_v53  ;;  %v8584_v53 = vld [vmem:[#allocation5 + $0xb48] sm:$0xff] }
 0xc38   :  { %3829 = vmatprep.subr.mxu1 %v8568_v32  ;;  %6265 = vmatprep.subr.mxu0 %v9435_v61 }
 0xc39   :  { %3830 = vmatpush1.msra.mxu1 %v8572_v51  ;;  %6266 = vmatpush3.msra.mxu0 %v9449_v2  ;;  %v8592_v2 = vld [vmem:[#allocation5 + $0xb30] sm:$0xff] }
 0xc3a   :  { %3831 = vmatprep.subr.mxu1 %v8576_v16  ;;  %6267 = vmatprep.subr.mxu0 %v9435_v61 }
 0xc3b   :  { %3832 = vmatpush1.msra.mxu1 %v8580_v43  ;;  %6268 = vmatpush3.msra.mxu0 %v9452_v40  ;;  %v8600_v40 = vld [vmem:[#allocation5 + $0xb18] sm:$0xff] }
 0xc3c   :  { %3833 = vmatprep.subr.mxu1 %v8584_v53  ;;  %6269 = vmatprep.subr.mxu0 %v9435_v61 }
 0xc3d   :  { %3834 = vmatpush1.msra.mxu1 %v8588_v17  ;;  %6270 = vmatpush3.msra.mxu0 %v9455_v21  ;;  %v8635_v21 = vld [vmem:[#allocation5 + $0xbf0] sm:$0xff] }
 0xc3e   :  { %3835 = vmatprep.subr.mxu1 %v8592_v2  ;;  %6271 = vmatprep.subr.mxu0 %v9435_v61  ;;  %9481 = vst [vmem:[#allocation60_spill] sm:$0xff] %v8635_v21 }
 0xc3f   :  { %3836 = vmatpush1.msra.mxu1 %v8596_v3  ;;  %6272 = vmatpush3.msra.mxu0 %v9458_v11 }
 0xc40   :  { %3837 = vmatprep.subr.mxu1 %v8600_v40  ;;  %6273 = vmatprep.subr.mxu0 %v9435_v61 }
 0xc41   :  { %3838 = vmatpush1.msra.mxu1 %v8604_v6  ;;  %6274 = vmatpush3.msra.mxu0 %v9461_v38 }
 0xc42   :  { %3839 = vmatprep.subr.mxu1 %v9462_v45  ;;  %6275 = vmatprep.subr.mxu0 %v9435_v61 }
 0xc43   :  { %3840 = vmatpush1.msra.mxu1 %v9463_v4  ;;  %6276 = vmatpush3.msra.mxu0 %v9464_v50 }
 0xc44   :  { %3841 = vmatprep.subr.mxu1 %v9465_v36  ;;  %6277 = vmatprep.subr.mxu0 %v9435_v61 }
 0xc45   :  { %3842 = vmatpush1.msra.mxu1 %v9466_v5  ;;  %6278 = vmatpush3.msra.mxu0 %v9467_v28 }
 0xc46   :  { %3843 = vmatprep.subr.mxu1 %v9468_v63  ;;  %6279 = vmatprep.subr.mxu0 %v9435_v61 }
 0xc47   :  { %3844 = vmatpush1.msra.mxu1 %v9469_v1  ;;  %6280 = vmatpush3.msra.mxu0 %v9470_v58 }
 0xc48   :  { %3845 = vmatprep.subr.mxu1 %v9471_v34  ;;  %6281 = vmatprep.subr.mxu0 %v9435_v61 }
 0xc49   :  { %3846 = vmatpush1.msra.mxu1 %v9472_v54  ;;  %6282 = vmatpush3.msra.mxu0 %v9473_v18 }
 0xc4a   :  { %3847 = vmatprep.subr.mxu1 %v9474_v25  ;;  %6283 = vmatprep.subr.mxu0 %v9435_v61 }
 0xc4b   :  { %3848 = vmatpush1.msra.mxu1 %v9475_v52  ;;  %6284 = vmatpush3.msra.mxu0 %v9476_v19 }
 0xc4c   :  { %3849 = vmatprep.subr.mxu1 %v9477_v13  ;;  %6285 = vmatprep.subr.mxu0 %v9435_v61 }
 0xc4d   :  { %3850 = vmatpush1.msra.mxu1 %v9478_v15  ;;  %3883 = vmatprep.mubr.f32.mxu1 %v9435_v61 }
 0xc4e   :  { %6286 = vmatpush3.msra.mxu0 %v9479_v47  ;;  %6287 = vmatprep.mubr.msk.f32.mxu0 %vm6879_vm9, %v9435_v61 }
 0xc4f   :  { %3987 = vmatprep.subr.mxu1 %v8635_v21  ;;  %6290 = vmatprep.subr.mxu0 %v9435_v61 }
 0xcee   :  { %v3717_v11 = vpop.f32.mrf.mxu1  ;;  %v3788_v38 = vpop.f32.mrf.mxu0 }
 0xcef   :  { %v3718_v45 = vadd.f32 %v3717_v11, %v8428_v62  ;;  %v3789_v25 = vadd.f32 %v3788_v38, %v8444_v59  ;;  %v8687_v11 = vld [vmem:[#allocation5 + $0xb68] sm:$0xff]  ;;  %v8693_v38 = vld [vmem:[#allocation5 + $0xb50] sm:$0xff] }
 0xcf0   :  { %v3719_v4 = vpop.f32.mrf.mxu1  ;;  %v6254_v50 = vpop.f32.mrf.mxu0 }
 0xcf1   :  { %v3792_v36 = vadd.f32 %v3718_v45, %v8416_v35  ;;  %v3720_v28 = vadd.f32 %v3719_v4, %v8438_v20  ;;  %v8699_v45 = vld [vmem:[#allocation5 + $0xb38] sm:$0xff]  ;;  %v8705_v4 = vld [vmem:[#allocation5 + $0xb20] sm:$0xff] }
 0xcf2   :  { %v8708_v50 = vld [vmem:[#allocation5 + $0xb00] sm:$0xff] }
 0xcf3   :  { %v5112_v5 = vmul.f32 -1.442695, %v3792_v36  ;;  %v3799_v63 = vadd.f32 %v3720_v28, %v8421_v46  ;;  %v8712_v36 = vld [vmem:[#allocation5 + $0xaf8] sm:$0xff]  ;;  %v8718_v28 = vld [vmem:[#allocation5 + $0xae8] sm:$0xff] }
 0xcf5   :  { %6613 = vpow2.f32 %v5112_v5  ;;  %v5113_v1 = vmul.f32 -1.442695, %v3799_v63  ;;  %v8715_v5 = vld [vmem:[#allocation5 + $0xb08] sm:$0xff]  ;;  %v8722_v63 = vld [vmem:[#allocation5 + $0xae0] sm:$0xff] }
 0xcf7   :  { %6615 = vpow2.f32 %v5113_v1  ;;  %v8725_v1 = vld [vmem:[#allocation5 + $0xaf0] sm:$0xff] }
 0xd02   :  { %v6614_v58 = vpop.eup %6613 }
 0xd03   :  { %v3796_v34 = vadd.f32 1.0, %v6614_v58  ;;  %v8728_v58 = vld [vmem:[#allocation5 + $0xad0] sm:$0xff] }
 0xd04   :  { %v6616_v54 = vpop.eup %6615 }
 0xd05   :  { %6617 = vrcp.f32 %v3796_v34  ;;  %v3803_v18 = vadd.f32 1.0, %v6616_v54  ;;  %v8732_v34 = vld [vmem:[#allocation5 + $0xac8] sm:$0xff]  ;;  %v8735_v54 = vld [vmem:[#allocation5 + $0xad8] sm:$0xff] }
 0xd07   :  { %6619 = vrcp.f32 %v3803_v18  ;;  %v8738_v18 = vld [vmem:[#allocation5 + $0xab8] sm:$0xff] }
 0xd12   :  { %v6618_v52 = vpop.eup %6617 }
 0xd13   :  { %v3806_v19 = vmul.f32 %v6618_v52, %v3789_v25  ;;  %v8742_v25 = vld [vmem:[#allocation5 + $0xab0] sm:$0xff]  ;;  %v8745_v52 = vld [vmem:[#allocation5 + $0xac0] sm:$0xff] }
 0xd14   :  { %v6620_v13 = vpop.eup %6619 }
 0xd15   :  { %v3807_v35 = vadd.f32 %v3806_v19, %v8378_v39  ;;  %v3809_v15 = vsub.f32 1.0, %v6620_v13  ;;  %v3811_v46 = vmul.f32 %v6620_v13, %v8528_v49  ;;  %v8657_v39 = vld [vmem:[#allocation5 + $0xbe0] sm:$0xff]  ;;  %v8755_v13 = vld [vmem:[#allocation5 + $0xaa8] sm:$0xff] }
 0xd16   :  { %v8681_v49 = vld [vmem:[#allocation5 + $0xb80] sm:$0xff]  ;;  %9484 = vst [vmem:[#allocation46_spill] sm:$0xff] %v8755_v13 }
 0xd17   :  { %6621 = vtanh.f32 %v3807_v35  ;;  %v8748_v19 = vld [vmem:[#allocation5 + $0xaa0] sm:$0xff]  ;;  %v8752_v35 = vld [vmem:[#allocation5 + $0xa98] sm:$0xff] }
 0xd18   :  { %9482 = vst [vmem:[#allocation61_spill] sm:$0xff] %v8748_v19  ;;  %9483 = vst [vmem:[#allocation19_spill] sm:$0xff] %v8752_v35 }
 0xd24   :  { %v6622_v47 = vpop.eup %6621 }
 0xd25   :  { %v3810_v12 = vmul.f32 %v6622_v47, %v3809_v15  ;;  %v8758_v15 = vld [vmem:[#allocation5 + $0xa88] sm:$0xff]  ;;  %v8762_v47 = vld [vmem:[#allocation5 + $0xa80] sm:$0xff] }
 0xd26   :  { %9485 = vst [vmem:[#allocation20_spill] sm:$0xff] %v8758_v15  ;;  %9486 = vst [vmem:[#allocation31_spill] sm:$0xff] %v8762_v47 }
 0xd27   :  { %v8646_v57 = vadd.f32 %v3811_v46, %v3810_v12  ;;  %v8766_v12 = vld [vmem:[#allocation5 + $0xa90] sm:$0xff] }
 0xd28   :  { %9487 = vst [vmem:[#allocation50_spill] sm:$0xff] %v8766_v12 }
 0xd29   :  { %3884 = vmatmul.mubr.f32.vlgmr.msra.gmra.mxu1 %v8646_v57  ;;  %6288 = vmatmul.mubr.f32.vlgmr.msra.gmra.mxu0 %v8646_v57 }
 0xd2a   :  { %3988 = vmatpush1.msra.mxu1 %v8532_v44  ;;  %6291 = vmatpush3.msra.mxu0 %v8651_v33 }
 0xd2b   :  { %3989 = vmatprep.subr.mxu1 %v8536_v8  ;;  %6292 = vmatprep.subr.mxu0 %v9435_v61 }
 0xd2c   :  { %3990 = vmatpush1.msra.mxu1 %v8540_v27  ;;  %6293 = vmatpush3.msra.mxu0 %v8657_v39 }
 0xd2d   :  { %3991 = vmatprep.subr.mxu1 %v8544_v26  ;;  %6294 = vmatprep.subr.mxu0 %v9435_v61 }
 0xd2e   :  { %3992 = vmatpush1.msra.mxu1 %v8548_v24  ;;  %6295 = vmatpush3.msra.mxu0 %v8663_v48 }
 0xd2f   :  { %3993 = vmatprep.subr.mxu1 %v8552_v0  ;;  %6296 = vmatprep.subr.mxu0 %v9435_v61 }
 0xd30   :  { %3994 = vmatpush1.msra.mxu1 %v8556_v41  ;;  %6297 = vmatpush3.msra.mxu0 %v8669_v14 }
 0xd31   :  { %3995 = vmatprep.subr.mxu1 %v8560_v29  ;;  %6298 = vmatprep.subr.mxu0 %v9435_v61 }
 0xd32   :  { %3996 = vmatpush1.msra.mxu1 %v8564_v60  ;;  %6299 = vmatpush3.msra.mxu0 %v8675_v22 }
 0xd33   :  { %3997 = vmatprep.subr.mxu1 %v8568_v32  ;;  %6300 = vmatprep.subr.mxu0 %v9435_v61 }
 0xd34   :  { %3998 = vmatpush1.msra.mxu1 %v8572_v51  ;;  %6301 = vmatpush3.msra.mxu0 %v8681_v49 }
 0xd35   :  { %3999 = vmatprep.subr.mxu1 %v8576_v16  ;;  %6302 = vmatprep.subr.mxu0 %v9435_v61 }
 0xd36   :  { %4000 = vmatpush1.msra.mxu1 %v8580_v43  ;;  %6303 = vmatpush3.msra.mxu0 %v8687_v11 }
 0xd37   :  { %4001 = vmatprep.subr.mxu1 %v8584_v53  ;;  %6304 = vmatprep.subr.mxu0 %v9435_v61 }
 0xd38   :  { %4002 = vmatpush1.msra.mxu1 %v8588_v17  ;;  %6305 = vmatpush3.msra.mxu0 %v8693_v38 }
 0xd39   :  { %4003 = vmatprep.subr.mxu1 %v8592_v2  ;;  %6306 = vmatprep.subr.mxu0 %v9435_v61 }
 0xd3a   :  { %4004 = vmatpush1.msra.mxu1 %v8596_v3  ;;  %6307 = vmatpush3.msra.mxu0 %v8699_v45 }
 0xd3b   :  { %4005 = vmatprep.subr.mxu1 %v8600_v40  ;;  %6308 = vmatprep.subr.mxu0 %v9435_v61 }
 0xd3c   :  { %4006 = vmatpush1.msra.mxu1 %v8604_v6  ;;  %6309 = vmatpush3.msra.mxu0 %v8705_v4 }
 0xd3d   :  { %4007 = vmatprep.subr.mxu1 %v8708_v50  ;;  %6310 = vmatprep.subr.mxu0 %v9435_v61 }
 0xd3e   :  { %4008 = vmatpush1.msra.mxu1 %v8712_v36  ;;  %6311 = vmatpush3.msra.mxu0 %v8715_v5 }
 0xd3f   :  { %4009 = vmatprep.subr.mxu1 %v8718_v28  ;;  %6312 = vmatprep.subr.mxu0 %v9435_v61 }
 0xd40   :  { %4010 = vmatpush1.msra.mxu1 %v8722_v63  ;;  %6313 = vmatpush3.msra.mxu0 %v8725_v1 }
 0xd41   :  { %4011 = vmatprep.subr.mxu1 %v8728_v58  ;;  %6314 = vmatprep.subr.mxu0 %v9435_v61 }
 0xd42   :  { %4012 = vmatpush1.msra.mxu1 %v8732_v34  ;;  %6315 = vmatpush3.msra.mxu0 %v8735_v54 }
 0xd43   :  { %4013 = vmatprep.subr.mxu1 %v8738_v18  ;;  %6316 = vmatprep.subr.mxu0 %v9435_v61 }
 0xd44   :  { %4014 = vmatpush1.msra.mxu1 %v8742_v25  ;;  %6317 = vmatpush3.msra.mxu0 %v8745_v52 }
 0xd45   :  { %4015 = vmatprep.subr.mxu1 %v8748_v19  ;;  %6318 = vmatprep.subr.mxu0 %v9435_v61 }
 0xd46   :  { %4016 = vmatpush1.msra.mxu1 %v8752_v35  ;;  %6319 = vmatpush3.msra.mxu0 %v8755_v13 }
 0xd47   :  { %4017 = vmatprep.subr.mxu1 %v8758_v15  ;;  %6320 = vmatprep.subr.mxu0 %v9435_v61 }
 0xd48   :  { %4018 = vmatpush1.msra.mxu1 %v8762_v47  ;;  %4051 = vmatprep.mubr.f32.mxu1 %v9435_v61 }
 0xd49   :  { %6321 = vmatpush3.msra.mxu0 %v8766_v12  ;;  %6322 = vmatprep.mubr.msk.f32.mxu0 %vm6879_vm9, %v9435_v61 }
 0xd4a   :  { %4155 = vmatprep.subr.mxu1 %v8635_v21  ;;  %6325 = vmatprep.subr.mxu0 %v9435_v61 }
 0xde9   :  { %v3885_v46 = vpop.f32.mrf.mxu1  ;;  %v3956_v7 = vpop.f32.mrf.mxu0 }
 0xdea   :  { %v3886_v30 = vadd.f32 %v3885_v46, %v8428_v62  ;;  %v3957_v19 = vadd.f32 %v3956_v7, %v8444_v59  ;;  %v9491_v7 = vld [vmem:[#allocation20_spill] sm:$0xff] }
 0xdeb   :  { %v3887_v10 = vpop.f32.mrf.mxu1  ;;  %v6289_v42 = vpop.f32.mrf.mxu0 }
 0xdec   :  { %v3960_v55 = vadd.f32 %v3886_v30, %v8406_v37  ;;  %v3888_v23 = vadd.f32 %v3887_v10, %v8438_v20 }
 0xdee   :  { %v5114_v9 = vmul.f32 -1.442695, %v3960_v55  ;;  %v3967_v12 = vadd.f32 %v3888_v23, %v8411_v56  ;;  %v9489_v56 = vld [vmem:[#allocation19_spill] sm:$0xff] }
 0xdf0   :  { %6623 = vpow2.f32 %v5114_v9  ;;  %v5115_v47 = vmul.f32 -1.442695, %v3967_v12 }
 0xdf2   :  { %6625 = vpow2.f32 %v5115_v47 }
 0xdfd   :  { %v6624_v15 = vpop.eup %6623 }
 0xdfe   :  { %v3964_v21 = vadd.f32 1.0, %v6624_v15  ;;  %v9495_v15 = vld [vmem:[#allocation75_spill] sm:$0xff] }
 0xdff   :  { %v6626_v13 = vpop.eup %6625 }
 0xe00   :  { %6627 = vrcp.f32 %v3964_v21  ;;  %v3971_v35 = vadd.f32 1.0, %v6626_v13  ;;  %v9492_v21 = vld [vmem:[#allocation31_spill] sm:$0xff] }
 0xe02   :  { %6629 = vrcp.f32 %v3971_v35 }
 0xe0d   :  { %v6628_v46 = vpop.eup %6627 }
 0xe0e   :  { %v3974_v62 = vmul.f32 %v6628_v46, %v3957_v19  ;;  %v9494_v19 = vld [vmem:[#allocation60_spill] sm:$0xff] }
 0xe0f   :  { %v6630_v55 = vpop.eup %6629 }
 0xe10   :  { %v3975_v30 = vadd.f32 %v3974_v62, %v8387_v31  ;;  %v3977_v42 = vsub.f32 1.0, %v6630_v55  ;;  %v3979_v23 = vmul.f32 %v6630_v55, %v8646_v57  ;;  %v9488_v31 = vld [vmem:[#allocation61_spill] sm:$0xff]  ;;  %v9490_v62 = vld [vmem:[#allocation46_spill] sm:$0xff] }
 0xe11   :  { %v9493_v57 = vld [vmem:[#allocation50_spill] sm:$0xff] }
 0xe12   :  { %6631 = vtanh.f32 %v3975_v30  ;;  %v9496_v30 = vld [vmem:[#allocation73_spill] sm:$0xff] }
 0xe1f   :  { %v6632_v10 = vpop.eup %6631 }
 0xe20   :  { %v3978_v9 = vmul.f32 %v6632_v10, %v3977_v42 }
 0xe22   :  { %v8780_v37 = vadd.f32 %v3979_v23, %v3978_v9  ;;  %v9497_v9 = vld [vmem:[#allocation74_spill] sm:$0xff] }
 0xe24   :  { %4052 = vmatmul.mubr.f32.vlgmr.msra.gmra.mxu1 %v8780_v37  ;;  %6323 = vmatmul.mubr.f32.vlgmr.msra.gmra.mxu0 %v8780_v37 }
 0xe25   :  { %4156 = vmatpush1.msra.mxu1 %v8532_v44  ;;  %6326 = vmatpush3.msra.mxu0 %v8651_v33 }
 0xe26   :  { %4157 = vmatprep.subr.mxu1 %v8536_v8  ;;  %6327 = vmatprep.subr.mxu0 %v9435_v61 }
 0xe27   :  { %4158 = vmatpush1.msra.mxu1 %v8540_v27  ;;  %6328 = vmatpush3.msra.mxu0 %v8657_v39 }
 0xe28   :  { %4159 = vmatprep.subr.mxu1 %v8544_v26  ;;  %6329 = vmatprep.subr.mxu0 %v9435_v61 }
 0xe29   :  { %4160 = vmatpush1.msra.mxu1 %v8548_v24  ;;  %6330 = vmatpush3.msra.mxu0 %v8663_v48 }
 0xe2a   :  { %4161 = vmatprep.subr.mxu1 %v8552_v0  ;;  %6331 = vmatprep.subr.mxu0 %v9435_v61 }
 0xe2b   :  { %4162 = vmatpush1.msra.mxu1 %v8556_v41  ;;  %6332 = vmatpush3.msra.mxu0 %v8669_v14 }
 0xe2c   :  { %4163 = vmatprep.subr.mxu1 %v8560_v29  ;;  %6333 = vmatprep.subr.mxu0 %v9435_v61 }
 0xe2d   :  { %4164 = vmatpush1.msra.mxu1 %v8564_v60  ;;  %6334 = vmatpush3.msra.mxu0 %v8675_v22 }
 0xe2e   :  { %4165 = vmatprep.subr.mxu1 %v8568_v32  ;;  %6335 = vmatprep.subr.mxu0 %v9435_v61 }
 0xe2f   :  { %4166 = vmatpush1.msra.mxu1 %v8572_v51  ;;  %6336 = vmatpush3.msra.mxu0 %v8681_v49 }
 0xe30   :  { %4167 = vmatprep.subr.mxu1 %v8576_v16  ;;  %6337 = vmatprep.subr.mxu0 %v9435_v61 }
 0xe31   :  { %4168 = vmatpush1.msra.mxu1 %v8580_v43  ;;  %6338 = vmatpush3.msra.mxu0 %v8687_v11 }
 0xe32   :  { %4169 = vmatprep.subr.mxu1 %v8584_v53  ;;  %6339 = vmatprep.subr.mxu0 %v9435_v61 }
 0xe33   :  { %4170 = vmatpush1.msra.mxu1 %v8588_v17  ;;  %6340 = vmatpush3.msra.mxu0 %v8693_v38 }
 0xe34   :  { %4171 = vmatprep.subr.mxu1 %v8592_v2  ;;  %6341 = vmatprep.subr.mxu0 %v9435_v61 }
 0xe35   :  { %4172 = vmatpush1.msra.mxu1 %v8596_v3  ;;  %6342 = vmatpush3.msra.mxu0 %v8699_v45 }
 0xe36   :  { %4173 = vmatprep.subr.mxu1 %v8600_v40  ;;  %6343 = vmatprep.subr.mxu0 %v9435_v61 }
 0xe37   :  { %4174 = vmatpush1.msra.mxu1 %v8604_v6  ;;  %6344 = vmatpush3.msra.mxu0 %v8705_v4 }
 0xe38   :  { %4175 = vmatprep.subr.mxu1 %v8708_v50  ;;  %6345 = vmatprep.subr.mxu0 %v9435_v61 }
 0xe39   :  { %4176 = vmatpush1.msra.mxu1 %v8712_v36  ;;  %6346 = vmatpush3.msra.mxu0 %v8715_v5 }
 0xe3a   :  { %4177 = vmatprep.subr.mxu1 %v8718_v28  ;;  %6347 = vmatprep.subr.mxu0 %v9435_v61 }
 0xe3b   :  { %4178 = vmatpush1.msra.mxu1 %v8722_v63  ;;  %6348 = vmatpush3.msra.mxu0 %v8725_v1 }
 0xe3c   :  { %4179 = vmatprep.subr.mxu1 %v8728_v58  ;;  %6349 = vmatprep.subr.mxu0 %v9435_v61 }
 0xe3d   :  { %4180 = vmatpush1.msra.mxu1 %v8732_v34  ;;  %6350 = vmatpush3.msra.mxu0 %v8735_v54 }
 0xe3e   :  { %4181 = vmatprep.subr.mxu1 %v8738_v18  ;;  %6351 = vmatprep.subr.mxu0 %v9435_v61 }
 0xe3f   :  { %4182 = vmatpush1.msra.mxu1 %v8742_v25  ;;  %6352 = vmatpush3.msra.mxu0 %v8745_v52 }
 0xe40   :  { %4183 = vmatprep.subr.mxu1 %v9488_v31  ;;  %6353 = vmatprep.subr.mxu0 %v9435_v61 }
 0xe41   :  { %4184 = vmatpush1.msra.mxu1 %v9489_v56  ;;  %6354 = vmatpush3.msra.mxu0 %v9490_v62 }
 0xe42   :  { %4185 = vmatprep.subr.mxu1 %v9491_v7  ;;  %6355 = vmatprep.subr.mxu0 %v9435_v61 }
 0xe43   :  { %4186 = vmatpush1.msra.mxu1 %v9492_v21  ;;  %4219 = vmatprep.mubr.f32.mxu1 %v9435_v61 }
 0xe44   :  { %6356 = vmatpush3.msra.mxu0 %v9493_v57  ;;  %6357 = vmatprep.mubr.msk.f32.mxu0 %vm6879_vm9, %v9435_v61 }
 0xe45   :  { %4323 = vmatprep.subr.mxu1 %v9494_v19  ;;  %6360 = vmatprep.subr.mxu0 %v9435_v61 }
 0xee4   :  { %v4053_v35 = vpop.f32.mrf.mxu1  ;;  %v4124_v13 = vpop.f32.mrf.mxu0 }
 0xee5   :  { %v4054_v47 = vadd.f32 %v4053_v35, %v9495_v15  ;;  %v4125_v56 = vadd.f32 %v4124_v13, %v8444_v59 }
 0xee6   :  { %v4055_v12 = vpop.f32.mrf.mxu1  ;;  %v6324_v46 = vpop.f32.mrf.mxu0 }
 0xee7   :  { %v4128_v55 = vadd.f32 %v4054_v47, %v9496_v30  ;;  %v4056_v10 = vadd.f32 %v4055_v12, %v8438_v20  ;;  %v9498_v46 = vld [vmem:[#allocation68_spill] sm:$0xff] }
 0xee9   :  { %v5116_v42 = vmul.f32 -1.442695, %v4128_v55  ;;  %v4135_v23 = vadd.f32 %v4056_v10, %v9497_v9  ;;  %v9505_v9 = vld [vmem:[#allocation75_spill] sm:$0xff] }
 0xeeb   :  { %6633 = vpow2.f32 %v5116_v42  ;;  %v5117_v57 = vmul.f32 -1.442695, %v4135_v23 }
 0xeed   :  { %6635 = vpow2.f32 %v5117_v57 }
 0xef8   :  { %v6634_v21 = vpop.eup %6633 }
 0xef9   :  { %v4132_v19 = vadd.f32 1.0, %v6634_v21  ;;  %v9503_v21 = vld [vmem:[#allocation50_spill] sm:$0xff] }
 0xefa   :  { %v6636_v7 = vpop.eup %6635 }
 0xefb   :  { %6637 = vrcp.f32 %v4132_v19  ;;  %v4139_v62 = vadd.f32 1.0, %v6636_v7  ;;  %v9502_v7 = vld [vmem:[#allocation31_spill] sm:$0xff]  ;;  %v9504_v19 = vld [vmem:[#allocation60_spill] sm:$0xff] }
 0xefd   :  { %6639 = vrcp.f32 %v4139_v62  ;;  %v9501_v62 = vld [vmem:[#allocation20_spill] sm:$0xff] }
 0xf08   :  { %v6638_v35 = vpop.eup %6637 }
 0xf09   :  { %v4142_v15 = vmul.f32 %v6638_v35, %v4125_v56  ;;  %v9500_v56 = vld [vmem:[#allocation46_spill] sm:$0xff] }
 0xf0a   :  { %v6640_v30 = vpop.eup %6639 }
 0xf0b   :  { %v4143_v47 = vadd.f32 %v4142_v15, %v9498_v46  ;;  %v4145_v12 = vsub.f32 1.0, %v6640_v30  ;;  %v4147_v10 = vmul.f32 %v6640_v30, %v8780_v37  ;;  %v9499_v37 = vld [vmem:[#allocation19_spill] sm:$0xff] }
 0xf0d   :  { %6641 = vtanh.f32 %v4143_v47  ;;  %v9506_v47 = vld [vmem:[#allocation71_spill] sm:$0xff] }
 0xf1a   :  { %v6642_v55 = vpop.eup %6641 }
 0xf1b   :  { %v4146_v42 = vmul.f32 %v6642_v55, %v4145_v12 }
 0xf1d   :  { %v8858_v57 = vadd.f32 %v4147_v10, %v4146_v42  ;;  %v9507_v42 = vld [vmem:[#allocation72_spill] sm:$0xff] }
 0xf1f   :  { %4220 = vmatmul.mubr.f32.vlgmr.msra.gmra.mxu1 %v8858_v57  ;;  %6358 = vmatmul.mubr.f32.vlgmr.msra.gmra.mxu0 %v8858_v57 }
 0xf20   :  { %4324 = vmatpush1.msra.mxu1 %v8532_v44  ;;  %6361 = vmatpush3.msra.mxu0 %v8651_v33 }
 0xf21   :  { %4325 = vmatprep.subr.mxu1 %v8536_v8  ;;  %6362 = vmatprep.subr.mxu0 %v9435_v61 }
 0xf22   :  { %4326 = vmatpush1.msra.mxu1 %v8540_v27  ;;  %6363 = vmatpush3.msra.mxu0 %v8657_v39 }
 0xf23   :  { %4327 = vmatprep.subr.mxu1 %v8544_v26  ;;  %6364 = vmatprep.subr.mxu0 %v9435_v61 }
 0xf24   :  { %4328 = vmatpush1.msra.mxu1 %v8548_v24  ;;  %6365 = vmatpush3.msra.mxu0 %v8663_v48 }
 0xf25   :  { %4329 = vmatprep.subr.mxu1 %v8552_v0  ;;  %6366 = vmatprep.subr.mxu0 %v9435_v61 }
 0xf26   :  { %4330 = vmatpush1.msra.mxu1 %v8556_v41  ;;  %6367 = vmatpush3.msra.mxu0 %v8669_v14 }
 0xf27   :  { %4331 = vmatprep.subr.mxu1 %v8560_v29  ;;  %6368 = vmatprep.subr.mxu0 %v9435_v61 }
 0xf28   :  { %4332 = vmatpush1.msra.mxu1 %v8564_v60  ;;  %6369 = vmatpush3.msra.mxu0 %v8675_v22 }
 0xf29   :  { %4333 = vmatprep.subr.mxu1 %v8568_v32  ;;  %6370 = vmatprep.subr.mxu0 %v9435_v61 }
 0xf2a   :  { %4334 = vmatpush1.msra.mxu1 %v8572_v51  ;;  %6371 = vmatpush3.msra.mxu0 %v8681_v49 }
 0xf2b   :  { %4335 = vmatprep.subr.mxu1 %v8576_v16  ;;  %6372 = vmatprep.subr.mxu0 %v9435_v61 }
 0xf2c   :  { %4336 = vmatpush1.msra.mxu1 %v8580_v43  ;;  %6373 = vmatpush3.msra.mxu0 %v8687_v11 }
 0xf2d   :  { %4337 = vmatprep.subr.mxu1 %v8584_v53  ;;  %6374 = vmatprep.subr.mxu0 %v9435_v61 }
 0xf2e   :  { %4338 = vmatpush1.msra.mxu1 %v8588_v17  ;;  %6375 = vmatpush3.msra.mxu0 %v8693_v38 }
 0xf2f   :  { %4339 = vmatprep.subr.mxu1 %v8592_v2  ;;  %6376 = vmatprep.subr.mxu0 %v9435_v61 }
 0xf30   :  { %4340 = vmatpush1.msra.mxu1 %v8596_v3  ;;  %6377 = vmatpush3.msra.mxu0 %v8699_v45 }
 0xf31   :  { %4341 = vmatprep.subr.mxu1 %v8600_v40  ;;  %6378 = vmatprep.subr.mxu0 %v9435_v61 }
 0xf32   :  { %4342 = vmatpush1.msra.mxu1 %v8604_v6  ;;  %6379 = vmatpush3.msra.mxu0 %v8705_v4 }
 0xf33   :  { %4343 = vmatprep.subr.mxu1 %v8708_v50  ;;  %6380 = vmatprep.subr.mxu0 %v9435_v61 }
 0xf34   :  { %4344 = vmatpush1.msra.mxu1 %v8712_v36  ;;  %6381 = vmatpush3.msra.mxu0 %v8715_v5 }
 0xf35   :  { %4345 = vmatprep.subr.mxu1 %v8718_v28  ;;  %6382 = vmatprep.subr.mxu0 %v9435_v61 }
 0xf36   :  { %4346 = vmatpush1.msra.mxu1 %v8722_v63  ;;  %6383 = vmatpush3.msra.mxu0 %v8725_v1 }
 0xf37   :  { %4347 = vmatprep.subr.mxu1 %v8728_v58  ;;  %6384 = vmatprep.subr.mxu0 %v9435_v61 }
 0xf38   :  { %4348 = vmatpush1.msra.mxu1 %v8732_v34  ;;  %6385 = vmatpush3.msra.mxu0 %v8735_v54 }
 0xf39   :  { %4349 = vmatprep.subr.mxu1 %v8738_v18  ;;  %6386 = vmatprep.subr.mxu0 %v9435_v61 }
 0xf3a   :  { %4350 = vmatpush1.msra.mxu1 %v8742_v25  ;;  %6387 = vmatpush3.msra.mxu0 %v8745_v52 }
 0xf3b   :  { %4351 = vmatprep.subr.mxu1 %v9488_v31  ;;  %6388 = vmatprep.subr.mxu0 %v9435_v61 }
 0xf3c   :  { %4352 = vmatpush1.msra.mxu1 %v9499_v37  ;;  %6389 = vmatpush3.msra.mxu0 %v9500_v56 }
 0xf3d   :  { %4353 = vmatprep.subr.mxu1 %v9501_v62  ;;  %6390 = vmatprep.subr.mxu0 %v9435_v61 }
 0xf3e   :  { %4354 = vmatpush1.msra.mxu1 %v9502_v7  ;;  %4387 = vmatprep.mubr.f32.mxu1 %v9435_v61 }
 0xf3f   :  { %6391 = vmatpush3.msra.mxu0 %v9503_v21  ;;  %6392 = vmatprep.mubr.msk.f32.mxu0 %vm6879_vm9, %v9435_v61 }
 0xf40   :  { %4491 = vmatprep.subr.mxu1 %v9504_v19  ;;  %6395 = vmatprep.subr.mxu0 %v9435_v61 }
 0xfdf   :  { %v4221_v13 = vpop.f32.mrf.mxu1  ;;  %v4292_v15 = vpop.f32.mrf.mxu0 }
 0xfe0   :  { %v4222_v23 = vadd.f32 %v4221_v13, %v9505_v9  ;;  %v4293_v37 = vadd.f32 %v4292_v15, %v8444_v59  ;;  %v9509_v59 = vld [vmem:[#allocation19_spill] sm:$0xff]  ;;  %v4736_v15 = vld [vmem:[#allocation5 + $0xe88] sm:$0xff] }
 0xfe1   :  { %v4223_v35 = vpop.f32.mrf.mxu1  ;;  %v6359_v46 = vpop.f32.mrf.mxu0 }
 0xfe2   :  { %v4296_v30 = vadd.f32 %v4222_v23, %v9506_v47  ;;  %v4224_v55 = vadd.f32 %v4223_v35, %v8438_v20  ;;  %v9508_v46 = vld [vmem:[#allocation70_spill] sm:$0xff] }
 0xfe4   :  { %v5118_v12 = vmul.f32 -1.442695, %v4296_v30  ;;  %v4303_v10 = vadd.f32 %v4224_v55, %v9507_v42  ;;  %v4738_v55 = vld [vmem:[#allocation5 + $0xe98] sm:$0xff] }
 0xfe5   :  { %v4734_v42 = vld [vmem:[#allocation5 + $0xe78] sm:$0xff] }
 0xfe6   :  { %6643 = vpow2.f32 %v5118_v12  ;;  %v5119_v21 = vmul.f32 -1.442695, %v4303_v10  ;;  %v4733_v10 = vld [vmem:[#allocation5 + $0xe70] sm:$0xff] }
 0xfe8   :  { %6645 = vpow2.f32 %v5119_v21 }
 0xff3   :  { %v6644_v7 = vpop.eup %6643 }
 0xff4   :  { %v4300_v19 = vadd.f32 1.0, %v6644_v7  ;;  %v4737_v7 = vld [vmem:[#allocation5 + $0xe90] sm:$0xff] }
 0xff5   :  { %v6646_v62 = vpop.eup %6645 }
 0xff6   :  { %6647 = vrcp.f32 %v4300_v19  ;;  %v4307_v56 = vadd.f32 1.0, %v6646_v62  ;;  %v4741_v62 = vld [vmem:[#allocation5 + $0xeb0] sm:$0xff]  ;;  %v4735_v19 = vld [vmem:[#allocation5 + $0xe80] sm:$0xff] }
 0xff8   :  { %6649 = vrcp.f32 %v4307_v56  ;;  %v4739_v56 = vld [vmem:[#allocation5 + $0xea0] sm:$0xff] }
0x1003   :  { %v6648_v13 = vpop.eup %6647 }
0x1004   :  { %v4310_v9 = vmul.f32 %v6648_v13, %v4293_v37  ;;  %v4740_v37 = vld [vmem:[#allocation5 + $0xea8] sm:$0xff]  ;;  %v4731_v13 = vld [vmem:[#allocation5 + $0xe60] sm:$0xff] }
0x1005   :  { %v6650_v47 = vpop.eup %6649 }
0x1006   :  { %v4311_v23 = vadd.f32 %v4310_v9, %v9508_v46  ;;  %v4313_v20 = vsub.f32 1.0, %v6650_v47  ;;  %v4315_v12 = vmul.f32 %v6650_v47, %v8858_v57  ;;  %v4744_v57 = vld [vmem:[#allocation5 + $0xec8] sm:$0xff]  ;;  %v4730_v9 = vld [vmem:[#allocation5 + $0xe58] sm:$0xff]  ;;  %v4727_v47 = vld [vmem:[#allocation5 + $0xe40] sm:$0xff] }
0x1007   :  { %v4732_v46 = vld [vmem:[#allocation5 + $0xe68] sm:$0xff] }
0x1008   :  { %6651 = vtanh.f32 %v4311_v23  ;;  %v4728_v23 = vld [vmem:[#allocation5 + $0xe48] sm:$0xff] }
0x1015   :  { %v6652_v35 = vpop.eup %6651 }
0x1016   :  { %v4314_v30 = vmul.f32 %v6652_v35, %v4313_v20  ;;  %v4729_v20 = vld [vmem:[#allocation5 + $0xe50] sm:$0xff] }
0x1017   :  { %v4725_v35 = vld [vmem:[#allocation5 + $0xe30] sm:$0xff] }
0x1018   :  { %v8936_v21 = vadd.f32 %v4315_v12, %v4314_v30  ;;  %v4724_v30 = vld [vmem:[#allocation5 + $0xe28] sm:$0xff]  ;;  %v4726_v12 = vld [vmem:[#allocation5 + $0xe38] sm:$0xff] }
0x101a   :  { %4388 = vmatmul.mubr.f32.vlgmr.msra.gmra.mxu1 %v8936_v21  ;;  %6393 = vmatmul.mubr.f32.vlgmr.msra.gmra.mxu0 %v8936_v21 }
0x101b   :  { %4492 = vmatpush1.msra.mxu1 %v8532_v44  ;;  %6396 = vmatpush3.msra.mxu0 %v8651_v33  ;;  %v9510_v44 = vld [vmem:[#allocation46_spill] sm:$0xff] }
0x101c   :  { %4493 = vmatprep.subr.mxu1 %v8536_v8  ;;  %6397 = vmatprep.subr.mxu0 %v9435_v61  ;;  %v9511_v8 = vld [vmem:[#allocation20_spill] sm:$0xff] }
0x101d   :  { %4494 = vmatpush1.msra.mxu1 %v8540_v27  ;;  %6398 = vmatpush3.msra.mxu0 %v8657_v39  ;;  %v9512_v27 = vld [vmem:[#allocation31_spill] sm:$0xff] }
0x101e   :  { %4495 = vmatprep.subr.mxu1 %v8544_v26  ;;  %6399 = vmatprep.subr.mxu0 %v9435_v61  ;;  %v9513_v26 = vld [vmem:[#allocation50_spill] sm:$0xff] }
0x101f   :  { %4496 = vmatpush1.msra.mxu1 %v8548_v24  ;;  %6400 = vmatpush3.msra.mxu0 %v8663_v48  ;;  %v4749_v24 = vld [vmem:[#allocation5 + $0xef0] sm:$0xff] }
0x1020   :  { %4497 = vmatprep.subr.mxu1 %v8552_v0  ;;  %6401 = vmatprep.subr.mxu0 %v9435_v61 }
0x1021   :  { %4498 = vmatpush1.msra.mxu1 %v8556_v41  ;;  %6402 = vmatpush3.msra.mxu0 %v8669_v14 }
0x1022   :  { %4499 = vmatprep.subr.mxu1 %v8560_v29  ;;  %6403 = vmatprep.subr.mxu0 %v9435_v61  ;;  %v9006_v29 = vld [vmem:[#allocation7 + $0x48] sm:$0xff] }
0x1023   :  { %4500 = vmatpush1.msra.mxu1 %v8564_v60  ;;  %6404 = vmatpush3.msra.mxu0 %v8675_v22  ;;  %v9014_v22 = vld [vmem:[#allocation7 + $0x58] sm:$0xff] }
0x1024   :  { %4501 = vmatprep.subr.mxu1 %v8568_v32  ;;  %6405 = vmatprep.subr.mxu0 %v9435_v61 }
0x1025   :  { %4502 = vmatpush1.msra.mxu1 %v8572_v51  ;;  %6406 = vmatpush3.msra.mxu0 %v8681_v49 }
0x1026   :  { %4503 = vmatprep.subr.mxu1 %v8576_v16  ;;  %6407 = vmatprep.subr.mxu0 %v9435_v61  ;;  %v9514_v16 = vld [vmem:[#allocation67_spill] sm:$0xff] }
0x1027   :  { %4504 = vmatpush1.msra.mxu1 %v8580_v43  ;;  %6408 = vmatpush3.msra.mxu0 %v8687_v11 }
0x1028   :  { %4505 = vmatprep.subr.mxu1 %v8584_v53  ;;  %6409 = vmatprep.subr.mxu0 %v9435_v61 }
0x1029   :  { %4506 = vmatpush1.msra.mxu1 %v8588_v17  ;;  %6410 = vmatpush3.msra.mxu0 %v8693_v38  ;;  %v9010_v17 = vld [vmem:[#allocation7 + $0x50] sm:$0xff] }
0x102a   :  { %4507 = vmatprep.subr.mxu1 %v8592_v2  ;;  %6411 = vmatprep.subr.mxu0 %v9435_v61 }
0x102b   :  { %4508 = vmatpush1.msra.mxu1 %v8596_v3  ;;  %6412 = vmatpush3.msra.mxu0 %v8699_v45  ;;  %v9515_v3 = vld [vmem:[#allocation69_spill] sm:$0xff]  ;;  %v9516_v45 = vld [vmem:[#allocation63_spill] sm:$0xff] }
0x102c   :  { %4509 = vmatprep.subr.mxu1 %v8600_v40  ;;  %6413 = vmatprep.subr.mxu0 %v9435_v61 }
0x102d   :  { %4510 = vmatpush1.msra.mxu1 %v8604_v6  ;;  %6414 = vmatpush3.msra.mxu0 %v8705_v4 }
0x102e   :  { %4511 = vmatprep.subr.mxu1 %v8708_v50  ;;  %6415 = vmatprep.subr.mxu0 %v9435_v61 }
0x102f   :  { %4512 = vmatpush1.msra.mxu1 %v8712_v36  ;;  %6416 = vmatpush3.msra.mxu0 %v8715_v5 }
0x1030   :  { %4513 = vmatprep.subr.mxu1 %v8718_v28  ;;  %6417 = vmatprep.subr.mxu0 %v9435_v61 }
0x1031   :  { %4514 = vmatpush1.msra.mxu1 %v8722_v63  ;;  %6418 = vmatpush3.msra.mxu0 %v8725_v1 }
0x1032   :  { %4515 = vmatprep.subr.mxu1 %v8728_v58  ;;  %6419 = vmatprep.subr.mxu0 %v9435_v61  ;;  %v4748_v58 = vld [vmem:[#allocation5 + $0xee8] sm:$0xff] }
0x1033   :  { %4516 = vmatpush1.msra.mxu1 %v8732_v34  ;;  %6420 = vmatpush3.msra.mxu0 %v8735_v54  ;;  %v4750_v34 = vld [vmem:[#allocation5 + $0xef8] sm:$0xff] }
0x1034   :  { %4517 = vmatprep.subr.mxu1 %v8738_v18  ;;  %6421 = vmatprep.subr.mxu0 %v9435_v61  ;;  %v4746_v54 = vld [vmem:[#allocation5 + $0xed8] sm:$0xff]  ;;  %v4745_v18 = vld [vmem:[#allocation5 + $0xed0] sm:$0xff] }
0x1035   :  { %4518 = vmatpush1.msra.mxu1 %v8742_v25  ;;  %6422 = vmatpush3.msra.mxu0 %v8745_v52  ;;  %v4747_v25 = vld [vmem:[#allocation5 + $0xee0] sm:$0xff] }
0x1036   :  { %4519 = vmatprep.subr.mxu1 %v9488_v31  ;;  %6423 = vmatprep.subr.mxu0 %v9435_v61  ;;  %v4743_v52 = vld [vmem:[#allocation5 + $0xec0] sm:$0xff]  ;;  %v4742_v31 = vld [vmem:[#allocation5 + $0xeb8] sm:$0xff] }
0x1037   :  { %4520 = vmatpush1.msra.mxu1 %v9509_v59  ;;  %6424 = vmatpush3.msra.mxu0 %v9510_v44  ;;  %v4721_v59 = vld [vmem:[#allocation5 + $0xe10] sm:$0xff]  ;;  %v4723_v44 = vld [vmem:[#allocation5 + $0xe20] sm:$0xff] }
0x1038   :  { %4521 = vmatprep.subr.mxu1 %v9511_v8  ;;  %6425 = vmatprep.subr.mxu0 %v9435_v61  ;;  %v4719_v8 = vld [vmem:[#allocation5 + $0xe00] sm:$0xff] }
0x1039   :  { %4522 = vmatpush1.msra.mxu1 %v9512_v27  ;;  %6426 = vmatpush3.msra.mxu0 %v9513_v26  ;;  %v4718_v27 = vld [vmem:[#allocation5 + $0xdf8] sm:$0xff]  ;;  %v4720_v26 = vld [vmem:[#allocation5 + $0xe08] sm:$0xff] }
0x103a   :  { %4555 = vmatprep.mubr.f32.mxu1 %v9435_v61  ;;  %6427 = vmatprep.mubr.msk.f32.mxu0 %vm6879_vm9, %v9435_v61 }
0x103b   :  { %6430 = vmatprep.subr.mxu0 %v9435_v61  ;;  %4755 = vmatprep.subr.mxu1 %v4749_v24  ;;  %v4716_v24 = vld [vmem:[#allocation5 + $0xde8] sm:$0xff] }
0x10da   :  { %v4389_v0 = vpop.f32.mrf.mxu1  ;;  %v4460_v41 = vpop.f32.mrf.mxu0 }
0x10db   :  { %v4390_v60 = vadd.f32 %v9006_v29, %v4389_v0  ;;  %v4461_v49 = vadd.f32 %v9014_v22, %v4460_v41  ;;  %v4715_v0 = vld [vmem:[#allocation5 + $0xde0] sm:$0xff]  ;;  %v4717_v41 = vld [vmem:[#allocation5 + $0xdf0] sm:$0xff] }
0x10dc   :  { %v4391_v32 = vpop.f32.mrf.mxu1  ;;  %v6394_v51 = vpop.f32.mrf.mxu0 }
0x10dd   :  { %v4464_v43 = vadd.f32 %v4390_v60, %v9514_v16  ;;  %v4392_v2 = vadd.f32 %v9010_v17, %v4391_v32  ;;  %v4713_v60 = vld [vmem:[#allocation5 + $0xdd0] sm:$0xff]  ;;  %v4712_v32 = vld [vmem:[#allocation5 + $0xdc8] sm:$0xff]  ;;  %v4714_v51 = vld [vmem:[#allocation5 + $0xdd8] sm:$0xff] }
0x10de   :  { %v4710_v16 = vld [vmem:[#allocation5 + $0xdb8] sm:$0xff] }
0x10df   :  { %v5120_v53 = vmul.f32 -1.442695, %v4464_v43  ;;  %v4471_v40 = vadd.f32 %v4392_v2, %v9515_v3  ;;  %v4709_v43 = vld [vmem:[#allocation5 + $0xdb0] sm:$0xff]  ;;  %v4707_v2 = vld [vmem:[#allocation5 + $0xda0] sm:$0xff]  ;;  %v4706_v3 = vld [vmem:[#allocation5 + $0xd98] sm:$0xff] }
0x10e1   :  { %6653 = vpow2.f32 %v5120_v53  ;;  %v5121_v6 = vmul.f32 -1.442695, %v4471_v40  ;;  %v4711_v53 = vld [vmem:[#allocation5 + $0xdc0] sm:$0xff]  ;;  %v4708_v40 = vld [vmem:[#allocation5 + $0xda8] sm:$0xff] }
0x10e3   :  { %6655 = vpow2.f32 %v5121_v6  ;;  %v4704_v6 = vld [vmem:[#allocation5 + $0xd88] sm:$0xff] }
0x10ee   :  { %v6654_v33 = vpop.eup %6653 }
0x10ef   :  { %v4468_v39 = vadd.f32 1.0, %v6654_v33  ;;  %v4703_v33 = vld [vmem:[#allocation5 + $0xd80] sm:$0xff] }
0x10f0   :  { %v6656_v48 = vpop.eup %6655 }
0x10f1   :  { %6657 = vrcp.f32 %v4468_v39  ;;  %v4475_v14 = vadd.f32 1.0, %v6656_v48  ;;  %v4705_v39 = vld [vmem:[#allocation5 + $0xd90] sm:$0xff] }
0x10f2   :  { %v9517_v48 = vld [vmem:[#allocation62_spill] sm:$0xff] }
0x10f3   :  { %6659 = vrcp.f32 %v4475_v14  ;;  %v4700_v14 = vld [vmem:[#allocation5 + $0xd70] sm:$0xff] }
0x10fe   :  { %v6658_v11 = vpop.eup %6657 }
0x10ff   :  { %v4478_v38 = vmul.f32 %v6658_v11, %v4461_v49  ;;  %v4699_v49 = vld [vmem:[#allocation5 + $0xd68] sm:$0xff]  ;;  %v4701_v11 = vld [vmem:[#allocation5 + $0xd78] sm:$0xff] }
0x1100   :  { %v6660_v50 = vpop.eup %6659 }
0x1101   :  { %v4479_v4 = vadd.f32 %v4478_v38, %v9516_v45  ;;  %v4481_v36 = vsub.f32 1.0, %v6660_v50  ;;  %v4483_v63 = vmul.f32 %v6660_v50, %v8936_v21  ;;  %v4722_v21 = vld [vmem:[#allocation5 + $0xe18] sm:$0xff]  ;;  %v4696_v45 = vld [vmem:[#allocation5 + $0xd50] sm:$0xff]  ;;  %v4694_v50 = vld [vmem:[#allocation5 + $0xd40] sm:$0xff] }
0x1102   :  { %v4697_v38 = vld [vmem:[#allocation5 + $0xd58] sm:$0xff] }
0x1103   :  { %6661 = vtanh.f32 %v4479_v4  ;;  %v4698_v4 = vld [vmem:[#allocation5 + $0xd60] sm:$0xff] }
0x1110   :  { %v6662_v5 = vpop.eup %6661 }
0x1111   :  { %v4482_v28 = vmul.f32 %v6662_v5, %v4481_v36  ;;  %v4693_v36 = vld [vmem:[#allocation5 + $0xd38] sm:$0xff]  ;;  %v4695_v5 = vld [vmem:[#allocation5 + $0xd48] sm:$0xff] }
0x1113   :  { %v9019_v1 = vadd.f32 %v4483_v63, %v4482_v28  ;;  %v4691_v28 = vld [vmem:[#allocation5 + $0xd28] sm:$0xff]  ;;  %v4690_v63 = vld [vmem:[#allocation5 + $0xd20] sm:$0xff] }
0x1115   :  { %4556 = vmatmul.mubr.f32.vlgmr.msra.gmra.mxu1 %v9019_v1  ;;  %6428 = vmatmul.mubr.f32.vlgmr.msra.gmra.mxu0 %v9019_v1 }
0x1116   :  { %4756 = vmatpush1.msra.mxu1 %v4748_v58  ;;  %6431 = vmatpush3.msra.mxu0 %v4750_v34  ;;  %v4692_v58 = vld [vmem:[#allocation5 + $0xd30] sm:$0xff] }
0x1117   :  { %4757 = vmatprep.subr.mxu1 %v4746_v54  ;;  %6432 = vmatprep.subr.mxu0 %v9435_v61  ;;  %v4688_v34 = vld [vmem:[#allocation5 + $0xd10] sm:$0xff]  ;;  %v4687_v54 = vld [vmem:[#allocation5 + $0xd08] sm:$0xff] }
0x1118   :  { %4758 = vmatpush1.msra.mxu1 %v4745_v18  ;;  %6433 = vmatpush3.msra.mxu0 %v4747_v25  ;;  %v4689_v18 = vld [vmem:[#allocation5 + $0xd18] sm:$0xff] }
0x1119   :  { %4759 = vmatprep.subr.mxu1 %v4743_v52  ;;  %6434 = vmatprep.subr.mxu0 %v9435_v61  ;;  %v4685_v25 = vld [vmem:[#allocation5 + $0xcf8] sm:$0xff]  ;;  %v4684_v52 = vld [vmem:[#allocation5 + $0xcf0] sm:$0xff] }
0x111a   :  { %4760 = vmatpush1.msra.mxu1 %v4742_v31  ;;  %6435 = vmatpush3.msra.mxu0 %v4744_v57  ;;  %v4686_v31 = vld [vmem:[#allocation5 + $0xd00] sm:$0xff] }
0x111b   :  { %4761 = vmatprep.subr.mxu1 %v4740_v37  ;;  %6436 = vmatprep.subr.mxu0 %v9435_v61  ;;  %v4682_v57 = vld [vmem:[#allocation5 + $0xce0] sm:$0xff]  ;;  %v4681_v37 = vld [vmem:[#allocation5 + $0xcd8] sm:$0xff] }
0x111c   :  { %4762 = vmatpush1.msra.mxu1 %v4739_v56  ;;  %6437 = vmatpush3.msra.mxu0 %v4741_v62  ;;  %v4683_v56 = vld [vmem:[#allocation5 + $0xce8] sm:$0xff] }
0x111d   :  { %4763 = vmatprep.subr.mxu1 %v4737_v7  ;;  %6438 = vmatprep.subr.mxu0 %v9435_v61  ;;  %v4679_v62 = vld [vmem:[#allocation5 + $0xcc8] sm:$0xff]  ;;  %v4678_v7 = vld [vmem:[#allocation5 + $0xcc0] sm:$0xff] }
0x111e   :  { %4764 = vmatpush1.msra.mxu1 %v4736_v15  ;;  %6439 = vmatpush3.msra.mxu0 %v4738_v55  ;;  %v4680_v15 = vld [vmem:[#allocation5 + $0xcd0] sm:$0xff] }
0x111f   :  { %4765 = vmatprep.subr.mxu1 %v4734_v42  ;;  %6440 = vmatprep.subr.mxu0 %v9435_v61  ;;  %v4676_v55 = vld [vmem:[#allocation5 + $0xcb0] sm:$0xff]  ;;  %v4675_v42 = vld [vmem:[#allocation5 + $0xca8] sm:$0xff] }
0x1120   :  { %4766 = vmatpush1.msra.mxu1 %v4733_v10  ;;  %6441 = vmatpush3.msra.mxu0 %v4735_v19  ;;  %v4677_v10 = vld [vmem:[#allocation5 + $0xcb8] sm:$0xff] }
0x1121   :  { %4767 = vmatprep.subr.mxu1 %v4731_v13  ;;  %6442 = vmatprep.subr.mxu0 %v9435_v61  ;;  %v4673_v19 = vld [vmem:[#allocation5 + $0xc98] sm:$0xff]  ;;  %v4672_v13 = vld [vmem:[#allocation5 + $0xc90] sm:$0xff] }
0x1122   :  { %4768 = vmatpush1.msra.mxu1 %v4730_v9  ;;  %6443 = vmatpush3.msra.mxu0 %v4732_v46  ;;  %v4674_v9 = vld [vmem:[#allocation5 + $0xca0] sm:$0xff] }
0x1123   :  { %4769 = vmatprep.subr.mxu1 %v4728_v23  ;;  %6444 = vmatprep.subr.mxu0 %v9435_v61  ;;  %v4670_v46 = vld [vmem:[#allocation5 + $0xc80] sm:$0xff]  ;;  %v4669_v23 = vld [vmem:[#allocation5 + $0xc78] sm:$0xff] }
0x1124   :  { %4770 = vmatpush1.msra.mxu1 %v4727_v47  ;;  %6445 = vmatpush3.msra.mxu0 %v4729_v20  ;;  %v4671_v47 = vld [vmem:[#allocation5 + $0xc88] sm:$0xff] }
0x1125   :  { %4771 = vmatprep.subr.mxu1 %v4725_v35  ;;  %6446 = vmatprep.subr.mxu0 %v9435_v61  ;;  %v4667_v20 = vld [vmem:[#allocation5 + $0xc68] sm:$0xff]  ;;  %v4666_v35 = vld [vmem:[#allocation5 + $0xc60] sm:$0xff] }
0x1126   :  { %4772 = vmatpush1.msra.mxu1 %v4724_v30  ;;  %6447 = vmatpush3.msra.mxu0 %v4726_v12  ;;  %v4668_v30 = vld [vmem:[#allocation5 + $0xc70] sm:$0xff] }
0x1127   :  { %4773 = vmatprep.subr.mxu1 %v4722_v21  ;;  %6448 = vmatprep.subr.mxu0 %v9435_v61  ;;  %v4664_v12 = vld [vmem:[#allocation5 + $0xc50] sm:$0xff]  ;;  %v4663_v21 = vld [vmem:[#allocation5 + $0xc48] sm:$0xff] }
0x1128   :  { %4774 = vmatpush1.msra.mxu1 %v4721_v59  ;;  %6449 = vmatpush3.msra.mxu0 %v4723_v44  ;;  %v4665_v59 = vld [vmem:[#allocation5 + $0xc58] sm:$0xff] }
0x1129   :  { %4775 = vmatprep.subr.mxu1 %v4719_v8  ;;  %6450 = vmatprep.subr.mxu0 %v9435_v61  ;;  %v4661_v44 = vld [vmem:[#allocation5 + $0xc38] sm:$0xff]  ;;  %v4660_v8 = vld [vmem:[#allocation5 + $0xc30] sm:$0xff] }
0x112a   :  { %4776 = vmatpush1.msra.mxu1 %v4718_v27  ;;  %6451 = vmatpush3.msra.mxu0 %v4720_v26  ;;  %v4662_v27 = vld [vmem:[#allocation5 + $0xc40] sm:$0xff] }
0x112b   :  { %4777 = vmatprep.subr.mxu1 %v4716_v24  ;;  %6452 = vmatprep.subr.mxu0 %v9435_v61  ;;  %v4658_v26 = vld [vmem:[#allocation5 + $0xc20] sm:$0xff]  ;;  %v4657_v24 = vld [vmem:[#allocation5 + $0xc18] sm:$0xff] }
0x112c   :  { %4778 = vmatpush1.msra.mxu1 %v4715_v0  ;;  %6453 = vmatpush3.msra.mxu0 %v4717_v41  ;;  %v4659_v0 = vld [vmem:[#allocation5 + $0xc28] sm:$0xff] }
0x112d   :  { %4779 = vmatprep.subr.mxu1 %v4713_v60  ;;  %6454 = vmatprep.subr.mxu0 %v9435_v61  ;;  %v4655_v41 = vld [vmem:[#allocation5 + $0xc08] sm:$0xff]  ;;  %v4654_v60 = vld [vmem:[#allocation5 + $0xc00] sm:$0xff] }
0x112e   :  { %4780 = vmatpush1.msra.mxu1 %v4712_v32  ;;  %6455 = vmatpush3.msra.mxu0 %v4714_v51  ;;  %v4656_v32 = vld [vmem:[#allocation5 + $0xc10] sm:$0xff] }
0x112f   :  { %4781 = vmatprep.subr.mxu1 %v4710_v16  ;;  %6456 = vmatprep.subr.mxu0 %v9435_v61 }
0x1130   :  { %4782 = vmatpush1.msra.mxu1 %v4709_v43  ;;  %6457 = vmatpush3.msra.mxu0 %v4711_v53 }
0x1131   :  { %4783 = vmatprep.subr.mxu1 %v4707_v2  ;;  %6458 = vmatprep.subr.mxu0 %v9435_v61 }
0x1132   :  { %4784 = vmatpush1.msra.mxu1 %v4706_v3  ;;  %6459 = vmatpush3.msra.mxu0 %v4708_v40  ;;  %v9518_v3 = vld [vmem:[#allocation64_spill] sm:$0xff] }
0x1133   :  { %4785 = vmatprep.subr.mxu1 %v4704_v6  ;;  %6460 = vmatprep.subr.mxu0 %v9435_v61 }
0x1134   :  { %4786 = vmatpush1.msra.mxu1 %v4703_v33  ;;  %4819 = vmatprep.mubr.f32.mxu1 %v9435_v61 }
0x1135   :  { %6461 = vmatpush3.msra.mxu0 %v4705_v39  ;;  %6462 = vmatprep.mubr.msk.f32.mxu0 %vm6879_vm9, %v9435_v61  ;;  %v9519_v39 = vld [vmem:[#allocation66_spill] sm:$0xff] }
0x1136   :  { %4820 = vmatmul.mubr.f32.vlgmr.msra.gmra.mxu1 %v9517_v48  ;;  %6463 = vmatmul.mubr.f32.vlgmr.msra.gmra.mxu0 %v9517_v48 }
0x1137   :  { %6465 = vmatprep.subr.mxu0 %v9435_v61  ;;  %4960 = vmatprep.mubr.f32.mxu1 %v9435_v61 }
0x1138   :  { %6497 = vmatprep.mubr.msk.f32.mxu0 %vm6879_vm9, %v9435_v61  ;;  %4896 = vmatprep.subr.mxu1 %v4700_v14 }
0x1139   :  { %4897 = vmatpush1.msra.mxu1 %v4699_v49  ;;  %6466 = vmatpush3.msra.mxu0 %v4701_v11 }
0x113a   :  { %4898 = vmatprep.subr.mxu1 %v4697_v38  ;;  %6467 = vmatprep.subr.mxu0 %v9435_v61 }
0x113b   :  { %4899 = vmatpush1.msra.mxu1 %v4696_v45  ;;  %6468 = vmatpush3.msra.mxu0 %v4698_v4 }
0x113c   :  { %4900 = vmatprep.subr.mxu1 %v4694_v50  ;;  %6469 = vmatprep.subr.mxu0 %v9435_v61 }
0x113d   :  { %4901 = vmatpush1.msra.mxu1 %v4693_v36  ;;  %6470 = vmatpush3.msra.mxu0 %v4695_v5  ;;  %v9520_v5 = vld [vmem:[#allocation65_spill] sm:$0xff] }
0x113e   :  { %4902 = vmatprep.subr.mxu1 %v4691_v28  ;;  %6471 = vmatprep.subr.mxu0 %v9435_v61 }
0x113f   :  { %4903 = vmatpush1.msra.mxu1 %v4690_v63  ;;  %6472 = vmatpush3.msra.mxu0 %v4692_v58 }
0x1140   :  { %4904 = vmatprep.subr.mxu1 %v4688_v34  ;;  %6473 = vmatprep.subr.mxu0 %v9435_v61 }
0x1141   :  { %4905 = vmatpush1.msra.mxu1 %v4687_v54  ;;  %6474 = vmatpush3.msra.mxu0 %v4689_v18 }
0x1142   :  { %4906 = vmatprep.subr.mxu1 %v4685_v25  ;;  %6475 = vmatprep.subr.mxu0 %v9435_v61 }
0x1143   :  { %4907 = vmatpush1.msra.mxu1 %v4684_v52  ;;  %6476 = vmatpush3.msra.mxu0 %v4686_v31 }
0x1144   :  { %4908 = vmatprep.subr.mxu1 %v4682_v57  ;;  %6477 = vmatprep.subr.mxu0 %v9435_v61 }
0x1145   :  { %4909 = vmatpush1.msra.mxu1 %v4681_v37  ;;  %6478 = vmatpush3.msra.mxu0 %v4683_v56  ;;  %v4752_v37 = vld [vmem:[#allocation7 + $0x60] sm:$0xff]  ;;  %v4753_v56 = vld [vmem:[#allocation7 + $0x68] sm:$0xff] }
0x1146   :  { %4910 = vmatprep.subr.mxu1 %v4679_v62  ;;  %6479 = vmatprep.subr.mxu0 %v9435_v61 }
0x1147   :  { %4911 = vmatpush1.msra.mxu1 %v4678_v7  ;;  %6480 = vmatpush3.msra.mxu0 %v4680_v15 }
0x1148   :  { %4912 = vmatprep.subr.mxu1 %v4676_v55  ;;  %6481 = vmatprep.subr.mxu0 %v9435_v61 }
0x1149   :  { %4913 = vmatpush1.msra.mxu1 %v4675_v42  ;;  %6482 = vmatpush3.msra.mxu0 %v4677_v10  ;;  %v4754_v42 = vld [vmem:[#allocation7 + $0x70] sm:$0xff] }
0x114a   :  { %4914 = vmatprep.subr.mxu1 %v4673_v19  ;;  %6483 = vmatprep.subr.mxu0 %v9435_v61 }
0x114b   :  { %4915 = vmatpush1.msra.mxu1 %v4672_v13  ;;  %6484 = vmatpush3.msra.mxu0 %v4674_v9 }
0x114c   :  { %4916 = vmatprep.subr.mxu1 %v4670_v46  ;;  %6485 = vmatprep.subr.mxu0 %v9435_v61 }
0x114d   :  { %4917 = vmatpush1.msra.mxu1 %v4669_v23  ;;  %6486 = vmatpush3.msra.mxu0 %v4671_v47 }
0x114e   :  { %4918 = vmatprep.subr.mxu1 %v4667_v20  ;;  %6487 = vmatprep.subr.mxu0 %v9435_v61 }
0x114f   :  { %4919 = vmatpush1.msra.mxu1 %v4666_v35  ;;  %6488 = vmatpush3.msra.mxu0 %v4668_v30 }
0x1150   :  { %4920 = vmatprep.subr.mxu1 %v4664_v12  ;;  %6489 = vmatprep.subr.mxu0 %v9435_v61 }
0x1151   :  { %4921 = vmatpush1.msra.mxu1 %v4663_v21  ;;  %6490 = vmatpush3.msra.mxu0 %v4665_v59 }
0x1152   :  { %4922 = vmatprep.subr.mxu1 %v4661_v44  ;;  %6491 = vmatprep.subr.mxu0 %v9435_v61 }
0x1153   :  { %4923 = vmatpush1.msra.mxu1 %v4660_v8  ;;  %6492 = vmatpush3.msra.mxu0 %v4662_v27 }
0x1154   :  { %4924 = vmatprep.subr.mxu1 %v4658_v26  ;;  %6493 = vmatprep.subr.mxu0 %v9435_v61 }
0x1155   :  { %4925 = vmatpush1.msra.mxu1 %v4657_v24  ;;  %6494 = vmatpush3.msra.mxu0 %v4659_v0 }
0x1156   :  { %4926 = vmatprep.subr.mxu1 %v4655_v41  ;;  %6495 = vmatprep.subr.mxu0 %v9435_v61 }
0x1157   :  { %4927 = vmatpush1.msra.mxu1 %v4654_v60  ;;  %6496 = vmatpush3.msra.mxu0 %v4656_v32 }
0x11d5   :  { %v4557_v51 = vpop.f32.mrf.mxu1  ;;  %v4628_v16 = vpop.f32.mrf.mxu0 }
0x11d6   :  { %v4558_v43 = vadd.f32 %v9006_v29, %v4557_v51  ;;  %v4629_v29 = vadd.f32 %v9014_v22, %v4628_v16 }
0x11d7   :  { %v4559_v53 = vpop.f32.mrf.mxu1  ;;  %v6429_v2 = vpop.f32.mrf.mxu0 }
0x11d8   :  { %v4632_v40 = vadd.f32 %v4558_v43, %v9518_v3  ;;  %v4560_v33 = vadd.f32 %v9010_v17, %v4559_v53 }
0x11da   :  { %v5122_v6 = vmul.f32 -1.442695, %v4632_v40  ;;  %v4639_v48 = vadd.f32 %v4560_v33, %v9519_v39 }
0x11dc   :  { %6663 = vpow2.f32 %v5122_v6  ;;  %v5123_v14 = vmul.f32 -1.442695, %v4639_v48 }
0x11de   :  { %6665 = vpow2.f32 %v5123_v14 }
0x11e9   :  { %v6664_v49 = vpop.eup %6663 }
0x11ea   :  { %v4636_v61 = vadd.f32 1.0, %v6664_v49 }
0x11eb   :  { %v6666_v11 = vpop.eup %6665 }
0x11ec   :  { %6667 = vrcp.f32 %v4636_v61  ;;  %v4643_v38 = vadd.f32 1.0, %v6666_v11 }
0x11ee   :  { %6669 = vrcp.f32 %v4643_v38 }
0x11f6   :  { %v4892_v45 = vpop.f32.mrf.mxu0  ;;  %v4821_v25 = vpop.f32.mrf.mxu1 }
0x11f8   :  { %v6464_v4 = vpop.f32.mrf.mxu0  ;;  %v4823_v52 = vpop.f32.mrf.mxu1 }
0x11f9   :  { %v6668_v50 = vpop.eup %6667 }
0x11fa   :  { %v4646_v36 = vmul.f32 %v6668_v50, %v4629_v29 }
0x11fb   :  { %v6670_v17 = vpop.eup %6669 }
0x11fc   :  { %v4647_v28 = vadd.f32 %v4646_v36, %v9520_v5  ;;  %v4649_v63 = vsub.f32 1.0, %v6670_v17  ;;  %v4651_v54 = vmul.f32 %v6670_v17, %v9019_v1 }
0x11fe   :  { %6671 = vtanh.f32 %v4647_v28 }
0x120b   :  { %v6672_v58 = vpop.eup %6671 }
0x120c   :  { %v4650_v34 = vmul.f32 %v6672_v58, %v4649_v63 }
0x120e   :  { %v4652_v18 = vadd.f32 %v4651_v54, %v4650_v34 }
0x1210   :  { %4961 = vmatmul.mubr.f32.vlgmr.msra.gmra.mxu1 %v4652_v18  ;;  %6498 = vmatmul.mubr.f32.vlgmr.msra.gmra.mxu0 %v4652_v18 }
0x12d0   :  { %v4962_v31 = vpop.f32.mrf.mxu1  ;;  %v5033_v22 = vpop.f32.mrf.mxu0 }
0x12d1   :  { %v4963_v57 = vadd.f32 %v4962_v31, %v4821_v25  ;;  %v5034_v15 = vadd.f32 %v5033_v22, %v4892_v45 }
0x12d2   :  { %v4964_v62 = vpop.f32.mrf.mxu1  ;;  %v6499_v7 = vpop.f32.mrf.mxu0 }
0x12d3   :  { %v4965_v55 = vadd.f32 %v4964_v62, %v4823_v52  ;;  %v5037_v10 = vadd.f32 %v4963_v57, %v4752_v37  ;;  %v5039_v13 = vadd.f32 %v5034_v15, %v4754_v42 }
0x12d5   :  { %v5038_v19 = vadd.f32 %v4965_v55, %v4753_v56 }
0x12d7   :  { %v5040_v9 = vmax.f32 %v5037_v10, %v5038_v19 }
0x12d9   :  { %v5041_v1 = vmax.f32 %v5040_v9, %v5039_v13 }
0x12db   :  { %5042 = vmax.xlane.f32.xlu0 %v5041_v1 }
0x1364   :  { %v5043_v46 = vpop.xlane.xlu0 %5042 }
0x1365   :  { %v5044_v23 = vsub.f32 %v5037_v10, %v5043_v46  ;;  %v5045_v47 = vsub.f32 %v5038_v19, %v5043_v46  ;;  %v5046_v20 = vsub.f32 %v5039_v13, %v5043_v46 }
0x1367   :  { %v5047_v35 = vmul.f32 1.442695, %v5044_v23  ;;  %v5049_v30 = vmul.f32 1.442695, %v5045_v47  ;;  %v5051_v12 = vmul.f32 1.442695, %v5046_v20 }
0x1369   :  { %6673 = vpow2.f32 %v5047_v35 }
0x136a   :  { %6675 = vpow2.f32 %v5049_v30 }
0x136b   :  { %6677 = vpow2.f32 %v5051_v12 }
0x1376   :  { %v6674_v21 = vpop.eup %6673 }
0x1377   :  { %v6676_v59 = vpop.eup %6675 }
0x1378   :  { %v5053_v44 = vadd.f32 %v6676_v59, %v6674_v21  ;;  %v6678_v8 = vpop.eup %6677 }
0x137a   :  { %v5054_v27 = vadd.f32 %v6678_v8, %v5053_v44 }
0x137c   :  { %5055 = vadd.xlane.f32.xlu1 %v5054_v27 }
0x1405   :  { %v5056_v26 = vpop.xlane.xlu1 %5055 }
0x1406   :  { %6679 = vrcp.f32 %v5056_v26 }
0x1413   :  { %v6680_v24 = vpop.eup %6679 }
0x1414   :  { %v5058_v0 = vmul.f32 %v6680_v24, %v6674_v21 }
0x1416   :  { %5059 = vst [vmem:[#allocation8] sm:$0xff] %v5058_v0 }
0x1417   :  { %6855 = shalt.err (!%p6852_p5)
}
0x1418   :  { %5069 = dma.vmem_to_hbm [thread:$0]  %s5067_s21, 128, %s9076_s4, [#allocation4]  }
0x1419   :  { %6868 = dma.done.wait [#allocation4], 128  }
0x141a   :  { %6869 = vsyncadd [#allocation4], 4294967168 }
0x141b   :  { %5073 = vsyncpa [#allocation3], 1 }
0x141c   :  { %5074 = vsyncpa [#allocation6], 1 }
0x141d   :  { %5075 = vsyncpa [#allocation4], 1 }

</bundles_post_ra>
